<compile_context>
chip_gen: v5e
topology: v5e:2x2
jax: 0.10.0
libtpu: 0.0.40
codegen_flags: <defaults>
</compile_context>

<pallas_src>
import functools

import jax
import jax.numpy as jnp
from jax.experimental import pallas as pl
from jax.experimental.pallas import tpu as pltpu

_LANE = 128


def _stem_kernel(x_ref, w1_ref, b1_ref, w2_ref, b2_ref, w3_ref, b3_ref,
                 g_ref, x128_ref=None, *, bt, nt):
    """One grid step: bt batches x nt points.

    x_ref:    (3, bt*nt) bf16, flattened channels-major points.
    w*_ref:   bf16 folded conv+BN weights;  b*_ref: f32 (Cout, 1) folded biases.
    g_ref:    (bt, 1024, 1) f32 running-max accumulator (resident across the n axis).
    x128_ref: (bt, 128, nt) f32 point features (optional output).
    """
    ni = pl.program_id(1)
    x = x_ref[...]                                                    # (3, P) bf16

    # conv1 + bn1 + relu
    h1 = jnp.maximum(
        jnp.dot(w1_ref[...], x, preferred_element_type=jnp.float32) + b1_ref[...], 0.0)
    # conv2 + bn2 + relu
    h2 = jnp.maximum(
        jnp.dot(w2_ref[...], h1.astype(jnp.bfloat16),
                preferred_element_type=jnp.float32) + b2_ref[...], 0.0)      # (128, P) f32
    # conv3 + bn3 (no relu)
    h3 = jnp.dot(w3_ref[...], h2.astype(jnp.bfloat16),
                 preferred_element_type=jnp.float32) + b3_ref[...]           # (1024, P) f32

    if x128_ref is not None:
        for bb in range(bt):                                  # static, lane-aligned slices
            x128_ref[bb] = h2[:, bb * nt:(bb + 1) * nt]

    # per-batch max over the point (lane) axis -> running max across n tiles
    maxes = [jnp.max(h3[:, bb * nt:(bb + 1) * nt], axis=-1, keepdims=True)
             for bb in range(bt)]                                            # (1024, 1)

    @pl.when(ni == 0)
    def _():
        for bb in range(bt):
            g_ref[bb] = maxes[bb]

    @pl.when(ni != 0)
    def _():
        for bb in range(bt):
            g_ref[bb] = jnp.maximum(g_ref[bb], maxes[bb])


def _choose_tiles(B, Npad):
    """Pick (Bt, Nt): batches / points per grid step.  Npad is a multiple of 128."""
    if Npad >= 512:
        for nt in (1024, 512, 256, 128):
            if Npad % nt == 0:
                return 1, nt
    # small point clouds: pack whole batches per step to widen the MXU RHS
    budget = max(1, 1024 // Npad)
    for bt in range(min(B, budget), 0, -1):
        if B % bt == 0:
            return bt, Npad
    return 1, Npad


def _prep_points(x):
    """(B, 3, N) -> channels-major (3, B*Npad) bf16, Npad % 128 == 0.
    Padding duplicates the last point so the per-batch max pool is unchanged."""
    B, C, N = x.shape
    Npad = max(_LANE, ((N + _LANE - 1) // _LANE) * _LANE)
    if Npad != N:
        pad = jnp.broadcast_to(x[:, :, -1:], (B, C, Npad - N))
        x = jnp.concatenate([x, pad], axis=2)
    xt = jnp.reshape(jnp.transpose(x, (1, 0, 2)), (C, B * Npad))
    return xt.astype(jnp.bfloat16), Npad


def _stem(x, params, *, emit_pointfeat):
    """relu(bn1(conv1 x)) -> relu(bn2(conv2 .)) -> bn3(conv3 .) -> max over points.

    x: (B, 3, N) f32.  params: three (W (Cout,Cin), b (Cout,1)) folded conv+BN pairs.
    Returns (global (B, 1024) f32, x128 (B, 128, N) f32 or None).
    """
    B, C, N = x.shape
    xt, Npad = _prep_points(x)
    Bt, Nt = _choose_tiles(B, Npad)
    P = Bt * Nt
    steps_per_batch = Npad // Nt
    grid = (B // Bt, steps_per_batch)

    (w1, b1), (w2, b2), (w3, b3) = params
    w1, w2, w3 = (w.astype(jnp.bfloat16) for w in (w1, w2, w3))   # bf16-native MXU

    const = lambda bi, ni: (0, 0)
    in_specs = [
        pl.BlockSpec((C, P), lambda bi, ni: (0, bi * steps_per_batch + ni)),
        pl.BlockSpec(w1.shape, const), pl.BlockSpec(b1.shape, const),
        pl.BlockSpec(w2.shape, const), pl.BlockSpec(b2.shape, const),
        pl.BlockSpec(w3.shape, const), pl.BlockSpec(b3.shape, const),
    ]

    g_shape = jax.ShapeDtypeStruct((B, 1024, 1), jnp.float32)
    g_spec = pl.BlockSpec((Bt, 1024, 1), lambda bi, ni: (bi, 0, 0))   # resident over ni
    if emit_pointfeat:
        out_shape = (g_shape, jax.ShapeDtypeStruct((B, 128, Npad), jnp.float32))
        out_specs = (g_spec, pl.BlockSpec((Bt, 128, Nt), lambda bi, ni: (bi, 0, ni)))
    else:
        out_shape = g_shape
        out_specs = g_spec

    outs = pl.pallas_call(
        functools.partial(_stem_kernel, bt=Bt, nt=Nt),
        out_shape=out_shape,
        grid_spec=pltpu.PrefetchScalarGridSpec(
            num_scalar_prefetch=0,
            grid=grid,
            in_specs=in_specs,
            out_specs=out_specs,
        ),
        compiler_params=pltpu.CompilerParams(
            dimension_semantics=("parallel", "arbitrary"),
            vmem_limit_bytes=32 << 20,
        ),
    )(xt, w1, b1, w2, b2, w3, b3)

    if emit_pointfeat:
        g, x128 = outs
        return g[..., 0], x128[:, :, :N]
    return outs[..., 0], None


def pointnetfeat_return2t_partial(x, params, extra_fn=None):
    """Forward of PointNetfeatReturn2TPartial with eval-mode BN folded into the convs.

    x: (B, 3, N) f32.  Returns (global_feature (B, 1024), x128 (B, 128, N)).
    """
    g1, x128 = _stem(x, params, emit_pointfeat=True)
    # TODO(synk): self.extra (GlobalTransformIndentityGlobalV / GlobalTransformDepthSep)
    #             is not defined in the provided spec; identity transform assumed.
    x2 = x if extra_fn is None else extra_fn(x128, x, g1)
    g2, _ = _stem(x2, params, emit_pointfeat=False)   # shared conv/bn weights, 2nd pass
    return g2, x128


def init_params(key):
    """Synthetic Conv1d(k=1) + eval-mode BatchNorm1d params, BN folded into the conv."""
    keys = iter(jax.random.split(key, 32))

    def conv(cin, cout):
        bound = 1.0 / (cin ** 0.5)
        w = jax.random.uniform(next(keys), (cout, cin), jnp.float32, -bound, bound)
        b = jax.random.uniform(next(keys), (cout,), jnp.float32, -bound, bound)
        return w, b

    def bn(c):
        gamma = jax.random.uniform(next(keys), (c,), jnp.float32, 0.5, 1.5)
        beta = jax.random.uniform(next(keys), (c,), jnp.float32, -0.1, 0.1)
        mean = jax.random.uniform(next(keys), (c,), jnp.float32, -0.1, 0.1)
        var = jax.random.uniform(next(keys), (c,), jnp.float32, 0.5, 1.5)
        return gamma, beta, mean, var

    def fold(conv_wb, bn_p, eps=1e-5):
        (w, b), (g, be, mu, v) = conv_wb, bn_p
        s = g / jnp.sqrt(v + eps)
        return w * s[:, None], ((b - mu) * s + be)[:, None]

    return (
        fold(conv(3, 64), bn(64)),        # conv1 + bn1
        fold(conv(64, 128), bn(128)),     # conv2 + bn2
        fold(conv(128, 1024), bn(1024)),  # conv3 + bn3
    )


if __name__ == "__main__":
    key = jax.random.PRNGKey(0)
    kx, kp = jax.random.split(key)

    B, N = 2, 128                      # small test shapes; channel sizes fixed by the module
    x = jax.random.normal(kx, (B, 3, N), dtype=jnp.float32)
    params = init_params(kp)

    fwd = jax.jit(lambda xx: pointnetfeat_return2t_partial(xx, params))
    g, x128 = fwd(x)
    g, x128 = jax.block_until_ready((g, x128))

    assert g.shape == (B, 1024) and g.dtype == jnp.float32
    assert x128.shape == (B, 128, N) and x128.dtype == jnp.float32
    assert bool(jnp.all(jnp.isfinite(g))) and bool(jnp.all(jnp.isfinite(x128)))
    print("KERNEL_OK")
</pallas_src>

<mosaic_0001>
module attributes {stable_mosaic.version = 11 : i64} {
  func.func @_stem_kernel(%arg0: i32, %arg1: i32, %arg2: memref<3x256xbf16, #tpu.memory_space<vmem>>, %arg3: memref<64x3xbf16, #tpu.memory_space<vmem>>, %arg4: memref<64x1xf32, #tpu.memory_space<vmem>>, %arg5: memref<128x64xbf16, #tpu.memory_space<vmem>>, %arg6: memref<128x1xf32, #tpu.memory_space<vmem>>, %arg7: memref<1024x128xbf16, #tpu.memory_space<vmem>>, %arg8: memref<1024x1xf32, #tpu.memory_space<vmem>>, %arg9: memref<2x1024x1xf32, #tpu.memory_space<vmem>>) attributes {dimension_semantics = [#tpu.dimension_semantics<parallel>, #tpu.dimension_semantics<arbitrary>], iteration_bounds = array<i64: 1, 1>, scalar_prefetch = 0 : i64, scratch_operands = 0 : i64, tpu.core_type = #tpu.core_type<tc>, window_params = [{transform_indices = @transform_0, window_bounds = array<i64: 3, 256>}, {pipeline_mode = #tpu.pipeline_mode<synchronous>, transform_indices = @transform_1, window_bounds = array<i64: 64, 3>}, {pipeline_mode = #tpu.pipeline_mode<synchronous>, transform_indices = @transform_2, window_bounds = array<i64: 64, 1>}, {pipeline_mode = #tpu.pipeline_mode<synchronous>, transform_indices = @transform_3, window_bounds = array<i64: 128, 64>}, {pipeline_mode = #tpu.pipeline_mode<synchronous>, transform_indices = @transform_4, window_bounds = array<i64: 128, 1>}, {pipeline_mode = #tpu.pipeline_mode<synchronous>, transform_indices = @transform_5, window_bounds = array<i64: 1024, 128>}, {pipeline_mode = #tpu.pipeline_mode<synchronous>, transform_indices = @transform_6, window_bounds = array<i64: 1024, 1>}, {transform_indices = @transform_7, window_bounds = array<i64: 2, 1024, 1>}]} {
    %c0 = arith.constant 0 : index
    %c0_0 = arith.constant 0 : index
    %0 = vector.load %arg2[%c0, %c0_0] : memref<3x256xbf16, #tpu.memory_space<vmem>>, vector<3x256xbf16>
    %c0_1 = arith.constant 0 : index
    %c0_2 = arith.constant 0 : index
    %1 = vector.load %arg3[%c0_1, %c0_2] : memref<64x3xbf16, #tpu.memory_space<vmem>>, vector<64x3xbf16>
    %cst = arith.constant dense<0.000000e+00> : vector<64x256xf32>
    %2 = tpu.matmul %1, %0, %cst {dimension_numbers = #tpu.dot_dimension_numbers<[1], [0], [0], [1], [0, 0, 1, 1], [], []>} : vector<64x3xbf16>, vector<3x256xbf16>, vector<64x256xf32> -> vector<64x256xf32>
    %c0_3 = arith.constant 0 : index
    %c0_4 = arith.constant 0 : index
    %3 = vector.load %arg4[%c0_3, %c0_4] : memref<64x1xf32, #tpu.memory_space<vmem>>, vector<64x1xf32>
    %4 = vector.broadcast %3 : vector<64x1xf32> to vector<64x256xf32>
    %5 = arith.addf %2, %4 : vector<64x256xf32>
    %cst_5 = arith.constant 0.000000e+00 : f32
    %6 = vector.broadcast %cst_5 : f32 to vector<64x256xf32>
    %7 = arith.maximumf %5, %6 : vector<64x256xf32>
    %c0_6 = arith.constant 0 : index
    %c0_7 = arith.constant 0 : index
    %8 = vector.load %arg5[%c0_6, %c0_7] : memref<128x64xbf16, #tpu.memory_space<vmem>>, vector<128x64xbf16>
    %9 = arith.truncf %7 : vector<64x256xf32> to vector<64x256xbf16>
    %cst_8 = arith.constant dense<0.000000e+00> : vector<128x256xf32>
    %10 = tpu.matmul %8, %9, %cst_8 {dimension_numbers = #tpu.dot_dimension_numbers<[1], [0], [0], [1], [0, 0, 1, 1], [], []>} : vector<128x64xbf16>, vector<64x256xbf16>, vector<128x256xf32> -> vector<128x256xf32>
    %c0_9 = arith.constant 0 : index
    %c0_10 = arith.constant 0 : index
    %11 = vector.load %arg6[%c0_9, %c0_10] : memref<128x1xf32, #tpu.memory_space<vmem>>, vector<128x1xf32>
    %12 = vector.broadcast %11 : vector<128x1xf32> to vector<128x256xf32>
    %13 = arith.addf %10, %12 : vector<128x256xf32>
    %cst_11 = arith.constant 0.000000e+00 : f32
    %14 = vector.broadcast %cst_11 : f32 to vector<128x256xf32>
    %15 = arith.maximumf %13, %14 : vector<128x256xf32>
    %c0_12 = arith.constant 0 : index
    %c0_13 = arith.constant 0 : index
    %16 = vector.load %arg7[%c0_12, %c0_13] : memref<1024x128xbf16, #tpu.memory_space<vmem>>, vector<1024x128xbf16>
    %17 = arith.truncf %15 : vector<128x256xf32> to vector<128x256xbf16>
    %cst_14 = arith.constant dense<0.000000e+00> : vector<1024x256xf32>
    %18 = tpu.matmul %16, %17, %cst_14 {dimension_numbers = #tpu.dot_dimension_numbers<[1], [0], [0], [1], [0, 0, 1, 1], [], []>} : vector<1024x128xbf16>, vector<128x256xbf16>, vector<1024x256xf32> -> vector<1024x256xf32>
    %c0_15 = arith.constant 0 : index
    %c0_16 = arith.constant 0 : index
    %19 = vector.load %arg8[%c0_15, %c0_16] : memref<1024x1xf32, #tpu.memory_space<vmem>>, vector<1024x1xf32>
    %20 = vector.broadcast %19 : vector<1024x1xf32> to vector<1024x256xf32>
    %21 = arith.addf %18, %20 : vector<1024x256xf32>
    %22 = vector.extract_strided_slice %21 {offsets = [0, 0], sizes = [1024, 128], strides = [1, 1]} : vector<1024x256xf32> to vector<1024x128xf32>
    %cst_17 = arith.constant dense<0xFF800000> : vector<1024xf32>
    %23 = vector.multi_reduction <maximumf>, %22, %cst_17 [1] : vector<1024x128xf32> to vector<1024xf32>
    %24 = vector.shape_cast %23 : vector<1024xf32> to vector<1024x1xf32>
    %25 = vector.extract_strided_slice %21 {offsets = [0, 128], sizes = [1024, 128], strides = [1, 1]} : vector<1024x256xf32> to vector<1024x128xf32>
    %cst_18 = arith.constant dense<0xFF800000> : vector<1024xf32>
    %26 = vector.multi_reduction <maximumf>, %25, %cst_18 [1] : vector<1024x128xf32> to vector<1024xf32>
    %27 = vector.shape_cast %26 : vector<1024xf32> to vector<1024x1xf32>
    %c0_i32 = arith.constant 0 : i32
    %28 = arith.cmpi eq, %arg1, %c0_i32 : i32
    %29 = arith.extui %28 : i1 to i32
    %c0_i32_19 = arith.constant 0 : i32
    %30 = arith.cmpi ne, %29, %c0_i32_19 : i32
    scf.if %30 {
      %c0_22 = arith.constant 0 : index
      %c0_23 = arith.constant 0 : index
      %c0_24 = arith.constant 0 : index
      %34 = vector.load %arg9[%c0_22, %c0_23, %c0_24] : memref<2x1024x1xf32, #tpu.memory_space<vmem>>, vector<1x1024x1xf32>
      %35 = vector.shape_cast %34 : vector<1x1024x1xf32> to vector<1024x1xf32>
      %36 = vector.shape_cast %24 : vector<1024x1xf32> to vector<1x1024x1xf32>
      tpu.vector_store %arg9[%c0_22, %c0_23, %c0_24], %36 {strides = array<i32>} : memref<2x1024x1xf32, #tpu.memory_space<vmem>>, vector<1x1024x1xf32>,
      %c1 = arith.constant 1 : index
      %c0_25 = arith.constant 0 : index
      %c0_26 = arith.constant 0 : index
      %37 = vector.load %arg9[%c1, %c0_25, %c0_26] : memref<2x1024x1xf32, #tpu.memory_space<vmem>>, vector<1x1024x1xf32>
      %38 = vector.shape_cast %37 : vector<1x1024x1xf32> to vector<1024x1xf32>
      %39 = vector.shape_cast %27 : vector<1024x1xf32> to vector<1x1024x1xf32>
      tpu.vector_store %arg9[%c1, %c0_25, %c0_26], %39 {strides = array<i32>} : memref<2x1024x1xf32, #tpu.memory_space<vmem>>, vector<1x1024x1xf32>,
    } else {
    }
    %c0_i32_20 = arith.constant 0 : i32
    %31 = arith.cmpi ne, %arg1, %c0_i32_20 : i32
    %32 = arith.extui %31 : i1 to i32
    %c0_i32_21 = arith.constant 0 : i32
    %33 = arith.cmpi ne, %32, %c0_i32_21 : i32
    scf.if %33 {
      %c0_22 = arith.constant 0 : index
      %c0_23 = arith.constant 0 : index
      %c0_24 = arith.constant 0 : index
      %34 = vector.load %arg9[%c0_22, %c0_23, %c0_24] : memref<2x1024x1xf32, #tpu.memory_space<vmem>>, vector<1x1024x1xf32>
      %35 = vector.shape_cast %34 : vector<1x1024x1xf32> to vector<1024x1xf32>
      %36 = arith.maximumf %35, %24 : vector<1024x1xf32>
      %c0_25 = arith.constant 0 : index
      %c0_26 = arith.constant 0 : index
      %c0_27 = arith.constant 0 : index
      %37 = vector.load %arg9[%c0_25, %c0_26, %c0_27] : memref<2x1024x1xf32, #tpu.memory_space<vmem>>, vector<1x1024x1xf32>
      %38 = vector.shape_cast %37 : vector<1x1024x1xf32> to vector<1024x1xf32>
      %39 = vector.shape_cast %36 : vector<1024x1xf32> to vector<1x1024x1xf32>
      tpu.vector_store %arg9[%c0_25, %c0_26, %c0_27], %39 {strides = array<i32>} : memref<2x1024x1xf32, #tpu.memory_space<vmem>>, vector<1x1024x1xf32>,
      %c1 = arith.constant 1 : index
      %c0_28 = arith.constant 0 : index
      %c0_29 = arith.constant 0 : index
      %40 = vector.load %arg9[%c1, %c0_28, %c0_29] : memref<2x1024x1xf32, #tpu.memory_space<vmem>>, vector<1x1024x1xf32>
      %41 = vector.shape_cast %40 : vector<1x1024x1xf32> to vector<1024x1xf32>
      %42 = arith.maximumf %41, %27 : vector<1024x1xf32>
      %c1_30 = arith.constant 1 : index
      %c0_31 = arith.constant 0 : index
      %c0_32 = arith.constant 0 : index
      %43 = vector.load %arg9[%c1_30, %c0_31, %c0_32] : memref<2x1024x1xf32, #tpu.memory_space<vmem>>, vector<1x1024x1xf32>
      %44 = vector.shape_cast %43 : vector<1x1024x1xf32> to vector<1024x1xf32>
      %45 = vector.shape_cast %42 : vector<1024x1xf32> to vector<1x1024x1xf32>
      tpu.vector_store %arg9[%c1_30, %c0_31, %c0_32], %45 {strides = array<i32>} : memref<2x1024x1xf32, #tpu.memory_space<vmem>>, vector<1x1024x1xf32>,
    } else {
    }
    return
  }
  func.func @transform_0(%arg0: i32, %arg1: i32) -> (i32, i32) {
    %c1_i32 = arith.constant 1 : i32
    %0 = arith.muli %arg0, %c1_i32 : i32
    %1 = arith.addi %0, %arg1 : i32
    %c0_i32 = arith.constant 0 : i32
    %c0_i32_0 = arith.constant 0 : i32
    return %c0_i32, %1 : i32, i32
  }
  func.func @transform_1(%arg0: i32, %arg1: i32) -> (i32, i32) {
    %c0_i32 = arith.constant 0 : i32
    %c0_i32_0 = arith.constant 0 : i32
    %c0_i32_1 = arith.constant 0 : i32
    return %c0_i32, %c0_i32_0 : i32, i32
  }
  func.func @transform_2(%arg0: i32, %arg1: i32) -> (i32, i32) {
    %c0_i32 = arith.constant 0 : i32
    %c0_i32_0 = arith.constant 0 : i32
    %c0_i32_1 = arith.constant 0 : i32
    return %c0_i32, %c0_i32_0 : i32, i32
  }
  func.func @transform_3(%arg0: i32, %arg1: i32) -> (i32, i32) {
    %c0_i32 = arith.constant 0 : i32
    %c0_i32_0 = arith.constant 0 : i32
    %c0_i32_1 = arith.constant 0 : i32
    return %c0_i32, %c0_i32_0 : i32, i32
  }
  func.func @transform_4(%arg0: i32, %arg1: i32) -> (i32, i32) {
    %c0_i32 = arith.constant 0 : i32
    %c0_i32_0 = arith.constant 0 : i32
    %c0_i32_1 = arith.constant 0 : i32
    return %c0_i32, %c0_i32_0 : i32, i32
  }
  func.func @transform_5(%arg0: i32, %arg1: i32) -> (i32, i32) {
    %c0_i32 = arith.constant 0 : i32
    %c0_i32_0 = arith.constant 0 : i32
    %c0_i32_1 = arith.constant 0 : i32
    return %c0_i32, %c0_i32_0 : i32, i32
  }
  func.func @transform_6(%arg0: i32, %arg1: i32) -> (i32, i32) {
    %c0_i32 = arith.constant 0 : i32
    %c0_i32_0 = arith.constant 0 : i32
    %c0_i32_1 = arith.constant 0 : i32
    return %c0_i32, %c0_i32_0 : i32, i32
  }
  func.func @transform_7(%arg0: i32, %arg1: i32) -> (i32, i32, i32) {
    %c0_i32 = arith.constant 0 : i32
    %c0_i32_0 = arith.constant 0 : i32
    %c0_i32_1 = arith.constant 0 : i32
    return %arg0, %c0_i32, %c0_i32_0 : i32, i32, i32
  }
}

module attributes {stable_mosaic.version = 11 : i64} {
  func.func @_stem_kernel(%arg0: i32, %arg1: i32, %arg2: memref<3x256xbf16, #tpu.memory_space<vmem>>, %arg3: memref<64x3xbf16, #tpu.memory_space<vmem>>, %arg4: memref<64x1xf32, #tpu.memory_space<vmem>>, %arg5: memref<128x64xbf16, #tpu.memory_space<vmem>>, %arg6: memref<128x1xf32, #tpu.memory_space<vmem>>, %arg7: memref<1024x128xbf16, #tpu.memory_space<vmem>>, %arg8: memref<1024x1xf32, #tpu.memory_space<vmem>>, %arg9: memref<2x1024x1xf32, #tpu.memory_space<vmem>>, %arg10: memref<2x128x128xf32, #tpu.memory_space<vmem>>) attributes {dimension_semantics = [#tpu.dimension_semantics<parallel>, #tpu.dimension_semantics<arbitrary>], iteration_bounds = array<i64: 1, 1>, scalar_prefetch = 0 : i64, scratch_operands = 0 : i64, tpu.core_type = #tpu.core_type<tc>, window_params = [{transform_indices = @transform_0, window_bounds = array<i64: 3, 256>}, {pipeline_mode = #tpu.pipeline_mode<synchronous>, transform_indices = @transform_1, window_bounds = array<i64: 64, 3>}, {pipeline_mode = #tpu.pipeline_mode<synchronous>, transform_indices = @transform_2, window_bounds = array<i64: 64, 1>}, {pipeline_mode = #tpu.pipeline_mode<synchronous>, transform_indices = @transform_3, window_bounds = array<i64: 128, 64>}, {pipeline_mode = #tpu.pipeline_mode<synchronous>, transform_indices = @transform_4, window_bounds = array<i64: 128, 1>}, {pipeline_mode = #tpu.pipeline_mode<synchronous>, transform_indices = @transform_5, window_bounds = array<i64: 1024, 128>}, {pipeline_mode = #tpu.pipeline_mode<synchronous>, transform_indices = @transform_6, window_bounds = array<i64: 1024, 1>}, {transform_indices = @transform_7, window_bounds = array<i64: 2, 1024, 1>}, {transform_indices = @transform_8, window_bounds = array<i64: 2, 128, 128>}]} {
    %c0 = arith.constant 0 : index
    %c0_0 = arith.constant 0 : index
    %0 = vector.load %arg2[%c0, %c0_0] : memref<3x256xbf16, #tpu.memory_space<vmem>>, vector<3x256xbf16>
    %c0_1 = arith.constant 0 : index
    %c0_2 = arith.constant 0 : index
    %1 = vector.load %arg3[%c0_1, %c0_2] : memref<64x3xbf16, #tpu.memory_space<vmem>>, vector<64x3xbf16>
    %cst = arith.constant dense<0.000000e+00> : vector<64x256xf32>
    %2 = tpu.matmul %1, %0, %cst {dimension_numbers = #tpu.dot_dimension_numbers<[1], [0], [0], [1], [0, 0, 1, 1], [], []>} : vector<64x3xbf16>, vector<3x256xbf16>, vector<64x256xf32> -> vector<64x256xf32>
    %c0_3 = arith.constant 0 : index
    %c0_4 = arith.constant 0 : index
    %3 = vector.load %arg4[%c0_3, %c0_4] : memref<64x1xf32, #tpu.memory_space<vmem>>, vector<64x1xf32>
    %4 = vector.broadcast %3 : vector<64x1xf32> to vector<64x256xf32>
    %5 = arith.addf %2, %4 : vector<64x256xf32>
    %cst_5 = arith.constant 0.000000e+00 : f32
    %6 = vector.broadcast %cst_5 : f32 to vector<64x256xf32>
    %7 = arith.maximumf %5, %6 : vector<64x256xf32>
    %c0_6 = arith.constant 0 : index
    %c0_7 = arith.constant 0 : index
    %8 = vector.load %arg5[%c0_6, %c0_7] : memref<128x64xbf16, #tpu.memory_space<vmem>>, vector<128x64xbf16>
    %9 = arith.truncf %7 : vector<64x256xf32> to vector<64x256xbf16>
    %cst_8 = arith.constant dense<0.000000e+00> : vector<128x256xf32>
    %10 = tpu.matmul %8, %9, %cst_8 {dimension_numbers = #tpu.dot_dimension_numbers<[1], [0], [0], [1], [0, 0, 1, 1], [], []>} : vector<128x64xbf16>, vector<64x256xbf16>, vector<128x256xf32> -> vector<128x256xf32>
    %c0_9 = arith.constant 0 : index
    %c0_10 = arith.constant 0 : index
    %11 = vector.load %arg6[%c0_9, %c0_10] : memref<128x1xf32, #tpu.memory_space<vmem>>, vector<128x1xf32>
    %12 = vector.broadcast %11 : vector<128x1xf32> to vector<128x256xf32>
    %13 = arith.addf %10, %12 : vector<128x256xf32>
    %cst_11 = arith.constant 0.000000e+00 : f32
    %14 = vector.broadcast %cst_11 : f32 to vector<128x256xf32>
    %15 = arith.maximumf %13, %14 : vector<128x256xf32>
    %c0_12 = arith.constant 0 : index
    %c0_13 = arith.constant 0 : index
    %16 = vector.load %arg7[%c0_12, %c0_13] : memref<1024x128xbf16, #tpu.memory_space<vmem>>, vector<1024x128xbf16>
    %17 = arith.truncf %15 : vector<128x256xf32> to vector<128x256xbf16>
    %cst_14 = arith.constant dense<0.000000e+00> : vector<1024x256xf32>
    %18 = tpu.matmul %16, %17, %cst_14 {dimension_numbers = #tpu.dot_dimension_numbers<[1], [0], [0], [1], [0, 0, 1, 1], [], []>} : vector<1024x128xbf16>, vector<128x256xbf16>, vector<1024x256xf32> -> vector<1024x256xf32>
    %c0_15 = arith.constant 0 : index
    %c0_16 = arith.constant 0 : index
    %19 = vector.load %arg8[%c0_15, %c0_16] : memref<1024x1xf32, #tpu.memory_space<vmem>>, vector<1024x1xf32>
    %20 = vector.broadcast %19 : vector<1024x1xf32> to vector<1024x256xf32>
    %21 = arith.addf %18, %20 : vector<1024x256xf32>
    %22 = vector.extract_strided_slice %15 {offsets = [0, 0], sizes = [128, 128], strides = [1, 1]} : vector<128x256xf32> to vector<128x128xf32>
    %c0_17 = arith.constant 0 : index
    %c0_18 = arith.constant 0 : index
    %c0_19 = arith.constant 0 : index
    %23 = vector.load %arg10[%c0_17, %c0_18, %c0_19] : memref<2x128x128xf32, #tpu.memory_space<vmem>>, vector<1x128x128xf32>
    %24 = vector.shape_cast %23 : vector<1x128x128xf32> to vector<128x128xf32>
    %25 = vector.shape_cast %22 : vector<128x128xf32> to vector<1x128x128xf32>
    tpu.vector_store %arg10[%c0_17, %c0_18, %c0_19], %25 {strides = array<i32>} : memref<2x128x128xf32, #tpu.memory_space<vmem>>, vector<1x128x128xf32>,
    %26 = vector.extract_strided_slice %15 {offsets = [0, 128], sizes = [128, 128], strides = [1, 1]} : vector<128x256xf32> to vector<128x128xf32>
    %c1 = arith.constant 1 : index
    %c0_20 = arith.constant 0 : index
    %c0_21 = arith.constant 0 : index
    %27 = vector.load %arg10[%c1, %c0_20, %c0_21] : memref<2x128x128xf32, #tpu.memory_space<vmem>>, vector<1x128x128xf32>
    %28 = vector.shape_cast %27 : vector<1x128x128xf32> to vector<128x128xf32>
    %29 = vector.shape_cast %26 : vector<128x128xf32> to vector<1x128x128xf32>
    tpu.vector_store %arg10[%c1, %c0_20, %c0_21], %29 {strides = array<i32>} : memref<2x128x128xf32, #tpu.memory_space<vmem>>, vector<1x128x128xf32>,
    %30 = vector.extract_strided_slice %21 {offsets = [0, 0], sizes = [1024, 128], strides = [1, 1]} : vector<1024x256xf32> to vector<1024x128xf32>
    %cst_22 = arith.constant dense<0xFF800000> : vector<1024xf32>
    %31 = vector.multi_reduction <maximumf>, %30, %cst_22 [1] : vector<1024x128xf32> to vector<1024xf32>
    %32 = vector.shape_cast %31 : vector<1024xf32> to vector<1024x1xf32>
    %33 = vector.extract_strided_slice %21 {offsets = [0, 128], sizes = [1024, 128], strides = [1, 1]} : vector<1024x256xf32> to vector<1024x128xf32>
    %cst_23 = arith.constant dense<0xFF800000> : vector<1024xf32>
    %34 = vector.multi_reduction <maximumf>, %33, %cst_23 [1] : vector<1024x128xf32> to vector<1024xf32>
    %35 = vector.shape_cast %34 : vector<1024xf32> to vector<1024x1xf32>
    %c0_i32 = arith.constant 0 : i32
    %36 = arith.cmpi eq, %arg1, %c0_i32 : i32
    %37 = arith.extui %36 : i1 to i32
    %c0_i32_24 = arith.constant 0 : i32
    %38 = arith.cmpi ne, %37, %c0_i32_24 : i32
    scf.if %38 {
      %c0_27 = arith.constant 0 : index
      %c0_28 = arith.constant 0 : index
      %c0_29 = arith.constant 0 : index
      %42 = vector.load %arg9[%c0_27, %c0_28, %c0_29] : memref<2x1024x1xf32, #tpu.memory_space<vmem>>, vector<1x1024x1xf32>
      %43 = vector.shape_cast %42 : vector<1x1024x1xf32> to vector<1024x1xf32>
      %44 = vector.shape_cast %32 : vector<1024x1xf32> to vector<1x1024x1xf32>
      tpu.vector_store %arg9[%c0_27, %c0_28, %c0_29], %44 {strides = array<i32>} : memref<2x1024x1xf32, #tpu.memory_space<vmem>>, vector<1x1024x1xf32>,
      %c1_30 = arith.constant 1 : index
      %c0_31 = arith.constant 0 : index
      %c0_32 = arith.constant 0 : index
      %45 = vector.load %arg9[%c1_30, %c0_31, %c0_32] : memref<2x1024x1xf32, #tpu.memory_space<vmem>>, vector<1x1024x1xf32>
      %46 = vector.shape_cast %45 : vector<1x1024x1xf32> to vector<1024x1xf32>
      %47 = vector.shape_cast %35 : vector<1024x1xf32> to vector<1x1024x1xf32>
      tpu.vector_store %arg9[%c1_30, %c0_31, %c0_32], %47 {strides = array<i32>} : memref<2x1024x1xf32, #tpu.memory_space<vmem>>, vector<1x1024x1xf32>,
    } else {
    }
    %c0_i32_25 = arith.constant 0 : i32
    %39 = arith.cmpi ne, %arg1, %c0_i32_25 : i32
    %40 = arith.extui %39 : i1 to i32
    %c0_i32_26 = arith.constant 0 : i32
    %41 = arith.cmpi ne, %40, %c0_i32_26 : i32
    scf.if %41 {
      %c0_27 = arith.constant 0 : index
      %c0_28 = arith.constant 0 : index
      %c0_29 = arith.constant 0 : index
      %42 = vector.load %arg9[%c0_27, %c0_28, %c0_29] : memref<2x1024x1xf32, #tpu.memory_space<vmem>>, vector<1x1024x1xf32>
      %43 = vector.shape_cast %42 : vector<1x1024x1xf32> to vector<1024x1xf32>
      %44 = arith.maximumf %43, %32 : vector<1024x1xf32>
      %c0_30 = arith.constant 0 : index
      %c0_31 = arith.constant 0 : index
      %c0_32 = arith.constant 0 : index
      %45 = vector.load %arg9[%c0_30, %c0_31, %c0_32] : memref<2x1024x1xf32, #tpu.memory_space<vmem>>, vector<1x1024x1xf32>
      %46 = vector.shape_cast %45 : vector<1x1024x1xf32> to vector<1024x1xf32>
      %47 = vector.shape_cast %44 : vector<1024x1xf32> to vector<1x1024x1xf32>
      tpu.vector_store %arg9[%c0_30, %c0_31, %c0_32], %47 {strides = array<i32>} : memref<2x1024x1xf32, #tpu.memory_space<vmem>>, vector<1x1024x1xf32>,
      %c1_33 = arith.constant 1 : index
      %c0_34 = arith.constant 0 : index
      %c0_35 = arith.constant 0 : index
      %48 = vector.load %arg9[%c1_33, %c0_34, %c0_35] : memref<2x1024x1xf32, #tpu.memory_space<vmem>>, vector<1x1024x1xf32>
      %49 = vector.shape_cast %48 : vector<1x1024x1xf32> to vector<1024x1xf32>
      %50 = arith.maximumf %49, %35 : vector<1024x1xf32>
      %c1_36 = arith.constant 1 : index
      %c0_37 = arith.constant 0 : index
      %c0_38 = arith.constant 0 : index
      %51 = vector.load %arg9[%c1_36, %c0_37, %c0_38] : memref<2x1024x1xf32, #tpu.memory_space<vmem>>, vector<1x1024x1xf32>
      %52 = vector.shape_cast %51 : vector<1x1024x1xf32> to vector<1024x1xf32>
      %53 = vector.shape_cast %50 : vector<1024x1xf32> to vector<1x1024x1xf32>
      tpu.vector_store %arg9[%c1_36, %c0_37, %c0_38], %53 {strides = array<i32>} : memref<2x1024x1xf32, #tpu.memory_space<vmem>>, vector<1x1024x1xf32>,
    } else {
    }
    return
  }
  func.func @transform_0(%arg0: i32, %arg1: i32) -> (i32, i32) {
    %c1_i32 = arith.constant 1 : i32
    %0 = arith.muli %arg0, %c1_i32 : i32
    %1 = arith.addi %0, %arg1 : i32
    %c0_i32 = arith.constant 0 : i32
    %c0_i32_0 = arith.constant 0 : i32
    return %c0_i32, %1 : i32, i32
  }
  func.func @transform_1(%arg0: i32, %arg1: i32) -> (i32, i32) {
    %c0_i32 = arith.constant 0 : i32
    %c0_i32_0 = arith.constant 0 : i32
    %c0_i32_1 = arith.constant 0 : i32
    return %c0_i32, %c0_i32_0 : i32, i32
  }
  func.func @transform_2(%arg0: i32, %arg1: i32) -> (i32, i32) {
    %c0_i32 = arith.constant 0 : i32
    %c0_i32_0 = arith.constant 0 : i32
    %c0_i32_1 = arith.constant 0 : i32
    return %c0_i32, %c0_i32_0 : i32, i32
  }
  func.func @transform_3(%arg0: i32, %arg1: i32) -> (i32, i32) {
    %c0_i32 = arith.constant 0 : i32
    %c0_i32_0 = arith.constant 0 : i32
    %c0_i32_1 = arith.constant 0 : i32
    return %c0_i32, %c0_i32_0 : i32, i32
  }
  func.func @transform_4(%arg0: i32, %arg1: i32) -> (i32, i32) {
    %c0_i32 = arith.constant 0 : i32
    %c0_i32_0 = arith.constant 0 : i32
    %c0_i32_1 = arith.constant 0 : i32
    return %c0_i32, %c0_i32_0 : i32, i32
  }
  func.func @transform_5(%arg0: i32, %arg1: i32) -> (i32, i32) {
    %c0_i32 = arith.constant 0 : i32
    %c0_i32_0 = arith.constant 0 : i32
    %c0_i32_1 = arith.constant 0 : i32
    return %c0_i32, %c0_i32_0 : i32, i32
  }
  func.func @transform_6(%arg0: i32, %arg1: i32) -> (i32, i32) {
    %c0_i32 = arith.constant 0 : i32
    %c0_i32_0 = arith.constant 0 : i32
    %c0_i32_1 = arith.constant 0 : i32
    return %c0_i32, %c0_i32_0 : i32, i32
  }
  func.func @transform_7(%arg0: i32, %arg1: i32) -> (i32, i32, i32) {
    %c0_i32 = arith.constant 0 : i32
    %c0_i32_0 = arith.constant 0 : i32
    %c0_i32_1 = arith.constant 0 : i32
    return %arg0, %c0_i32, %c0_i32_0 : i32, i32, i32
  }
  func.func @transform_8(%arg0: i32, %arg1: i32) -> (i32, i32, i32) {
    %c0_i32 = arith.constant 0 : i32
    %c0_i32_0 = arith.constant 0 : i32
    return %arg0, %c0_i32, %arg1 : i32, i32, i32
  }
}

</mosaic_0001>

<bundles_post_ra>
// kernel: _lambda_.3
= control target key start
LH: loop header
LB: loop body
LE: loop exit
PB: predicated region body
PF: predicated region fallthrough
CT: control target
= control target key end

     0   :  { %12 = vsyncpa [#allocation3], 0  ;;  %s7308_s0 = inlined_call_operand.vmem [shape: bf16[3,256], index: 0, kind: input, shape index: {}]   ;;  %s7309_s1 = inlined_call_operand.hbm [shape: bf16[64,3], index: 1, kind: input, shape index: {}]   ;;  %s7310_s2 = inlined_call_operand.hbm [shape: f32[64,1], index: 2, kind: input, shape index: {}]   ;;  %s7311_s3 = inlined_call_operand.hbm [shape: bf16[128,64], index: 3, kind: input, shape index: {}]   ;;  %s7312_s4 = inlined_call_operand.hbm [shape: f32[128,1], index: 4, kind: input, shape index: {}]   ;;  %s7313_s5 = inlined_call_operand.hbm [shape: bf16[1024,128], index: 5, kind: input, shape index: {}]   ;;  %s7314_s6 = inlined_call_operand.hbm [shape: f32[1024,1], index: 6, kind: input, shape index: {}]   ;;  %s7315_s7 = inlined_call_operand.vmem [shape: f32[2,1024,1], index: 7, kind: output, shape index: {}]  }
   0x1   :  { %13 = vsyncpa [#allocation5], 0 }
   0x2   :  { %14 = vsyncpa [#allocation8], 0  ;;  %s43_s26 = sshll.u32 %s7310_s2, 4  ;;  %s44_s26 = int_to_ptr.hbm [resolvable:$true] %s43_s26 }
   0x3   :  { %15 = vsyncpa [#allocation11], 0  ;;  %s5121_s27 = smov [#allocation4]   ;;  %s69_s8 = sshll.u32 %s7312_s4, 4  ;;  %s70_s8 = int_to_ptr.hbm [resolvable:$true] %s69_s8 }
   0x4   :  { %s45_s28 = sshll.u32 %s5121_s27, 4  ;;  %s5122_s9 = smov 128   ;;  %s46_s28 = int_to_ptr.vmem [resolvable:$true] %s45_s28 }
   0x5   :  { %s5123_s10 = smov 8   ;;  %s5124_s11 = smov [#allocation7]  }
   0x6   :  { %51 = dma.hbm_to_vmem [thread:$0]  %s44_s26, 1024, %s46_s28, [#allocation5], %s5122_s9, %s5122_s9, %s5123_s10  }
   0x7   :  { %s71_s12 = sshll.u32 %s5124_s11, 4  ;;  %s30_s14 = sshll.u32 %s7309_s1, 4  ;;  %s72_s12 = int_to_ptr.vmem [resolvable:$true] %s71_s12  ;;  %s31_s14 = int_to_ptr.hbm [resolvable:$true] %s30_s14 }
   0x8   :  { %77 = dma.hbm_to_vmem [thread:$0]  %s70_s8, 2048, %s72_s12, [#allocation8], %s5122_s9, %s5122_s9, %s5123_s10  }
   0x9   :  { %s5125_s4 = smov [#allocation2]   ;;  %s56_s18 = sshll.u32 %s7311_s3, 4  ;;  %s57_s18 = int_to_ptr.hbm [resolvable:$true] %s56_s18 }
   0xa   :  { %s32_s15 = sshll.u32 %s5125_s4, 4  ;;  %s5126_s19 = smov 64   ;;  %s33_s15 = int_to_ptr.vmem [resolvable:$true] %s32_s15 }
   0xb   :  { %s5127_s20 = smov 4   ;;  %s5128_s21 = smov [#allocation6]  }
   0xc   :  { %38 = dma.hbm_to_vmem [thread:$0]  %s31_s14, 512, %s33_s15, [#allocation3], %s5126_s19, %s5126_s19, %s5127_s20  }
   0xd   :  { %s58_s22 = sshll.u32 %s5128_s21, 4  ;;  %s82_s24 = sshll.u32 %s7313_s5, 4  ;;  %s59_s22 = int_to_ptr.vmem [resolvable:$true] %s58_s22  ;;  %s83_s24 = int_to_ptr.hbm [resolvable:$true] %s82_s24 }
   0xe   :  { %64 = dma.hbm_to_vmem [thread:$0]  %s57_s18, 1024, %s59_s22, [#allocation5], %s5126_s19, %s5126_s19, %s5127_s20  }
   0xf   :  { %s95_s27 = sshll.u32 %s7314_s6, 4  ;;  %s5129_s28 = smov [#allocation9]   ;;  %s96_s27 = int_to_ptr.hbm [resolvable:$true] %s95_s27 }
  0x10   :  { %s84_s29 = sshll.u32 %s5129_s28, 4  ;;  %s5130_s3 = smov [#allocation10]   ;;  %s85_s29 = int_to_ptr.vmem [resolvable:$true] %s84_s29 }
  0x11   :  { %90 = dma.hbm_to_vmem [thread:$0]  %s83_s24, 8192, %s85_s29, [#allocation8], %s5126_s19, %s5126_s19, %s5127_s20  }
  0x12   :  { %s97_s30 = sshll.u32 %s5130_s3, 4  ;;  %s98_s30 = int_to_ptr.vmem [resolvable:$true] %s97_s30 }
  0x13   :  { %103 = dma.hbm_to_vmem [thread:$0]  %s96_s27, 16384, %s98_s30, [#allocation11], %s5122_s9, %s5122_s9, %s5123_s10  }
  0x14   :  { %5113 = dma.done.wait [#allocation3], 512  }
  0x15   :  { %5114 = vsyncadd [#allocation3], 4294966784 }
  0x16   :  { %5115 = dma.done.wait [#allocation5], 2048  }
  0x17   :  { %5116 = vsyncadd [#allocation5], 4294965248 }
  0x18   :  { %5117 = dma.done.wait [#allocation8], 10240  }
  0x19   :  { %5118 = vsyncadd [#allocation8], 4294957056 }
  0x1a   :  { %5119 = dma.done.wait [#allocation11], 16384  }
  0x1b   :  { %5120 = vsyncadd [#allocation11], 4294950912  ;;  %v5131_v0 = vmov 0   ;;  %v156_v1 = vld [vmem:[#allocation4 + $0x20] sm:$0xff]  ;;  %v154_v2 = vld [vmem:[#allocation4 + $0x10] sm:$0xff]  ;;  %vm237_vm0 = vcmask 1040384  }
  0x1c   :  { %4968 = vset.pattern.permute.xlu2 %v5131_v0  ;;  %4967 = vset.pattern.permute.xlu1 %v5131_v0  ;;  %v152_v3 = vld [vmem:[#allocation4] sm:$0xff]  ;;  %v143_v4 = vld [vmem:[%s7308_s0] sm:$0xf]  ;;  %vm238_vm1 = vcmask 1041408   ;;  %v5132_v5 = vmov 65535   ;;  %v157_v7 = vld [vmem:[#allocation4 + $0x28] sm:$0xff] }
  0x1d   :  { %4966 = vset.pattern.permute.xlu0 %v5131_v0  ;;  %182 = vperm.xlu2 %4968, %v156_v1   ;;  %221 = vst [vmem:[#allocation1] ss:$4 sm:$0xff] %v143_v4  ;;  %v239_v6 = vsel %vm237_vm0, 4294967295, %v5132_v5  ;;  %v155_v8 = vld [vmem:[#allocation4 + $0x18] sm:$0xff]  ;;  %v153_v9 = vld [vmem:[#allocation4 + $0x8] sm:$0xff]  ;;  %v4862_v15 = vld [vmem:[#allocation2] sm:$0xff] }
  0x1e   :  { %172 = vperm.xlu1 %4967, %v154_v2   ;;  %162 = vperm.xlu0 %4966, %v152_v3   ;;  %v240_v10 = vsel %vm238_vm1, %v239_v6, 0  ;;  %vm224_vm2 = vcmask 23552   ;;  %v343_v16 = vld [vmem:[#allocation7] sm:$0xff]  ;;  %v159_v17 = vld [vmem:[#allocation4 + $0x38] sm:$0xff]  ;;  %v158_v18 = vld [vmem:[#allocation4 + $0x30] sm:$0xff]  ;;  %vm479_vm3 = vcmask 523264  }
  0x1f   :  { %v346_v19 = vld [vmem:[#allocation7 + $0x18] sm:$0xff]  ;;  %v345_v20 = vld [vmem:[#allocation7 + $0x10] sm:$0xff]  ;;  %v344_v21 = vld [vmem:[#allocation7 + $0x8] sm:$0xff]  ;;  %vm3104_vm4 = vcmask 7168  }
  0x20   :  { %v4863_v22 = vld [vmem:[#allocation2 + $0x8] sm:$0xff]  ;;  %v349_v23 = vld [vmem:[#allocation7 + $0x30] sm:$0xff]  ;;  %v347_v25 = vld [vmem:[#allocation7 + $0x20] sm:$0xff] }
  0x21   :  { %v348_v24 = vld [vmem:[#allocation7 + $0x28] sm:$0xff]  ;;  %v351_v27 = vld [vmem:[#allocation7 + $0x40] sm:$0xff]  ;;  %v350_v28 = vld [vmem:[#allocation7 + $0x38] sm:$0xff] }
  0x22   :  { %v352_v26 = vld [vmem:[#allocation7 + $0x48] sm:$0xff]  ;;  %v4864_v29 = vld [vmem:[#allocation2 + $0x10] sm:$0xff]  ;;  %v355_v30 = vld [vmem:[#allocation7 + $0x60] sm:$0xff] }
  0x23   :  { %v354_v31 = vld [vmem:[#allocation7 + $0x58] sm:$0xff]  ;;  %v353_v32 = vld [vmem:[#allocation7 + $0x50] sm:$0xff]  ;;  %v356_v35 = vld [vmem:[#allocation7 + $0x68] sm:$0xff] }
  0x24   :  { %v222_v11 = vld.sshfl [vmem:[#allocation1] sm:$0xff pattern:$0x73625140]  ;;  %v223_v12 = vld.sshfl [vmem:[#allocation1 + $0x8] sm:$0xff pattern:$0x73625140] }
  0x25   :  { %187 = vperm.xlu2 %4968, %v157_v7   ;;  %v241_v13 = vand.u32 %v240_v10, %v222_v11  ;;  %v243_v14 = vand.u32 %v240_v10, %v223_v12  ;;  %v358_v33 = vld [vmem:[#allocation7 + $0x78] sm:$0xff]  ;;  %v357_v34 = vld [vmem:[#allocation7 + $0x70] sm:$0xff]  ;;  %v779_v38 = vld [vmem:[#allocation10 + $0x8] sm:$0xff] }
  0x26   :  { %177 = vperm.xlu1 %4967, %v155_v8   ;;  %167 = vperm.xlu0 %4966, %v153_v9   ;;  %v4865_v36 = vld [vmem:[#allocation2 + $0x18] sm:$0xff]  ;;  %v780_v37 = vld [vmem:[#allocation10 + $0x10] sm:$0xff]  ;;  %v778_v39 = vld [vmem:[#allocation10] sm:$0xff] }
  0x27   :  { %252 = vmatpush.bf16.msra.mxu0 %v241_v13  ;;  %281 = vmatpush.bf16.msra.mxu1 %v243_v14  ;;  %v783_v40 = vld [vmem:[#allocation10 + $0x28] sm:$0xff]  ;;  %v782_v41 = vld [vmem:[#allocation10 + $0x20] sm:$0xff]  ;;  %v781_v42 = vld [vmem:[#allocation10 + $0x18] sm:$0xff] }
  0x28   :  { %v786_v43 = vld [vmem:[#allocation10 + $0x40] sm:$0xff]  ;;  %v785_v44 = vld [vmem:[#allocation10 + $0x38] sm:$0xff]  ;;  %v784_v45 = vld [vmem:[#allocation10 + $0x30] sm:$0xff] }
  0x29   :  { %v789_v46 = vld [vmem:[#allocation10 + $0x58] sm:$0xff]  ;;  %v788_v47 = vld [vmem:[#allocation10 + $0x50] sm:$0xff]  ;;  %v787_v48 = vld [vmem:[#allocation10 + $0x48] sm:$0xff] }
  0x2a   :  { %4166 = vmatmul.msk.bf16.vlgmr.msra.gmra.mxu0 %vm224_vm2, %v4862_v15  ;;  %4170 = vmatmul.msk.bf16.vlgmr.msra.gmra.mxu1 %vm224_vm2, %v4862_v15  ;;  %v792_v49 = vld [vmem:[#allocation10 + $0x70] sm:$0xff]  ;;  %v791_v50 = vld [vmem:[#allocation10 + $0x68] sm:$0xff]  ;;  %v790_v51 = vld [vmem:[#allocation10 + $0x60] sm:$0xff] }
  0x2b   :  { %v795_v52 = vld [vmem:[#allocation10 + $0x88] sm:$0xff]  ;;  %v794_v53 = vld [vmem:[#allocation10 + $0x80] sm:$0xff]  ;;  %v793_v54 = vld [vmem:[#allocation10 + $0x78] sm:$0xff] }
  0x2c   :  { %v798_v55 = vld [vmem:[#allocation10 + $0xa0] sm:$0xff]  ;;  %v797_v56 = vld [vmem:[#allocation10 + $0x98] sm:$0xff]  ;;  %v796_v57 = vld [vmem:[#allocation10 + $0x90] sm:$0xff] }
  0x2d   :  { %361 = vperm.xlu2 %4968, %v343_v16   ;;  %v801_v58 = vld [vmem:[#allocation10 + $0xb8] sm:$0xff]  ;;  %v800_v59 = vld [vmem:[#allocation10 + $0xb0] sm:$0xff]  ;;  %v799_v60 = vld [vmem:[#allocation10 + $0xa8] sm:$0xff] }
  0x2e   :  { %197 = vperm.xlu1 %4967, %v159_v17   ;;  %192 = vperm.xlu0 %4966, %v158_v18   ;;  %v804_v61 = vld [vmem:[#allocation10 + $0xd0] sm:$0xff]  ;;  %v803_v62 = vld [vmem:[#allocation10 + $0xc8] sm:$0xff]  ;;  %v802_v63 = vld [vmem:[#allocation10 + $0xc0] sm:$0xff] }
  0x2f   :  { %v807_v0 = vld [vmem:[#allocation10 + $0xe8] sm:$0xff]  ;;  %v806_v1 = vld [vmem:[#allocation10 + $0xe0] sm:$0xff]  ;;  %v805_v2 = vld [vmem:[#allocation10 + $0xd8] sm:$0xff] }
  0x30   :  { %v810_v5 = vld [vmem:[#allocation10 + $0x100] sm:$0xff]  ;;  %v809_v6 = vld [vmem:[#allocation10 + $0xf8] sm:$0xff]  ;;  %v808_v7 = vld [vmem:[#allocation10 + $0xf0] sm:$0xff] }
  0x31   :  { %v813_v10 = vld [vmem:[#allocation10 + $0x118] sm:$0xff]  ;;  %v812_v11 = vld [vmem:[#allocation10 + $0x110] sm:$0xff]  ;;  %v811_v12 = vld [vmem:[#allocation10 + $0x108] sm:$0xff] }
  0x32   :  { %v816_v15 = vld [vmem:[#allocation10 + $0x130] sm:$0xff]  ;;  %v815_v16 = vld [vmem:[#allocation10 + $0x128] sm:$0xff]  ;;  %v814_v17 = vld [vmem:[#allocation10 + $0x120] sm:$0xff] }
  0x35   :  { %376 = vperm.xlu2 %4968, %v346_v19  }
  0x36   :  { %371 = vperm.xlu1 %4967, %v345_v20   ;;  %366 = vperm.xlu0 %4966, %v344_v21   ;;  %v819_v20 = vld [vmem:[#allocation10 + $0x148] sm:$0xff]  ;;  %v818_v21 = vld [vmem:[#allocation10 + $0x140] sm:$0xff] }
  0x3a   :  { %4167 = vmatmul.msk.bf16.gmra.mxu0 %vm224_vm2, %v4863_v22  ;;  %4171 = vmatmul.msk.bf16.gmra.mxu1 %vm224_vm2, %v4863_v22  ;;  %v817_v22 = vld [vmem:[#allocation10 + $0x138] sm:$0xff] }
  0x3d   :  { %391 = vperm.xlu2 %4968, %v349_v23  }
  0x3e   :  { %386 = vperm.xlu1 %4967, %v348_v24   ;;  %381 = vperm.xlu0 %4966, %v347_v25   ;;  %v822_v25 = vld [vmem:[#allocation10 + $0x160] sm:$0xff] }
  0x45   :  { %406 = vperm.xlu2 %4968, %v352_v26   ;;  %v821_v26 = vld [vmem:[#allocation10 + $0x158] sm:$0xff] }
  0x46   :  { %401 = vperm.xlu1 %4967, %v351_v27   ;;  %396 = vperm.xlu0 %4966, %v350_v28   ;;  %v820_v28 = vld [vmem:[#allocation10 + $0x150] sm:$0xff] }
  0x4a   :  { %4168 = vmatmul.msk.bf16.gmra.mxu0 %vm224_vm2, %v4864_v29  ;;  %4172 = vmatmul.msk.bf16.gmra.mxu1 %vm224_vm2, %v4864_v29 }
  0x4d   :  { %421 = vperm.xlu2 %4968, %v355_v30  }
  0x4e   :  { %416 = vperm.xlu1 %4967, %v354_v31   ;;  %411 = vperm.xlu0 %4966, %v353_v32   ;;  %v825_v32 = vld [vmem:[#allocation10 + $0x178] sm:$0xff] }
  0x55   :  { %436 = vperm.xlu2 %4968, %v358_v33   ;;  %v824_v33 = vld [vmem:[#allocation10 + $0x170] sm:$0xff] }
  0x56   :  { %431 = vperm.xlu1 %4967, %v357_v34   ;;  %426 = vperm.xlu0 %4966, %v356_v35   ;;  %v823_v34 = vld [vmem:[#allocation10 + $0x168] sm:$0xff] }
  0x5a   :  { %4169 = vmatmul.msk.bf16.gmra.mxu0 %vm224_vm2, %v4865_v36  ;;  %4173 = vmatmul.msk.bf16.gmra.mxu1 %vm224_vm2, %v4865_v36 }
  0x5d   :  { %918 = vperm.xlu2 %4968, %v780_v37  }
  0x5e   :  { %913 = vperm.xlu1 %4967, %v779_v38   ;;  %908 = vperm.xlu0 %4966, %v778_v39  }
  0x65   :  { %933 = vperm.xlu2 %4968, %v783_v40   ;;  %v828_v40 = vld [vmem:[#allocation10 + $0x190] sm:$0xff] }
  0x66   :  { %928 = vperm.xlu1 %4967, %v782_v41   ;;  %923 = vperm.xlu0 %4966, %v781_v42   ;;  %v827_v41 = vld [vmem:[#allocation10 + $0x188] sm:$0xff]  ;;  %v826_v42 = vld [vmem:[#allocation10 + $0x180] sm:$0xff] }
  0x6d   :  { %948 = vperm.xlu2 %4968, %v786_v43  }
  0x6e   :  { %943 = vperm.xlu1 %4967, %v785_v44   ;;  %938 = vperm.xlu0 %4966, %v784_v45  }
  0x75   :  { %963 = vperm.xlu2 %4968, %v789_v46  }
  0x76   :  { %958 = vperm.xlu1 %4967, %v788_v47   ;;  %953 = vperm.xlu0 %4966, %v787_v48  }
  0x77   :  { %v183_v36 = vpop.permute.xlu2 %182 }
  0x7d   :  { %978 = vperm.xlu2 %4968, %v792_v49  }
  0x7e   :  { %973 = vperm.xlu1 %4967, %v791_v50   ;;  %968 = vperm.xlu0 %4966, %v790_v51  }
  0x7f   :  { %v188_v44 = vpop.permute.xlu2 %187 }
  0x85   :  { %993 = vperm.xlu2 %4968, %v795_v52  }
  0x86   :  { %988 = vperm.xlu1 %4967, %v794_v53   ;;  %983 = vperm.xlu0 %4966, %v793_v54   ;;  %v831_v54 = vld [vmem:[#allocation10 + $0x1a8] sm:$0xff] }
  0x8d   :  { %1008 = vperm.xlu2 %4968, %v798_v55   ;;  %v830_v55 = vld [vmem:[#allocation10 + $0x1a0] sm:$0xff] }
  0x8e   :  { %1003 = vperm.xlu1 %4967, %v797_v56   ;;  %998 = vperm.xlu0 %4966, %v796_v57  }
  0x90   :  { %v5223_v27 = vpop.permute.xlu0 %162  ;;  %v173_v29 = vpop.permute.xlu1 %172 }
  0x95   :  { %1023 = vperm.xlu2 %4968, %v801_v58   ;;  %v829_v58 = vld [vmem:[#allocation10 + $0x198] sm:$0xff] }
  0x96   :  { %1018 = vperm.xlu1 %4967, %v800_v59   ;;  %1013 = vperm.xlu0 %4966, %v799_v60  }
  0x98   :  { %v168_v35 = vpop.permute.xlu0 %167  ;;  %v178_v37 = vpop.permute.xlu1 %177 }
  0x9d   :  { %1038 = vperm.xlu2 %4968, %v804_v61  }
  0x9e   :  { %1033 = vperm.xlu1 %4967, %v803_v62   ;;  %1028 = vperm.xlu0 %4966, %v802_v63  }
  0xa0   :  { %v193_v43 = vpop.permute.xlu0 %192  ;;  %v198_v45 = vpop.permute.xlu1 %197 }
  0xa5   :  { %1053 = vperm.xlu2 %4968, %v807_v0  }
  0xa6   :  { %1048 = vperm.xlu1 %4967, %v806_v1   ;;  %1043 = vperm.xlu0 %4966, %v805_v2  }
  0xa7   :  { %v5211_v3 = vpop.f32.mrf.mxu0  ;;  %v5213_v4 = vpop.f32.mrf.mxu1 }
  0xad   :  { %1068 = vperm.xlu2 %4968, %v810_v5  }
  0xae   :  { %1063 = vperm.xlu1 %4967, %v809_v6   ;;  %1058 = vperm.xlu0 %4966, %v808_v7  }
  0xaf   :  { %v5215_v8 = vpop.f32.mrf.mxu0  ;;  %v5217_v9 = vpop.f32.mrf.mxu1 }
  0xb5   :  { %1083 = vperm.xlu2 %4968, %v813_v10  }
  0xb6   :  { %1078 = vperm.xlu1 %4967, %v812_v11   ;;  %1073 = vperm.xlu0 %4966, %v811_v12  }
  0xb7   :  { %v5219_v13 = vpop.f32.mrf.mxu0  ;;  %v5221_v14 = vpop.f32.mrf.mxu1 }
  0xb8   :  { %v260_v7 = vadd.f32 %v5219_v13, %v173_v29  ;;  %v289_v10 = vadd.f32 %v5221_v14, %v173_v29  ;;  %v255_v13 = vadd.f32 %v5211_v3, %v5223_v27  ;;  %v284_v14 = vadd.f32 %v5213_v4, %v5223_v27  ;;  %v835_v4 = vld [vmem:[#allocation10 + $0x1c8] sm:$0xff]  ;;  %v4866_v27 = vld [vmem:[#allocation6] sm:$0xff] }
  0xba   :  { %v303_v29 = vmax.f32 %v255_v13, 0.0 }
  0xbd   :  { %1098 = vperm.xlu2 %4968, %v816_v15   ;;  %v257_v15 = vadd.f32 %v5215_v8, %v168_v35 }
  0xbe   :  { %1093 = vperm.xlu1 %4967, %v815_v16   ;;  %1088 = vperm.xlu0 %4966, %v814_v17   ;;  %v286_v16 = vadd.f32 %v5217_v9, %v168_v35  ;;  %v839_v35 = vld [vmem:[#allocation10 + $0x1e8] sm:$0xff] }
  0xbf   :  { %v261_v18 = vpop.f32.mrf.mxu0  ;;  %v290_v19 = vpop.f32.mrf.mxu1  ;;  %v305_v8 = vmax.f32 %v257_v15, 0.0  ;;  %v866_v15 = vld [vmem:[#allocation10 + $0x2c0] sm:$0xff] }
  0xc0   :  { %v262_v63 = vadd.f32 %v261_v18, %v178_v37  ;;  %v291_v0 = vadd.f32 %v290_v19, %v178_v37  ;;  %v306_v9 = vmax.f32 %v286_v16, 0.0  ;;  %v843_v37 = vld [vmem:[#allocation10 + $0x208] sm:$0xff] }
  0xc2   :  { %v309_v17 = vmax.f32 %v262_v63, 0.0  ;;  %v310_v18 = vmax.f32 %v291_v0, 0.0  ;;  %v859_v63 = vld [vmem:[#allocation10 + $0x288] sm:$0xff]  ;;  %v4870_v0 = vld [vmem:[#allocation6 + $0x20] sm:$0xff] }
  0xc5   :  { %1113 = vperm.xlu2 %4968, %v819_v20  }
  0xc6   :  { %1108 = vperm.xlu1 %4967, %v818_v21   ;;  %1103 = vperm.xlu0 %4966, %v817_v22   ;;  %v834_v21 = vld [vmem:[#allocation10 + $0x1c0] sm:$0xff]  ;;  %v833_v22 = vld [vmem:[#allocation10 + $0x1b8] sm:$0xff] }
  0xc7   :  { %v264_v23 = vpop.f32.mrf.mxu0  ;;  %v293_v24 = vpop.f32.mrf.mxu1 }
  0xc8   :  { %v265_v56 = vadd.f32 %v264_v23, %v183_v36  ;;  %v294_v57 = vadd.f32 %v293_v24, %v183_v36  ;;  %v832_v23 = vld [vmem:[#allocation10 + $0x1b0] sm:$0xff]  ;;  %v307_v24 = vmax.f32 %v260_v7, 0.0  ;;  %v838_v36 = vld [vmem:[#allocation10 + $0x1e0] sm:$0xff] }
  0xc9   :  { %v862_v7 = vld [vmem:[#allocation10 + $0x2a0] sm:$0xff] }
  0xca   :  { %v311_v11 = vmax.f32 %v265_v56, 0.0  ;;  %v312_v12 = vmax.f32 %v294_v57, 0.0  ;;  %v857_v56 = vld [vmem:[#allocation10 + $0x278] sm:$0xff]  ;;  %v856_v57 = vld [vmem:[#allocation10 + $0x270] sm:$0xff] }
  0xcd   :  { %1128 = vperm.xlu2 %4968, %v822_v25   ;;  %v308_v25 = vmax.f32 %v289_v10, 0.0 }
  0xce   :  { %1123 = vperm.xlu1 %4967, %v821_v26   ;;  %1118 = vperm.xlu0 %4966, %v820_v28   ;;  %v337_v26 = vpack.c.bf16 %v309_v17, %v307_v24  ;;  %v865_v17 = vld [vmem:[#allocation10 + $0x2b8] sm:$0xff] }
  0xcf   :  { %v266_v30 = vpop.f32.mrf.mxu0  ;;  %v295_v31 = vpop.f32.mrf.mxu1  ;;  %v338_v28 = vpack.c.bf16 %v310_v18, %v308_v25  ;;  %v4871_v18 = vld [vmem:[#allocation6 + $0x28] sm:$0xff]  ;;  %v873_v24 = vld [vmem:[#allocation10 + $0x2f8] sm:$0xff]  ;;  %v872_v25 = vld [vmem:[#allocation10 + $0x2f0] sm:$0xff] }
  0xd0   :  { %v267_v50 = vadd.f32 %v266_v30, %v188_v44  ;;  %v296_v51 = vadd.f32 %v295_v31, %v188_v44  ;;  %v304_v30 = vmax.f32 %v284_v14, 0.0  ;;  %v335_v31 = vpack.c.bf16 %v305_v8, %v303_v29  ;;  %v849_v44 = vld [vmem:[#allocation10 + $0x238] sm:$0xff]  ;;  %v871_v8 = vld [vmem:[#allocation10 + $0x2e8] sm:$0xff]  ;;  %v876_v29 = vld [vmem:[#allocation10 + $0x310] sm:$0xff] }
  0xd2   :  { %v313_v1 = vmax.f32 %v267_v50, 0.0  ;;  %v314_v2 = vmax.f32 %v296_v51, 0.0  ;;  %v336_v3 = vpack.c.bf16 %v306_v9, %v304_v30  ;;  %v850_v50 = vld [vmem:[#allocation10 + $0x240] sm:$0xff]  ;;  %v855_v51 = vld [vmem:[#allocation10 + $0x268] sm:$0xff]  ;;  %v4872_v9 = vld [vmem:[#allocation6 + $0x30] sm:$0xff] }
  0xd3   :  { %v875_v30 = vld [vmem:[#allocation10 + $0x308] sm:$0xff] }
  0xd4   :  { %v339_v19 = vpack.c.bf16 %v313_v1, %v311_v11  ;;  %v340_v20 = vpack.c.bf16 %v314_v2, %v312_v12  ;;  %v867_v12 = vld [vmem:[#allocation10 + $0x2c8] sm:$0xff] }
  0xd5   :  { %1143 = vperm.xlu2 %4968, %v825_v32   ;;  %v837_v32 = vld [vmem:[#allocation10 + $0x1d8] sm:$0xff] }
  0xd6   :  { %1138 = vperm.xlu1 %4967, %v824_v33   ;;  %1133 = vperm.xlu0 %4966, %v823_v34   ;;  %v836_v33 = vld [vmem:[#allocation10 + $0x1d0] sm:$0xff] }
  0xd7   :  { %v269_v38 = vpop.f32.mrf.mxu0  ;;  %v298_v39 = vpop.f32.mrf.mxu1  ;;  %v840_v34 = vld [vmem:[#allocation10 + $0x1f0] sm:$0xff] }
  0xd8   :  { %v270_v46 = vadd.f32 %v269_v38, %v193_v43  ;;  %v299_v47 = vadd.f32 %v298_v39, %v193_v43  ;;  %v842_v38 = vld [vmem:[#allocation10 + $0x200] sm:$0xff]  ;;  %v841_v39 = vld [vmem:[#allocation10 + $0x1f8] sm:$0xff]  ;;  %v844_v43 = vld [vmem:[#allocation10 + $0x210] sm:$0xff] }
  0xda   :  { %v315_v59 = vmax.f32 %v270_v46, 0.0  ;;  %v316_v60 = vmax.f32 %v299_v47, 0.0  ;;  %v847_v46 = vld [vmem:[#allocation10 + $0x228] sm:$0xff]  ;;  %v4868_v47 = vld [vmem:[#allocation6 + $0x10] sm:$0xff] }
  0xdd   :  { %1158 = vperm.xlu2 %4968, %v828_v40   ;;  %v4867_v40 = vld [vmem:[#allocation6 + $0x8] sm:$0xff] }
  0xde   :  { %1153 = vperm.xlu1 %4967, %v827_v41   ;;  %1148 = vperm.xlu0 %4966, %v826_v42   ;;  %v846_v41 = vld [vmem:[#allocation10 + $0x220] sm:$0xff]  ;;  %v845_v42 = vld [vmem:[#allocation10 + $0x218] sm:$0xff] }
  0xdf   :  { %v271_v48 = vpop.f32.mrf.mxu0  ;;  %v300_v49 = vpop.f32.mrf.mxu1 }
  0xe0   :  { %v272_v52 = vadd.f32 %v271_v48, %v198_v45  ;;  %v301_v53 = vadd.f32 %v300_v49, %v198_v45  ;;  %v848_v45 = vld [vmem:[#allocation10 + $0x230] sm:$0xff]  ;;  %v851_v49 = vld [vmem:[#allocation10 + $0x248] sm:$0xff] }
  0xe1   :  { %v852_v48 = vld [vmem:[#allocation10 + $0x250] sm:$0xff] }
  0xe2   :  { %v317_v61 = vmax.f32 %v272_v52, 0.0  ;;  %v318_v62 = vmax.f32 %v301_v53, 0.0  ;;  %v854_v52 = vld [vmem:[#allocation10 + $0x260] sm:$0xff]  ;;  %v853_v53 = vld [vmem:[#allocation10 + $0x258] sm:$0xff] }
  0xe4   :  { %v341_v5 = vpack.c.bf16 %v317_v61, %v315_v59  ;;  %v342_v6 = vpack.c.bf16 %v318_v62, %v316_v60  ;;  %v5243_v59 = vpop.permute.xlu0 %366  ;;  %v861_v60 = vld [vmem:[#allocation10 + $0x298] sm:$0xff]  ;;  %v860_v61 = vld [vmem:[#allocation10 + $0x290] sm:$0xff]  ;;  %v5245_v62 = vpop.permute.xlu1 %371 }
  0xe5   :  { %1173 = vperm.xlu2 %4968, %v831_v54   ;;  %v4869_v54 = vld [vmem:[#allocation6 + $0x18] sm:$0xff] }
  0xe6   :  { %1168 = vperm.xlu1 %4967, %v830_v55   ;;  %1163 = vperm.xlu0 %4966, %v829_v58   ;;  %v858_v55 = vld [vmem:[#allocation10 + $0x280] sm:$0xff]  ;;  %v5241_v58 = vpop.permute.xlu2 %361 }
  0xe7   :  { %508 = vmatpush.bf16.msra.mxu2 %v341_v5  ;;  %557 = vmatpush.bf16.msra.mxu3 %v342_v6  ;;  %v864_v5 = vld [vmem:[#allocation10 + $0x2b0] sm:$0xff]  ;;  %v863_v6 = vld [vmem:[#allocation10 + $0x2a8] sm:$0xff] }
  0xeb   :  { %509 = vmatpush.bf16.msra.mxu2 %v339_v19  ;;  %558 = vmatpush.bf16.msra.mxu3 %v340_v20  ;;  %v870_v20 = vld [vmem:[#allocation10 + $0x2e0] sm:$0xff] }
  0xec   :  { %v5251_v2 = vpop.permute.xlu0 %381  ;;  %v5253_v10 = vpop.permute.xlu1 %386 }
  0xed   :  { %1188 = vperm.xlu2 %4968, %v834_v21   ;;  %v869_v21 = vld [vmem:[#allocation10 + $0x2d8] sm:$0xff] }
  0xee   :  { %1183 = vperm.xlu1 %4967, %v833_v22   ;;  %1178 = vperm.xlu0 %4966, %v832_v23   ;;  %v5247_v1 = vpop.permute.xlu2 %376  ;;  %v868_v23 = vld [vmem:[#allocation10 + $0x2d0] sm:$0xff] }
  0xef   :  { %510 = vmatpush.bf16.msra.mxu2 %v337_v26  ;;  %559 = vmatpush.bf16.msra.mxu3 %v338_v28 }
  0xf3   :  { %511 = vmatpush.bf16.msra.mxu2 %v335_v31  ;;  %560 = vmatpush.bf16.msra.mxu3 %v336_v3  ;;  %v874_v3 = vld [vmem:[#allocation10 + $0x300] sm:$0xff] }
  0xf4   :  { %v5257_v16 = vpop.permute.xlu0 %396  ;;  %v5259_v19 = vpop.permute.xlu1 %401 }
  0xf5   :  { %1203 = vperm.xlu2 %4968, %v837_v32  }
  0xf6   :  { %1198 = vperm.xlu1 %4967, %v836_v33   ;;  %1193 = vperm.xlu0 %4966, %v835_v4   ;;  %v5255_v11 = vpop.permute.xlu2 %391  ;;  %v879_v4 = vld [vmem:[#allocation10 + $0x328] sm:$0xff] }
  0xf7   :  { %4206 = vmatmul.msk.bf16.vlgmr.msra.gmra.mxu2 %vm479_vm3, %v4866_v27  ;;  %4214 = vmatmul.msk.bf16.vlgmr.msra.gmra.mxu3 %vm479_vm3, %v4866_v27  ;;  %v878_v27 = vld [vmem:[#allocation10 + $0x320] sm:$0xff] }
  0xfc   :  { %v5265_v13 = vpop.permute.xlu0 %411  ;;  %v5267_v14 = vpop.permute.xlu1 %416 }
  0xfd   :  { %1218 = vperm.xlu2 %4968, %v840_v34   ;;  %v877_v34 = vld [vmem:[#allocation10 + $0x318] sm:$0xff] }
  0xfe   :  { %1213 = vperm.xlu1 %4967, %v839_v35   ;;  %1208 = vperm.xlu0 %4966, %v838_v36   ;;  %v5263_v22 = vpop.permute.xlu2 %406  ;;  %v4873_v35 = vld [vmem:[#allocation6 + $0x38] sm:$0xff] }
 0x104   :  { %v5271_v28 = vpop.permute.xlu0 %426  ;;  %v5275_v31 = vpop.permute.xlu1 %431 }
 0x105   :  { %1233 = vperm.xlu2 %4968, %v843_v37  }
 0x106   :  { %1228 = vperm.xlu1 %4967, %v842_v38   ;;  %1223 = vperm.xlu0 %4966, %v841_v39   ;;  %v5269_v26 = vpop.permute.xlu2 %421  ;;  %v882_v38 = vld [vmem:[#allocation10 + $0x340] sm:$0xff]  ;;  %v881_v39 = vld [vmem:[#allocation10 + $0x338] sm:$0xff] }
 0x107   :  { %4207 = vmatmul.msk.bf16.gmra.mxu2 %vm479_vm3, %v4867_v40  ;;  %4215 = vmatmul.msk.bf16.gmra.mxu3 %vm479_vm3, %v4867_v40 }
 0x10c   :  { %v5279_v33 = vpop.permute.xlu0 %908  ;;  %v5281_v36 = vpop.permute.xlu1 %913 }
 0x10d   :  { %1248 = vperm.xlu2 %4968, %v846_v41   ;;  %v880_v41 = vld [vmem:[#allocation10 + $0x330] sm:$0xff] }
 0x10e   :  { %1243 = vperm.xlu1 %4967, %v845_v42   ;;  %1238 = vperm.xlu0 %4966, %v844_v43   ;;  %v5277_v32 = vpop.permute.xlu2 %436  ;;  %v885_v43 = vld [vmem:[#allocation10 + $0x358] sm:$0xff] }
 0x114   :  { %v5287_v40 = vpop.permute.xlu0 %923  ;;  %v5289_v42 = vpop.permute.xlu1 %928 }
 0x115   :  { %1263 = vperm.xlu2 %4968, %v849_v44   ;;  %7392 = vst [vmem:[#allocation16_spill] sm:$0xff] %v5287_v40  ;;  %v884_v44 = vld [vmem:[#allocation10 + $0x350] sm:$0xff] }
 0x116   :  { %1258 = vperm.xlu1 %4967, %v848_v45   ;;  %1253 = vperm.xlu0 %4966, %v847_v46   ;;  %v5285_v37 = vpop.permute.xlu2 %918  ;;  %7393 = vst [vmem:[#allocation17_spill] sm:$0xff] %v5289_v42  ;;  %v883_v46 = vld [vmem:[#allocation10 + $0x348] sm:$0xff] }
 0x117   :  { %4208 = vmatmul.msk.bf16.gmra.mxu2 %vm479_vm3, %v4868_v47  ;;  %4216 = vmatmul.msk.bf16.gmra.mxu3 %vm479_vm3, %v4868_v47 }
 0x11c   :  { %v5293_v47 = vpop.permute.xlu0 %938 }
 0x11d   :  { %1278 = vperm.xlu2 %4968, %v852_v48   ;;  %7395 = vst [vmem:[#allocation19_spill] sm:$0xff] %v5293_v47  ;;  %v5295_v48 = vpop.permute.xlu1 %943 }
 0x11e   :  { %1273 = vperm.xlu1 %4967, %v851_v49   ;;  %1268 = vperm.xlu0 %4966, %v850_v50   ;;  %v5291_v45 = vpop.permute.xlu2 %933  ;;  %7396 = vst [vmem:[#allocation20_spill] sm:$0xff] %v5295_v48 }
 0x11f   :  { %7394 = vst [vmem:[#allocation18_spill] sm:$0xff] %v5291_v45 }
 0x125   :  { %1293 = vperm.xlu2 %4968, %v855_v51   ;;  %v888_v51 = vld [vmem:[#allocation10 + $0x370] sm:$0xff] }
 0x126   :  { %1288 = vperm.xlu1 %4967, %v854_v52   ;;  %1283 = vperm.xlu0 %4966, %v853_v53   ;;  %v887_v52 = vld [vmem:[#allocation10 + $0x368] sm:$0xff]  ;;  %v886_v53 = vld [vmem:[#allocation10 + $0x360] sm:$0xff] }
 0x127   :  { %4209 = vmatmul.msk.bf16.gmra.mxu2 %vm479_vm3, %v4869_v54  ;;  %4217 = vmatmul.msk.bf16.gmra.mxu3 %vm479_vm3, %v4869_v54  ;;  %v5301_v54 = vpop.permute.xlu2 %948 }
 0x128   :  { %7397 = vst [vmem:[#allocation21_spill] sm:$0xff] %v5301_v54 }
 0x12d   :  { %1308 = vperm.xlu2 %4968, %v858_v55   ;;  %v5303_v55 = vpop.permute.xlu0 %953 }
 0x12e   :  { %1303 = vperm.xlu1 %4967, %v857_v56   ;;  %1298 = vperm.xlu0 %4966, %v856_v57   ;;  %7398 = vst [vmem:[#allocation22_spill] sm:$0xff] %v5303_v55 }
 0x135   :  { %1323 = vperm.xlu2 %4968, %v861_v60   ;;  %v891_v60 = vld [vmem:[#allocation10 + $0x388] sm:$0xff] }
 0x136   :  { %1318 = vperm.xlu1 %4967, %v860_v61   ;;  %1313 = vperm.xlu0 %4966, %v859_v63   ;;  %v890_v61 = vld [vmem:[#allocation10 + $0x380] sm:$0xff]  ;;  %v5309_v63 = vpop.permute.xlu1 %958 }
 0x137   :  { %4210 = vmatmul.msk.bf16.gmra.mxu2 %vm479_vm3, %v4870_v0  ;;  %4218 = vmatmul.msk.bf16.gmra.mxu3 %vm479_vm3, %v4870_v0  ;;  %7399 = vst [vmem:[#allocation23_spill] sm:$0xff] %v5309_v63  ;;  %v889_v0 = vld [vmem:[#allocation10 + $0x378] sm:$0xff] }
 0x13d   :  { %1338 = vperm.xlu2 %4968, %v864_v5   ;;  %v5311_v5 = vpop.permute.xlu2 %963 }
 0x13e   :  { %1333 = vperm.xlu1 %4967, %v863_v6   ;;  %1328 = vperm.xlu0 %4966, %v862_v7   ;;  %7400 = vst [vmem:[#allocation24_spill] sm:$0xff] %v5311_v5  ;;  %v5313_v6 = vpop.permute.xlu0 %968 }
 0x13f   :  { %7401 = vst [vmem:[#allocation25_spill] sm:$0xff] %v5313_v6 }
 0x145   :  { %1353 = vperm.xlu2 %4968, %v867_v12  }
 0x146   :  { %1348 = vperm.xlu1 %4967, %v866_v15   ;;  %1343 = vperm.xlu0 %4966, %v865_v17   ;;  %v894_v15 = vld [vmem:[#allocation10 + $0x3a0] sm:$0xff]  ;;  %v893_v17 = vld [vmem:[#allocation10 + $0x398] sm:$0xff] }
 0x147   :  { %4211 = vmatmul.msk.bf16.gmra.mxu2 %vm479_vm3, %v4871_v18  ;;  %4219 = vmatmul.msk.bf16.gmra.mxu3 %vm479_vm3, %v4871_v18  ;;  %v892_v18 = vld [vmem:[#allocation10 + $0x390] sm:$0xff] }
 0x14d   :  { %1368 = vperm.xlu2 %4968, %v870_v20   ;;  %v5319_v20 = vpop.permute.xlu1 %973 }
 0x14e   :  { %1363 = vperm.xlu1 %4967, %v869_v21   ;;  %1358 = vperm.xlu0 %4966, %v868_v23   ;;  %7402 = vst [vmem:[#allocation26_spill] sm:$0xff] %v5319_v20  ;;  %v5321_v21 = vpop.permute.xlu2 %978 }
 0x14f   :  { %7403 = vst [vmem:[#allocation27_spill] sm:$0xff] %v5321_v21 }
 0x155   :  { %1383 = vperm.xlu2 %4968, %v873_v24  }
 0x156   :  { %1378 = vperm.xlu1 %4967, %v872_v25   ;;  %1373 = vperm.xlu0 %4966, %v871_v8   ;;  %v897_v25 = vld [vmem:[#allocation10 + $0x3b8] sm:$0xff]  ;;  %v896_v8 = vld [vmem:[#allocation10 + $0x3b0] sm:$0xff] }
 0x157   :  { %4212 = vmatmul.msk.bf16.gmra.mxu2 %vm479_vm3, %v4872_v9  ;;  %4220 = vmatmul.msk.bf16.gmra.mxu3 %vm479_vm3, %v4872_v9  ;;  %v5327_v9 = vpop.permute.xlu0 %983 }
 0x158   :  { %7404 = vst [vmem:[#allocation28_spill] sm:$0xff] %v5327_v9 }
 0x15d   :  { %1398 = vperm.xlu2 %4968, %v876_v29   ;;  %v895_v29 = vld [vmem:[#allocation10 + $0x3a8] sm:$0xff] }
 0x15e   :  { %1393 = vperm.xlu1 %4967, %v875_v30   ;;  %1388 = vperm.xlu0 %4966, %v874_v3   ;;  %v5329_v30 = vpop.permute.xlu1 %988 }
 0x15f   :  { %7405 = vst [vmem:[#allocation29_spill] sm:$0xff] %v5329_v30 }
 0x165   :  { %1413 = vperm.xlu2 %4968, %v879_v4  }
 0x166   :  { %1408 = vperm.xlu1 %4967, %v878_v27   ;;  %1403 = vperm.xlu0 %4966, %v877_v34   ;;  %v900_v27 = vld [vmem:[#allocation10 + $0x3d0] sm:$0xff]  ;;  %v899_v34 = vld [vmem:[#allocation10 + $0x3c8] sm:$0xff] }
 0x167   :  { %4213 = vmatmul.msk.bf16.gmra.mxu2 %vm479_vm3, %v4873_v35  ;;  %4221 = vmatmul.msk.bf16.gmra.mxu3 %vm479_vm3, %v4873_v35  ;;  %v5335_v35 = vpop.permute.xlu2 %993 }
 0x168   :  { %7406 = vst [vmem:[#allocation30_spill] sm:$0xff] %v5335_v35 }
 0x16d   :  { %1428 = vperm.xlu2 %4968, %v882_v38   ;;  %v898_v38 = vld [vmem:[#allocation10 + $0x3c0] sm:$0xff] }
 0x16e   :  { %1423 = vperm.xlu1 %4967, %v881_v39   ;;  %1418 = vperm.xlu0 %4966, %v880_v41   ;;  %v5337_v39 = vpop.permute.xlu0 %998  ;;  %v5339_v41 = vpop.permute.xlu1 %1003 }
 0x16f   :  { %7407 = vst [vmem:[#allocation31_spill] sm:$0xff] %v5337_v39 }
 0x170   :  { %7408 = vst [vmem:[#allocation32_spill] sm:$0xff] %v5339_v41 }
 0x175   :  { %1443 = vperm.xlu2 %4968, %v885_v43  }
 0x176   :  { %1438 = vperm.xlu1 %4967, %v884_v44   ;;  %1433 = vperm.xlu0 %4966, %v883_v46   ;;  %v903_v46 = vld [vmem:[#allocation10 + $0x3e8] sm:$0xff] }
 0x17a   :  { %v5297_v49 = vpop.f32.mrf.mxu2  ;;  %v5299_v50 = vpop.f32.mrf.mxu3 }
 0x17d   :  { %1458 = vperm.xlu2 %4968, %v888_v51   ;;  %v902_v51 = vld [vmem:[#allocation10 + $0x3e0] sm:$0xff] }
 0x17e   :  { %1453 = vperm.xlu1 %4967, %v887_v52   ;;  %1448 = vperm.xlu0 %4966, %v886_v53   ;;  %v901_v52 = vld [vmem:[#allocation10 + $0x3d8] sm:$0xff]  ;;  %v5345_v53 = vpop.permute.xlu2 %1008 }
 0x17f   :  { %7409 = vst [vmem:[#allocation33_spill] sm:$0xff] %v5345_v53 }
 0x182   :  { %v5305_v56 = vpop.f32.mrf.mxu2  ;;  %v5307_v57 = vpop.f32.mrf.mxu3 }
 0x185   :  { %1473 = vperm.xlu2 %4968, %v891_v60   ;;  %v5347_v60 = vpop.permute.xlu0 %1013 }
 0x186   :  { %1468 = vperm.xlu1 %4967, %v890_v61   ;;  %1463 = vperm.xlu0 %4966, %v889_v0   ;;  %7410 = vst [vmem:[#allocation34_spill] sm:$0xff] %v5347_v60 }
 0x18a   :  { %v5315_v7 = vpop.f32.mrf.mxu2  ;;  %v5317_v12 = vpop.f32.mrf.mxu3 }
 0x18d   :  { %1488 = vperm.xlu2 %4968, %v894_v15   ;;  %v905_v15 = vld [vmem:[#allocation10 + $0x3f8] sm:$0xff] }
 0x18e   :  { %1483 = vperm.xlu1 %4967, %v893_v17   ;;  %1478 = vperm.xlu0 %4966, %v892_v18   ;;  %v5353_v17 = vpop.permute.xlu1 %1018  ;;  %v904_v18 = vld [vmem:[#allocation10 + $0x3f0] sm:$0xff] }
 0x18f   :  { %7411 = vst [vmem:[#allocation35_spill] sm:$0xff] %v5353_v17 }
 0x192   :  { %v5323_v23 = vpop.f32.mrf.mxu2  ;;  %v5325_v24 = vpop.f32.mrf.mxu3 }
 0x195   :  { %1503 = vperm.xlu2 %4968, %v897_v25   ;;  %v5355_v25 = vpop.permute.xlu2 %1023 }
 0x196   :  { %1498 = vperm.xlu1 %4967, %v896_v8   ;;  %1493 = vperm.xlu0 %4966, %v895_v29   ;;  %7412 = vst [vmem:[#allocation36_spill] sm:$0xff] %v5355_v25  ;;  %v5357_v8 = vpop.permute.xlu0 %1028 }
 0x197   :  { %7413 = vst [vmem:[#allocation37_spill] sm:$0xff] %v5357_v8 }
 0x19a   :  { %v5331_v3 = vpop.f32.mrf.mxu2  ;;  %v5333_v4 = vpop.f32.mrf.mxu3 }
 0x19d   :  { %1518 = vperm.xlu2 %4968, %v900_v27  }
 0x19e   :  { %1513 = vperm.xlu1 %4967, %v899_v34   ;;  %1508 = vperm.xlu0 %4966, %v898_v38   ;;  %v5363_v34 = vpop.permute.xlu1 %1033  ;;  %v5365_v38 = vpop.permute.xlu2 %1038 }
 0x19f   :  { %7414 = vst [vmem:[#allocation38_spill] sm:$0xff] %v5363_v34 }
 0x1a0   :  { %7415 = vst [vmem:[#allocation39_spill] sm:$0xff] %v5365_v38 }
 0x1a2   :  { %v5341_v43 = vpop.f32.mrf.mxu2  ;;  %v5343_v44 = vpop.f32.mrf.mxu3 }
 0x1a5   :  { %1533 = vperm.xlu2 %4968, %v903_v46  }
 0x1a6   :  { %1528 = vperm.xlu1 %4967, %v902_v51   ;;  %1523 = vperm.xlu0 %4966, %v901_v52   ;;  %v5371_v52 = vpop.permute.xlu0 %1043  ;;  %v5375_v17 = vpop.permute.xlu2 %1053 }
 0x1a7   :  { %7416 = vst [vmem:[#allocation40_spill] sm:$0xff] %v5371_v52 }
 0x1a8   :  { %7418 = vst [vmem:[#allocation42_spill] sm:$0xff] %v5375_v17 }
 0x1aa   :  { %v5349_v61 = vpop.f32.mrf.mxu2  ;;  %v5351_v0 = vpop.f32.mrf.mxu3 }
 0x1ae   :  { %1543 = vperm.xlu1 %4967, %v905_v15   ;;  %1538 = vperm.xlu0 %4966, %v904_v18   ;;  %v5373_v15 = vpop.permute.xlu1 %1048  ;;  %v5377_v8 = vpop.permute.xlu0 %1058 }
 0x1af   :  { %7417 = vst [vmem:[#allocation41_spill] sm:$0xff] %v5373_v15  ;;  %v5381_v41 = vpop.permute.xlu2 %1068 }
 0x1b0   :  { %7419 = vst [vmem:[#allocation43_spill] sm:$0xff] %v5377_v8 }
 0x1b1   :  { %7421 = vst [vmem:[#allocation45_spill] sm:$0xff] %v5381_v41 }
 0x1b2   :  { %v5359_v29 = vpop.f32.mrf.mxu2  ;;  %v5361_v27 = vpop.f32.mrf.mxu3 }
 0x1b6   :  { %v5379_v60 = vpop.permute.xlu1 %1063  ;;  %v5383_v38 = vpop.permute.xlu0 %1073 }
 0x1b7   :  { %7420 = vst [vmem:[#allocation44_spill] sm:$0xff] %v5379_v60  ;;  %v5387_v52 = vpop.permute.xlu2 %1083 }
 0x1b8   :  { %7422 = vst [vmem:[#allocation46_spill] sm:$0xff] %v5383_v38 }
 0x1b9   :  { %7424 = vst [vmem:[#allocation48_spill] sm:$0xff] %v5387_v52 }
 0x1ba   :  { %v5367_v46 = vpop.f32.mrf.mxu2  ;;  %v5369_v51 = vpop.f32.mrf.mxu3 }
 0x1be   :  { %v5385_v30 = vpop.permute.xlu1 %1078  ;;  %v5389_v15 = vpop.permute.xlu0 %1088 }
 0x1bf   :  { %7423 = vst [vmem:[#allocation47_spill] sm:$0xff] %v5385_v30  ;;  %v5393_v8 = vpop.permute.xlu2 %1098 }
 0x1c0   :  { %7425 = vst [vmem:[#allocation49_spill] sm:$0xff] %v5389_v15 }
 0x1c1   :  { %7427 = vst [vmem:[#allocation51_spill] sm:$0xff] %v5393_v8 }
 0x1c2   :  { %v535_v18 = vpop.f32.mrf.mxu2  ;;  %v584_v25 = vpop.f32.mrf.mxu3 }
 0x1c6   :  { %v5391_v21 = vpop.permute.xlu1 %1093  ;;  %v5395_v6 = vpop.permute.xlu0 %1103 }
 0x1c7   :  { %7426 = vst [vmem:[#allocation50_spill] sm:$0xff] %v5391_v21  ;;  %v5399_v63 = vpop.permute.xlu2 %1113 }
 0x1c8   :  { %7428 = vst [vmem:[#allocation52_spill] sm:$0xff] %v5395_v6 }
 0x1c9   :  { %7430 = vst [vmem:[#allocation54_spill] sm:$0xff] %v5399_v63 }
 0x1ca   :  { %v538_v53 = vpop.f32.mrf.mxu2  ;;  %v587_v34 = vpop.f32.mrf.mxu3 }
 0x1ce   :  { %v5397_v41 = vpop.permute.xlu1 %1108  ;;  %v5401_v30 = vpop.permute.xlu0 %1118 }
 0x1cf   :  { %7429 = vst [vmem:[#allocation53_spill] sm:$0xff] %v5397_v41  ;;  %v5412_v42 = vpop.permute.xlu2 %1128 }
 0x1d0   :  { %7431 = vst [vmem:[#allocation55_spill] sm:$0xff] %v5401_v30 }
 0x1d2   :  { %v540_v39 = vpop.f32.mrf.mxu2  ;;  %v589_v35 = vpop.f32.mrf.mxu3 }
 0x1d6   :  { %v5403_v52 = vpop.permute.xlu1 %1123 }
 0x1d7   :  { %7432 = vst [vmem:[#allocation56_spill] sm:$0xff] %v5403_v52 }
 0x1da   :  { %v543_v9 = vpop.f32.mrf.mxu2  ;;  %v592_v17 = vpop.f32.mrf.mxu3 }
 0x1db   :  { %v544_v48 = vadd.f32 %v543_v9, %v5269_v26 }
 0x1e2   :  { %v545_v60 = vpop.f32.mrf.mxu2  ;;  %v594_v20 = vpop.f32.mrf.mxu3 }
 0x1e3   :  { %v546_v54 = vadd.f32 %v545_v60, %v5271_v28  ;;  %v595_v63 = vadd.f32 %v594_v20, %v5271_v28  ;;  %v541_v60 = vadd.f32 %v540_v39, %v5267_v14  ;;  %v539_v28 = vadd.f32 %v538_v53, %v5265_v13 }
 0x1e4   :  { %v626_v20 = vmax.f32 %v544_v48, 0.0  ;;  %v534_v48 = vadd.f32 %v5367_v46, %v5259_v19 }
 0x1e5   :  { %v629_v9 = vmax.f32 %v595_v63, 0.0  ;;  %v622_v63 = vmax.f32 %v539_v28, 0.0 }
 0x1e6   :  { %v618_v46 = vmax.f32 %v534_v48, 0.0 }
 0x1ea   :  { %v548_v38 = vpop.f32.mrf.mxu2  ;;  %v597_v5 = vpop.f32.mrf.mxu3 }
 0x1eb   :  { %v549_v15 = vadd.f32 %v548_v38, %v5275_v31  ;;  %v598_v21 = vadd.f32 %v597_v5, %v5275_v31  ;;  %v593_v31 = vadd.f32 %v592_v17, %v5269_v26  ;;  %v5415_v5 = vpop.permute.xlu0 %1133  ;;  %v628_v38 = vmax.f32 %v546_v54, 0.0  ;;  %v5422_v54 = vpop.permute.xlu1 %1138 }
 0x1ec   :  { %7433 = vst [vmem:[#allocation57_spill] sm:$0xff] %v5415_v5  ;;  %v536_v26 = vadd.f32 %v535_v18, %v5263_v22  ;;  %v580_v17 = vadd.f32 %v5361_v27, %v5257_v16 }
 0x1ed   :  { %v630_v47 = vmax.f32 %v549_v15, 0.0  ;;  %v631_v30 = vmax.f32 %v598_v21, 0.0  ;;  %v627_v21 = vmax.f32 %v593_v31, 0.0  ;;  %v774_v39 = vpack.c.bf16 %v628_v38, %v626_v20  ;;  %7434 = vst [vmem:[#allocation58_spill] sm:$0xff] %v5422_v54 }
 0x1ee   :  { %v575_v15 = vadd.f32 %v5343_v44, %v5253_v10  ;;  %v617_v18 = vmax.f32 %v580_v17, 0.0 }
 0x1f2   :  { %v550_v55 = vpop.f32.mrf.mxu2  ;;  %v599_v8 = vpop.f32.mrf.mxu3 }
 0x1f3   :  { %v551_v6 = vadd.f32 %v550_v55, %v5277_v32  ;;  %v600_v41 = vadd.f32 %v599_v8, %v5277_v32  ;;  %v590_v32 = vadd.f32 %v589_v35, %v5267_v14  ;;  %v620_v35 = vmax.f32 %v536_v26, 0.0 }
 0x1f5   :  { %v632_v45 = vmax.f32 %v551_v6, 0.0  ;;  %v633_v52 = vmax.f32 %v600_v41, 0.0  ;;  %v588_v6 = vadd.f32 %v587_v34, %v5265_v13  ;;  %v624_v41 = vmax.f32 %v541_v60, 0.0  ;;  %v5435_v34 = vpop.permute.xlu0 %1148 }
 0x1f6   :  { %v625_v14 = vmax.f32 %v590_v32, 0.0  ;;  %v583_v13 = vadd.f32 %v5369_v51, %v5259_v19  ;;  %7436 = vst [vmem:[#allocation60_spill] sm:$0xff] %v5435_v34  ;;  %v529_v19 = vadd.f32 %v5349_v61, %v5255_v11  ;;  %v770_v27 = vpack.c.bf16 %v620_v35, %v618_v46 }
 0x1f7   :  { %v776_v55 = vpack.c.bf16 %v632_v45, %v630_v47  ;;  %v777_v40 = vpack.c.bf16 %v633_v52, %v631_v30  ;;  %v585_v45 = vadd.f32 %v584_v25, %v5263_v22  ;;  %v775_v47 = vpack.c.bf16 %v629_v9, %v627_v21  ;;  %v5431_v22 = vpop.permute.xlu2 %1143 }
 0x1f8   :  { %v531_v30 = vadd.f32 %v5359_v29, %v5257_v16  ;;  %v772_v53 = vpack.c.bf16 %v624_v41, %v622_v63  ;;  %7435 = vst [vmem:[#allocation59_spill] sm:$0xff] %v5431_v22  ;;  %v578_v29 = vadd.f32 %v5351_v0, %v5255_v11  ;;  %v619_v51 = vmax.f32 %v583_v13, 0.0  ;;  %v5447_v11 = vpop.permute.xlu1 %1153 }
 0x1f9   :  { %1930 = vmatpush.bf16.msrb.mxu0 %v776_v55  ;;  %4938 = vmatpush.bf16.msrb.mxu2 %v776_v55  ;;  %v621_v25 = vmax.f32 %v585_v45, 0.0  ;;  %v526_v52 = vadd.f32 %v5341_v43, %v5253_v10  ;;  %v524_v61 = vadd.f32 %v5331_v3, %v5251_v2  ;;  %v614_v60 = vmax.f32 %v529_v19, 0.0  ;;  %7437 = vst [vmem:[#allocation61_spill] sm:$0xff] %v5447_v11 }
 0x1fa   :  { %2259 = vmatpush.bf16.msrb.mxu1 %v777_v40  ;;  %4946 = vmatpush.bf16.msrb.mxu3 %v777_v40  ;;  %v623_v40 = vmax.f32 %v588_v6, 0.0  ;;  %v616_v16 = vmax.f32 %v531_v30, 0.0  ;;  %v573_v0 = vadd.f32 %v5333_v4, %v5251_v2  ;;  %v615_v38 = vmax.f32 %v578_v29, 0.0 }
 0x1fb   :  { %v771_v31 = vpack.c.bf16 %v621_v25, %v619_v51  ;;  %v521_v43 = vadd.f32 %v5323_v23, %v5247_v1  ;;  %v612_v10 = vmax.f32 %v526_v52, 0.0  ;;  %v570_v55 = vadd.f32 %v5325_v24, %v5247_v1  ;;  %v4875_v25 = vld [vmem:[#allocation9 + $0x8] sm:$0xff] }
 0x1fc   :  { %v773_v8 = vpack.c.bf16 %v625_v14, %v623_v40  ;;  %v768_v44 = vpack.c.bf16 %v616_v16, %v614_v60  ;;  %v613_v3 = vmax.f32 %v575_v15, 0.0  ;;  %v769_v32 = vpack.c.bf16 %v617_v18, %v615_v38  ;;  %v4876_v16 = vld [vmem:[#allocation9 + $0x10] sm:$0xff]  ;;  %v4877_v60 = vld [vmem:[#allocation9 + $0x18] sm:$0xff] }
 0x1fd   :  { %1931 = vmatpush.bf16.msrb.mxu0 %v774_v39  ;;  %4939 = vmatpush.bf16.msrb.mxu2 %v774_v39  ;;  %v519_v9 = vadd.f32 %v5315_v7, %v5245_v62  ;;  %v610_v28 = vmax.f32 %v524_v61, 0.0  ;;  %v568_v4 = vadd.f32 %v5317_v12, %v5245_v62  ;;  %v611_v20 = vmax.f32 %v573_v0, 0.0  ;;  %v5461_v23 = vpop.permute.xlu0 %1163  ;;  %v4912_v0 = vld [vmem:[#allocation9 + $0x130] sm:$0xff] }
 0x1fe   :  { %2260 = vmatpush.bf16.msrb.mxu1 %v775_v47  ;;  %4947 = vmatpush.bf16.msrb.mxu3 %v775_v47  ;;  %7439 = vst [vmem:[#allocation63_spill] sm:$0xff] %v5461_v23  ;;  %v516_v1 = vadd.f32 %v5305_v56, %v5243_v59  ;;  %v608_v24 = vmax.f32 %v521_v43, 0.0  ;;  %v565_v7 = vadd.f32 %v5307_v57, %v5243_v59  ;;  %v609_v21 = vmax.f32 %v570_v55, 0.0 }
 0x1ff   :  { %v5457_v2 = vpop.permute.xlu2 %1158  ;;  %v766_v6 = vpack.c.bf16 %v612_v10, %v610_v28  ;;  %v767_v26 = vpack.c.bf16 %v613_v3, %v611_v20  ;;  %v514_v41 = vadd.f32 %v5297_v49, %v5241_v58  ;;  %v606_v39 = vmax.f32 %v519_v9, 0.0  ;;  %v4878_v3 = vld [vmem:[#allocation9 + $0x20] sm:$0xff] }
 0x200   :  { %7438 = vst [vmem:[#allocation62_spill] sm:$0xff] %v5457_v2  ;;  %v563_v62 = vadd.f32 %v5299_v50, %v5241_v58  ;;  %v607_v12 = vmax.f32 %v568_v4, 0.0  ;;  %v604_v56 = vmax.f32 %v516_v1, 0.0  ;;  %v5471_v14 = vpop.permute.xlu1 %1168  ;;  %v605_v47 = vmax.f32 %v565_v7, 0.0  ;;  %v4874_v58 = vld [vmem:[#allocation9] sm:$0xff]  ;;  %v4909_v50 = vld [vmem:[#allocation9 + $0x118] sm:$0xff] }
 0x201   :  { %1932 = vmatpush.bf16.msrb.mxu0 %v772_v53  ;;  %4940 = vmatpush.bf16.msrb.mxu2 %v772_v53  ;;  %v764_v45 = vpack.c.bf16 %v608_v24, %v606_v39  ;;  %7440 = vst [vmem:[#allocation64_spill] sm:$0xff] %v5471_v14  ;;  %v602_v57 = vmax.f32 %v514_v41, 0.0  ;;  %v4879_v24 = vld [vmem:[#allocation9 + $0x28] sm:$0xff]  ;;  %v4921_v14 = vld [vmem:[#allocation9 + $0x178] sm:$0xff] }
 0x202   :  { %2261 = vmatpush.bf16.msrb.mxu1 %v773_v8  ;;  %4948 = vmatpush.bf16.msrb.mxu3 %v773_v8  ;;  %v765_v59 = vpack.c.bf16 %v609_v21, %v607_v12  ;;  %v603_v48 = vmax.f32 %v563_v62, 0.0  ;;  %v4910_v8 = vld [vmem:[#allocation9 + $0x120] sm:$0xff]  ;;  %v4880_v62 = vld [vmem:[#allocation9 + $0x30] sm:$0xff]  ;;  %v4915_v12 = vld [vmem:[#allocation9 + $0x148] sm:$0xff] }
 0x203   :  { %v762_v49 = vpack.c.bf16 %v604_v56, %v602_v57 }
 0x204   :  { %v763_v13 = vpack.c.bf16 %v605_v47, %v603_v48  ;;  %v4881_v48 = vld [vmem:[#allocation9 + $0x38] sm:$0xff] }
 0x205   :  { %1933 = vmatpush.bf16.msrb.mxu0 %v770_v27  ;;  %4941 = vmatpush.bf16.msrb.mxu2 %v770_v27  ;;  %v5475_v40 = vpop.permute.xlu0 %1178  ;;  %v4911_v27 = vld [vmem:[#allocation9 + $0x128] sm:$0xff] }
 0x206   :  { %2262 = vmatpush.bf16.msrb.mxu1 %v771_v31  ;;  %4949 = vmatpush.bf16.msrb.mxu3 %v771_v31  ;;  %7442 = vst [vmem:[#allocation66_spill] sm:$0xff] %v5475_v40 }
 0x207   :  { %v5473_v63 = vpop.permute.xlu2 %1173 }
 0x208   :  { %7441 = vst [vmem:[#allocation65_spill] sm:$0xff] %v5473_v63  ;;  %v5477_v30 = vpop.permute.xlu1 %1183 }
 0x209   :  { %1934 = vmatpush.bf16.msrb.mxu0 %v768_v44  ;;  %4942 = vmatpush.bf16.msrb.mxu2 %v768_v44  ;;  %7443 = vst [vmem:[#allocation67_spill] sm:$0xff] %v5477_v30 }
 0x20a   :  { %2263 = vmatpush.bf16.msrb.mxu1 %v769_v32  ;;  %4950 = vmatpush.bf16.msrb.mxu3 %v769_v32  ;;  %v4913_v32 = vld [vmem:[#allocation9 + $0x138] sm:$0xff] }
 0x20d   :  { %1935 = vmatpush.bf16.msrb.mxu0 %v766_v6  ;;  %4943 = vmatpush.bf16.msrb.mxu2 %v766_v6  ;;  %v5481_v53 = vpop.permute.xlu0 %1193  ;;  %v4914_v6 = vld [vmem:[#allocation9 + $0x140] sm:$0xff] }
 0x20e   :  { %2264 = vmatpush.bf16.msrb.mxu1 %v767_v26  ;;  %4951 = vmatpush.bf16.msrb.mxu3 %v767_v26  ;;  %7445 = vst [vmem:[#allocation69_spill] sm:$0xff] %v5481_v53 }
 0x20f   :  { %v5479_v35 = vpop.permute.xlu2 %1188 }
 0x210   :  { %7444 = vst [vmem:[#allocation68_spill] sm:$0xff] %v5479_v35  ;;  %v5483_v17 = vpop.permute.xlu1 %1198 }
 0x211   :  { %1936 = vmatpush.bf16.msrb.mxu0 %v764_v45  ;;  %4944 = vmatpush.bf16.msrb.mxu2 %v764_v45  ;;  %7446 = vst [vmem:[#allocation70_spill] sm:$0xff] %v5483_v17 }
 0x212   :  { %2265 = vmatpush.bf16.msrb.mxu1 %v765_v59  ;;  %4952 = vmatpush.bf16.msrb.mxu3 %v765_v59 }
 0x215   :  { %1937 = vmatpush.bf16.msrb.mxu0 %v762_v49  ;;  %4945 = vmatpush.bf16.msrb.mxu2 %v762_v49  ;;  %v5487_v46 = vpop.permute.xlu0 %1208  ;;  %v4916_v49 = vld [vmem:[#allocation9 + $0x150] sm:$0xff] }
 0x216   :  { %2266 = vmatpush.bf16.msrb.mxu1 %v763_v13  ;;  %4953 = vmatpush.bf16.msrb.mxu3 %v763_v13  ;;  %7448 = vst [vmem:[#allocation72_spill] sm:$0xff] %v5487_v46 }
 0x217   :  { %v5485_v19 = vpop.permute.xlu2 %1203 }
 0x218   :  { %1938 = vmatmul.bf16.vlgmr.msrb.gmra.mxu0 %v4874_v58  ;;  %2113 = vmatmul.bf16.vlgmr.msrb.gmra.mxu2 %v4909_v50  ;;  %7447 = vst [vmem:[#allocation71_spill] sm:$0xff] %v5485_v19  ;;  %v5489_v29 = vpop.permute.xlu1 %1213 }
 0x219   :  { %2267 = vmatmul.bf16.vlgmr.msrb.gmra.mxu1 %v4874_v58  ;;  %2442 = vmatmul.bf16.vlgmr.msrb.gmra.mxu3 %v4909_v50  ;;  %7449 = vst [vmem:[#allocation73_spill] sm:$0xff] %v5489_v29 }
 0x21d   :  { %v5493_v52 = vpop.permute.xlu0 %1223 }
 0x21e   :  { %7451 = vst [vmem:[#allocation75_spill] sm:$0xff] %v5493_v52 }
 0x21f   :  { %v5491_v51 = vpop.permute.xlu2 %1218 }
 0x220   :  { %7450 = vst [vmem:[#allocation74_spill] sm:$0xff] %v5491_v51  ;;  %v5495_v15 = vpop.permute.xlu1 %1228  ;;  %v7458_v51 = vld [vmem:[#allocation16_spill] sm:$0xff] }
 0x221   :  { %7452 = vst [vmem:[#allocation76_spill] sm:$0xff] %v5495_v15 }
 0x225   :  { %v5499_v31 = vpop.permute.xlu0 %1238 }
 0x226   :  { %7454 = vst [vmem:[#allocation78_spill] sm:$0xff] %v5499_v31 }
 0x227   :  { %v5497_v18 = vpop.permute.xlu2 %1233 }
 0x228   :  { %1943 = vmatmul.bf16.gmra.mxu0 %v4875_v25  ;;  %2118 = vmatmul.bf16.gmra.mxu2 %v4910_v8  ;;  %7453 = vst [vmem:[#allocation77_spill] sm:$0xff] %v5497_v18  ;;  %v5501_v61 = vpop.permute.xlu1 %1243  ;;  %v4919_v18 = vld [vmem:[#allocation9 + $0x168] sm:$0xff] }
 0x229   :  { %2272 = vmatmul.bf16.gmra.mxu1 %v4875_v25  ;;  %2447 = vmatmul.bf16.gmra.mxu3 %v4910_v8  ;;  %7455 = vst [vmem:[#allocation79_spill] sm:$0xff] %v5501_v61  ;;  %v4882_v8 = vld [vmem:[#allocation9 + $0x40] sm:$0xff] }
 0x22d   :  { %v5505_v43 = vpop.permute.xlu0 %1253 }
 0x22e   :  { %7457 = vst [vmem:[#allocation81_spill] sm:$0xff] %v5505_v43 }
 0x22f   :  { %v5503_v38 = vpop.permute.xlu2 %1248 }
 0x230   :  { %7456 = vst [vmem:[#allocation80_spill] sm:$0xff] %v5503_v38  ;;  %v5507_v10 = vpop.permute.xlu1 %1258 }
 0x235   :  { %v5511_v55 = vpop.permute.xlu0 %1268 }
 0x237   :  { %v5509_v44 = vpop.permute.xlu2 %1263 }
 0x238   :  { %1948 = vmatmul.bf16.gmra.mxu0 %v4876_v16  ;;  %2123 = vmatmul.bf16.gmra.mxu2 %v4911_v27  ;;  %v5513_v9 = vpop.permute.xlu1 %1273 }
 0x239   :  { %2277 = vmatmul.bf16.gmra.mxu1 %v4876_v16  ;;  %2452 = vmatmul.bf16.gmra.mxu3 %v4911_v27  ;;  %v4917_v16 = vld [vmem:[#allocation9 + $0x158] sm:$0xff] }
 0x23d   :  { %v5517_v4 = vpop.permute.xlu0 %1283 }
 0x23f   :  { %v5515_v28 = vpop.permute.xlu2 %1278 }
 0x240   :  { %v5519_v20 = vpop.permute.xlu1 %1288 }
 0x245   :  { %v5523_v7 = vpop.permute.xlu0 %1298 }
 0x247   :  { %v5521_v1 = vpop.permute.xlu2 %1293 }
 0x248   :  { %1953 = vmatmul.bf16.gmra.mxu0 %v4877_v60  ;;  %2128 = vmatmul.bf16.gmra.mxu2 %v4912_v0  ;;  %v5525_v21 = vpop.permute.xlu1 %1303 }
 0x249   :  { %2282 = vmatmul.bf16.gmra.mxu1 %v4877_v60  ;;  %2457 = vmatmul.bf16.gmra.mxu3 %v4912_v0 }
 0x24d   :  { %v5529_v41 = vpop.permute.xlu0 %1313 }
 0x24f   :  { %v5527_v26 = vpop.permute.xlu2 %1308 }
 0x250   :  { %v5531_v39 = vpop.permute.xlu1 %1318 }
 0x255   :  { %v5535_v45 = vpop.permute.xlu0 %1328 }
 0x257   :  { %v5533_v56 = vpop.permute.xlu2 %1323 }
 0x258   :  { %1958 = vmatmul.bf16.gmra.mxu0 %v4878_v3  ;;  %2133 = vmatmul.bf16.gmra.mxu2 %v4913_v32  ;;  %v5537_v47 = vpop.permute.xlu1 %1333 }
 0x259   :  { %2287 = vmatmul.bf16.gmra.mxu1 %v4878_v3  ;;  %2462 = vmatmul.bf16.gmra.mxu3 %v4913_v32 }
 0x25d   :  { %v5541_v57 = vpop.permute.xlu0 %1343 }
 0x25f   :  { %v5539_v59 = vpop.permute.xlu2 %1338 }
 0x260   :  { %v5543_v13 = vpop.permute.xlu1 %1348 }
 0x265   :  { %v5547_v50 = vpop.permute.xlu0 %1358 }
 0x267   :  { %v5545_v58 = vpop.permute.xlu2 %1353 }
 0x268   :  { %1963 = vmatmul.bf16.gmra.mxu0 %v4879_v24  ;;  %2138 = vmatmul.bf16.gmra.mxu2 %v4914_v6  ;;  %v5549_v25 = vpop.permute.xlu1 %1363 }
 0x269   :  { %2292 = vmatmul.bf16.gmra.mxu1 %v4879_v24  ;;  %2467 = vmatmul.bf16.gmra.mxu3 %v4914_v6 }
 0x26d   :  { %v5554_v32 = vpop.permute.xlu0 %1373 }
 0x26f   :  { %v5551_v60 = vpop.permute.xlu2 %1368 }
 0x277   :  { %v5561_v61 = vpop.permute.xlu2 %1383 }
 0x278   :  { %1968 = vmatmul.bf16.gmra.mxu0 %v4880_v62  ;;  %2143 = vmatmul.bf16.gmra.mxu2 %v4915_v12 }
 0x279   :  { %2297 = vmatmul.bf16.gmra.mxu1 %v4880_v62  ;;  %2472 = vmatmul.bf16.gmra.mxu3 %v4915_v12  ;;  %v5557_v62 = vpop.permute.xlu1 %1378 }
 0x281   :  { %v5567_v31 = vpop.permute.xlu1 %1393 }
 0x288   :  { %1973 = vmatmul.bf16.gmra.mxu0 %v4881_v48  ;;  %2148 = vmatmul.bf16.gmra.mxu2 %v4916_v49 }
 0x289   :  { %2302 = vmatmul.bf16.gmra.mxu1 %v4881_v48  ;;  %2477 = vmatmul.bf16.gmra.mxu3 %v4916_v49 }
 0x295   :  { %v1939_v27 = vpop.f32.mrf.mxu0 }
 0x296   :  { %v1940_v0 = vadd.f32 %v1939_v27, %v5279_v33  ;;  %v2268_v3 = vpop.f32.mrf.mxu1 }
 0x297   :  { %v2269_v24 = vadd.f32 %v2268_v3, %v5279_v33  ;;  %v5564_v3 = vpop.permute.xlu0 %1388 }
 0x298   :  { %1978 = vmatmul.bf16.gmra.mxu0 %v4882_v8  ;;  %2153 = vmatmul.bf16.gmra.mxu2 %v4917_v16 }
 0x299   :  { %2307 = vmatmul.bf16.gmra.mxu1 %v4882_v8  ;;  %2482 = vmatmul.bf16.gmra.mxu3 %v4917_v16 }
 0x29a   :  { %2844 = vmax.xlane.f32.xlu0 %v2269_v24  ;;  %2588 = vmax.xlane.f32.xlu2 %v1940_v0  ;;  %v4883_v0 = vld [vmem:[#allocation9 + $0x48] sm:$0xff]  ;;  %v4918_v24 = vld [vmem:[#allocation9 + $0x160] sm:$0xff] }
 0x29b   :  { %v2114_v6 = vpop.f32.mrf.mxu2 }
 0x29c   :  { %v2443_v12 = vpop.f32.mrf.mxu3  ;;  %v2115_v33 = vadd.f32 %v2114_v6, %v5507_v10 }
 0x29d   :  { %v2444_v48 = vadd.f32 %v2443_v12, %v5507_v10  ;;  %v1941_v49 = vpop.f32.mrf.mxu0  ;;  %v5571_v10 = vpop.permute.xlu2 %1398 }
 0x29e   :  { %v1942_v27 = vadd.f32 %v1941_v49, %v5281_v36  ;;  %v2270_v43 = vpop.f32.mrf.mxu1 }
 0x29f   :  { %2984 = vmax.xlane.f32.xlu1 %v2444_v48  ;;  %v2271_v38 = vadd.f32 %v2270_v43, %v5281_v36  ;;  %v5573_v6 = vpop.permute.xlu0 %1403 }
 0x2a2   :  { %2590 = vmax.xlane.f32.xlu0 %v1942_v27  ;;  %2728 = vmax.xlane.f32.xlu2 %v2115_v33 }
 0x2a3   :  { %v2116_v8 = vpop.f32.mrf.mxu2 }
 0x2a4   :  { %v2445_v16 = vpop.f32.mrf.mxu3  ;;  %v2117_v48 = vadd.f32 %v2116_v8, %v5509_v44  ;;  %v5576_v8 = vpop.permute.xlu1 %1408 }
 0x2a5   :  { %v1944_v12 = vpop.f32.mrf.mxu0  ;;  %v2446_v15 = vadd.f32 %v2445_v16, %v5509_v44 }
 0x2a6   :  { %v2273_v49 = vpop.f32.mrf.mxu1  ;;  %v1945_v27 = vadd.f32 %v1944_v12, %v5285_v37 }
 0x2a7   :  { %2846 = vmax.xlane.f32.xlu1 %v2271_v38  ;;  %v2274_v44 = vadd.f32 %v2273_v49, %v5285_v37  ;;  %v5582_v52 = vpop.permute.xlu0 %1418 }
 0x2a8   :  { %1983 = vmatmul.bf16.gmra.mxu0 %v4883_v0  ;;  %2158 = vmatmul.bf16.gmra.mxu2 %v4918_v24 }
 0x2a9   :  { %2312 = vmatmul.bf16.gmra.mxu1 %v4883_v0  ;;  %2487 = vmatmul.bf16.gmra.mxu3 %v4918_v24  ;;  %v5580_v24 = vpop.permute.xlu2 %1413 }
 0x2aa   :  { %2730 = vmax.xlane.f32.xlu0 %v2117_v48  ;;  %2986 = vmax.xlane.f32.xlu2 %v2446_v15  ;;  %v4884_v48 = vld [vmem:[#allocation9 + $0x50] sm:$0xff] }
 0x2ab   :  { %v2119_v36 = vpop.f32.mrf.mxu2 }
 0x2ac   :  { %v2448_v43 = vpop.f32.mrf.mxu3  ;;  %v2120_v12 = vadd.f32 %v2119_v36, %v5511_v55  ;;  %v5587_v49 = vpop.permute.xlu1 %1423 }
 0x2ad   :  { %v1946_v33 = vpop.f32.mrf.mxu0  ;;  %v2449_v16 = vadd.f32 %v2448_v43, %v5511_v55 }
 0x2ae   :  { %v2275_v38 = vpop.f32.mrf.mxu1  ;;  %v1947_v46 = vadd.f32 %v1946_v33, %v7458_v51 }
 0x2af   :  { %2592 = vmax.xlane.f32.xlu1 %v1945_v27  ;;  %v2276_v37 = vadd.f32 %v2275_v38, %v7458_v51  ;;  %v5592_v17 = vpop.permute.xlu0 %1433 }
 0x2b1   :  { %v5590_v36 = vpop.permute.xlu2 %1428 }
 0x2b2   :  { %2988 = vmax.xlane.f32.xlu0 %v2449_v16  ;;  %2848 = vmax.xlane.f32.xlu2 %v2274_v44 }
 0x2b3   :  { %v2121_v0 = vpop.f32.mrf.mxu2 }
 0x2b4   :  { %v2450_v15 = vpop.f32.mrf.mxu3  ;;  %v2122_v51 = vadd.f32 %v2121_v0, %v5513_v9  ;;  %v5596_v38 = vpop.permute.xlu1 %1438 }
 0x2b5   :  { %v1949_v29 = vpop.f32.mrf.mxu0  ;;  %v2451_v16 = vadd.f32 %v2450_v15, %v5513_v9  ;;  %v7459_v15 = vld [vmem:[#allocation17_spill] sm:$0xff]  ;;  %v7460_v9 = vld [vmem:[#allocation18_spill] sm:$0xff] }
 0x2b6   :  { %v2278_v27 = vpop.f32.mrf.mxu1 }
 0x2b7   :  { %2732 = vmax.xlane.f32.xlu1 %v2120_v12  ;;  %v2279_v19 = vadd.f32 %v2278_v27, %v7459_v15 }
 0x2b8   :  { %1988 = vmatmul.bf16.gmra.mxu0 %v4884_v48  ;;  %2163 = vmatmul.bf16.gmra.mxu2 %v4919_v18 }
 0x2b9   :  { %2317 = vmatmul.bf16.gmra.mxu1 %v4884_v48  ;;  %2492 = vmatmul.bf16.gmra.mxu3 %v4919_v18  ;;  %v4885_v48 = vld [vmem:[#allocation9 + $0x58] sm:$0xff]  ;;  %v5599_v30 = vpop.permute.xlu2 %1443 }
 0x2ba   :  { %2850 = vmax.xlane.f32.xlu0 %v2276_v37  ;;  %2594 = vmax.xlane.f32.xlu2 %v1947_v46  ;;  %v4920_v37 = vld [vmem:[#allocation9 + $0x170] sm:$0xff] }
 0x2bb   :  { %v2124_v43 = vpop.f32.mrf.mxu2 }
 0x2bc   :  { %v2453_v44 = vpop.f32.mrf.mxu3  ;;  %v2125_v33 = vadd.f32 %v2124_v43, %v5515_v28  ;;  %v5603_v43 = vpop.permute.xlu0 %1448 }
 0x2bd   :  { %v1951_v55 = vpop.f32.mrf.mxu0 }
 0x2be   :  { %v2280_v12 = vpop.f32.mrf.mxu1  ;;  %v1952_v0 = vadd.f32 %v1951_v55, %v7460_v9 }
 0x2bf   :  { %2990 = vmax.xlane.f32.xlu1 %v2451_v16  ;;  %v1950_v16 = vadd.f32 %v1949_v29, %v7459_v15  ;;  %v2454_v29 = vadd.f32 %v2453_v44, %v5515_v28  ;;  %v2281_v28 = vadd.f32 %v2280_v12, %v7460_v9 }
 0x2c1   :  { %v5610_v15 = vpop.permute.xlu2 %1458 }
 0x2c2   :  { %2736 = vmax.xlane.f32.xlu0 %v2125_v33  ;;  %2734 = vmax.xlane.f32.xlu2 %v2122_v51 }
 0x2c3   :  { %v2126_v18 = vpop.f32.mrf.mxu2 }
 0x2c4   :  { %v2455_v46 = vpop.f32.mrf.mxu3  ;;  %v2127_v27 = vadd.f32 %v2126_v18, %v5517_v4  ;;  %v7461_v18 = vld [vmem:[#allocation19_spill] sm:$0xff] }
 0x2c5   :  { %v1954_v53 = vpop.f32.mrf.mxu0  ;;  %v2456_v55 = vadd.f32 %v2455_v46, %v5517_v4 }
 0x2c6   :  { %v2283_v35 = vpop.f32.mrf.mxu1  ;;  %v1955_v23 = vadd.f32 %v1954_v53, %v7461_v18 }
 0x2c7   :  { %2852 = vmax.xlane.f32.xlu1 %v2279_v19  ;;  %v5606_v19 = vpop.permute.xlu1 %1453  ;;  %v2284_v4 = vadd.f32 %v2283_v35, %v7461_v18  ;;  %v4922_v18 = vld [vmem:[#allocation9 + $0x180] sm:$0xff] }
 0x2c8   :  { %1993 = vmatmul.bf16.gmra.mxu0 %v4885_v48  ;;  %2168 = vmatmul.bf16.gmra.mxu2 %v4920_v37 }
 0x2c9   :  { %2322 = vmatmul.bf16.gmra.mxu1 %v4885_v48  ;;  %2497 = vmatmul.bf16.gmra.mxu3 %v4920_v37  ;;  %v5612_v48 = vpop.permute.xlu0 %1463  ;;  %v5619_v46 = vpop.permute.xlu2 %1473 }
 0x2ca   :  { %2598 = vmax.xlane.f32.xlu0 %v1952_v0  ;;  %2596 = vmax.xlane.f32.xlu2 %v1950_v16  ;;  %v4886_v0 = vld [vmem:[#allocation9 + $0x60] sm:$0xff] }
 0x2cb   :  { %v2129_v51 = vpop.f32.mrf.mxu2 }
 0x2cc   :  { %v2458_v33 = vpop.f32.mrf.mxu3  ;;  %v2130_v12 = vadd.f32 %v2129_v51, %v5519_v20  ;;  %v7466_v51 = vld [vmem:[#allocation21_spill] sm:$0xff] }
 0x2cd   :  { %v1956_v40 = vpop.f32.mrf.mxu0  ;;  %v2459_v53 = vadd.f32 %v2458_v33, %v5519_v20 }
 0x2ce   :  { %v2285_v63 = vpop.f32.mrf.mxu1 }
 0x2cf   :  { %2738 = vmax.xlane.f32.xlu1 %v2127_v27  ;;  %v5615_v27 = vpop.permute.xlu1 %1468 }
 0x2d1   :  { %v5631_v33 = vpop.permute.xlu2 %1488 }
 0x2d2   :  { %2994 = vmax.xlane.f32.xlu0 %v2456_v55  ;;  %2992 = vmax.xlane.f32.xlu2 %v2454_v29  ;;  %v5621_v29 = vpop.permute.xlu0 %1478  ;;  %7464 = vst [vmem:[#allocation17_spill] sm:$0xff] %v5631_v33 }
 0x2d3   :  { %v2131_v37 = vpop.f32.mrf.mxu2 }
 0x2d4   :  { %v2460_v16 = vpop.f32.mrf.mxu3  ;;  %v2132_v35 = vadd.f32 %v2131_v37, %v5521_v1 }
 0x2d5   :  { %v1959_v2 = vpop.f32.mrf.mxu0 }
 0x2d6   :  { %v2288_v11 = vpop.f32.mrf.mxu1  ;;  %v1960_v37 = vadd.f32 %v1959_v2, %v7466_v51  ;;  %v2461_v2 = vadd.f32 %v2460_v16, %v5521_v1 }
 0x2d7   :  { %2600 = vmax.xlane.f32.xlu1 %v1955_v23  ;;  %v5626_v9 = vpop.permute.xlu1 %1483  ;;  %v2289_v1 = vadd.f32 %v2288_v11, %v7466_v51 }
 0x2d8   :  { %1998 = vmatmul.bf16.gmra.mxu0 %v4886_v0  ;;  %2173 = vmatmul.bf16.gmra.mxu2 %v4921_v14  ;;  %7462 = vst [vmem:[#allocation16_spill] sm:$0xff] %v5626_v9 }
 0x2d9   :  { %2327 = vmatmul.bf16.gmra.mxu1 %v4886_v0  ;;  %2502 = vmatmul.bf16.gmra.mxu3 %v4921_v14  ;;  %v4887_v0 = vld [vmem:[#allocation9 + $0x68] sm:$0xff] }
 0x2da   :  { %2856 = vmax.xlane.f32.xlu0 %v2284_v4  ;;  %2854 = vmax.xlane.f32.xlu2 %v2281_v28  ;;  %v7463_v28 = vld [vmem:[#allocation20_spill] sm:$0xff]  ;;  %v5633_v5 = vpop.permute.xlu0 %1493 }
 0x2db   :  { %v2134_v44 = vpop.f32.mrf.mxu2  ;;  %v2286_v4 = vadd.f32 %v2285_v63, %v7463_v28  ;;  %7465 = vst [vmem:[#allocation18_spill] sm:$0xff] %v5633_v5  ;;  %v1957_v20 = vadd.f32 %v1956_v40, %v7463_v28 }
 0x2dc   :  { %v2463_v55 = vpop.f32.mrf.mxu3 }
 0x2dd   :  { %v1961_v23 = vpop.f32.mrf.mxu0  ;;  %v2464_v40 = vadd.f32 %v2463_v55, %v5523_v7 }
 0x2de   :  { %v2290_v34 = vpop.f32.mrf.mxu1 }
 0x2df   :  { %2996 = vmax.xlane.f32.xlu1 %v2459_v53  ;;  %v5637_v63 = vpop.permute.xlu1 %1498 }
 0x2e0   :  { %7467 = vst [vmem:[#allocation19_spill] sm:$0xff] %v5637_v63 }
 0x2e2   :  { %2742 = vmax.xlane.f32.xlu0 %v2132_v35  ;;  %2740 = vmax.xlane.f32.xlu2 %v2130_v12  ;;  %v2135_v12 = vadd.f32 %v2134_v44, %v5523_v7  ;;  %v5646_v28 = vpop.permute.xlu0 %1508 }
 0x2e3   :  { %v2136_v14 = vpop.f32.mrf.mxu2 }
 0x2e4   :  { %v2465_v53 = vpop.f32.mrf.mxu3  ;;  %v2137_v11 = vadd.f32 %v2136_v14, %v5525_v21  ;;  %v7476_v14 = vld [vmem:[#allocation24_spill] sm:$0xff] }
 0x2e5   :  { %v5629_v22 = vpop.f32.mrf.mxu0 }
 0x2e6   :  { %v2293_v54 = vpop.f32.mrf.mxu1 }
 0x2e7   :  { %2858 = vmax.xlane.f32.xlu1 %v2286_v4  ;;  %v5642_v4 = vpop.permute.xlu2 %1503  ;;  %v5651_v5 = vpop.permute.xlu1 %1513 }
 0x2e8   :  { %2003 = vmatmul.bf16.gmra.mxu0 %v4887_v0  ;;  %2178 = vmatmul.bf16.gmra.mxu2 %v4922_v18  ;;  %7469 = vst [vmem:[#allocation20_spill] sm:$0xff] %v5651_v5 }
 0x2e9   :  { %2332 = vmatmul.bf16.gmra.mxu1 %v4887_v0  ;;  %2507 = vmatmul.bf16.gmra.mxu3 %v4922_v18  ;;  %v4888_v18 = vld [vmem:[#allocation9 + $0x70] sm:$0xff] }
 0x2ea   :  { %2604 = vmax.xlane.f32.xlu0 %v1960_v37  ;;  %2602 = vmax.xlane.f32.xlu2 %v1957_v20  ;;  %v4923_v20 = vld [vmem:[#allocation9 + $0x188] sm:$0xff]  ;;  %v7468_v37 = vld [vmem:[#allocation22_spill] sm:$0xff] }
 0x2eb   :  { %v2139_v33 = vpop.f32.mrf.mxu2  ;;  %v1962_v44 = vadd.f32 %v1961_v23, %v7468_v37  ;;  %v2291_v7 = vadd.f32 %v2290_v34, %v7468_v37  ;;  %v5659_v23 = vpop.permute.xlu0 %1523  ;;  %v4889_v37 = vld [vmem:[#allocation9 + $0x78] sm:$0xff] }
 0x2ec   :  { %v2468_v0 = vpop.f32.mrf.mxu3  ;;  %7471 = vst [vmem:[#allocation22_spill] sm:$0xff] %v5659_v23  ;;  %v2140_v51 = vadd.f32 %v2139_v33, %v5527_v26 }
 0x2ed   :  { %v1966_v35 = vpop.f32.mrf.mxu0 }
 0x2ee   :  { %v5640_v9 = vpop.f32.mrf.mxu1  ;;  %v1967_v33 = vadd.f32 %v1966_v35, %v7476_v14 }
 0x2ef   :  { %2744 = vmax.xlane.f32.xlu1 %v2135_v12  ;;  %v5657_v55 = vpop.permute.xlu2 %1518  ;;  %v5666_v34 = vpop.permute.xlu1 %1528 }
 0x2f0   :  { %7470 = vst [vmem:[#allocation21_spill] sm:$0xff] %v5657_v55 }
 0x2f1   :  { %7472 = vst [vmem:[#allocation82_spill] sm:$0xff] %v5666_v34 }
 0x2f2   :  { %3000 = vmax.xlane.f32.xlu0 %v2464_v40  ;;  %2998 = vmax.xlane.f32.xlu2 %v2461_v2  ;;  %v2466_v40 = vadd.f32 %v2465_v53, %v5525_v21 }
 0x2f3   :  { %v2141_v16 = vpop.f32.mrf.mxu2  ;;  %v5674_v53 = vpop.permute.xlu0 %1538 }
 0x2f4   :  { %v2470_v2 = vpop.f32.mrf.mxu3  ;;  %7474 = vst [vmem:[#allocation84_spill] sm:$0xff] %v5674_v53 }
 0x2f5   :  { %v5649_v63 = vpop.f32.mrf.mxu0 }
 0x2f6   :  { %v5653_v12 = vpop.f32.mrf.mxu1 }
 0x2f7   :  { %2606 = vmax.xlane.f32.xlu1 %v1962_v44 }
 0x2f8   :  { %2008 = vmatmul.bf16.gmra.mxu0 %v4888_v18  ;;  %2183 = vmatmul.bf16.gmra.mxu2 %v4923_v20 }
 0x2f9   :  { %2337 = vmatmul.bf16.gmra.mxu1 %v4888_v18  ;;  %2512 = vmatmul.bf16.gmra.mxu3 %v4923_v20  ;;  %v5672_v20 = vpop.permute.xlu2 %1533 }
 0x2fa   :  { %2862 = vmax.xlane.f32.xlu0 %v2291_v7  ;;  %2860 = vmax.xlane.f32.xlu2 %v2289_v1  ;;  %7473 = vst [vmem:[#allocation83_spill] sm:$0xff] %v5672_v20  ;;  %v4924_v1 = vld [vmem:[#allocation9 + $0x190] sm:$0xff]  ;;  %v7475_v7 = vld [vmem:[#allocation23_spill] sm:$0xff] }
 0x2fb   :  { %v5670_v18 = vpop.f32.mrf.mxu2  ;;  %v2294_v23 = vadd.f32 %v2293_v54, %v7475_v7  ;;  %v1965_v21 = vadd.f32 %v5629_v22, %v7475_v7  ;;  %v4925_v7 = vld [vmem:[#allocation9 + $0x198] sm:$0xff] }
 0x2fd   :  { %v5662_v5 = vpop.f32.mrf.mxu0 }
 0x2fe   :  { %v5664_v44 = vpop.f32.mrf.mxu1 }
 0x2ff   :  { %3002 = vmax.xlane.f32.xlu1 %v2466_v40  ;;  %v2473_v40 = vpop.f32.mrf.mxu3 }
 0x302   :  { %2748 = vmax.xlane.f32.xlu0 %v2140_v51  ;;  %2746 = vmax.xlane.f32.xlu2 %v2137_v11  ;;  %v5684_v11 = vpop.permute.xlu1 %1543  ;;  %v2142_v51 = vadd.f32 %v2141_v16, %v5529_v41  ;;  %v2471_v16 = vadd.f32 %v2470_v2, %v5529_v41 }
 0x303   :  { %v2146_v54 = vpop.f32.mrf.mxu2 }
 0x305   :  { %v5677_v55 = vpop.f32.mrf.mxu0 }
 0x306   :  { %v5679_v34 = vpop.f32.mrf.mxu1 }
 0x307   :  { %2864 = vmax.xlane.f32.xlu1 %v2294_v23  ;;  %v2469_v23 = vadd.f32 %v2468_v0, %v5527_v26 }
 0x308   :  { %2013 = vmatmul.bf16.gmra.mxu0 %v4889_v37  ;;  %2188 = vmatmul.bf16.gmra.mxu2 %v4924_v1 }
 0x309   :  { %2342 = vmatmul.bf16.gmra.mxu1 %v4889_v37  ;;  %2517 = vmatmul.bf16.gmra.mxu3 %v4924_v1  ;;  %v5701_v37 = vpop.f32.mrf.mxu3 }
 0x30a   :  { %2610 = vmax.xlane.f32.xlu0 %v1967_v33  ;;  %2608 = vmax.xlane.f32.xlu2 %v1965_v21  ;;  %v7477_v21 = vld [vmem:[#allocation25_spill] sm:$0xff] }
 0x30b   :  { %v2299_v0 = vadd.f32 %v5653_v12, %v7477_v21  ;;  %v2149_v2 = vpop.f32.mrf.mxu2 }
 0x30d   :  { %v2845_v53 = vpop.xlane.xlu0 %2844  ;;  %v2589_v20 = vpop.xlane.xlu2 %2588 }
 0x30e   :  { %4478 = vst.msk [vmem:[%s7315_s7 + $0x400] sm:$0xff] %vm3104_vm4, %v2845_v53  ;;  %v5691_v22 = vpop.f32.mrf.mxu0  ;;  %v5693_v35 = vpop.f32.mrf.mxu1  ;;  %v4890_v53 = vld [vmem:[#allocation9 + $0x80] sm:$0xff] }
 0x30f   :  { %3105 = vst.msk [vmem:[%s7315_s7] sm:$0xff] %vm3104_vm4, %v2589_v20  ;;  %2750 = vmax.xlane.f32.xlu1 %v2142_v51  ;;  %v1970_v20 = vadd.f32 %v5649_v63, %v7477_v21  ;;  %v2296_v63 = vadd.f32 %v5640_v9, %v7476_v14 }
 0x312   :  { %3006 = vmax.xlane.f32.xlu0 %v2471_v16  ;;  %3004 = vmax.xlane.f32.xlu2 %v2469_v23  ;;  %v2985_v1 = vpop.xlane.xlu1 %2984  ;;  %v2478_v23 = vpop.f32.mrf.mxu3 }
 0x313   :  { %4548 = vst.msk [vmem:[%s7315_s7 + $0x630] sm:$0xff] %vm3104_vm4, %v2985_v1  ;;  %v2474_v1 = vadd.f32 %v2473_v40, %v5531_v39  ;;  %v2147_v40 = vadd.f32 %v2146_v54, %v5533_v56  ;;  %v5745_v21 = vpop.f32.mrf.mxu2 }
 0x315   :  { %v2591_v33 = vpop.xlane.xlu0 %2590  ;;  %v2729_v51 = vpop.xlane.xlu2 %2728 }
 0x316   :  { %3106 = vst.msk [vmem:[%s7315_s7 + $0x8] sm:$0xff] %vm3104_vm4, %v2591_v33  ;;  %v5713_v26 = vpop.f32.mrf.mxu0  ;;  %v5715_v41 = vpop.f32.mrf.mxu1 }
 0x317   :  { %3175 = vst.msk [vmem:[%s7315_s7 + $0x230] sm:$0xff] %vm3104_vm4, %v2729_v51  ;;  %2612 = vmax.xlane.f32.xlu1 %v1970_v20  ;;  %v4891_v51 = vld [vmem:[#allocation9 + $0x88] sm:$0xff] }
 0x318   :  { %2018 = vmatmul.bf16.gmra.mxu0 %v4890_v53  ;;  %2193 = vmatmul.bf16.gmra.mxu2 %v4925_v7 }
 0x319   :  { %2347 = vmatmul.bf16.gmra.mxu1 %v4890_v53  ;;  %2522 = vmatmul.bf16.gmra.mxu3 %v4925_v7  ;;  %v2145_v53 = vadd.f32 %v5670_v18, %v5531_v39 }
 0x31a   :  { %2868 = vmax.xlane.f32.xlu0 %v2299_v0  ;;  %2866 = vmax.xlane.f32.xlu2 %v2296_v63  ;;  %v2847_v16 = vpop.xlane.xlu1 %2846  ;;  %v2480_v33 = vpop.f32.mrf.mxu3  ;;  %v4926_v63 = vld [vmem:[#allocation9 + $0x1a0] sm:$0xff]  ;;  %v7478_v0 = vld [vmem:[#allocation26_spill] sm:$0xff] }
 0x31b   :  { %4479 = vst.msk [vmem:[%s7315_s7 + $0x408] sm:$0xff] %vm3104_vm4, %v2847_v16  ;;  %v2301_v39 = vadd.f32 %v5664_v44, %v7478_v0  ;;  %v1972_v16 = vadd.f32 %v5662_v5, %v7478_v0  ;;  %v2154_v5 = vpop.f32.mrf.mxu2 }
 0x31d   :  { %v2731_v9 = vpop.xlane.xlu0 %2730  ;;  %v2987_v14 = vpop.xlane.xlu2 %2986 }
 0x31e   :  { %3176 = vst.msk [vmem:[%s7315_s7 + $0x238] sm:$0xff] %vm3104_vm4, %v2731_v9  ;;  %v5734_v12 = vpop.f32.mrf.mxu0  ;;  %v5743_v7 = vpop.f32.mrf.mxu1 }
 0x31f   :  { %4549 = vst.msk [vmem:[%s7315_s7 + $0x638] sm:$0xff] %vm3104_vm4, %v2987_v14  ;;  %3008 = vmax.xlane.f32.xlu1 %v2474_v1  ;;  %v7479_v1 = vld [vmem:[#allocation27_spill] sm:$0xff] }
 0x320   :  { %v1975_v9 = vadd.f32 %v5677_v55, %v7479_v1 }
 0x322   :  { %2754 = vmax.xlane.f32.xlu0 %v2147_v40  ;;  %2752 = vmax.xlane.f32.xlu2 %v2145_v53  ;;  %v2593_v20 = vpop.xlane.xlu1 %2592  ;;  %v2150_v40 = vadd.f32 %v2149_v2, %v5535_v45  ;;  %v5774_v0 = vpop.f32.mrf.mxu3  ;;  %v2479_v2 = vadd.f32 %v2478_v23, %v5535_v45  ;;  %v2304_v23 = vadd.f32 %v5679_v34, %v7479_v1 }
 0x323   :  { %3107 = vst.msk [vmem:[%s7315_s7 + $0x10] sm:$0xff] %vm3104_vm4, %v2593_v20  ;;  %v2156_v45 = vpop.f32.mrf.mxu2  ;;  %v2481_v34 = vadd.f32 %v2480_v33, %v5537_v47  ;;  %v2155_v33 = vadd.f32 %v2154_v5, %v5539_v59 }
 0x325   :  { %v2989_v18 = vpop.xlane.xlu0 %2988  ;;  %v2849_v54 = vpop.xlane.xlu2 %2848 }
 0x326   :  { %4550 = vst.msk [vmem:[%s7315_s7 + $0x640] sm:$0xff] %vm3104_vm4, %v2989_v18  ;;  %v5765_v44 = vpop.f32.mrf.mxu0  ;;  %v5767_v14 = vpop.f32.mrf.mxu1 }
 0x327   :  { %4480 = vst.msk [vmem:[%s7315_s7 + $0x410] sm:$0xff] %vm3104_vm4, %v2849_v54  ;;  %2870 = vmax.xlane.f32.xlu1 %v2301_v39  ;;  %v4892_v54 = vld [vmem:[#allocation9 + $0x90] sm:$0xff] }
 0x328   :  { %2023 = vmatmul.bf16.gmra.mxu0 %v4891_v51  ;;  %2198 = vmatmul.bf16.gmra.mxu2 %v4926_v63 }
 0x329   :  { %2352 = vmatmul.bf16.gmra.mxu1 %v4891_v51  ;;  %2527 = vmatmul.bf16.gmra.mxu3 %v4926_v63  ;;  %v2476_v51 = vadd.f32 %v5701_v37, %v5533_v56 }
 0x32a   :  { %2616 = vmax.xlane.f32.xlu0 %v1975_v9  ;;  %2614 = vmax.xlane.f32.xlu2 %v1972_v16  ;;  %v2733_v53 = vpop.xlane.xlu1 %2732  ;;  %v4927_v16 = vld [vmem:[#allocation9 + $0x1a8] sm:$0xff]  ;;  %v7480_v9 = vld [vmem:[#allocation28_spill] sm:$0xff] }
 0x32b   :  { %3177 = vst.msk [vmem:[%s7315_s7 + $0x240] sm:$0xff] %vm3104_vm4, %v2733_v53  ;;  %v1977_v53 = vadd.f32 %v5691_v22, %v7480_v9  ;;  %v2306_v22 = vadd.f32 %v5693_v35, %v7480_v9  ;;  %v4893_v9 = vld [vmem:[#allocation9 + $0x98] sm:$0xff] }
 0x32d   :  { %v2851_v55 = vpop.xlane.xlu0 %2850  ;;  %v2595_v20 = vpop.xlane.xlu2 %2594 }
 0x32e   :  { %4481 = vst.msk [vmem:[%s7315_s7 + $0x418] sm:$0xff] %vm3104_vm4, %v2851_v55  ;;  %v5787_v63 = vpop.f32.mrf.mxu0  ;;  %v5793_v18 = vpop.f32.mrf.mxu1 }
 0x32f   :  { %3108 = vst.msk [vmem:[%s7315_s7 + $0x18] sm:$0xff] %vm3104_vm4, %v2595_v20  ;;  %2756 = vmax.xlane.f32.xlu1 %v2150_v40  ;;  %v2485_v40 = vpop.f32.mrf.mxu3 }
 0x332   :  { %3012 = vmax.xlane.f32.xlu0 %v2479_v2  ;;  %3010 = vmax.xlane.f32.xlu2 %v2476_v51  ;;  %v2991_v39 = vpop.xlane.xlu1 %2990  ;;  %v2152_v2 = vadd.f32 %v5745_v21, %v5537_v47 }
 0x333   :  { %4551 = vst.msk [vmem:[%s7315_s7 + $0x648] sm:$0xff] %vm3104_vm4, %v2991_v39  ;;  %v5829_v39 = vpop.f32.mrf.mxu2 }
 0x335   :  { %v2737_v56 = vpop.xlane.xlu0 %2736  ;;  %v2735_v37 = vpop.xlane.xlu2 %2734 }
 0x336   :  { %3179 = vst.msk [vmem:[%s7315_s7 + $0x250] sm:$0xff] %vm3104_vm4, %v2737_v56  ;;  %v5813_v20 = vpop.f32.mrf.mxu0  ;;  %v5816_v35 = vpop.f32.mrf.mxu1  ;;  %v7481_v56 = vld [vmem:[#allocation29_spill] sm:$0xff] }
 0x337   :  { %3178 = vst.msk [vmem:[%s7315_s7 + $0x248] sm:$0xff] %vm3104_vm4, %v2735_v37  ;;  %2618 = vmax.xlane.f32.xlu1 %v1977_v53  ;;  %v4928_v53 = vld [vmem:[#allocation9 + $0x1b0] sm:$0xff]  ;;  %v2309_v37 = vadd.f32 %v5715_v41, %v7481_v56 }
 0x338   :  { %2028 = vmatmul.bf16.gmra.mxu0 %v4892_v54  ;;  %2203 = vmatmul.bf16.gmra.mxu2 %v4927_v16 }
 0x339   :  { %2357 = vmatmul.bf16.gmra.mxu1 %v4892_v54  ;;  %2532 = vmatmul.bf16.gmra.mxu3 %v4927_v16  ;;  %v5831_v54 = vpop.f32.mrf.mxu3 }
 0x33a   :  { %2874 = vmax.xlane.f32.xlu0 %v2306_v22  ;;  %2872 = vmax.xlane.f32.xlu2 %v2304_v23  ;;  %v2853_v55 = vpop.xlane.xlu1 %2852  ;;  %v1980_v23 = vadd.f32 %v5713_v26, %v7481_v56  ;;  %v7482_v22 = vld [vmem:[#allocation30_spill] sm:$0xff]  ;;  %v2157_v26 = vadd.f32 %v2156_v45, %v5541_v57 }
 0x33b   :  { %4482 = vst.msk [vmem:[%s7315_s7 + $0x420] sm:$0xff] %vm3104_vm4, %v2853_v55  ;;  %v1982_v41 = vadd.f32 %v5734_v12, %v7482_v22 }
 0x33d   :  { %v2599_v1 = vpop.xlane.xlu0 %2598  ;;  %v2597_v51 = vpop.xlane.xlu2 %2596 }
 0x33e   :  { %3110 = vst.msk [vmem:[%s7315_s7 + $0x28] sm:$0xff] %vm3104_vm4, %v2599_v1  ;;  %v5839_v5 = vpop.f32.mrf.mxu0  ;;  %v5853_v55 = vpop.f32.mrf.mxu1 }
 0x33f   :  { %3109 = vst.msk [vmem:[%s7315_s7 + $0x20] sm:$0xff] %vm3104_vm4, %v2597_v51  ;;  %3014 = vmax.xlane.f32.xlu1 %v2481_v34  ;;  %v2161_v34 = vpop.f32.mrf.mxu2 }
 0x341   :  { %v5859_v51 = vpop.f32.mrf.mxu3 }
 0x342   :  { %2760 = vmax.xlane.f32.xlu0 %v2155_v33  ;;  %2758 = vmax.xlane.f32.xlu2 %v2152_v2  ;;  %v2739_v16 = vpop.xlane.xlu1 %2738  ;;  %v2484_v33 = vadd.f32 %v5774_v0, %v5539_v59 }
 0x343   :  { %3180 = vst.msk [vmem:[%s7315_s7 + $0x258] sm:$0xff] %vm3104_vm4, %v2739_v16  ;;  %v2486_v16 = vadd.f32 %v2485_v40, %v5541_v57 }
 0x345   :  { %v2995_v47 = vpop.xlane.xlu0 %2994  ;;  %v2993_v21 = vpop.xlane.xlu2 %2992 }
 0x346   :  { %4553 = vst.msk [vmem:[%s7315_s7 + $0x658] sm:$0xff] %vm3104_vm4, %v2995_v47  ;;  %v5875_v45 = vpop.f32.mrf.mxu1  ;;  %v4929_v47 = vld [vmem:[#allocation9 + $0x1b8] sm:$0xff] }
 0x347   :  { %4552 = vst.msk [vmem:[%s7315_s7 + $0x650] sm:$0xff] %vm3104_vm4, %v2993_v21  ;;  %2876 = vmax.xlane.f32.xlu1 %v2309_v37  ;;  %v2164_v56 = vpop.f32.mrf.mxu2  ;;  %v4894_v37 = vld [vmem:[#allocation9 + $0xa0] sm:$0xff]  ;;  %v7483_v21 = vld [vmem:[#allocation31_spill] sm:$0xff] }
 0x348   :  { %2033 = vmatmul.bf16.gmra.mxu0 %v4893_v9  ;;  %2208 = vmatmul.bf16.gmra.mxu2 %v4928_v53  ;;  %v1985_v59 = vadd.f32 %v5765_v44, %v7483_v21  ;;  %v2314_v44 = vadd.f32 %v5767_v14, %v7483_v21  ;;  %v7484_v21 = vld [vmem:[#allocation32_spill] sm:$0xff] }
 0x349   :  { %2362 = vmatmul.bf16.gmra.mxu1 %v4893_v9  ;;  %2537 = vmatmul.bf16.gmra.mxu3 %v4928_v53  ;;  %v5873_v9 = vpop.f32.mrf.mxu0  ;;  %v2493_v40 = vpop.f32.mrf.mxu3 }
 0x34a   :  { %2622 = vmax.xlane.f32.xlu0 %v1982_v41  ;;  %2620 = vmax.xlane.f32.xlu2 %v1980_v23  ;;  %v2601_v1 = vpop.xlane.xlu1 %2600  ;;  %v2311_v23 = vadd.f32 %v5743_v7, %v7482_v22  ;;  %v2489_v7 = vadd.f32 %v5831_v54, %v5543_v13  ;;  %v2162_v54 = vadd.f32 %v2161_v34, %v5545_v58 }
 0x34b   :  { %3111 = vst.msk [vmem:[%s7315_s7 + $0x30] sm:$0xff] %vm3104_vm4, %v2601_v1 }
 0x34d   :  { %v2857_v12 = vpop.xlane.xlu0 %2856  ;;  %v2855_v2 = vpop.xlane.xlu2 %2854 }
 0x34e   :  { %4484 = vst.msk [vmem:[%s7315_s7 + $0x430] sm:$0xff] %vm3104_vm4, %v2857_v12 }
 0x34f   :  { %4483 = vst.msk [vmem:[%s7315_s7 + $0x428] sm:$0xff] %vm3104_vm4, %v2855_v2  ;;  %2762 = vmax.xlane.f32.xlu1 %v2157_v26  ;;  %v5901_v26 = vpop.f32.mrf.mxu1  ;;  %v5905_v12 = vpop.f32.mrf.mxu2  ;;  %v2160_v2 = vadd.f32 %v5829_v39, %v5543_v13 }
 0x351   :  { %v5895_v41 = vpop.f32.mrf.mxu0 }
 0x352   :  { %3018 = vmax.xlane.f32.xlu0 %v2486_v16  ;;  %3016 = vmax.xlane.f32.xlu2 %v2484_v33  ;;  %v2997_v53 = vpop.xlane.xlu1 %2996  ;;  %v5918_v33 = vpop.f32.mrf.mxu3 }
 0x353   :  { %4554 = vst.msk [vmem:[%s7315_s7 + $0x660] sm:$0xff] %vm3104_vm4, %v2997_v53 }
 0x355   :  { %v2743_v0 = vpop.xlane.xlu0 %2742  ;;  %v2741_v57 = vpop.xlane.xlu2 %2740 }
 0x356   :  { %3182 = vst.msk [vmem:[%s7315_s7 + $0x268] sm:$0xff] %vm3104_vm4, %v2743_v0  ;;  %v1987_v0 = vadd.f32 %v5787_v63, %v7484_v21  ;;  %v2165_v63 = vadd.f32 %v2164_v56, %v5547_v50  ;;  %v2494_v56 = vadd.f32 %v2493_v40, %v5547_v50 }
 0x357   :  { %3181 = vst.msk [vmem:[%s7315_s7 + $0x260] sm:$0xff] %vm3104_vm4, %v2741_v57  ;;  %2624 = vmax.xlane.f32.xlu1 %v1985_v59  ;;  %v2316_v59 = vadd.f32 %v5793_v18, %v7484_v21  ;;  %v5928_v34 = vpop.f32.mrf.mxu1  ;;  %v7485_v57 = vld [vmem:[#allocation33_spill] sm:$0xff] }
 0x358   :  { %2038 = vmatmul.bf16.gmra.mxu0 %v4894_v37  ;;  %2213 = vmatmul.bf16.gmra.mxu2 %v4929_v47  ;;  %v1990_v18 = vadd.f32 %v5813_v20, %v7485_v57  ;;  %v4931_v21 = vld [vmem:[#allocation9 + $0x1c8] sm:$0xff]  ;;  %v2319_v40 = vadd.f32 %v5816_v35, %v7485_v57 }
 0x359   :  { %2367 = vmatmul.bf16.gmra.mxu1 %v4894_v37  ;;  %2542 = vmatmul.bf16.gmra.mxu3 %v4929_v47  ;;  %v5924_v53 = vpop.f32.mrf.mxu0  ;;  %v4895_v37 = vld [vmem:[#allocation9 + $0xa8] sm:$0xff]  ;;  %v4930_v47 = vld [vmem:[#allocation9 + $0x1c0] sm:$0xff] }
 0x35a   :  { %2880 = vmax.xlane.f32.xlu0 %v2314_v44  ;;  %2878 = vmax.xlane.f32.xlu2 %v2311_v23  ;;  %v2859_v1 = vpop.xlane.xlu1 %2858  ;;  %v2169_v23 = vpop.f32.mrf.mxu2 }
 0x35b   :  { %4485 = vst.msk [vmem:[%s7315_s7 + $0x438] sm:$0xff] %vm3104_vm4, %v2859_v1  ;;  %v5942_v44 = vpop.f32.mrf.mxu3 }
 0x35d   :  { %v2605_v14 = vpop.xlane.xlu0 %2604  ;;  %v2603_v22 = vpop.xlane.xlu2 %2602 }
 0x35e   :  { %3113 = vst.msk [vmem:[%s7315_s7 + $0x40] sm:$0xff] %vm3104_vm4, %v2605_v14 }
 0x35f   :  { %3112 = vst.msk [vmem:[%s7315_s7 + $0x38] sm:$0xff] %vm3104_vm4, %v2603_v22  ;;  %3020 = vmax.xlane.f32.xlu1 %v2489_v7  ;;  %v2491_v22 = vadd.f32 %v5859_v51, %v5545_v58 }
 0x361   :  { %v5949_v20 = vpop.f32.mrf.mxu0 }
 0x362   :  { %2766 = vmax.xlane.f32.xlu0 %v2162_v54  ;;  %2764 = vmax.xlane.f32.xlu2 %v2160_v2  ;;  %v2745_v16 = vpop.xlane.xlu1 %2744  ;;  %v5962_v2 = vpop.f32.mrf.mxu1 }
 0x363   :  { %3183 = vst.msk [vmem:[%s7315_s7 + $0x270] sm:$0xff] %vm3104_vm4, %v2745_v16  ;;  %v5964_v54 = vpop.f32.mrf.mxu2 }
 0x365   :  { %v3001_v13 = vpop.xlane.xlu0 %3000  ;;  %v2999_v39 = vpop.xlane.xlu2 %2998 }
 0x366   :  { %4556 = vst.msk [vmem:[%s7315_s7 + $0x670] sm:$0xff] %vm3104_vm4, %v3001_v13 }
 0x367   :  { %4555 = vst.msk [vmem:[%s7315_s7 + $0x668] sm:$0xff] %vm3104_vm4, %v2999_v39  ;;  %2882 = vmax.xlane.f32.xlu1 %v2316_v59  ;;  %v7486_v59 = vld [vmem:[#allocation34_spill] sm:$0xff] }
 0x368   :  { %2043 = vmatmul.bf16.gmra.mxu0 %v4895_v37  ;;  %2218 = vmatmul.bf16.gmra.mxu2 %v4930_v47  ;;  %v1992_v58 = vadd.f32 %v5839_v5, %v7486_v59  ;;  %v2321_v13 = vadd.f32 %v5853_v55, %v7486_v59  ;;  %v2496_v55 = vadd.f32 %v5918_v33, %v5549_v25 }
 0x369   :  { %2372 = vmatmul.bf16.gmra.mxu1 %v4895_v37  ;;  %2547 = vmatmul.bf16.gmra.mxu3 %v4930_v47  ;;  %v5970_v37 = vpop.f32.mrf.mxu3  ;;  %v4896_v47 = vld [vmem:[#allocation9 + $0xb0] sm:$0xff]  ;;  %v5986_v5 = vpop.f32.mrf.mxu0  ;;  %v2170_v33 = vadd.f32 %v2169_v23, %v5551_v60 }
 0x36a   :  { %2628 = vmax.xlane.f32.xlu0 %v1990_v18  ;;  %2626 = vmax.xlane.f32.xlu2 %v1987_v0  ;;  %v2607_v1 = vpop.xlane.xlu1 %2606  ;;  %v5988_v39 = vpop.f32.mrf.mxu1 }
 0x36b   :  { %3114 = vst.msk [vmem:[%s7315_s7 + $0x48] sm:$0xff] %vm3104_vm4, %v2607_v1  ;;  %v5994_v35 = vpop.f32.mrf.mxu2 }
 0x36d   :  { %v2863_v7 = vpop.xlane.xlu0 %2862  ;;  %v2861_v14 = vpop.xlane.xlu2 %2860 }
 0x36e   :  { %4487 = vst.msk [vmem:[%s7315_s7 + $0x448] sm:$0xff] %vm3104_vm4, %v2863_v7 }
 0x36f   :  { %4486 = vst.msk [vmem:[%s7315_s7 + $0x440] sm:$0xff] %vm3104_vm4, %v2861_v14  ;;  %2768 = vmax.xlane.f32.xlu1 %v2165_v63  ;;  %v2167_v63 = vadd.f32 %v5905_v12, %v5549_v25 }
 0x371   :  { %v5998_v1 = vpop.f32.mrf.mxu3  ;;  %v6011_v7 = vpop.f32.mrf.mxu0 }
 0x372   :  { %3024 = vmax.xlane.f32.xlu0 %v2494_v56  ;;  %3022 = vmax.xlane.f32.xlu2 %v2491_v22  ;;  %v3003_v16 = vpop.xlane.xlu1 %3002  ;;  %v6017_v22 = vpop.f32.mrf.mxu1  ;;  %v4897_v56 = vld [vmem:[#allocation9 + $0xb8] sm:$0xff] }
 0x373   :  { %4557 = vst.msk [vmem:[%s7315_s7 + $0x678] sm:$0xff] %vm3104_vm4, %v3003_v16  ;;  %v4932_v16 = vld [vmem:[#allocation9 + $0x1d0] sm:$0xff]  ;;  %v2176_v23 = vpop.f32.mrf.mxu2 }
 0x375   :  { %v2749_v50 = vpop.xlane.xlu0 %2748  ;;  %v2747_v51 = vpop.xlane.xlu2 %2746 }
 0x376   :  { %3185 = vst.msk [vmem:[%s7315_s7 + $0x280] sm:$0xff] %vm3104_vm4, %v2749_v50 }
 0x377   :  { %3184 = vst.msk [vmem:[%s7315_s7 + $0x278] sm:$0xff] %vm3104_vm4, %v2747_v51  ;;  %2630 = vmax.xlane.f32.xlu1 %v1992_v58  ;;  %v7488_v58 = vld [vmem:[#allocation36_spill] sm:$0xff] }
 0x378   :  { %2048 = vmatmul.bf16.gmra.mxu0 %v4896_v47  ;;  %2223 = vmatmul.bf16.gmra.mxu2 %v4931_v21 }
 0x379   :  { %2377 = vmatmul.bf16.gmra.mxu1 %v4896_v47  ;;  %2552 = vmatmul.bf16.gmra.mxu3 %v4931_v21  ;;  %v7487_v47 = vld [vmem:[#allocation35_spill] sm:$0xff]  ;;  %v6033_v50 = vpop.f32.mrf.mxu3 }
 0x37a   :  { %2886 = vmax.xlane.f32.xlu0 %v2321_v13  ;;  %2884 = vmax.xlane.f32.xlu2 %v2319_v40  ;;  %v2865_v0 = vpop.xlane.xlu1 %2864  ;;  %v2324_v21 = vadd.f32 %v5875_v45, %v7487_v47  ;;  %v1995_v59 = vadd.f32 %v5873_v9, %v7487_v47  ;;  %v1997_v45 = vadd.f32 %v5895_v41, %v7488_v58  ;;  %v6039_v40 = vpop.f32.mrf.mxu0 }
 0x37b   :  { %4488 = vst.msk [vmem:[%s7315_s7 + $0x450] sm:$0xff] %vm3104_vm4, %v2865_v0  ;;  %v2172_v9 = vadd.f32 %v5964_v54, %v5554_v32  ;;  %v6043_v0 = vpop.f32.mrf.mxu1  ;;  %v2501_v54 = vadd.f32 %v5970_v37, %v5554_v32  ;;  %v2326_v37 = vadd.f32 %v5901_v26, %v7488_v58  ;;  %v2175_v58 = vadd.f32 %v5994_v35, %v5557_v62 }
 0x37d   :  { %v2611_v57 = vpop.xlane.xlu0 %2610  ;;  %v2609_v18 = vpop.xlane.xlu2 %2608 }
 0x37e   :  { %3116 = vst.msk [vmem:[%s7315_s7 + $0x58] sm:$0xff] %vm3104_vm4, %v2611_v57  ;;  %v6057_v57 = vpop.f32.mrf.mxu2 }
 0x37f   :  { %3115 = vst.msk [vmem:[%s7315_s7 + $0x50] sm:$0xff] %vm3104_vm4, %v2609_v18  ;;  %3026 = vmax.xlane.f32.xlu1 %v2496_v55  ;;  %v2499_v55 = vadd.f32 %v5942_v44, %v5551_v60 }
 0x381   :  { %v6059_v18 = vpop.f32.mrf.mxu3 }
 0x382   :  { %2772 = vmax.xlane.f32.xlu0 %v2170_v33  ;;  %2770 = vmax.xlane.f32.xlu2 %v2167_v63  ;;  %v2751_v14 = vpop.xlane.xlu1 %2750  ;;  %v4898_v33 = vld [vmem:[#allocation9 + $0xc0] sm:$0xff]  ;;  %v6067_v32 = vpop.f32.mrf.mxu0 }
 0x383   :  { %3186 = vst.msk [vmem:[%s7315_s7 + $0x288] sm:$0xff] %vm3104_vm4, %v2751_v14  ;;  %v4933_v14 = vld [vmem:[#allocation9 + $0x1d8] sm:$0xff]  ;;  %v6081_v47 = vpop.f32.mrf.mxu1 }
 0x385   :  { %v3007_v25 = vpop.xlane.xlu0 %3006  ;;  %v3005_v12 = vpop.xlane.xlu2 %3004 }
 0x386   :  { %4559 = vst.msk [vmem:[%s7315_s7 + $0x688] sm:$0xff] %vm3104_vm4, %v3007_v25 }
 0x387   :  { %4558 = vst.msk [vmem:[%s7315_s7 + $0x680] sm:$0xff] %vm3104_vm4, %v3005_v12  ;;  %2888 = vmax.xlane.f32.xlu1 %v2324_v21  ;;  %v6083_v21 = vpop.f32.mrf.mxu2 }
 0x388   :  { %2053 = vmatmul.bf16.gmra.mxu0 %v4897_v56  ;;  %2228 = vmatmul.bf16.gmra.mxu2 %v4932_v16 }
 0x389   :  { %2382 = vmatmul.bf16.gmra.mxu1 %v4897_v56  ;;  %2557 = vmatmul.bf16.gmra.mxu3 %v4932_v16  ;;  %v7489_v56 = vld [vmem:[#allocation37_spill] sm:$0xff]  ;;  %v6089_v26 = vpop.f32.mrf.mxu3 }
 0x38a   :  { %2634 = vmax.xlane.f32.xlu0 %v1997_v45  ;;  %2632 = vmax.xlane.f32.xlu2 %v1995_v59  ;;  %v2613_v51 = vpop.xlane.xlu1 %2612  ;;  %v2000_v60 = vadd.f32 %v5924_v53, %v7489_v56  ;;  %v2329_v53 = vadd.f32 %v5928_v34, %v7489_v56  ;;  %v2504_v34 = vadd.f32 %v5998_v1, %v5557_v62 }
 0x38b   :  { %3117 = vst.msk [vmem:[%s7315_s7 + $0x60] sm:$0xff] %vm3104_vm4, %v2613_v51  ;;  %v2177_v45 = vadd.f32 %v2176_v23, %v5561_v61  ;;  %v6104_v51 = vpop.f32.mrf.mxu0  ;;  %v6106_v1 = vpop.f32.mrf.mxu1 }
 0x38d   :  { %v2869_v41 = vpop.xlane.xlu0 %2868  ;;  %v2867_v13 = vpop.xlane.xlu2 %2866 }
 0x38e   :  { %4490 = vst.msk [vmem:[%s7315_s7 + $0x460] sm:$0xff] %vm3104_vm4, %v2869_v41 }
 0x38f   :  { %4489 = vst.msk [vmem:[%s7315_s7 + $0x458] sm:$0xff] %vm3104_vm4, %v2867_v13  ;;  %2774 = vmax.xlane.f32.xlu1 %v2172_v9  ;;  %v6112_v41 = vpop.f32.mrf.mxu2  ;;  %v4899_v13 = vld [vmem:[#allocation9 + $0xc8] sm:$0xff] }
 0x392   :  { %3030 = vmax.xlane.f32.xlu0 %v2501_v54  ;;  %3028 = vmax.xlane.f32.xlu2 %v2499_v55  ;;  %v3009_v63 = vpop.xlane.xlu1 %3008  ;;  %v4934_v55 = vld [vmem:[#allocation9 + $0x1e0] sm:$0xff]  ;;  %v7490_v54 = vld [vmem:[#allocation38_spill] sm:$0xff] }
 0x393   :  { %4560 = vst.msk [vmem:[%s7315_s7 + $0x690] sm:$0xff] %vm3104_vm4, %v3009_v63  ;;  %v2331_v62 = vadd.f32 %v5962_v2, %v7490_v54  ;;  %v6116_v63 = vpop.f32.mrf.mxu3  ;;  %v6130_v56 = vpop.f32.mrf.mxu0 }
 0x395   :  { %v2755_v44 = vpop.xlane.xlu0 %2754  ;;  %v2753_v16 = vpop.xlane.xlu2 %2752 }
 0x396   :  { %3188 = vst.msk [vmem:[%s7315_s7 + $0x298] sm:$0xff] %vm3104_vm4, %v2755_v44  ;;  %v6136_v44 = vpop.f32.mrf.mxu1 }
 0x397   :  { %3187 = vst.msk [vmem:[%s7315_s7 + $0x290] sm:$0xff] %vm3104_vm4, %v2753_v16  ;;  %2636 = vmax.xlane.f32.xlu1 %v2000_v60 }
 0x398   :  { %2058 = vmatmul.bf16.gmra.mxu0 %v4898_v33  ;;  %2233 = vmatmul.bf16.gmra.mxu2 %v4933_v14 }
 0x399   :  { %2387 = vmatmul.bf16.gmra.mxu1 %v4898_v33  ;;  %2562 = vmatmul.bf16.gmra.mxu3 %v4933_v14  ;;  %v2002_v33 = vadd.f32 %v5949_v20, %v7490_v54  ;;  %v7491_v14 = vld [vmem:[#allocation39_spill] sm:$0xff]  ;;  %v2180_v20 = vadd.f32 %v6057_v57, %v5564_v3  ;;  %v2509_v57 = vadd.f32 %v6059_v18, %v5564_v3 }
 0x39a   :  { %2892 = vmax.xlane.f32.xlu0 %v2329_v53  ;;  %2890 = vmax.xlane.f32.xlu2 %v2326_v37  ;;  %v2871_v25 = vpop.xlane.xlu1 %2870  ;;  %v2005_v2 = vadd.f32 %v5986_v5, %v7491_v14  ;;  %v6144_v37 = vpop.f32.mrf.mxu2  ;;  %v2506_v53 = vadd.f32 %v6033_v50, %v5561_v61  ;;  %v2334_v18 = vadd.f32 %v5988_v39, %v7491_v14 }
 0x39b   :  { %4491 = vst.msk [vmem:[%s7315_s7 + $0x468] sm:$0xff] %vm3104_vm4, %v2871_v25  ;;  %v6154_v25 = vpop.f32.mrf.mxu3  ;;  %v2511_v39 = vadd.f32 %v6089_v26, %v5567_v31  ;;  %v2185_v26 = vadd.f32 %v6112_v41, %v5571_v10 }
 0x39d   :  { %v2617_v12 = vpop.xlane.xlu0 %2616  ;;  %v2615_v59 = vpop.xlane.xlu2 %2614 }
 0x39e   :  { %3119 = vst.msk [vmem:[%s7315_s7 + $0x70] sm:$0xff] %vm3104_vm4, %v2617_v12  ;;  %v6160_v12 = vpop.f32.mrf.mxu0  ;;  %v6164_v3 = vpop.f32.mrf.mxu1 }
 0x39f   :  { %3118 = vst.msk [vmem:[%s7315_s7 + $0x68] sm:$0xff] %vm3104_vm4, %v2615_v59  ;;  %3032 = vmax.xlane.f32.xlu1 %v2504_v34  ;;  %v4900_v59 = vld [vmem:[#allocation9 + $0xd0] sm:$0xff] }
 0x3a2   :  { %2778 = vmax.xlane.f32.xlu0 %v2177_v45  ;;  %2776 = vmax.xlane.f32.xlu2 %v2175_v58  ;;  %v2757_v9 = vpop.xlane.xlu1 %2756  ;;  %v4935_v58 = vld [vmem:[#allocation9 + $0x1e8] sm:$0xff]  ;;  %v7492_v45 = vld [vmem:[#allocation40_spill] sm:$0xff] }
 0x3a3   :  { %3189 = vst.msk [vmem:[%s7315_s7 + $0x2a0] sm:$0xff] %vm3104_vm4, %v2757_v9  ;;  %v2007_v61 = vadd.f32 %v6011_v7, %v7492_v45  ;;  %v2336_v7 = vadd.f32 %v6017_v22, %v7492_v45 }
 0x3a5   :  { %v3013_v35 = vpop.xlane.xlu0 %3012  ;;  %v3011_v23 = vpop.xlane.xlu2 %3010 }
 0x3a6   :  { %4562 = vst.msk [vmem:[%s7315_s7 + $0x6a0] sm:$0xff] %vm3104_vm4, %v3013_v35  ;;  %v6188_v35 = vpop.f32.mrf.mxu0 }
 0x3a7   :  { %4561 = vst.msk [vmem:[%s7315_s7 + $0x698] sm:$0xff] %vm3104_vm4, %v3011_v23  ;;  %2894 = vmax.xlane.f32.xlu1 %v2331_v62  ;;  %v2182_v23 = vadd.f32 %v6083_v21, %v5567_v31  ;;  %v7493_v31 = vld [vmem:[#allocation41_spill] sm:$0xff] }
 0x3a8   :  { %2063 = vmatmul.bf16.gmra.mxu0 %v4899_v13  ;;  %2238 = vmatmul.bf16.gmra.mxu2 %v4934_v55  ;;  %v2339_v21 = vadd.f32 %v6043_v0, %v7493_v31 }
 0x3a9   :  { %2392 = vmatmul.bf16.gmra.mxu1 %v4899_v13  ;;  %2567 = vmatmul.bf16.gmra.mxu3 %v4934_v55  ;;  %v6178_v13 = vpop.f32.mrf.mxu2  ;;  %v6180_v55 = vpop.f32.mrf.mxu3 }
 0x3aa   :  { %2640 = vmax.xlane.f32.xlu0 %v2005_v2  ;;  %2638 = vmax.xlane.f32.xlu2 %v2002_v33  ;;  %v2619_v60 = vpop.xlane.xlu1 %2618  ;;  %v6202_v33 = vpop.f32.mrf.mxu1 }
 0x3ab   :  { %3120 = vst.msk [vmem:[%s7315_s7 + $0x78] sm:$0xff] %vm3104_vm4, %v2619_v60 }
 0x3ad   :  { %v2875_v5 = vpop.xlane.xlu0 %2874  ;;  %v2873_v16 = vpop.xlane.xlu2 %2872 }
 0x3ae   :  { %4493 = vst.msk [vmem:[%s7315_s7 + $0x478] sm:$0xff] %vm3104_vm4, %v2875_v5  ;;  %v4936_v5 = vld [vmem:[#allocation9 + $0x1f0] sm:$0xff]  ;;  %v6226_v0 = vpop.f32.mrf.mxu0 }
 0x3af   :  { %4492 = vst.msk [vmem:[%s7315_s7 + $0x470] sm:$0xff] %vm3104_vm4, %v2873_v16  ;;  %2780 = vmax.xlane.f32.xlu1 %v2180_v20  ;;  %v4901_v20 = vld [vmem:[#allocation9 + $0xd8] sm:$0xff] }
 0x3b1   :  { %v6208_v2 = vpop.f32.mrf.mxu2  ;;  %v6210_v60 = vpop.f32.mrf.mxu3 }
 0x3b2   :  { %3036 = vmax.xlane.f32.xlu0 %v2509_v57  ;;  %3034 = vmax.xlane.f32.xlu2 %v2506_v53  ;;  %v3015_v34 = vpop.xlane.xlu1 %3014  ;;  %v2010_v53 = vadd.f32 %v6039_v40, %v7493_v31  ;;  %v7494_v57 = vld [vmem:[#allocation42_spill] sm:$0xff]  ;;  %v2187_v40 = vadd.f32 %v6144_v37, %v5573_v6  ;;  %v2514_v37 = vadd.f32 %v6116_v63, %v5571_v10 }
 0x3b3   :  { %4563 = vst.msk [vmem:[%s7315_s7 + $0x6a8] sm:$0xff] %vm3104_vm4, %v3015_v34  ;;  %v2012_v34 = vadd.f32 %v6067_v32, %v7494_v57 }
 0x3b5   :  { %v2761_v50 = vpop.xlane.xlu0 %2760  ;;  %v2759_v9 = vpop.xlane.xlu2 %2758 }
 0x3b6   :  { %3191 = vst.msk [vmem:[%s7315_s7 + $0x2b0] sm:$0xff] %vm3104_vm4, %v2761_v50 }
 0x3b7   :  { %3190 = vst.msk [vmem:[%s7315_s7 + $0x2a8] sm:$0xff] %vm3104_vm4, %v2759_v9  ;;  %2642 = vmax.xlane.f32.xlu1 %v2007_v61  ;;  %v2516_v9 = vadd.f32 %v6154_v25, %v5573_v6  ;;  %v2341_v6 = vadd.f32 %v6081_v47, %v7494_v57 }
 0x3b8   :  { %2068 = vmatmul.bf16.gmra.mxu0 %v4900_v59  ;;  %2243 = vmatmul.bf16.gmra.mxu2 %v4935_v58 }
 0x3b9   :  { %2397 = vmatmul.bf16.gmra.mxu1 %v4900_v59  ;;  %2572 = vmatmul.bf16.gmra.mxu3 %v4935_v58  ;;  %v6228_v59 = vpop.f32.mrf.mxu1  ;;  %v6236_v61 = vpop.f32.mrf.mxu2 }
 0x3ba   :  { %2898 = vmax.xlane.f32.xlu0 %v2336_v7  ;;  %2896 = vmax.xlane.f32.xlu2 %v2334_v18  ;;  %v2877_v54 = vpop.xlane.xlu1 %2876  ;;  %v6242_v50 = vpop.f32.mrf.mxu3 }
 0x3bb   :  { %4494 = vst.msk [vmem:[%s7315_s7 + $0x480] sm:$0xff] %vm3104_vm4, %v2877_v54  ;;  %v6252_v18 = vpop.f32.mrf.mxu0 }
 0x3bd   :  { %v2623_v22 = vpop.xlane.xlu0 %2622  ;;  %v2621_v62 = vpop.xlane.xlu2 %2620 }
 0x3be   :  { %3122 = vst.msk [vmem:[%s7315_s7 + $0x88] sm:$0xff] %vm3104_vm4, %v2623_v22  ;;  %v4937_v22 = vld [vmem:[#allocation9 + $0x1f8] sm:$0xff] }
 0x3bf   :  { %3121 = vst.msk [vmem:[%s7315_s7 + $0x80] sm:$0xff] %vm3104_vm4, %v2621_v62  ;;  %3038 = vmax.xlane.f32.xlu1 %v2511_v39  ;;  %v4902_v39 = vld [vmem:[#allocation9 + $0xe0] sm:$0xff]  ;;  %v7495_v62 = vld [vmem:[#allocation43_spill] sm:$0xff] }
 0x3c0   :  { %v2015_v10 = vadd.f32 %v6104_v51, %v7495_v62  ;;  %v2344_v25 = vadd.f32 %v6106_v1, %v7495_v62  ;;  %v2519_v1 = vadd.f32 %v6180_v55, %v5576_v8  ;;  %v2192_v55 = vadd.f32 %v6208_v2, %v5580_v24  ;;  %v7498_v62 = vld [vmem:[#allocation46_spill] sm:$0xff] }
 0x3c1   :  { %v6258_v54 = vpop.f32.mrf.mxu1  ;;  %v6274_v51 = vpop.f32.mrf.mxu2 }
 0x3c2   :  { %2784 = vmax.xlane.f32.xlu0 %v2185_v26  ;;  %2782 = vmax.xlane.f32.xlu2 %v2182_v23  ;;  %v2763_v14 = vpop.xlane.xlu1 %2762  ;;  %v6276_v26 = vpop.f32.mrf.mxu3 }
 0x3c3   :  { %3192 = vst.msk [vmem:[%s7315_s7 + $0x2b8] sm:$0xff] %vm3104_vm4, %v2763_v14  ;;  %v6282_v47 = vpop.f32.mrf.mxu0 }
 0x3c5   :  { %v3019_v41 = vpop.xlane.xlu0 %3018  ;;  %v3017_v16 = vpop.xlane.xlu2 %3016 }
 0x3c6   :  { %4565 = vst.msk [vmem:[%s7315_s7 + $0x6b8] sm:$0xff] %vm3104_vm4, %v3019_v41 }
 0x3c7   :  { %4564 = vst.msk [vmem:[%s7315_s7 + $0x6b0] sm:$0xff] %vm3104_vm4, %v3017_v16  ;;  %2900 = vmax.xlane.f32.xlu1 %v2339_v21  ;;  %v2190_v21 = vadd.f32 %v6178_v13, %v5576_v8  ;;  %v4903_v16 = vld [vmem:[#allocation9 + $0xe8] sm:$0xff] }
 0x3c8   :  { %2073 = vmatmul.bf16.gmra.mxu0 %v4901_v20  ;;  %2248 = vmatmul.bf16.gmra.mxu2 %v4936_v5  ;;  %v7497_v13 = vld [vmem:[#allocation45_spill] sm:$0xff] }
 0x3c9   :  { %2402 = vmatmul.bf16.gmra.mxu1 %v4901_v20  ;;  %2577 = vmatmul.bf16.gmra.mxu3 %v4936_v5  ;;  %v6286_v31 = vpop.f32.mrf.mxu1 }
 0x3ca   :  { %2646 = vmax.xlane.f32.xlu0 %v2012_v34  ;;  %2644 = vmax.xlane.f32.xlu2 %v2010_v53  ;;  %v2625_v58 = vpop.xlane.xlu1 %2624  ;;  %v7496_v53 = vld [vmem:[#allocation44_spill] sm:$0xff] }
 0x3cb   :  { %3123 = vst.msk [vmem:[%s7315_s7 + $0x90] sm:$0xff] %vm3104_vm4, %v2625_v58  ;;  %v2346_v57 = vadd.f32 %v6136_v44, %v7496_v53  ;;  %v2017_v8 = vadd.f32 %v6130_v56, %v7496_v53  ;;  %v2020_v44 = vadd.f32 %v6160_v12, %v7497_v13  ;;  %v2521_v12 = vadd.f32 %v6210_v60, %v5580_v24 }
 0x3cd   :  { %v2881_v32 = vpop.xlane.xlu0 %2880  ;;  %v2879_v45 = vpop.xlane.xlu2 %2878 }
 0x3ce   :  { %4496 = vst.msk [vmem:[%s7315_s7 + $0x490] sm:$0xff] %vm3104_vm4, %v2881_v32 }
 0x3cf   :  { %4495 = vst.msk [vmem:[%s7315_s7 + $0x488] sm:$0xff] %vm3104_vm4, %v2879_v45  ;;  %2786 = vmax.xlane.f32.xlu1 %v2187_v40  ;;  %v6306_v40 = vpop.f32.mrf.mxu0  ;;  %v2195_v45 = vadd.f32 %v6236_v61, %v5582_v52 }
 0x3d1   :  { %v6320_v2 = vpop.f32.mrf.mxu1 }
 0x3d2   :  { %3042 = vmax.xlane.f32.xlu0 %v2516_v9  ;;  %3040 = vmax.xlane.f32.xlu2 %v2514_v37  ;;  %v3021_v7 = vpop.xlane.xlu1 %3020  ;;  %v2524_v9 = vadd.f32 %v6242_v50, %v5582_v52  ;;  %v2349_v52 = vadd.f32 %v6164_v3, %v7497_v13  ;;  %v2351_v50 = vadd.f32 %v6202_v33, %v7498_v62 }
 0x3d3   :  { %4566 = vst.msk [vmem:[%s7315_s7 + $0x6c0] sm:$0xff] %vm3104_vm4, %v3021_v7  ;;  %v2526_v3 = vadd.f32 %v6276_v26, %v5587_v49 }
 0x3d5   :  { %v2767_v63 = vpop.xlane.xlu0 %2766  ;;  %v2765_v23 = vpop.xlane.xlu2 %2764 }
 0x3d6   :  { %3194 = vst.msk [vmem:[%s7315_s7 + $0x2c8] sm:$0xff] %vm3104_vm4, %v2767_v63 }
 0x3d7   :  { %3193 = vst.msk [vmem:[%s7315_s7 + $0x2c0] sm:$0xff] %vm3104_vm4, %v2765_v23  ;;  %2648 = vmax.xlane.f32.xlu1 %v2015_v10  ;;  %v6340_v61 = vpop.f32.mrf.mxu0  ;;  %v2022_v10 = vadd.f32 %v6188_v35, %v7498_v62  ;;  %v2199_v23 = vpop.f32.mrf.mxu2 }
 0x3d8   :  { %2078 = vmatmul.bf16.gmra.mxu0 %v4902_v39  ;;  %2253 = vmatmul.bf16.gmra.mxu2 %v4937_v22 }
 0x3d9   :  { %2407 = vmatmul.bf16.gmra.mxu1 %v4902_v39  ;;  %2582 = vmatmul.bf16.gmra.mxu3 %v4937_v22  ;;  %v6342_v7 = vpop.f32.mrf.mxu1  ;;  %v4904_v22 = vld [vmem:[#allocation9 + $0xf0] sm:$0xff] }
 0x3da   :  { %2904 = vmax.xlane.f32.xlu0 %v2344_v25  ;;  %2902 = vmax.xlane.f32.xlu2 %v2341_v6  ;;  %v2883_v14 = vpop.xlane.xlu1 %2882 }
 0x3db   :  { %4497 = vst.msk [vmem:[%s7315_s7 + $0x498] sm:$0xff] %vm3104_vm4, %v2883_v14  ;;  %v2197_v14 = vadd.f32 %v6274_v51, %v5587_v49 }
 0x3dd   :  { %v2629_v20 = vpop.xlane.xlu0 %2628  ;;  %v2627_v5 = vpop.xlane.xlu2 %2626 }
 0x3de   :  { %3125 = vst.msk [vmem:[%s7315_s7 + $0xa0] sm:$0xff] %vm3104_vm4, %v2629_v20  ;;  %v2528_v20 = vpop.f32.mrf.mxu3 }
 0x3df   :  { %3124 = vst.msk [vmem:[%s7315_s7 + $0x98] sm:$0xff] %vm3104_vm4, %v2627_v5  ;;  %3044 = vmax.xlane.f32.xlu1 %v2519_v1  ;;  %v6362_v35 = vpop.f32.mrf.mxu0  ;;  %v2200_v1 = vadd.f32 %v2199_v23, %v5590_v36 }
 0x3e1   :  { %v6368_v6 = vpop.f32.mrf.mxu1 }
 0x3e2   :  { %2790 = vmax.xlane.f32.xlu0 %v2192_v55  ;;  %2788 = vmax.xlane.f32.xlu2 %v2190_v21  ;;  %v2769_v41 = vpop.xlane.xlu1 %2768  ;;  %v4905_v21 = vld [vmem:[#allocation9 + $0xf8] sm:$0xff] }
 0x3e3   :  { %3195 = vst.msk [vmem:[%s7315_s7 + $0x2d0] sm:$0xff] %vm3104_vm4, %v2769_v41  ;;  %v7499_v55 = vld [vmem:[#allocation47_spill] sm:$0xff] }
 0x3e4   :  { %v2354_v41 = vadd.f32 %v6228_v59, %v7499_v55  ;;  %v2025_v51 = vadd.f32 %v6226_v0, %v7499_v55 }
 0x3e5   :  { %v3025_v34 = vpop.xlane.xlu0 %3024  ;;  %v3023_v58 = vpop.xlane.xlu2 %3022 }
 0x3e6   :  { %4568 = vst.msk [vmem:[%s7315_s7 + $0x6d0] sm:$0xff] %vm3104_vm4, %v3025_v34  ;;  %v2201_v34 = vpop.f32.mrf.mxu2 }
 0x3e7   :  { %4567 = vst.msk [vmem:[%s7315_s7 + $0x6c8] sm:$0xff] %vm3104_vm4, %v3023_v58  ;;  %2906 = vmax.xlane.f32.xlu1 %v2346_v57  ;;  %v6387_v5 = vpop.f32.mrf.mxu0  ;;  %v7500_v57 = vld [vmem:[#allocation48_spill] sm:$0xff]  ;;  %v2202_v13 = vadd.f32 %v2201_v34, %v5592_v17 }
 0x3e8   :  { %2083 = vmatmul.bf16.gmra.mxu0 %v4903_v16  ;;  %v2027_v59 = vadd.f32 %v6252_v18, %v7500_v57  ;;  %v2529_v18 = vadd.f32 %v2528_v20, %v5590_v36  ;;  %v4907_v20 = vld [vmem:[#allocation9 + $0x108] sm:$0xff] }
 0x3e9   :  { %2412 = vmatmul.bf16.gmra.mxu1 %v4903_v16  ;;  %v6391_v49 = vpop.f32.mrf.mxu1 }
 0x3ea   :  { %2652 = vmax.xlane.f32.xlu0 %v2020_v44  ;;  %2650 = vmax.xlane.f32.xlu2 %v2017_v8  ;;  %v2631_v32 = vpop.xlane.xlu1 %2630  ;;  %v2530_v8 = vpop.f32.mrf.mxu3 }
 0x3eb   :  { %3126 = vst.msk [vmem:[%s7315_s7 + $0xa8] sm:$0xff] %vm3104_vm4, %v2631_v32 }
 0x3ed   :  { %v2887_v37 = vpop.xlane.xlu0 %2886  ;;  %v2885_v56 = vpop.xlane.xlu2 %2884 }
 0x3ee   :  { %4499 = vst.msk [vmem:[%s7315_s7 + $0x4a8] sm:$0xff] %vm3104_vm4, %v2887_v37 }
 0x3ef   :  { %4498 = vst.msk [vmem:[%s7315_s7 + $0x4a0] sm:$0xff] %vm3104_vm4, %v2885_v56  ;;  %2792 = vmax.xlane.f32.xlu1 %v2195_v45  ;;  %v6414_v0 = vpop.f32.mrf.mxu0  ;;  %v2531_v45 = vadd.f32 %v2530_v8, %v5592_v17  ;;  %v2204_v56 = vpop.f32.mrf.mxu2  ;;  %v2356_v17 = vadd.f32 %v6258_v54, %v7500_v57 }
 0x3f0   :  { %v2205_v23 = vadd.f32 %v2204_v56, %v5596_v38 }
 0x3f1   :  { %v6422_v37 = vpop.f32.mrf.mxu1 }
 0x3f2   :  { %3048 = vmax.xlane.f32.xlu0 %v2524_v9  ;;  %3046 = vmax.xlane.f32.xlu2 %v2521_v12  ;;  %v3027_v39 = vpop.xlane.xlu1 %3026  ;;  %v4906_v9 = vld [vmem:[#allocation9 + $0x100] sm:$0xff] }
 0x3f3   :  { %4569 = vst.msk [vmem:[%s7315_s7 + $0x6d8] sm:$0xff] %vm3104_vm4, %v3027_v39  ;;  %v7501_v39 = vld [vmem:[#allocation49_spill] sm:$0xff] }
 0x3f4   :  { %v2359_v36 = vadd.f32 %v6286_v31, %v7501_v39 }
 0x3f5   :  { %v2773_v24 = vpop.xlane.xlu0 %2772  ;;  %v2771_v60 = vpop.xlane.xlu2 %2770 }
 0x3f6   :  { %3197 = vst.msk [vmem:[%s7315_s7 + $0x2e0] sm:$0xff] %vm3104_vm4, %v2773_v24 }
 0x3f7   :  { %3196 = vst.msk [vmem:[%s7315_s7 + $0x2d8] sm:$0xff] %vm3104_vm4, %v2771_v60  ;;  %2654 = vmax.xlane.f32.xlu1 %v2022_v10  ;;  %v6442_v24 = vpop.f32.mrf.mxu0 }
 0x3f8   :  { %2088 = vmatmul.bf16.gmra.mxu0 %v4904_v22 }
 0x3f9   :  { %2417 = vmatmul.bf16.gmra.mxu1 %v4904_v22  ;;  %v2030_v22 = vadd.f32 %v6282_v47, %v7501_v39  ;;  %v2533_v47 = vpop.f32.mrf.mxu3  ;;  %v6444_v60 = vpop.f32.mrf.mxu1 }
 0x3fa   :  { %2910 = vmax.xlane.f32.xlu0 %v2351_v50  ;;  %2908 = vmax.xlane.f32.xlu2 %v2349_v52  ;;  %v2889_v63 = vpop.xlane.xlu1 %2888  ;;  %v2206_v50 = vpop.f32.mrf.mxu2  ;;  %v2534_v54 = vadd.f32 %v2533_v47, %v5596_v38 }
 0x3fb   :  { %4500 = vst.msk [vmem:[%s7315_s7 + $0x4b0] sm:$0xff] %vm3104_vm4, %v2889_v63 }
 0x3fd   :  { %v2635_v25 = vpop.xlane.xlu0 %2634  ;;  %v2633_v33 = vpop.xlane.xlu2 %2632 }
 0x3fe   :  { %3128 = vst.msk [vmem:[%s7315_s7 + $0xb8] sm:$0xff] %vm3104_vm4, %v2635_v25 }
 0x3ff   :  { %3127 = vst.msk [vmem:[%s7315_s7 + $0xb0] sm:$0xff] %vm3104_vm4, %v2633_v33  ;;  %3050 = vmax.xlane.f32.xlu1 %v2526_v3  ;;  %v2207_v3 = vadd.f32 %v2206_v50, %v5599_v30 }
 0x401   :  { %v2535_v25 = vpop.f32.mrf.mxu3 }
 0x402   :  { %2796 = vmax.xlane.f32.xlu0 %v2200_v1  ;;  %2794 = vmax.xlane.f32.xlu2 %v2197_v14  ;;  %v2775_v26 = vpop.xlane.xlu1 %2774  ;;  %v6465_v14 = vpop.f32.mrf.mxu0  ;;  %v2536_v8 = vadd.f32 %v2535_v25, %v5599_v30 }
 0x403   :  { %3198 = vst.msk [vmem:[%s7315_s7 + $0x2e8] sm:$0xff] %vm3104_vm4, %v2775_v26  ;;  %v6467_v1 = vpop.f32.mrf.mxu1  ;;  %v7502_v26 = vld [vmem:[#allocation50_spill] sm:$0xff] }
 0x405   :  { %v3031_v16 = vpop.xlane.xlu0 %3030  ;;  %v3029_v53 = vpop.xlane.xlu2 %3028 }
 0x406   :  { %4571 = vst.msk [vmem:[%s7315_s7 + $0x6e8] sm:$0xff] %vm3104_vm4, %v3031_v16  ;;  %v7503_v16 = vld [vmem:[#allocation51_spill] sm:$0xff] }
 0x407   :  { %4570 = vst.msk [vmem:[%s7315_s7 + $0x6e0] sm:$0xff] %vm3104_vm4, %v3029_v53  ;;  %2912 = vmax.xlane.f32.xlu1 %v2354_v41  ;;  %v2032_v41 = vadd.f32 %v6306_v40, %v7502_v26  ;;  %v2035_v53 = vadd.f32 %v6340_v61, %v7503_v16  ;;  %v2364_v30 = vadd.f32 %v6342_v7, %v7503_v16 }
 0x408   :  { %2093 = vmatmul.bf16.gmra.mxu0 %v4905_v21 }
 0x409   :  { %2422 = vmatmul.bf16.gmra.mxu1 %v4905_v21  ;;  %v2361_v21 = vadd.f32 %v6320_v2, %v7502_v26  ;;  %v2209_v2 = vpop.f32.mrf.mxu2  ;;  %v2538_v57 = vpop.f32.mrf.mxu3 }
 0x40a   :  { %2658 = vmax.xlane.f32.xlu0 %v2027_v59  ;;  %2656 = vmax.xlane.f32.xlu2 %v2025_v51  ;;  %v2637_v58 = vpop.xlane.xlu1 %2636  ;;  %v2210_v59 = vadd.f32 %v2209_v2, %v5603_v43  ;;  %v6488_v40 = vpop.f32.mrf.mxu0 }
 0x40b   :  { %3129 = vst.msk [vmem:[%s7315_s7 + $0xc0] sm:$0xff] %vm3104_vm4, %v2637_v58  ;;  %v6494_v61 = vpop.f32.mrf.mxu1 }
 0x40d   :  { %v2893_v44 = vpop.xlane.xlu0 %2892  ;;  %v2891_v32 = vpop.xlane.xlu2 %2890 }
 0x40e   :  { %4502 = vst.msk [vmem:[%s7315_s7 + $0x4c0] sm:$0xff] %vm3104_vm4, %v2893_v44 }
 0x40f   :  { %4501 = vst.msk [vmem:[%s7315_s7 + $0x4b8] sm:$0xff] %vm3104_vm4, %v2891_v32  ;;  %2798 = vmax.xlane.f32.xlu1 %v2202_v13  ;;  %v2539_v13 = vadd.f32 %v2538_v57, %v5603_v43  ;;  %v7507_v57 = vld [vmem:[#allocation55_spill] sm:$0xff] }
 0x411   :  { %v2211_v44 = vpop.f32.mrf.mxu2 }
 0x412   :  { %3054 = vmax.xlane.f32.xlu0 %v2531_v45  ;;  %3052 = vmax.xlane.f32.xlu2 %v2529_v18  ;;  %v3033_v12 = vpop.xlane.xlu1 %3032  ;;  %v4908_v18 = vld [vmem:[#allocation9 + $0x110] sm:$0xff]  ;;  %v7504_v45 = vld [vmem:[#allocation52_spill] sm:$0xff]  ;;  %v6520_v39 = vpop.f32.mrf.mxu0 }
 0x413   :  { %4572 = vst.msk [vmem:[%s7315_s7 + $0x6f0] sm:$0xff] %vm3104_vm4, %v3033_v12  ;;  %v2037_v56 = vadd.f32 %v6362_v35, %v7504_v45  ;;  %v2366_v43 = vadd.f32 %v6368_v6, %v7504_v45  ;;  %v2540_v35 = vpop.f32.mrf.mxu3 }
 0x414   :  { %v2541_v7 = vadd.f32 %v2540_v35, %v5606_v19 }
 0x415   :  { %v2779_v62 = vpop.xlane.xlu0 %2778  ;;  %v2777_v10 = vpop.xlane.xlu2 %2776 }
 0x416   :  { %3200 = vst.msk [vmem:[%s7315_s7 + $0x2f8] sm:$0xff] %vm3104_vm4, %v2779_v62 }
 0x417   :  { %3199 = vst.msk [vmem:[%s7315_s7 + $0x2f0] sm:$0xff] %vm3104_vm4, %v2777_v10  ;;  %2660 = vmax.xlane.f32.xlu1 %v2030_v22  ;;  %v6522_v22 = vpop.f32.mrf.mxu1 }
 0x418   :  { %2098 = vmatmul.bf16.gmra.mxu0 %v4906_v9 }
 0x419   :  { %2427 = vmatmul.bf16.gmra.mxu1 %v4906_v9  ;;  %v2214_v10 = vpop.f32.mrf.mxu2 }
 0x41a   :  { %2916 = vmax.xlane.f32.xlu0 %v2359_v36  ;;  %2914 = vmax.xlane.f32.xlu2 %v2356_v17  ;;  %v2895_v52 = vpop.xlane.xlu1 %2894  ;;  %v2212_v36 = vadd.f32 %v2211_v44, %v5606_v19  ;;  %v2215_v47 = vadd.f32 %v2214_v10, %v5610_v15 }
 0x41b   :  { %4503 = vst.msk [vmem:[%s7315_s7 + $0x4c8] sm:$0xff] %vm3104_vm4, %v2895_v52  ;;  %v2543_v52 = vpop.f32.mrf.mxu3 }
 0x41d   :  { %v2641_v63 = vpop.xlane.xlu0 %2640  ;;  %v2639_v31 = vpop.xlane.xlu2 %2638 }
 0x41e   :  { %3131 = vst.msk [vmem:[%s7315_s7 + $0xd0] sm:$0xff] %vm3104_vm4, %v2641_v63 }
 0x41f   :  { %3130 = vst.msk [vmem:[%s7315_s7 + $0xc8] sm:$0xff] %vm3104_vm4, %v2639_v31  ;;  %3056 = vmax.xlane.f32.xlu1 %v2534_v54  ;;  %v7505_v54 = vld [vmem:[#allocation53_spill] sm:$0xff] }
 0x420   :  { %v2369_v63 = vadd.f32 %v6391_v49, %v7505_v54  ;;  %v2040_v25 = vadd.f32 %v6387_v5, %v7505_v54  ;;  %v7506_v49 = vld [vmem:[#allocation54_spill] sm:$0xff]  ;;  %v2544_v5 = vadd.f32 %v2543_v52, %v5610_v15 }
 0x421   :  { %v2216_v19 = vpop.f32.mrf.mxu2 }
 0x422   :  { %2802 = vmax.xlane.f32.xlu0 %v2207_v3  ;;  %2800 = vmax.xlane.f32.xlu2 %v2205_v23  ;;  %v2781_v33 = vpop.xlane.xlu1 %2780  ;;  %v6545_v3 = vpop.f32.mrf.mxu1 }
 0x423   :  { %3201 = vst.msk [vmem:[%s7315_s7 + $0x300] sm:$0xff] %vm3104_vm4, %v2781_v33  ;;  %v2042_v33 = vadd.f32 %v6414_v0, %v7506_v49 }
 0x425   :  { %v3037_v38 = vpop.xlane.xlu0 %3036  ;;  %v3035_v55 = vpop.xlane.xlu2 %3034 }
 0x426   :  { %4574 = vst.msk [vmem:[%s7315_s7 + $0x700] sm:$0xff] %vm3104_vm4, %v3037_v38  ;;  %v2217_v38 = vadd.f32 %v2216_v19, %v5612_v48  ;;  %v7509_v19 = vld [vmem:[#allocation57_spill] sm:$0xff] }
 0x427   :  { %4573 = vst.msk [vmem:[%s7315_s7 + $0x6f8] sm:$0xff] %vm3104_vm4, %v3035_v55  ;;  %2918 = vmax.xlane.f32.xlu1 %v2361_v21  ;;  %v2545_v21 = vpop.f32.mrf.mxu3 }
 0x428   :  { %2103 = vmatmul.bf16.gmra.mxu0 %v4907_v20  ;;  %v2546_v0 = vadd.f32 %v2545_v21, %v5612_v48  ;;  %v2371_v48 = vadd.f32 %v6422_v37, %v7506_v49 }
 0x429   :  { %2432 = vmatmul.bf16.gmra.mxu1 %v4907_v20  ;;  %v6559_v20 = vpop.f32.mrf.mxu0 }
 0x42a   :  { %2664 = vmax.xlane.f32.xlu0 %v2035_v53  ;;  %2662 = vmax.xlane.f32.xlu2 %v2032_v41  ;;  %v2643_v51 = vpop.xlane.xlu1 %2642  ;;  %v6576_v16 = vpop.f32.mrf.mxu1 }
 0x42b   :  { %3132 = vst.msk [vmem:[%s7315_s7 + $0xd8] sm:$0xff] %vm3104_vm4, %v2643_v51  ;;  %v2219_v53 = vpop.f32.mrf.mxu2 }
 0x42d   :  { %v2899_v34 = vpop.xlane.xlu0 %2898  ;;  %v2897_v58 = vpop.xlane.xlu2 %2896 }
 0x42e   :  { %4505 = vst.msk [vmem:[%s7315_s7 + $0x4d8] sm:$0xff] %vm3104_vm4, %v2899_v34 }
 0x42f   :  { %4504 = vst.msk [vmem:[%s7315_s7 + $0x4d0] sm:$0xff] %vm3104_vm4, %v2897_v58  ;;  %2804 = vmax.xlane.f32.xlu1 %v2210_v59  ;;  %v2045_v59 = vadd.f32 %v6442_v24, %v7507_v57  ;;  %v2374_v58 = vadd.f32 %v6444_v60, %v7507_v57  ;;  %v2548_v24 = vpop.f32.mrf.mxu3  ;;  %v2220_v60 = vadd.f32 %v2219_v53, %v5615_v27 }
 0x431   :  { %v6578_v2 = vpop.f32.mrf.mxu0 }
 0x432   :  { %3060 = vmax.xlane.f32.xlu0 %v2539_v13  ;;  %3058 = vmax.xlane.f32.xlu2 %v2536_v8  ;;  %v3039_v32 = vpop.xlane.xlu1 %3038  ;;  %v6598_v8 = vpop.f32.mrf.mxu1 }
 0x433   :  { %4575 = vst.msk [vmem:[%s7315_s7 + $0x708] sm:$0xff] %vm3104_vm4, %v3039_v32  ;;  %v2221_v44 = vpop.f32.mrf.mxu2 }
 0x435   :  { %v2785_v12 = vpop.xlane.xlu0 %2784  ;;  %v2783_v9 = vpop.xlane.xlu2 %2782 }
 0x436   :  { %3203 = vst.msk [vmem:[%s7315_s7 + $0x310] sm:$0xff] %vm3104_vm4, %v2785_v12 }
 0x437   :  { %3202 = vst.msk [vmem:[%s7315_s7 + $0x308] sm:$0xff] %vm3104_vm4, %v2783_v9  ;;  %2666 = vmax.xlane.f32.xlu1 %v2037_v56  ;;  %v2222_v56 = vadd.f32 %v2221_v44, %v5619_v46  ;;  %v2550_v12 = vpop.f32.mrf.mxu3  ;;  %v7513_v44 = vld [vmem:[#allocation59_spill] sm:$0xff] }
 0x438   :  { %2108 = vmatmul.bf16.gmra.mxu0 %v4908_v18 }
 0x439   :  { %2437 = vmatmul.bf16.gmra.mxu1 %v4908_v18  ;;  %v6604_v32 = vpop.f32.mrf.mxu0  ;;  %v2549_v18 = vadd.f32 %v2548_v24, %v5615_v27 }
 0x43a   :  { %2922 = vmax.xlane.f32.xlu0 %v2366_v43  ;;  %2920 = vmax.xlane.f32.xlu2 %v2364_v30  ;;  %v2901_v62 = vpop.xlane.xlu1 %2900  ;;  %v6621_v30 = vpop.f32.mrf.mxu1  ;;  %v7508_v43 = vld [vmem:[#allocation56_spill] sm:$0xff] }
 0x43b   :  { %4506 = vst.msk [vmem:[%s7315_s7 + $0x4e0] sm:$0xff] %vm3104_vm4, %v2901_v62  ;;  %v2376_v35 = vadd.f32 %v6467_v1, %v7508_v43  ;;  %v2047_v27 = vadd.f32 %v6465_v14, %v7508_v43  ;;  %v2050_v1 = vadd.f32 %v6488_v40, %v5412_v42  ;;  %v2551_v14 = vadd.f32 %v2550_v12, %v5619_v46 }
 0x43d   :  { %v2647_v17 = vpop.xlane.xlu0 %2646  ;;  %v2645_v6 = vpop.xlane.xlu2 %2644 }
 0x43e   :  { %3134 = vst.msk [vmem:[%s7315_s7 + $0xe8] sm:$0xff] %vm3104_vm4, %v2647_v17  ;;  %v2224_v17 = vpop.f32.mrf.mxu2 }
 0x43f   :  { %3133 = vst.msk [vmem:[%s7315_s7 + $0xe0] sm:$0xff] %vm3104_vm4, %v2645_v6  ;;  %3062 = vmax.xlane.f32.xlu1 %v2541_v7 }
 0x441   :  { %v6625_v7 = vpop.f32.mrf.mxu0 }
 0x442   :  { %2808 = vmax.xlane.f32.xlu0 %v2215_v47  ;;  %2806 = vmax.xlane.f32.xlu2 %v2212_v36  ;;  %v2787_v50 = vpop.xlane.xlu1 %2786  ;;  %v2553_v36 = vpop.f32.mrf.mxu3  ;;  %v2225_v47 = vadd.f32 %v2224_v17, %v5621_v29 }
 0x443   :  { %3204 = vst.msk [vmem:[%s7315_s7 + $0x318] sm:$0xff] %vm3104_vm4, %v2787_v50  ;;  %v6644_v54 = vpop.f32.mrf.mxu1  ;;  %v2554_v40 = vadd.f32 %v2553_v36, %v5621_v29  ;;  %v2379_v29 = vadd.f32 %v6494_v61, %v5412_v42 }
 0x445   :  { %v3043_v31 = vpop.xlane.xlu0 %3042  ;;  %v3041_v23 = vpop.xlane.xlu2 %3040 }
 0x446   :  { %4577 = vst.msk [vmem:[%s7315_s7 + $0x718] sm:$0xff] %vm3104_vm4, %v3043_v31  ;;  %v2226_v31 = vpop.f32.mrf.mxu2 }
 0x447   :  { %4576 = vst.msk [vmem:[%s7315_s7 + $0x710] sm:$0xff] %vm3104_vm4, %v3041_v23  ;;  %2924 = vmax.xlane.f32.xlu1 %v2369_v63 }
 0x449   :  { %v6656_v63 = vpop.f32.mrf.mxu0 }
 0x44a   :  { %2670 = vmax.xlane.f32.xlu0 %v2042_v33  ;;  %2668 = vmax.xlane.f32.xlu2 %v2040_v25  ;;  %v2649_v26 = vpop.xlane.xlu1 %2648  ;;  %v2052_v25 = vadd.f32 %v6520_v39, %v7509_v19  ;;  %v2555_v46 = vpop.f32.mrf.mxu3  ;;  %v2381_v39 = vadd.f32 %v6522_v22, %v7509_v19  ;;  %v7511_v22 = vld [vmem:[#allocation17_spill] sm:$0xff] }
 0x44b   :  { %3135 = vst.msk [vmem:[%s7315_s7 + $0xf0] sm:$0xff] %vm3104_vm4, %v2649_v26  ;;  %v6676_v26 = vpop.f32.mrf.mxu1 }
 0x44d   :  { %v2905_v55 = vpop.xlane.xlu0 %2904  ;;  %v2903_v41 = vpop.xlane.xlu2 %2902 }
 0x44e   :  { %4508 = vst.msk [vmem:[%s7315_s7 + $0x4f0] sm:$0xff] %vm3104_vm4, %v2905_v55  ;;  %v2229_v55 = vpop.f32.mrf.mxu2 }
 0x44f   :  { %4507 = vst.msk [vmem:[%s7315_s7 + $0x4e8] sm:$0xff] %vm3104_vm4, %v2903_v41  ;;  %2810 = vmax.xlane.f32.xlu1 %v2217_v38  ;;  %v7510_v41 = vld [vmem:[#allocation16_spill] sm:$0xff]  ;;  %v2230_v53 = vadd.f32 %v2229_v55, %v7511_v22 }
 0x450   :  { %v2227_v61 = vadd.f32 %v2226_v31, %v7510_v41  ;;  %v7516_v31 = vld [vmem:[#allocation19_spill] sm:$0xff] }
 0x451   :  { %v6678_v21 = vpop.f32.mrf.mxu0 }
 0x452   :  { %3066 = vmax.xlane.f32.xlu0 %v2546_v0  ;;  %3064 = vmax.xlane.f32.xlu2 %v2544_v5  ;;  %v3045_v51 = vpop.xlane.xlu1 %3044  ;;  %v2556_v5 = vadd.f32 %v2555_v46, %v7510_v41 }
 0x453   :  { %4578 = vst.msk [vmem:[%s7315_s7 + $0x720] sm:$0xff] %vm3104_vm4, %v3045_v51  ;;  %v2558_v51 = vpop.f32.mrf.mxu3  ;;  %v6695_v57 = vpop.f32.mrf.mxu1 }
 0x455   :  { %v2791_v34 = vpop.xlane.xlu0 %2790  ;;  %v2789_v15 = vpop.xlane.xlu2 %2788 }
 0x456   :  { %3206 = vst.msk [vmem:[%s7315_s7 + $0x328] sm:$0xff] %vm3104_vm4, %v2791_v34 }
 0x457   :  { %3205 = vst.msk [vmem:[%s7315_s7 + $0x320] sm:$0xff] %vm3104_vm4, %v2789_v15  ;;  %2672 = vmax.xlane.f32.xlu1 %v2045_v59  ;;  %v7512_v15 = vld [vmem:[#allocation58_spill] sm:$0xff] }
 0x459   :  { %v6701_v34 = vpop.f32.mrf.mxu0 }
 0x45a   :  { %2928 = vmax.xlane.f32.xlu0 %v2374_v58  ;;  %2926 = vmax.xlane.f32.xlu2 %v2371_v48  ;;  %v2907_v13 = vpop.xlane.xlu1 %2906  ;;  %v2384_v48 = vadd.f32 %v6545_v3, %v7512_v15  ;;  %v2231_v3 = vpop.f32.mrf.mxu2 }
 0x45b   :  { %4509 = vst.msk [vmem:[%s7315_s7 + $0x4f8] sm:$0xff] %vm3104_vm4, %v2907_v13  ;;  %v2055_v13 = vadd.f32 %v6559_v20, %v7512_v15 }
 0x45d   :  { %v2653_v37 = vpop.xlane.xlu0 %2652  ;;  %v2651_v45 = vpop.xlane.xlu2 %2650 }
 0x45e   :  { %3137 = vst.msk [vmem:[%s7315_s7 + $0x100] sm:$0xff] %vm3104_vm4, %v2653_v37 }
 0x45f   :  { %3136 = vst.msk [vmem:[%s7315_s7 + $0xf8] sm:$0xff] %vm3104_vm4, %v2651_v45  ;;  %3068 = vmax.xlane.f32.xlu1 %v2549_v18  ;;  %v2057_v18 = vadd.f32 %v6578_v2, %v7513_v44  ;;  %v2560_v45 = vpop.f32.mrf.mxu3  ;;  %v2559_v2 = vadd.f32 %v2558_v51, %v7511_v22 }
 0x461   :  { %v6724_v20 = vpop.f32.mrf.mxu0 }
 0x462   :  { %2814 = vmax.xlane.f32.xlu0 %v2222_v56  ;;  %2812 = vmax.xlane.f32.xlu2 %v2220_v60  ;;  %v2793_v9 = vpop.xlane.xlu1 %2792  ;;  %v6721_v60 = vpop.f32.mrf.mxu1  ;;  %v7514_v56 = vld [vmem:[#allocation18_spill] sm:$0xff] }
 0x463   :  { %3207 = vst.msk [vmem:[%s7315_s7 + $0x330] sm:$0xff] %vm3104_vm4, %v2793_v9  ;;  %v2232_v12 = vadd.f32 %v2231_v3, %v7514_v56 }
 0x465   :  { %v3049_v62 = vpop.xlane.xlu0 %3048  ;;  %v3047_v10 = vpop.xlane.xlu2 %3046 }
 0x466   :  { %4580 = vst.msk [vmem:[%s7315_s7 + $0x730] sm:$0xff] %vm3104_vm4, %v3049_v62  ;;  %v2234_v62 = vpop.f32.mrf.mxu2 }
 0x467   :  { %4579 = vst.msk [vmem:[%s7315_s7 + $0x728] sm:$0xff] %vm3104_vm4, %v3047_v10  ;;  %2930 = vmax.xlane.f32.xlu1 %v2376_v35  ;;  %v2561_v35 = vadd.f32 %v2560_v45, %v7514_v56 }
 0x46a   :  { %2676 = vmax.xlane.f32.xlu0 %v2050_v1  ;;  %2674 = vmax.xlane.f32.xlu2 %v2047_v27  ;;  %v2655_v6 = vpop.xlane.xlu1 %2654  ;;  %v7515_v27 = vld [vmem:[#allocation60_spill] sm:$0xff]  ;;  %v6742_v36 = vpop.f32.mrf.mxu1 }
 0x46b   :  { %3138 = vst.msk [vmem:[%s7315_s7 + $0x108] sm:$0xff] %vm3104_vm4, %v2655_v6  ;;  %v2060_v1 = vadd.f32 %v6604_v32, %v7515_v27  ;;  %v2389_v32 = vadd.f32 %v6598_v8, %v7515_v27 }
 0x46d   :  { %v2911_v52 = vpop.xlane.xlu0 %2910  ;;  %v2909_v50 = vpop.xlane.xlu2 %2908 }
 0x46e   :  { %4511 = vst.msk [vmem:[%s7315_s7 + $0x508] sm:$0xff] %vm3104_vm4, %v2911_v52  ;;  %v2386_v52 = vadd.f32 %v6576_v16, %v7513_v44  ;;  %v2235_v16 = vadd.f32 %v2234_v62, %v7516_v31  ;;  %v7519_v44 = vld [vmem:[#allocation63_spill] sm:$0xff] }
 0x46f   :  { %4510 = vst.msk [vmem:[%s7315_s7 + $0x500] sm:$0xff] %vm3104_vm4, %v2909_v50  ;;  %2816 = vmax.xlane.f32.xlu1 %v2225_v47  ;;  %v2563_v47 = vpop.f32.mrf.mxu3  ;;  %v6756_v50 = vpop.f32.mrf.mxu0 }
 0x472   :  { %3072 = vmax.xlane.f32.xlu0 %v2554_v40  ;;  %3070 = vmax.xlane.f32.xlu2 %v2551_v14  ;;  %v3051_v23 = vpop.xlane.xlu1 %3050  ;;  %v2236_v40 = vpop.f32.mrf.mxu2 }
 0x473   :  { %4581 = vst.msk [vmem:[%s7315_s7 + $0x738] sm:$0xff] %vm3104_vm4, %v3051_v23  ;;  %v2564_v23 = vadd.f32 %v2563_v47, %v7516_v31  ;;  %v2237_v8 = vadd.f32 %v2236_v40, %v5642_v4  ;;  %v7523_v31 = vld [vmem:[#allocation65_spill] sm:$0xff] }
 0x475   :  { %v2797_v49 = vpop.xlane.xlu0 %2796  ;;  %v2795_v33 = vpop.xlane.xlu2 %2794 }
 0x476   :  { %3209 = vst.msk [vmem:[%s7315_s7 + $0x340] sm:$0xff] %vm3104_vm4, %v2797_v49  ;;  %v6773_v49 = vpop.f32.mrf.mxu1 }
 0x477   :  { %3208 = vst.msk [vmem:[%s7315_s7 + $0x338] sm:$0xff] %vm3104_vm4, %v2795_v33  ;;  %2678 = vmax.xlane.f32.xlu1 %v2052_v25  ;;  %v2565_v33 = vpop.f32.mrf.mxu3  ;;  %v6775_v46 = vpop.f32.mrf.mxu0 }
 0x47a   :  { %2934 = vmax.xlane.f32.xlu0 %v2381_v39  ;;  %2932 = vmax.xlane.f32.xlu2 %v2379_v29  ;;  %v2913_v38 = vpop.xlane.xlu1 %2912  ;;  %v7517_v39 = vld [vmem:[#allocation61_spill] sm:$0xff] }
 0x47b   :  { %4512 = vst.msk [vmem:[%s7315_s7 + $0x510] sm:$0xff] %vm3104_vm4, %v2913_v38  ;;  %v2391_v38 = vadd.f32 %v6621_v30, %v7517_v39  ;;  %v2239_v30 = vpop.f32.mrf.mxu2 }
 0x47d   :  { %v2659_v0 = vpop.xlane.xlu0 %2658  ;;  %v2657_v42 = vpop.xlane.xlu2 %2656 }
 0x47e   :  { %3140 = vst.msk [vmem:[%s7315_s7 + $0x118] sm:$0xff] %vm3104_vm4, %v2659_v0  ;;  %v7518_v0 = vld [vmem:[#allocation62_spill] sm:$0xff] }
 0x47f   :  { %3139 = vst.msk [vmem:[%s7315_s7 + $0x110] sm:$0xff] %vm3104_vm4, %v2657_v42  ;;  %3074 = vmax.xlane.f32.xlu1 %v2556_v5  ;;  %v2062_v5 = vadd.f32 %v6625_v7, %v7517_v39  ;;  %v2065_v42 = vadd.f32 %v6656_v63, %v7518_v0  ;;  %v6801_v51 = vpop.f32.mrf.mxu0  ;;  %v2566_v63 = vadd.f32 %v2565_v33, %v5642_v4 }
 0x480   :  { %v2394_v4 = vadd.f32 %v6644_v54, %v7518_v0  ;;  %v7525_v0 = vld [vmem:[#allocation66_spill] sm:$0xff] }
 0x482   :  { %2820 = vmax.xlane.f32.xlu0 %v2230_v53  ;;  %2818 = vmax.xlane.f32.xlu2 %v2227_v61  ;;  %v2799_v59 = vpop.xlane.xlu1 %2798  ;;  %v6795_v61 = vpop.f32.mrf.mxu1 }
 0x483   :  { %3210 = vst.msk [vmem:[%s7315_s7 + $0x348] sm:$0xff] %vm3104_vm4, %v2799_v59  ;;  %v2568_v53 = vpop.f32.mrf.mxu3  ;;  %v2240_v59 = vadd.f32 %v2239_v30, %v5646_v28 }
 0x485   :  { %v3055_v58 = vpop.xlane.xlu0 %3054  ;;  %v3053_v24 = vpop.xlane.xlu2 %3052 }
 0x486   :  { %4583 = vst.msk [vmem:[%s7315_s7 + $0x748] sm:$0xff] %vm3104_vm4, %v3055_v58  ;;  %v2241_v58 = vpop.f32.mrf.mxu2 }
 0x487   :  { %4582 = vst.msk [vmem:[%s7315_s7 + $0x740] sm:$0xff] %vm3104_vm4, %v3053_v24  ;;  %2936 = vmax.xlane.f32.xlu1 %v2384_v48  ;;  %v2569_v48 = vadd.f32 %v2568_v53, %v5646_v28  ;;  %v6822_v45 = vpop.f32.mrf.mxu0  ;;  %v2396_v28 = vadd.f32 %v6676_v26, %v7519_v44  ;;  %v7521_v26 = vld [vmem:[#allocation21_spill] sm:$0xff]  ;;  %v2401_v53 = vadd.f32 %v6721_v60, %v7523_v31 }
 0x48a   :  { %2682 = vmax.xlane.f32.xlu0 %v2057_v18  ;;  %2680 = vmax.xlane.f32.xlu2 %v2055_v13  ;;  %v2661_v37 = vpop.xlane.xlu1 %2660  ;;  %v6818_v13 = vpop.f32.mrf.mxu1  ;;  %v2067_v18 = vadd.f32 %v6678_v21, %v7519_v44 }
 0x48b   :  { %3141 = vst.msk [vmem:[%s7315_s7 + $0x120] sm:$0xff] %vm3104_vm4, %v2661_v37  ;;  %v2570_v21 = vpop.f32.mrf.mxu3 }
 0x48d   :  { %v2917_v9 = vpop.xlane.xlu0 %2916  ;;  %v2915_v43 = vpop.xlane.xlu2 %2914 }
 0x48e   :  { %4514 = vst.msk [vmem:[%s7315_s7 + $0x520] sm:$0xff] %vm3104_vm4, %v2917_v9  ;;  %v7520_v9 = vld [vmem:[#allocation20_spill] sm:$0xff] }
 0x48f   :  { %4513 = vst.msk [vmem:[%s7315_s7 + $0x518] sm:$0xff] %vm3104_vm4, %v2915_v43  ;;  %2822 = vmax.xlane.f32.xlu1 %v2232_v12  ;;  %v2244_v12 = vpop.f32.mrf.mxu2  ;;  %v2571_v43 = vadd.f32 %v2570_v21, %v7520_v9  ;;  %v2242_v54 = vadd.f32 %v2241_v58, %v7520_v9  ;;  %v6853_v27 = vpop.f32.mrf.mxu0 }
 0x492   :  { %3078 = vmax.xlane.f32.xlu0 %v2561_v35  ;;  %3076 = vmax.xlane.f32.xlu2 %v2559_v2  ;;  %v3057_v10 = vpop.xlane.xlu1 %3056  ;;  %v6841_v62 = vpop.f32.mrf.mxu1 }
 0x493   :  { %4584 = vst.msk [vmem:[%s7315_s7 + $0x750] sm:$0xff] %vm3104_vm4, %v3057_v10  ;;  %v2245_v10 = vadd.f32 %v2244_v12, %v7521_v26 }
 0x495   :  { %v2803_v17 = vpop.xlane.xlu0 %2802  ;;  %v2801_v6 = vpop.xlane.xlu2 %2800 }
 0x496   :  { %3212 = vst.msk [vmem:[%s7315_s7 + $0x358] sm:$0xff] %vm3104_vm4, %v2803_v17 }
 0x497   :  { %3211 = vst.msk [vmem:[%s7315_s7 + $0x350] sm:$0xff] %vm3104_vm4, %v2801_v6  ;;  %2684 = vmax.xlane.f32.xlu1 %v2060_v1  ;;  %v2573_v1 = vpop.f32.mrf.mxu3  ;;  %v7522_v6 = vld [vmem:[#allocation64_spill] sm:$0xff] }
 0x498   :  { %v2399_v47 = vadd.f32 %v6695_v57, %v7522_v6  ;;  %v2070_v40 = vadd.f32 %v6701_v34, %v7522_v6  ;;  %v2072_v57 = vadd.f32 %v6724_v20, %v7523_v31  ;;  %v2574_v20 = vadd.f32 %v2573_v1, %v7521_v26  ;;  %v7530_v26 = vld [vmem:[#allocation84_spill] sm:$0xff] }
 0x49a   :  { %2940 = vmax.xlane.f32.xlu0 %v2389_v32  ;;  %2938 = vmax.xlane.f32.xlu2 %v2386_v52  ;;  %v2919_v14 = vpop.xlane.xlu1 %2918 }
 0x49b   :  { %4515 = vst.msk [vmem:[%s7315_s7 + $0x528] sm:$0xff] %vm3104_vm4, %v2919_v14  ;;  %v2246_v14 = vpop.f32.mrf.mxu2 }
 0x49d   :  { %v2665_v19 = vpop.xlane.xlu0 %2664  ;;  %v2663_v25 = vpop.xlane.xlu2 %2662 }
 0x49e   :  { %3143 = vst.msk [vmem:[%s7315_s7 + $0x130] sm:$0xff] %vm3104_vm4, %v2665_v19  ;;  %v6875_v19 = vpop.f32.mrf.mxu0 }
 0x49f   :  { %3142 = vst.msk [vmem:[%s7315_s7 + $0x128] sm:$0xff] %vm3104_vm4, %v2663_v25  ;;  %3080 = vmax.xlane.f32.xlu1 %v2564_v23  ;;  %v6873_v23 = vpop.f32.mrf.mxu1 }
 0x4a2   :  { %2826 = vmax.xlane.f32.xlu0 %v2237_v8  ;;  %2824 = vmax.xlane.f32.xlu2 %v2235_v16  ;;  %v2805_v29 = vpop.xlane.xlu1 %2804  ;;  %v2575_v16 = vpop.f32.mrf.mxu3  ;;  %v7524_v8 = vld [vmem:[#allocation22_spill] sm:$0xff] }
 0x4a3   :  { %3213 = vst.msk [vmem:[%s7315_s7 + $0x360] sm:$0xff] %vm3104_vm4, %v2805_v29  ;;  %v2247_v33 = vadd.f32 %v2246_v14, %v7524_v8  ;;  %v2576_v39 = vadd.f32 %v2575_v16, %v7524_v8 }
 0x4a5   :  { %v3061_v55 = vpop.xlane.xlu0 %3060  ;;  %v3059_v41 = vpop.xlane.xlu2 %3058 }
 0x4a6   :  { %4586 = vst.msk [vmem:[%s7315_s7 + $0x760] sm:$0xff] %vm3104_vm4, %v3061_v55 }
 0x4a7   :  { %4585 = vst.msk [vmem:[%s7315_s7 + $0x758] sm:$0xff] %vm3104_vm4, %v3059_v41  ;;  %2942 = vmax.xlane.f32.xlu1 %v2391_v38  ;;  %v2249_v38 = vpop.f32.mrf.mxu2  ;;  %v6892_v55 = vpop.f32.mrf.mxu1 }
 0x4aa   :  { %2688 = vmax.xlane.f32.xlu0 %v2065_v42  ;;  %2686 = vmax.xlane.f32.xlu2 %v2062_v5  ;;  %v2667_v22 = vpop.xlane.xlu1 %2666  ;;  %v6898_v5 = vpop.f32.mrf.mxu0  ;;  %v2075_v42 = vadd.f32 %v6756_v50, %v7525_v0 }
 0x4ab   :  { %3144 = vst.msk [vmem:[%s7315_s7 + $0x138] sm:$0xff] %vm3104_vm4, %v2667_v22  ;;  %v2578_v50 = vpop.f32.mrf.mxu3 }
 0x4ad   :  { %v2923_v7 = vpop.xlane.xlu0 %2922  ;;  %v2921_v15 = vpop.xlane.xlu2 %2920 }
 0x4ae   :  { %4517 = vst.msk [vmem:[%s7315_s7 + $0x538] sm:$0xff] %vm3104_vm4, %v2923_v7 }
 0x4af   :  { %4516 = vst.msk [vmem:[%s7315_s7 + $0x530] sm:$0xff] %vm3104_vm4, %v2921_v15  ;;  %2828 = vmax.xlane.f32.xlu1 %v2240_v59  ;;  %v2404_v59 = vadd.f32 %v6742_v36, %v7525_v0  ;;  %v2251_v15 = vpop.f32.mrf.mxu2 }
 0x4b2   :  { %3084 = vmax.xlane.f32.xlu0 %v2569_v48  ;;  %3082 = vmax.xlane.f32.xlu2 %v2566_v63  ;;  %v3063_v24 = vpop.xlane.xlu1 %3062  ;;  %v6918_v63 = vpop.f32.mrf.mxu1  ;;  %v7526_v48 = vld [vmem:[#allocation82_spill] sm:$0xff] }
 0x4b3   :  { %4587 = vst.msk [vmem:[%s7315_s7 + $0x768] sm:$0xff] %vm3104_vm4, %v3063_v24  ;;  %v2579_v58 = vadd.f32 %v2578_v50, %v7526_v48  ;;  %v6921_v60 = vpop.f32.mrf.mxu0  ;;  %v2250_v36 = vadd.f32 %v2249_v38, %v7526_v48 }
 0x4b5   :  { %v2809_v3 = vpop.xlane.xlu0 %2808  ;;  %v2807_v37 = vpop.xlane.xlu2 %2806 }
 0x4b6   :  { %3215 = vst.msk [vmem:[%s7315_s7 + $0x370] sm:$0xff] %vm3104_vm4, %v2809_v3 }
 0x4b7   :  { %3214 = vst.msk [vmem:[%s7315_s7 + $0x368] sm:$0xff] %vm3104_vm4, %v2807_v37  ;;  %2690 = vmax.xlane.f32.xlu1 %v2067_v18  ;;  %v7527_v18 = vld [vmem:[#allocation83_spill] sm:$0xff] }
 0x4b8   :  { %v2252_v3 = vadd.f32 %v2251_v15, %v7527_v18 }
 0x4ba   :  { %2946 = vmax.xlane.f32.xlu0 %v2396_v28  ;;  %2944 = vmax.xlane.f32.xlu2 %v2394_v4  ;;  %v2925_v56 = vpop.xlane.xlu1 %2924  ;;  %v7528_v4 = vld [vmem:[#allocation67_spill] sm:$0xff]  ;;  %v6939_v12 = vpop.f32.mrf.mxu1 }
 0x4bb   :  { %4518 = vst.msk [vmem:[%s7315_s7 + $0x540] sm:$0xff] %vm3104_vm4, %v2925_v56  ;;  %v2406_v28 = vadd.f32 %v6773_v49, %v7528_v4  ;;  %v2077_v9 = vadd.f32 %v6775_v46, %v7528_v4  ;;  %v7538_v4 = vld [vmem:[#allocation77_spill] sm:$0xff] }
 0x4bd   :  { %v2671_v2 = vpop.xlane.xlu0 %2670  ;;  %v2669_v35 = vpop.xlane.xlu2 %2668 }
 0x4be   :  { %3146 = vst.msk [vmem:[%s7315_s7 + $0x148] sm:$0xff] %vm3104_vm4, %v2671_v2  ;;  %v2094_v2 = vpop.f32.mrf.mxu0 }
 0x4bf   :  { %3145 = vst.msk [vmem:[%s7315_s7 + $0x140] sm:$0xff] %vm3104_vm4, %v2669_v35  ;;  %3086 = vmax.xlane.f32.xlu1 %v2571_v43  ;;  %v7529_v43 = vld [vmem:[#allocation68_spill] sm:$0xff]  ;;  %v2254_v35 = vpop.f32.mrf.mxu2 }
 0x4c0   :  { %v2080_v49 = vadd.f32 %v6801_v51, %v7529_v43  ;;  %v2409_v46 = vadd.f32 %v6795_v61, %v7529_v43  ;;  %v7531_v51 = vld [vmem:[#allocation69_spill] sm:$0xff]  ;;  %v7539_v43 = vld [vmem:[#allocation76_spill] sm:$0xff] }
 0x4c1   :  { %v2411_v6 = vadd.f32 %v6818_v13, %v7531_v51  ;;  %v7532_v13 = vld [vmem:[#allocation71_spill] sm:$0xff] }
 0x4c2   :  { %2832 = vmax.xlane.f32.xlu0 %v2245_v10  ;;  %2830 = vmax.xlane.f32.xlu2 %v2242_v54  ;;  %v2811_v17 = vpop.xlane.xlu1 %2810  ;;  %v2255_v10 = vadd.f32 %v2254_v35, %v7530_v26 }
 0x4c3   :  { %3216 = vst.msk [vmem:[%s7315_s7 + $0x378] sm:$0xff] %vm3104_vm4, %v2811_v17 }
 0x4c5   :  { %v3067_v52 = vpop.xlane.xlu0 %3066  ;;  %v3065_v32 = vpop.xlane.xlu2 %3064 }
 0x4c6   :  { %4589 = vst.msk [vmem:[%s7315_s7 + $0x778] sm:$0xff] %vm3104_vm4, %v3067_v52  ;;  %v2096_v52 = vpop.f32.mrf.mxu0 }
 0x4c7   :  { %4588 = vst.msk [vmem:[%s7315_s7 + $0x770] sm:$0xff] %vm3104_vm4, %v3065_v32  ;;  %2948 = vmax.xlane.f32.xlu1 %v2399_v47  ;;  %v2425_v47 = vpop.f32.mrf.mxu1  ;;  %v2256_v14 = vpop.f32.mrf.mxu2 }
 0x4c8   :  { %v2257_v61 = vadd.f32 %v2256_v14, %v5684_v11  ;;  %v7541_v14 = vld [vmem:[#allocation80_spill] sm:$0xff] }
 0x4ca   :  { %2694 = vmax.xlane.f32.xlu0 %v2072_v57  ;;  %2692 = vmax.xlane.f32.xlu2 %v2070_v40  ;;  %v2673_v25 = vpop.xlane.xlu1 %2672  ;;  %v2082_v40 = vadd.f32 %v6822_v45, %v7531_v51 }
 0x4cb   :  { %3147 = vst.msk [vmem:[%s7315_s7 + $0x150] sm:$0xff] %vm3104_vm4, %v2673_v25  ;;  %v2087_v25 = vadd.f32 %v6875_v19, %v7532_v13 }
 0x4cd   :  { %v2929_v29 = vpop.xlane.xlu0 %2928  ;;  %v2927_v34 = vpop.xlane.xlu2 %2926 }
 0x4ce   :  { %4520 = vst.msk [vmem:[%s7315_s7 + $0x550] sm:$0xff] %vm3104_vm4, %v2929_v29  ;;  %v2099_v8 = vpop.f32.mrf.mxu0 }
 0x4cf   :  { %4519 = vst.msk [vmem:[%s7315_s7 + $0x548] sm:$0xff] %vm3104_vm4, %v2927_v34  ;;  %2834 = vmax.xlane.f32.xlu1 %v2247_v33  ;;  %v2428_v16 = vpop.f32.mrf.mxu1  ;;  %v7533_v33 = vld [vmem:[#allocation70_spill] sm:$0xff] }
 0x4d0   :  { %v2414_v29 = vadd.f32 %v6841_v62, %v7533_v33  ;;  %v2085_v19 = vadd.f32 %v6853_v27, %v7533_v33  ;;  %v2416_v27 = vadd.f32 %v6873_v23, %v7532_v13  ;;  %v7543_v33 = vld [vmem:[#allocation81_spill] sm:$0xff] }
 0x4d2   :  { %3090 = vmax.xlane.f32.xlu0 %v2576_v39  ;;  %3088 = vmax.xlane.f32.xlu2 %v2574_v20  ;;  %v3069_v41 = vpop.xlane.xlu1 %3068  ;;  %v7534_v39 = vld [vmem:[#allocation72_spill] sm:$0xff] }
 0x4d3   :  { %4590 = vst.msk [vmem:[%s7315_s7 + $0x780] sm:$0xff] %vm3104_vm4, %v3069_v41  ;;  %v2419_v38 = vadd.f32 %v6892_v55, %v7534_v39  ;;  %v2090_v0 = vadd.f32 %v6898_v5, %v7534_v39  ;;  %v7535_v55 = vld [vmem:[#allocation74_spill] sm:$0xff] }
 0x4d5   :  { %v2815_v30 = vpop.xlane.xlu0 %2814  ;;  %v2813_v22 = vpop.xlane.xlu2 %2812 }
 0x4d6   :  { %3218 = vst.msk [vmem:[%s7315_s7 + $0x388] sm:$0xff] %vm3104_vm4, %v2815_v30 }
 0x4d7   :  { %3217 = vst.msk [vmem:[%s7315_s7 + $0x380] sm:$0xff] %vm3104_vm4, %v2813_v22  ;;  %2696 = vmax.xlane.f32.xlu1 %v2075_v42  ;;  %v7009_v41 = vpop.f32.mrf.mxu1  ;;  %v2101_v22 = vpop.f32.mrf.mxu0 }
 0x4da   :  { %2952 = vmax.xlane.f32.xlu0 %v2404_v59  ;;  %2950 = vmax.xlane.f32.xlu2 %v2401_v53  ;;  %v2931_v7 = vpop.xlane.xlu1 %2930  ;;  %v2095_v53 = vadd.f32 %v2094_v2, %v7535_v55  ;;  %v7536_v59 = vld [vmem:[#allocation73_spill] sm:$0xff] }
 0x4db   :  { %4521 = vst.msk [vmem:[%s7315_s7 + $0x558] sm:$0xff] %vm3104_vm4, %v2931_v7  ;;  %v2421_v50 = vadd.f32 %v6918_v63, %v7536_v59  ;;  %v2092_v23 = vadd.f32 %v6921_v60, %v7536_v59  ;;  %v2424_v60 = vadd.f32 %v6939_v12, %v7535_v55  ;;  %v2100_v12 = vadd.f32 %v2099_v8, %v7539_v43 }
 0x4dd   :  { %v2677_v24 = vpop.xlane.xlu0 %2676  ;;  %v2675_v44 = vpop.xlane.xlu2 %2674 }
 0x4de   :  { %3149 = vst.msk [vmem:[%s7315_s7 + $0x160] sm:$0xff] %vm3104_vm4, %v2677_v24 }
 0x4df   :  { %3148 = vst.msk [vmem:[%s7315_s7 + $0x158] sm:$0xff] %vm3104_vm4, %v2675_v44  ;;  %3092 = vmax.xlane.f32.xlu1 %v2579_v58  ;;  %v2433_v48 = vpop.f32.mrf.mxu1  ;;  %v7537_v58 = vld [vmem:[#allocation75_spill] sm:$0xff]  ;;  %v2104_v63 = vpop.f32.mrf.mxu0 }
 0x4e0   :  { %v2426_v24 = vadd.f32 %v2425_v47, %v7537_v58 }
 0x4e2   :  { %2838 = vmax.xlane.f32.xlu0 %v2252_v3  ;;  %2836 = vmax.xlane.f32.xlu2 %v2250_v36  ;;  %v2817_v37 = vpop.xlane.xlu1 %2816  ;;  %v2097_v36 = vadd.f32 %v2096_v52, %v7537_v58  ;;  %v2580_v52 = vpop.f32.mrf.mxu3 }
 0x4e3   :  { %3219 = vst.msk [vmem:[%s7315_s7 + $0x390] sm:$0xff] %vm3104_vm4, %v2817_v37 }
 0x4e5   :  { %v3073_v21 = vpop.xlane.xlu0 %3072  ;;  %v3071_v56 = vpop.xlane.xlu2 %3070 }
 0x4e6   :  { %4592 = vst.msk [vmem:[%s7315_s7 + $0x790] sm:$0xff] %vm3104_vm4, %v3073_v21 }
 0x4e7   :  { %4591 = vst.msk [vmem:[%s7315_s7 + $0x788] sm:$0xff] %vm3104_vm4, %v3071_v56  ;;  %2954 = vmax.xlane.f32.xlu1 %v2406_v28  ;;  %v2102_v28 = vadd.f32 %v2101_v22, %v7538_v4  ;;  %v2435_v21 = vpop.f32.mrf.mxu1  ;;  %v2106_v56 = vpop.f32.mrf.mxu0 }
 0x4ea   :  { %2700 = vmax.xlane.f32.xlu0 %v2080_v49  ;;  %2698 = vmax.xlane.f32.xlu2 %v2077_v9  ;;  %v2679_v54 = vpop.xlane.xlu1 %2678  ;;  %v2429_v49 = vadd.f32 %v2428_v16, %v7539_v43 }
 0x4eb   :  { %3150 = vst.msk [vmem:[%s7315_s7 + $0x168] sm:$0xff] %vm3104_vm4, %v2679_v54  ;;  %v7540_v54 = vld [vmem:[#allocation78_spill] sm:$0xff] }
 0x4ec   :  { %v2105_v51 = vadd.f32 %v2104_v63, %v7540_v54 }
 0x4ed   :  { %v2935_v1 = vpop.xlane.xlu0 %2934  ;;  %v2933_v17 = vpop.xlane.xlu2 %2932 }
 0x4ee   :  { %4523 = vst.msk [vmem:[%s7315_s7 + $0x568] sm:$0xff] %vm3104_vm4, %v2935_v1 }
 0x4ef   :  { %4522 = vst.msk [vmem:[%s7315_s7 + $0x560] sm:$0xff] %vm3104_vm4, %v2933_v17  ;;  %2840 = vmax.xlane.f32.xlu1 %v2255_v10  ;;  %v2434_v10 = vadd.f32 %v2433_v48, %v7540_v54  ;;  %v2438_v1 = vpop.f32.mrf.mxu1 }
 0x4f2   :  { %2958 = vmax.xlane.f32.xlu0 %v2411_v6  ;;  %2956 = vmax.xlane.f32.xlu2 %v2409_v46  ;;  %v3075_v32 = vpop.xlane.xlu1 %3074  ;;  %v2109_v46 = vpop.f32.mrf.mxu0 }
 0x4f3   :  { %4593 = vst.msk [vmem:[%s7315_s7 + $0x798] sm:$0xff] %vm3104_vm4, %v3075_v32  ;;  %v2431_v32 = vadd.f32 %v7009_v41, %v7538_v4  ;;  %v2439_v41 = vadd.f32 %v2438_v1, %v7541_v14 }
 0x4f5   :  { %v2821_v31 = vpop.xlane.xlu0 %2820  ;;  %v2819_v57 = vpop.xlane.xlu2 %2818 }
 0x4f6   :  { %3221 = vst.msk [vmem:[%s7315_s7 + $0x3a0] sm:$0xff] %vm3104_vm4, %v2821_v31 }
 0x4f7   :  { %3220 = vst.msk [vmem:[%s7315_s7 + $0x398] sm:$0xff] %vm3104_vm4, %v2819_v57  ;;  %2702 = vmax.xlane.f32.xlu1 %v2082_v40  ;;  %v2110_v40 = vadd.f32 %v2109_v46, %v7541_v14  ;;  %v2440_v57 = vpop.f32.mrf.mxu1 }
 0x4fa   :  { %2706 = vmax.xlane.f32.xlu0 %v2087_v25  ;;  %2842 = vmax.xlane.f32.xlu2 %v2257_v61  ;;  %v2937_v45 = vpop.xlane.xlu1 %2936  ;;  %v7542_v61 = vld [vmem:[#allocation79_spill] sm:$0xff] }
 0x4fb   :  { %4524 = vst.msk [vmem:[%s7315_s7 + $0x570] sm:$0xff] %vm3104_vm4, %v2937_v45  ;;  %v2436_v13 = vadd.f32 %v2435_v21, %v7542_v61  ;;  %v2583_v45 = vpop.f32.mrf.mxu3  ;;  %v2107_v8 = vadd.f32 %v2106_v56, %v7542_v61 }
 0x4fd   :  { %v2683_v34 = vpop.xlane.xlu0 %2682  ;;  %v2681_v20 = vpop.xlane.xlu2 %2680 }
 0x4fe   :  { %3152 = vst.msk [vmem:[%s7315_s7 + $0x178] sm:$0xff] %vm3104_vm4, %v2683_v34  ;;  %v2111_v34 = vpop.f32.mrf.mxu0 }
 0x4ff   :  { %3151 = vst.msk [vmem:[%s7315_s7 + $0x170] sm:$0xff] %vm3104_vm4, %v2681_v20  ;;  %2960 = vmax.xlane.f32.xlu1 %v2414_v29  ;;  %v2441_v29 = vadd.f32 %v2440_v57, %v7543_v33 }
 0x502   :  { %2964 = vmax.xlane.f32.xlu0 %v2419_v38  ;;  %2704 = vmax.xlane.f32.xlu2 %v2085_v19  ;;  %v2823_v62 = vpop.xlane.xlu1 %2822  ;;  %v2112_v19 = vadd.f32 %v2111_v34, %v7543_v33 }
 0x503   :  { %3222 = vst.msk [vmem:[%s7315_s7 + $0x3a8] sm:$0xff] %vm3104_vm4, %v2823_v62  ;;  %v2584_v62 = vadd.f32 %v2583_v45, %v7530_v26  ;;  %v2581_v26 = vadd.f32 %v2580_v52, %v7527_v18 }
 0x505   :  { %v3079_v42 = vpop.xlane.xlu0 %3078  ;;  %v3077_v30 = vpop.xlane.xlu2 %3076 }
 0x506   :  { %4595 = vst.msk [vmem:[%s7315_s7 + $0x7a8] sm:$0xff] %vm3104_vm4, %v3079_v42 }
 0x507   :  { %4594 = vst.msk [vmem:[%s7315_s7 + $0x7a0] sm:$0xff] %vm3104_vm4, %v3077_v30  ;;  %2708 = vmax.xlane.f32.xlu1 %v2090_v0  ;;  %v2585_v0 = vpop.f32.mrf.mxu3 }
 0x508   :  { %v2586_v30 = vadd.f32 %v2585_v0, %v5684_v11 }
 0x50a   :  { %2712 = vmax.xlane.f32.xlu0 %v2095_v53  ;;  %2962 = vmax.xlane.f32.xlu2 %v2416_v27  ;;  %v2685_v5 = vpop.xlane.xlu1 %2684 }
 0x50b   :  { %3153 = vst.msk [vmem:[%s7315_s7 + $0x180] sm:$0xff] %vm3104_vm4, %v2685_v5 }
 0x50d   :  { %v2941_v7 = vpop.xlane.xlu0 %2940  ;;  %v2939_v15 = vpop.xlane.xlu2 %2938 }
 0x50e   :  { %4526 = vst.msk [vmem:[%s7315_s7 + $0x580] sm:$0xff] %vm3104_vm4, %v2941_v7 }
 0x50f   :  { %4525 = vst.msk [vmem:[%s7315_s7 + $0x578] sm:$0xff] %vm3104_vm4, %v2939_v15  ;;  %2966 = vmax.xlane.f32.xlu1 %v2421_v50 }
 0x512   :  { %2970 = vmax.xlane.f32.xlu0 %v2426_v24  ;;  %2710 = vmax.xlane.f32.xlu2 %v2092_v23  ;;  %v3081_v44 = vpop.xlane.xlu1 %3080 }
 0x513   :  { %4596 = vst.msk [vmem:[%s7315_s7 + $0x7b0] sm:$0xff] %vm3104_vm4, %v3081_v44 }
 0x515   :  { %v2827_v3 = vpop.xlane.xlu0 %2826  ;;  %v2825_v37 = vpop.xlane.xlu2 %2824 }
 0x516   :  { %3224 = vst.msk [vmem:[%s7315_s7 + $0x3b8] sm:$0xff] %vm3104_vm4, %v2827_v3 }
 0x517   :  { %3223 = vst.msk [vmem:[%s7315_s7 + $0x3b0] sm:$0xff] %vm3104_vm4, %v2825_v37  ;;  %2714 = vmax.xlane.f32.xlu1 %v2097_v36 }
 0x51a   :  { %2718 = vmax.xlane.f32.xlu0 %v2102_v28  ;;  %2968 = vmax.xlane.f32.xlu2 %v2424_v60  ;;  %v2943_v9 = vpop.xlane.xlu1 %2942 }
 0x51b   :  { %4527 = vst.msk [vmem:[%s7315_s7 + $0x588] sm:$0xff] %vm3104_vm4, %v2943_v9 }
 0x51d   :  { %v2689_v2 = vpop.xlane.xlu0 %2688  ;;  %v2687_v35 = vpop.xlane.xlu2 %2686 }
 0x51e   :  { %3155 = vst.msk [vmem:[%s7315_s7 + $0x190] sm:$0xff] %vm3104_vm4, %v2689_v2 }
 0x51f   :  { %3154 = vst.msk [vmem:[%s7315_s7 + $0x188] sm:$0xff] %vm3104_vm4, %v2687_v35  ;;  %2972 = vmax.xlane.f32.xlu1 %v2429_v49 }
 0x522   :  { %2976 = vmax.xlane.f32.xlu0 %v2434_v10  ;;  %2716 = vmax.xlane.f32.xlu2 %v2100_v12  ;;  %v2829_v17 = vpop.xlane.xlu1 %2828 }
 0x523   :  { %3225 = vst.msk [vmem:[%s7315_s7 + $0x3c0] sm:$0xff] %vm3104_vm4, %v2829_v17 }
 0x525   :  { %v3085_v6 = vpop.xlane.xlu0 %3084  ;;  %v3083_v47 = vpop.xlane.xlu2 %3082 }
 0x526   :  { %4598 = vst.msk [vmem:[%s7315_s7 + $0x7c0] sm:$0xff] %vm3104_vm4, %v3085_v6 }
 0x527   :  { %4597 = vst.msk [vmem:[%s7315_s7 + $0x7b8] sm:$0xff] %vm3104_vm4, %v3083_v47  ;;  %2720 = vmax.xlane.f32.xlu1 %v2105_v51 }
 0x52a   :  { %2724 = vmax.xlane.f32.xlu0 %v2110_v40  ;;  %2974 = vmax.xlane.f32.xlu2 %v2431_v32  ;;  %v2691_v31 = vpop.xlane.xlu1 %2690 }
 0x52b   :  { %3156 = vst.msk [vmem:[%s7315_s7 + $0x198] sm:$0xff] %vm3104_vm4, %v2691_v31 }
 0x52d   :  { %v2947_v25 = vpop.xlane.xlu0 %2946  ;;  %v2945_v16 = vpop.xlane.xlu2 %2944 }
 0x52e   :  { %4529 = vst.msk [vmem:[%s7315_s7 + $0x598] sm:$0xff] %vm3104_vm4, %v2947_v25 }
 0x52f   :  { %4528 = vst.msk [vmem:[%s7315_s7 + $0x590] sm:$0xff] %vm3104_vm4, %v2945_v16  ;;  %2978 = vmax.xlane.f32.xlu1 %v2436_v13 }
 0x532   :  { %2982 = vmax.xlane.f32.xlu0 %v2441_v29  ;;  %2722 = vmax.xlane.f32.xlu2 %v2107_v8  ;;  %v3087_v20 = vpop.xlane.xlu1 %3086 }
 0x533   :  { %4599 = vst.msk [vmem:[%s7315_s7 + $0x7c8] sm:$0xff] %vm3104_vm4, %v3087_v20 }
 0x535   :  { %v2833_v39 = vpop.xlane.xlu0 %2832  ;;  %v2831_v38 = vpop.xlane.xlu2 %2830 }
 0x536   :  { %3227 = vst.msk [vmem:[%s7315_s7 + $0x3d0] sm:$0xff] %vm3104_vm4, %v2833_v39 }
 0x537   :  { %3226 = vst.msk [vmem:[%s7315_s7 + $0x3c8] sm:$0xff] %vm3104_vm4, %v2831_v38  ;;  %2726 = vmax.xlane.f32.xlu1 %v2112_v19 }
 0x53a   :  { %3096 = vmax.xlane.f32.xlu0 %v2584_v62  ;;  %2980 = vmax.xlane.f32.xlu2 %v2439_v41  ;;  %v2949_v42 = vpop.xlane.xlu1 %2948 }
 0x53b   :  { %4530 = vst.msk [vmem:[%s7315_s7 + $0x5a0] sm:$0xff] %vm3104_vm4, %v2949_v42 }
 0x53d   :  { %v2695_v22 = vpop.xlane.xlu0 %2694  ;;  %v2693_v27 = vpop.xlane.xlu2 %2692 }
 0x53e   :  { %3158 = vst.msk [vmem:[%s7315_s7 + $0x1a8] sm:$0xff] %vm3104_vm4, %v2695_v22 }
 0x53f   :  { %3157 = vst.msk [vmem:[%s7315_s7 + $0x1a0] sm:$0xff] %vm3104_vm4, %v2693_v27  ;;  %3098 = vmax.xlane.f32.xlu1 %v2586_v30 }
 0x542   :  { %3094 = vmax.xlane.f32.xlu2 %v2581_v26  ;;  %v2835_v55 = vpop.xlane.xlu1 %2834 }
 0x543   :  { %3228 = vst.msk [vmem:[%s7315_s7 + $0x3d8] sm:$0xff] %vm3104_vm4, %v2835_v55 }
 0x545   :  { %v3091_v11 = vpop.xlane.xlu0 %3090  ;;  %v3089_v53 = vpop.xlane.xlu2 %3088 }
 0x546   :  { %4601 = vst.msk [vmem:[%s7315_s7 + $0x7d8] sm:$0xff] %vm3104_vm4, %v3091_v11 }
 0x547   :  { %4600 = vst.msk [vmem:[%s7315_s7 + $0x7d0] sm:$0xff] %vm3104_vm4, %v3089_v53 }
 0x54a   :  { %v2697_v18 = vpop.xlane.xlu1 %2696 }
 0x54b   :  { %3159 = vst.msk [vmem:[%s7315_s7 + $0x1b0] sm:$0xff] %vm3104_vm4, %v2697_v18 }
 0x54d   :  { %v2953_v5 = vpop.xlane.xlu0 %2952  ;;  %v2951_v59 = vpop.xlane.xlu2 %2950 }
 0x54e   :  { %4532 = vst.msk [vmem:[%s7315_s7 + $0x5b0] sm:$0xff] %vm3104_vm4, %v2953_v5 }
 0x54f   :  { %4531 = vst.msk [vmem:[%s7315_s7 + $0x5a8] sm:$0xff] %vm3104_vm4, %v2951_v59 }
 0x552   :  { %v3093_v50 = vpop.xlane.xlu1 %3092 }
 0x553   :  { %4602 = vst.msk [vmem:[%s7315_s7 + $0x7e0] sm:$0xff] %vm3104_vm4, %v3093_v50 }
 0x555   :  { %v2839_v7 = vpop.xlane.xlu0 %2838  ;;  %v2837_v15 = vpop.xlane.xlu2 %2836 }
 0x556   :  { %3230 = vst.msk [vmem:[%s7315_s7 + $0x3e8] sm:$0xff] %vm3104_vm4, %v2839_v7 }
 0x557   :  { %3229 = vst.msk [vmem:[%s7315_s7 + $0x3e0] sm:$0xff] %vm3104_vm4, %v2837_v15 }
 0x55a   :  { %v2955_v48 = vpop.xlane.xlu1 %2954 }
 0x55b   :  { %4533 = vst.msk [vmem:[%s7315_s7 + $0x5b8] sm:$0xff] %vm3104_vm4, %v2955_v48 }
 0x55d   :  { %v2701_v23 = vpop.xlane.xlu0 %2700  ;;  %v2699_v58 = vpop.xlane.xlu2 %2698 }
 0x55e   :  { %3161 = vst.msk [vmem:[%s7315_s7 + $0x1c0] sm:$0xff] %vm3104_vm4, %v2701_v23 }
 0x55f   :  { %3160 = vst.msk [vmem:[%s7315_s7 + $0x1b8] sm:$0xff] %vm3104_vm4, %v2699_v58 }
 0x562   :  { %v2841_v24 = vpop.xlane.xlu1 %2840 }
 0x563   :  { %3231 = vst.msk [vmem:[%s7315_s7 + $0x3f0] sm:$0xff] %vm3104_vm4, %v2841_v24 }
 0x565   :  { %v2959_v63 = vpop.xlane.xlu0 %2958  ;;  %v2957_v44 = vpop.xlane.xlu2 %2956 }
 0x566   :  { %4535 = vst.msk [vmem:[%s7315_s7 + $0x5c8] sm:$0xff] %vm3104_vm4, %v2959_v63 }
 0x567   :  { %4534 = vst.msk [vmem:[%s7315_s7 + $0x5c0] sm:$0xff] %vm3104_vm4, %v2957_v44 }
 0x56a   :  { %v2703_v36 = vpop.xlane.xlu1 %2702 }
 0x56b   :  { %3162 = vst.msk [vmem:[%s7315_s7 + $0x1c8] sm:$0xff] %vm3104_vm4, %v2703_v36 }
 0x56d   :  { %v2707_v3 = vpop.xlane.xlu0 %2706  ;;  %v2843_v37 = vpop.xlane.xlu2 %2842 }
 0x56e   :  { %3164 = vst.msk [vmem:[%s7315_s7 + $0x1d8] sm:$0xff] %vm3104_vm4, %v2707_v3 }
 0x56f   :  { %3232 = vst.msk [vmem:[%s7315_s7 + $0x3f8] sm:$0xff] %vm3104_vm4, %v2843_v37 }
 0x572   :  { %v2961_v60 = vpop.xlane.xlu1 %2960 }
 0x573   :  { %4536 = vst.msk [vmem:[%s7315_s7 + $0x5d0] sm:$0xff] %vm3104_vm4, %v2961_v60 }
 0x575   :  { %v2965_v4 = vpop.xlane.xlu0 %2964  ;;  %v2705_v28 = vpop.xlane.xlu2 %2704 }
 0x576   :  { %4538 = vst.msk [vmem:[%s7315_s7 + $0x5e0] sm:$0xff] %vm3104_vm4, %v2965_v4 }
 0x577   :  { %3163 = vst.msk [vmem:[%s7315_s7 + $0x1d0] sm:$0xff] %vm3104_vm4, %v2705_v28 }
 0x57a   :  { %v2709_v21 = vpop.xlane.xlu1 %2708 }
 0x57b   :  { %3165 = vst.msk [vmem:[%s7315_s7 + $0x1e0] sm:$0xff] %vm3104_vm4, %v2709_v21 }
 0x57d   :  { %v2713_v56 = vpop.xlane.xlu0 %2712  ;;  %v2963_v9 = vpop.xlane.xlu2 %2962 }
 0x57e   :  { %3167 = vst.msk [vmem:[%s7315_s7 + $0x1f0] sm:$0xff] %vm3104_vm4, %v2713_v56 }
 0x57f   :  { %4537 = vst.msk [vmem:[%s7315_s7 + $0x5d8] sm:$0xff] %vm3104_vm4, %v2963_v9 }
 0x582   :  { %v2967_v43 = vpop.xlane.xlu1 %2966 }
 0x583   :  { %4539 = vst.msk [vmem:[%s7315_s7 + $0x5e8] sm:$0xff] %vm3104_vm4, %v2967_v43 }
 0x585   :  { %v2971_v49 = vpop.xlane.xlu0 %2970  ;;  %v2711_v2 = vpop.xlane.xlu2 %2710 }
 0x586   :  { %4541 = vst.msk [vmem:[%s7315_s7 + $0x5f8] sm:$0xff] %vm3104_vm4, %v2971_v49 }
 0x587   :  { %3166 = vst.msk [vmem:[%s7315_s7 + $0x1e8] sm:$0xff] %vm3104_vm4, %v2711_v2 }
 0x58a   :  { %v2715_v35 = vpop.xlane.xlu1 %2714 }
 0x58b   :  { %3168 = vst.msk [vmem:[%s7315_s7 + $0x1f8] sm:$0xff] %vm3104_vm4, %v2715_v35 }
 0x58d   :  { %v2719_v12 = vpop.xlane.xlu0 %2718  ;;  %v2969_v54 = vpop.xlane.xlu2 %2968 }
 0x58e   :  { %3170 = vst.msk [vmem:[%s7315_s7 + $0x208] sm:$0xff] %vm3104_vm4, %v2719_v12 }
 0x58f   :  { %4540 = vst.msk [vmem:[%s7315_s7 + $0x5f0] sm:$0xff] %vm3104_vm4, %v2969_v54 }
 0x592   :  { %v2973_v10 = vpop.xlane.xlu1 %2972 }
 0x593   :  { %4542 = vst.msk [vmem:[%s7315_s7 + $0x600] sm:$0xff] %vm3104_vm4, %v2973_v10 }
 0x595   :  { %v2977_v1 = vpop.xlane.xlu0 %2976  ;;  %v2717_v17 = vpop.xlane.xlu2 %2716 }
 0x596   :  { %4544 = vst.msk [vmem:[%s7315_s7 + $0x610] sm:$0xff] %vm3104_vm4, %v2977_v1 }
 0x597   :  { %3169 = vst.msk [vmem:[%s7315_s7 + $0x200] sm:$0xff] %vm3104_vm4, %v2717_v17 }
 0x59a   :  { %v2721_v46 = vpop.xlane.xlu1 %2720 }
 0x59b   :  { %3171 = vst.msk [vmem:[%s7315_s7 + $0x210] sm:$0xff] %vm3104_vm4, %v2721_v46 }
 0x59d   :  { %v2725_v51 = vpop.xlane.xlu0 %2724  ;;  %v2975_v6 = vpop.xlane.xlu2 %2974 }
 0x59e   :  { %3173 = vst.msk [vmem:[%s7315_s7 + $0x220] sm:$0xff] %vm3104_vm4, %v2725_v51 }
 0x59f   :  { %4543 = vst.msk [vmem:[%s7315_s7 + $0x608] sm:$0xff] %vm3104_vm4, %v2975_v6 }
 0x5a2   :  { %v2979_v47 = vpop.xlane.xlu1 %2978 }
 0x5a3   :  { %4545 = vst.msk [vmem:[%s7315_s7 + $0x618] sm:$0xff] %vm3104_vm4, %v2979_v47 }
 0x5a5   :  { %v2983_v52 = vpop.xlane.xlu0 %2982  ;;  %v2723_v32 = vpop.xlane.xlu2 %2722 }
 0x5a6   :  { %4547 = vst.msk [vmem:[%s7315_s7 + $0x628] sm:$0xff] %vm3104_vm4, %v2983_v52 }
 0x5a7   :  { %3172 = vst.msk [vmem:[%s7315_s7 + $0x218] sm:$0xff] %vm3104_vm4, %v2723_v32 }
 0x5aa   :  { %v2727_v14 = vpop.xlane.xlu1 %2726 }
 0x5ab   :  { %3174 = vst.msk [vmem:[%s7315_s7 + $0x228] sm:$0xff] %vm3104_vm4, %v2727_v14 }
 0x5ad   :  { %v3097_v40 = vpop.xlane.xlu0 %3096  ;;  %v2981_v31 = vpop.xlane.xlu2 %2980 }
 0x5ae   :  { %4604 = vst.msk [vmem:[%s7315_s7 + $0x7f0] sm:$0xff] %vm3104_vm4, %v3097_v40 }
 0x5af   :  { %4546 = vst.msk [vmem:[%s7315_s7 + $0x620] sm:$0xff] %vm3104_vm4, %v2981_v31 }
 0x5b2   :  { %v3099_v57 = vpop.xlane.xlu1 %3098 }
 0x5b3   :  { %4605 = vst.msk [vmem:[%s7315_s7 + $0x7f8] sm:$0xff] %vm3104_vm4, %v3099_v57 }
 0x5b5   :  { %v3095_v61 = vpop.xlane.xlu2 %3094 }
 0x5b6   :  { %4603 = vst.msk [vmem:[%s7315_s7 + $0x7e8] sm:$0xff] %vm3104_vm4, %v3095_v61 }
 0x5b7   :  { %4140 = vsyncpa [#allocation3], 1 }
 0x5b8   :  { %4141 = vsyncpa [#allocation5], 1 }
 0x5b9   :  { %4142 = vsyncpa [#allocation8], 1 }
 0x5ba   :  { %4143 = vsyncpa [#allocation11], 1 }

// kernel: _lambda_.2
= control target key start
LH: loop header
LB: loop body
LE: loop exit
PB: predicated region body
PF: predicated region fallthrough
CT: control target
= control target key end

     0   :  { %14 = vsyncpa [#allocation3], 0  ;;  %s6324_s0 = inlined_call_operand.vmem [shape: bf16[3,256], index: 0, kind: input, shape index: {}]   ;;  %s6325_s1 = inlined_call_operand.hbm [shape: bf16[64,3], index: 1, kind: input, shape index: {}]   ;;  %s6326_s2 = inlined_call_operand.hbm [shape: f32[64,1], index: 2, kind: input, shape index: {}]   ;;  %s6327_s3 = inlined_call_operand.hbm [shape: bf16[128,64], index: 3, kind: input, shape index: {}]   ;;  %s6328_s4 = inlined_call_operand.hbm [shape: f32[128,1], index: 4, kind: input, shape index: {}]   ;;  %s6329_s5 = inlined_call_operand.hbm [shape: bf16[1024,128], index: 5, kind: input, shape index: {}]   ;;  %s6330_s6 = inlined_call_operand.hbm [shape: f32[1024,1], index: 6, kind: input, shape index: {}]   ;;  %s6331_s7 = inlined_call_operand.hbm [shape: f32[2,1024,1], index: 7, kind: output, shape index: {0}]   ;;  %s6332_s8 = inlined_call_operand.hbm [shape: f32[2,128,128], index: 8, kind: output, shape index: {1}]  }
   0x1   :  { %15 = vsyncpa [#allocation6], 0 }
   0x2   :  { %16 = vsyncpa [#allocation9], 0 }
   0x3   :  { %17 = vsyncpa [#allocation12], 0 }
   0x4   :  { %18 = vsyncpa [#allocation4], 0  ;;  %s47_s29 = sshll.u32 %s6326_s2, 4  ;;  %s48_s29 = int_to_ptr.hbm [resolvable:$true] %s47_s29 }
   0x5   :  { %19 = vsyncpa [#allocation15], 0  ;;  %s4860_s30 = smov [#allocation5]   ;;  %s73_s12 = sshll.u32 %s6328_s4, 4  ;;  %s74_s12 = int_to_ptr.hbm [resolvable:$true] %s73_s12 }
   0x6   :  { %s49_s9 = sshll.u32 %s4860_s30, 4  ;;  %s4861_s13 = smov 128   ;;  %s50_s9 = int_to_ptr.vmem [resolvable:$true] %s49_s9 }
   0x7   :  { %s4862_s14 = smov 8   ;;  %s4863_s15 = smov [#allocation8]  }
   0x8   :  { %55 = dma.hbm_to_vmem [thread:$0]  %s48_s29, 1024, %s50_s9, [#allocation6], %s4861_s13, %s4861_s13, %s4862_s14  }
   0x9   :  { %s75_s16 = sshll.u32 %s4863_s15, 4  ;;  %s34_s18 = sshll.u32 %s6325_s1, 4  ;;  %s76_s16 = int_to_ptr.vmem [resolvable:$true] %s75_s16  ;;  %s35_s18 = int_to_ptr.hbm [resolvable:$true] %s34_s18 }
   0xa   :  { %81 = dma.hbm_to_vmem [thread:$0]  %s74_s12, 2048, %s76_s16, [#allocation9], %s4861_s13, %s4861_s13, %s4862_s14  }
   0xb   :  { %s4864_s4 = smov [#allocation2]   ;;  %s60_s22 = sshll.u32 %s6327_s3, 4  ;;  %s61_s22 = int_to_ptr.hbm [resolvable:$true] %s60_s22 }
   0xc   :  { %s36_s19 = sshll.u32 %s4864_s4, 4  ;;  %s4865_s23 = smov 64   ;;  %s37_s19 = int_to_ptr.vmem [resolvable:$true] %s36_s19 }
   0xd   :  { %s4866_s24 = smov 4   ;;  %s4867_s25 = smov [#allocation7]  }
   0xe   :  { %42 = dma.hbm_to_vmem [thread:$0]  %s35_s18, 512, %s37_s19, [#allocation3], %s4865_s23, %s4865_s23, %s4866_s24  }
   0xf   :  { %s62_s26 = sshll.u32 %s4867_s25, 4  ;;  %s86_s28 = sshll.u32 %s6329_s5, 4  ;;  %s63_s26 = int_to_ptr.vmem [resolvable:$true] %s62_s26  ;;  %s87_s28 = int_to_ptr.hbm [resolvable:$true] %s86_s28 }
  0x10   :  { %68 = dma.hbm_to_vmem [thread:$0]  %s61_s22, 1024, %s63_s26, [#allocation6], %s4865_s23, %s4865_s23, %s4866_s24  }
  0x11   :  { %s99_s9 = sshll.u32 %s6330_s6, 4  ;;  %s4868_s10 = smov [#allocation10]   ;;  %s100_s9 = int_to_ptr.hbm [resolvable:$true] %s99_s9 }
  0x12   :  { %s88_s11 = sshll.u32 %s4868_s10, 4  ;;  %s4869_s3 = smov [#allocation11]   ;;  %s89_s11 = int_to_ptr.vmem [resolvable:$true] %s88_s11 }
  0x13   :  { %94 = dma.hbm_to_vmem [thread:$0]  %s87_s28, 8192, %s89_s11, [#allocation9], %s4865_s23, %s4865_s23, %s4866_s24  }
  0x14   :  { %s101_s12 = sshll.u32 %s4869_s3, 4  ;;  %s102_s12 = int_to_ptr.vmem [resolvable:$true] %s101_s12 }
  0x15   :  { %107 = dma.hbm_to_vmem [thread:$0]  %s100_s9, 16384, %s102_s12, [#allocation12], %s4861_s13, %s4861_s13, %s4862_s14  }
  0x16   :  { %4848 = dma.done.wait [#allocation3], 512  }
  0x17   :  { %4849 = vsyncadd [#allocation3], 4294966784 }
  0x18   :  { %4850 = dma.done.wait [#allocation6], 2048  }
  0x19   :  { %4851 = vsyncadd [#allocation6], 4294965248 }
  0x1a   :  { %4852 = dma.done.wait [#allocation9], 10240  }
  0x1b   :  { %4853 = vsyncadd [#allocation9], 4294957056 }
  0x1c   :  { %4854 = dma.done.wait [#allocation12], 16384  }
  0x1d   :  { %4855 = vsyncadd [#allocation12], 4294950912  ;;  %v4870_v0 = vmov 0   ;;  %v160_v1 = vld [vmem:[#allocation5 + $0x20] sm:$0xff]  ;;  %v158_v2 = vld [vmem:[#allocation5 + $0x10] sm:$0xff]  ;;  %vm241_vm0 = vcmask 1040384  }
  0x1e   :  { %4655 = vset.pattern.permute.xlu2 %v4870_v0  ;;  %4654 = vset.pattern.permute.xlu1 %v4870_v0  ;;  %v156_v3 = vld [vmem:[#allocation5] sm:$0xff]  ;;  %v147_v4 = vld [vmem:[%s6324_s0] sm:$0xf]  ;;  %vm242_vm1 = vcmask 1041408   ;;  %v4871_v5 = vmov 65535   ;;  %v161_v7 = vld [vmem:[#allocation5 + $0x28] sm:$0xff] }
  0x1f   :  { %4653 = vset.pattern.permute.xlu0 %v4870_v0  ;;  %186 = vperm.xlu2 %4655, %v160_v1   ;;  %225 = vst [vmem:[#allocation1] ss:$4 sm:$0xff] %v147_v4  ;;  %v243_v6 = vsel %vm241_vm0, 4294967295, %v4871_v5  ;;  %v159_v8 = vld [vmem:[#allocation5 + $0x18] sm:$0xff]  ;;  %v157_v9 = vld [vmem:[#allocation5 + $0x8] sm:$0xff]  ;;  %v4547_v15 = vld [vmem:[#allocation2] sm:$0xff] }
  0x20   :  { %176 = vperm.xlu1 %4654, %v158_v2   ;;  %166 = vperm.xlu0 %4653, %v156_v3   ;;  %v244_v10 = vsel %vm242_vm1, %v243_v6, 0  ;;  %vm228_vm2 = vcmask 23552   ;;  %v347_v16 = vld [vmem:[#allocation8] sm:$0xff]  ;;  %v163_v17 = vld [vmem:[#allocation5 + $0x38] sm:$0xff]  ;;  %v162_v18 = vld [vmem:[#allocation5 + $0x30] sm:$0xff]  ;;  %vm483_vm3 = vcmask 523264  }
  0x21   :  { %v350_v19 = vld [vmem:[#allocation8 + $0x18] sm:$0xff]  ;;  %v349_v20 = vld [vmem:[#allocation8 + $0x10] sm:$0xff]  ;;  %v348_v21 = vld [vmem:[#allocation8 + $0x8] sm:$0xff]  ;;  %vm3141_vm4 = vcmask 7168   ;;  %s4872_s0 = smov [#allocation14]   ;;  %s4192_s2 = sshll.u32 %s6332_s8, 4  ;;  %s4193_s2 = int_to_ptr.hbm [resolvable:$true] %s4192_s2 }
  0x22   :  { %v4548_v22 = vld [vmem:[#allocation2 + $0x8] sm:$0xff]  ;;  %v353_v23 = vld [vmem:[#allocation8 + $0x30] sm:$0xff]  ;;  %v351_v25 = vld [vmem:[#allocation8 + $0x20] sm:$0xff]  ;;  %s4190_s15 = sshll.u32 %s4872_s0, 4  ;;  %s4873_s8 = smov [#allocation13]   ;;  %s4191_s15 = int_to_ptr.vmem [resolvable:$true] %s4190_s15 }
  0x23   :  { %v352_v24 = vld [vmem:[#allocation8 + $0x28] sm:$0xff]  ;;  %v355_v27 = vld [vmem:[#allocation8 + $0x40] sm:$0xff]  ;;  %v354_v28 = vld [vmem:[#allocation8 + $0x38] sm:$0xff]  ;;  %s4177_s18 = sshll.u32 %s4873_s8, 4  ;;  %s4179_s20 = sshll.u32 %s6331_s7, 4  ;;  %s4178_s18 = int_to_ptr.vmem [resolvable:$true] %s4177_s18  ;;  %s4180_s20 = int_to_ptr.hbm [resolvable:$true] %s4179_s20 }
  0x24   :  { %v356_v26 = vld [vmem:[#allocation8 + $0x48] sm:$0xff]  ;;  %v4549_v29 = vld [vmem:[#allocation2 + $0x10] sm:$0xff]  ;;  %v359_v30 = vld [vmem:[#allocation8 + $0x60] sm:$0xff] }
  0x25   :  { %v358_v31 = vld [vmem:[#allocation8 + $0x58] sm:$0xff]  ;;  %v357_v32 = vld [vmem:[#allocation8 + $0x50] sm:$0xff]  ;;  %v360_v35 = vld [vmem:[#allocation8 + $0x68] sm:$0xff] }
  0x26   :  { %v226_v11 = vld.sshfl [vmem:[#allocation1] sm:$0xff pattern:$0x73625140]  ;;  %v227_v12 = vld.sshfl [vmem:[#allocation1 + $0x8] sm:$0xff pattern:$0x73625140] }
  0x27   :  { %191 = vperm.xlu2 %4655, %v161_v7   ;;  %v245_v13 = vand.u32 %v244_v10, %v226_v11  ;;  %v247_v14 = vand.u32 %v244_v10, %v227_v12  ;;  %v362_v33 = vld [vmem:[#allocation8 + $0x78] sm:$0xff]  ;;  %v361_v34 = vld [vmem:[#allocation8 + $0x70] sm:$0xff]  ;;  %v783_v38 = vld [vmem:[#allocation11 + $0x8] sm:$0xff] }
  0x28   :  { %181 = vperm.xlu1 %4654, %v159_v8   ;;  %171 = vperm.xlu0 %4653, %v157_v9   ;;  %v4550_v36 = vld [vmem:[#allocation2 + $0x18] sm:$0xff]  ;;  %v784_v37 = vld [vmem:[#allocation11 + $0x10] sm:$0xff]  ;;  %v782_v39 = vld [vmem:[#allocation11] sm:$0xff] }
  0x29   :  { %256 = vmatpush.bf16.msra.mxu0 %v245_v13  ;;  %285 = vmatpush.bf16.msra.mxu1 %v247_v14  ;;  %v787_v40 = vld [vmem:[#allocation11 + $0x28] sm:$0xff]  ;;  %v786_v41 = vld [vmem:[#allocation11 + $0x20] sm:$0xff]  ;;  %v785_v42 = vld [vmem:[#allocation11 + $0x18] sm:$0xff] }
  0x2a   :  { %v790_v43 = vld [vmem:[#allocation11 + $0x40] sm:$0xff]  ;;  %v789_v44 = vld [vmem:[#allocation11 + $0x38] sm:$0xff]  ;;  %v788_v45 = vld [vmem:[#allocation11 + $0x30] sm:$0xff] }
  0x2b   :  { %v793_v46 = vld [vmem:[#allocation11 + $0x58] sm:$0xff]  ;;  %v792_v47 = vld [vmem:[#allocation11 + $0x50] sm:$0xff]  ;;  %v791_v48 = vld [vmem:[#allocation11 + $0x48] sm:$0xff] }
  0x2c   :  { %4235 = vmatmul.msk.bf16.vlgmr.msra.gmra.mxu0 %vm228_vm2, %v4547_v15  ;;  %4239 = vmatmul.msk.bf16.vlgmr.msra.gmra.mxu1 %vm228_vm2, %v4547_v15  ;;  %v796_v49 = vld [vmem:[#allocation11 + $0x70] sm:$0xff]  ;;  %v795_v50 = vld [vmem:[#allocation11 + $0x68] sm:$0xff]  ;;  %v794_v51 = vld [vmem:[#allocation11 + $0x60] sm:$0xff] }
  0x2d   :  { %v799_v52 = vld [vmem:[#allocation11 + $0x88] sm:$0xff]  ;;  %v798_v53 = vld [vmem:[#allocation11 + $0x80] sm:$0xff]  ;;  %v797_v54 = vld [vmem:[#allocation11 + $0x78] sm:$0xff] }
  0x2e   :  { %v802_v55 = vld [vmem:[#allocation11 + $0xa0] sm:$0xff]  ;;  %v801_v56 = vld [vmem:[#allocation11 + $0x98] sm:$0xff]  ;;  %v800_v57 = vld [vmem:[#allocation11 + $0x90] sm:$0xff] }
  0x2f   :  { %365 = vperm.xlu2 %4655, %v347_v16   ;;  %v805_v58 = vld [vmem:[#allocation11 + $0xb8] sm:$0xff]  ;;  %v804_v59 = vld [vmem:[#allocation11 + $0xb0] sm:$0xff]  ;;  %v803_v60 = vld [vmem:[#allocation11 + $0xa8] sm:$0xff] }
  0x30   :  { %201 = vperm.xlu1 %4654, %v163_v17   ;;  %196 = vperm.xlu0 %4653, %v162_v18   ;;  %v808_v61 = vld [vmem:[#allocation11 + $0xd0] sm:$0xff]  ;;  %v807_v62 = vld [vmem:[#allocation11 + $0xc8] sm:$0xff]  ;;  %v806_v63 = vld [vmem:[#allocation11 + $0xc0] sm:$0xff] }
  0x31   :  { %v811_v0 = vld [vmem:[#allocation11 + $0xe8] sm:$0xff]  ;;  %v810_v1 = vld [vmem:[#allocation11 + $0xe0] sm:$0xff]  ;;  %v809_v2 = vld [vmem:[#allocation11 + $0xd8] sm:$0xff] }
  0x32   :  { %v814_v5 = vld [vmem:[#allocation11 + $0x100] sm:$0xff]  ;;  %v813_v6 = vld [vmem:[#allocation11 + $0xf8] sm:$0xff]  ;;  %v812_v7 = vld [vmem:[#allocation11 + $0xf0] sm:$0xff] }
  0x33   :  { %v817_v10 = vld [vmem:[#allocation11 + $0x118] sm:$0xff]  ;;  %v816_v11 = vld [vmem:[#allocation11 + $0x110] sm:$0xff]  ;;  %v815_v12 = vld [vmem:[#allocation11 + $0x108] sm:$0xff] }
  0x34   :  { %v820_v15 = vld [vmem:[#allocation11 + $0x130] sm:$0xff]  ;;  %v819_v16 = vld [vmem:[#allocation11 + $0x128] sm:$0xff]  ;;  %v818_v17 = vld [vmem:[#allocation11 + $0x120] sm:$0xff] }
  0x37   :  { %380 = vperm.xlu2 %4655, %v350_v19  }
  0x38   :  { %375 = vperm.xlu1 %4654, %v349_v20   ;;  %370 = vperm.xlu0 %4653, %v348_v21   ;;  %v823_v20 = vld [vmem:[#allocation11 + $0x148] sm:$0xff]  ;;  %v822_v21 = vld [vmem:[#allocation11 + $0x140] sm:$0xff] }
  0x3c   :  { %4236 = vmatmul.msk.bf16.gmra.mxu0 %vm228_vm2, %v4548_v22  ;;  %4240 = vmatmul.msk.bf16.gmra.mxu1 %vm228_vm2, %v4548_v22  ;;  %v821_v22 = vld [vmem:[#allocation11 + $0x138] sm:$0xff] }
  0x3f   :  { %395 = vperm.xlu2 %4655, %v353_v23  }
  0x40   :  { %390 = vperm.xlu1 %4654, %v352_v24   ;;  %385 = vperm.xlu0 %4653, %v351_v25   ;;  %v826_v25 = vld [vmem:[#allocation11 + $0x160] sm:$0xff] }
  0x47   :  { %410 = vperm.xlu2 %4655, %v356_v26   ;;  %v825_v26 = vld [vmem:[#allocation11 + $0x158] sm:$0xff] }
  0x48   :  { %405 = vperm.xlu1 %4654, %v355_v27   ;;  %400 = vperm.xlu0 %4653, %v354_v28   ;;  %v824_v28 = vld [vmem:[#allocation11 + $0x150] sm:$0xff] }
  0x4c   :  { %4237 = vmatmul.msk.bf16.gmra.mxu0 %vm228_vm2, %v4549_v29  ;;  %4241 = vmatmul.msk.bf16.gmra.mxu1 %vm228_vm2, %v4549_v29 }
  0x4f   :  { %425 = vperm.xlu2 %4655, %v359_v30  }
  0x50   :  { %420 = vperm.xlu1 %4654, %v358_v31   ;;  %415 = vperm.xlu0 %4653, %v357_v32   ;;  %v829_v32 = vld [vmem:[#allocation11 + $0x178] sm:$0xff] }
  0x57   :  { %440 = vperm.xlu2 %4655, %v362_v33   ;;  %v828_v33 = vld [vmem:[#allocation11 + $0x170] sm:$0xff] }
  0x58   :  { %435 = vperm.xlu1 %4654, %v361_v34   ;;  %430 = vperm.xlu0 %4653, %v360_v35   ;;  %v827_v34 = vld [vmem:[#allocation11 + $0x168] sm:$0xff] }
  0x5c   :  { %4238 = vmatmul.msk.bf16.gmra.mxu0 %vm228_vm2, %v4550_v36  ;;  %4242 = vmatmul.msk.bf16.gmra.mxu1 %vm228_vm2, %v4550_v36 }
  0x5f   :  { %922 = vperm.xlu2 %4655, %v784_v37  }
  0x60   :  { %917 = vperm.xlu1 %4654, %v783_v38   ;;  %912 = vperm.xlu0 %4653, %v782_v39  }
  0x67   :  { %937 = vperm.xlu2 %4655, %v787_v40   ;;  %v832_v40 = vld [vmem:[#allocation11 + $0x190] sm:$0xff] }
  0x68   :  { %932 = vperm.xlu1 %4654, %v786_v41   ;;  %927 = vperm.xlu0 %4653, %v785_v42   ;;  %v831_v41 = vld [vmem:[#allocation11 + $0x188] sm:$0xff]  ;;  %v830_v42 = vld [vmem:[#allocation11 + $0x180] sm:$0xff] }
  0x6f   :  { %952 = vperm.xlu2 %4655, %v790_v43  }
  0x70   :  { %947 = vperm.xlu1 %4654, %v789_v44   ;;  %942 = vperm.xlu0 %4653, %v788_v45  }
  0x77   :  { %967 = vperm.xlu2 %4655, %v793_v46  }
  0x78   :  { %962 = vperm.xlu1 %4654, %v792_v47   ;;  %957 = vperm.xlu0 %4653, %v791_v48  }
  0x79   :  { %v187_v36 = vpop.permute.xlu2 %186 }
  0x7f   :  { %982 = vperm.xlu2 %4655, %v796_v49  }
  0x80   :  { %977 = vperm.xlu1 %4654, %v795_v50   ;;  %972 = vperm.xlu0 %4653, %v794_v51  }
  0x81   :  { %v192_v44 = vpop.permute.xlu2 %191 }
  0x87   :  { %997 = vperm.xlu2 %4655, %v799_v52  }
  0x88   :  { %992 = vperm.xlu1 %4654, %v798_v53   ;;  %987 = vperm.xlu0 %4653, %v797_v54   ;;  %v835_v54 = vld [vmem:[#allocation11 + $0x1a8] sm:$0xff] }
  0x8f   :  { %1012 = vperm.xlu2 %4655, %v802_v55   ;;  %v834_v55 = vld [vmem:[#allocation11 + $0x1a0] sm:$0xff] }
  0x90   :  { %1007 = vperm.xlu1 %4654, %v801_v56   ;;  %1002 = vperm.xlu0 %4653, %v800_v57  }
  0x92   :  { %v4969_v27 = vpop.permute.xlu0 %166  ;;  %v177_v29 = vpop.permute.xlu1 %176 }
  0x97   :  { %1027 = vperm.xlu2 %4655, %v805_v58   ;;  %v833_v58 = vld [vmem:[#allocation11 + $0x198] sm:$0xff] }
  0x98   :  { %1022 = vperm.xlu1 %4654, %v804_v59   ;;  %1017 = vperm.xlu0 %4653, %v803_v60  }
  0x9a   :  { %v172_v35 = vpop.permute.xlu0 %171  ;;  %v182_v37 = vpop.permute.xlu1 %181 }
  0x9f   :  { %1042 = vperm.xlu2 %4655, %v808_v61  }
  0xa0   :  { %1037 = vperm.xlu1 %4654, %v807_v62   ;;  %1032 = vperm.xlu0 %4653, %v806_v63  }
  0xa2   :  { %v197_v43 = vpop.permute.xlu0 %196  ;;  %v202_v45 = vpop.permute.xlu1 %201 }
  0xa7   :  { %1057 = vperm.xlu2 %4655, %v811_v0  }
  0xa8   :  { %1052 = vperm.xlu1 %4654, %v810_v1   ;;  %1047 = vperm.xlu0 %4653, %v809_v2  }
  0xa9   :  { %v4957_v3 = vpop.f32.mrf.mxu0  ;;  %v4959_v4 = vpop.f32.mrf.mxu1 }
  0xaf   :  { %1072 = vperm.xlu2 %4655, %v814_v5  }
  0xb0   :  { %1067 = vperm.xlu1 %4654, %v813_v6   ;;  %1062 = vperm.xlu0 %4653, %v812_v7  }
  0xb1   :  { %v4961_v8 = vpop.f32.mrf.mxu0  ;;  %v4963_v9 = vpop.f32.mrf.mxu1 }
  0xb7   :  { %1087 = vperm.xlu2 %4655, %v817_v10  }
  0xb8   :  { %1082 = vperm.xlu1 %4654, %v816_v11   ;;  %1077 = vperm.xlu0 %4653, %v815_v12  }
  0xb9   :  { %v4965_v13 = vpop.f32.mrf.mxu0  ;;  %v4967_v14 = vpop.f32.mrf.mxu1 }
  0xba   :  { %v264_v7 = vadd.f32 %v4965_v13, %v177_v29  ;;  %v293_v10 = vadd.f32 %v4967_v14, %v177_v29  ;;  %v259_v13 = vadd.f32 %v4957_v3, %v4969_v27  ;;  %v288_v14 = vadd.f32 %v4959_v4, %v4969_v27  ;;  %v839_v4 = vld [vmem:[#allocation11 + $0x1c8] sm:$0xff]  ;;  %v4551_v27 = vld [vmem:[#allocation7] sm:$0xff] }
  0xbc   :  { %v307_v29 = vmax.f32 %v259_v13, 0.0 }
  0xbf   :  { %1102 = vperm.xlu2 %4655, %v820_v15   ;;  %v261_v15 = vadd.f32 %v4961_v8, %v172_v35 }
  0xc0   :  { %1097 = vperm.xlu1 %4654, %v819_v16   ;;  %1092 = vperm.xlu0 %4653, %v818_v17   ;;  %v290_v16 = vadd.f32 %v4963_v9, %v172_v35  ;;  %v843_v35 = vld [vmem:[#allocation11 + $0x1e8] sm:$0xff] }
  0xc1   :  { %v265_v18 = vpop.f32.mrf.mxu0  ;;  %v294_v19 = vpop.f32.mrf.mxu1  ;;  %v309_v8 = vmax.f32 %v261_v15, 0.0  ;;  %v870_v15 = vld [vmem:[#allocation11 + $0x2c0] sm:$0xff] }
  0xc2   :  { %v266_v63 = vadd.f32 %v265_v18, %v182_v37  ;;  %v295_v0 = vadd.f32 %v294_v19, %v182_v37  ;;  %v310_v9 = vmax.f32 %v290_v16, 0.0  ;;  %v847_v37 = vld [vmem:[#allocation11 + $0x208] sm:$0xff] }
  0xc4   :  { %v313_v17 = vmax.f32 %v266_v63, 0.0  ;;  %v314_v18 = vmax.f32 %v295_v0, 0.0  ;;  %v863_v63 = vld [vmem:[#allocation11 + $0x288] sm:$0xff]  ;;  %v4555_v0 = vld [vmem:[#allocation7 + $0x20] sm:$0xff] }
  0xc7   :  { %1117 = vperm.xlu2 %4655, %v823_v20  }
  0xc8   :  { %1112 = vperm.xlu1 %4654, %v822_v21   ;;  %1107 = vperm.xlu0 %4653, %v821_v22   ;;  %v838_v21 = vld [vmem:[#allocation11 + $0x1c0] sm:$0xff]  ;;  %v837_v22 = vld [vmem:[#allocation11 + $0x1b8] sm:$0xff] }
  0xc9   :  { %v268_v23 = vpop.f32.mrf.mxu0  ;;  %v297_v24 = vpop.f32.mrf.mxu1 }
  0xca   :  { %v269_v56 = vadd.f32 %v268_v23, %v187_v36  ;;  %v298_v57 = vadd.f32 %v297_v24, %v187_v36  ;;  %v836_v23 = vld [vmem:[#allocation11 + $0x1b0] sm:$0xff]  ;;  %v311_v24 = vmax.f32 %v264_v7, 0.0  ;;  %v842_v36 = vld [vmem:[#allocation11 + $0x1e0] sm:$0xff] }
  0xcb   :  { %v866_v7 = vld [vmem:[#allocation11 + $0x2a0] sm:$0xff] }
  0xcc   :  { %v315_v11 = vmax.f32 %v269_v56, 0.0  ;;  %v316_v12 = vmax.f32 %v298_v57, 0.0  ;;  %v861_v56 = vld [vmem:[#allocation11 + $0x278] sm:$0xff]  ;;  %v860_v57 = vld [vmem:[#allocation11 + $0x270] sm:$0xff] }
  0xcf   :  { %1132 = vperm.xlu2 %4655, %v826_v25   ;;  %v312_v25 = vmax.f32 %v293_v10, 0.0 }
  0xd0   :  { %1127 = vperm.xlu1 %4654, %v825_v26   ;;  %1122 = vperm.xlu0 %4653, %v824_v28   ;;  %v341_v26 = vpack.c.bf16 %v313_v17, %v311_v24  ;;  %v869_v17 = vld [vmem:[#allocation11 + $0x2b8] sm:$0xff] }
  0xd1   :  { %v270_v30 = vpop.f32.mrf.mxu0  ;;  %v299_v31 = vpop.f32.mrf.mxu1  ;;  %v342_v28 = vpack.c.bf16 %v314_v18, %v312_v25  ;;  %v4556_v18 = vld [vmem:[#allocation7 + $0x28] sm:$0xff]  ;;  %v877_v24 = vld [vmem:[#allocation11 + $0x2f8] sm:$0xff]  ;;  %v876_v25 = vld [vmem:[#allocation11 + $0x2f0] sm:$0xff] }
  0xd2   :  { %v271_v50 = vadd.f32 %v270_v30, %v192_v44  ;;  %v300_v51 = vadd.f32 %v299_v31, %v192_v44  ;;  %v308_v30 = vmax.f32 %v288_v14, 0.0  ;;  %v339_v31 = vpack.c.bf16 %v309_v8, %v307_v29  ;;  %v853_v44 = vld [vmem:[#allocation11 + $0x238] sm:$0xff]  ;;  %v875_v8 = vld [vmem:[#allocation11 + $0x2e8] sm:$0xff]  ;;  %v880_v29 = vld [vmem:[#allocation11 + $0x310] sm:$0xff] }
  0xd4   :  { %v317_v1 = vmax.f32 %v271_v50, 0.0  ;;  %v318_v2 = vmax.f32 %v300_v51, 0.0  ;;  %v340_v3 = vpack.c.bf16 %v310_v9, %v308_v30  ;;  %v854_v50 = vld [vmem:[#allocation11 + $0x240] sm:$0xff]  ;;  %v859_v51 = vld [vmem:[#allocation11 + $0x268] sm:$0xff]  ;;  %v4557_v9 = vld [vmem:[#allocation7 + $0x30] sm:$0xff] }
  0xd5   :  { %v879_v30 = vld [vmem:[#allocation11 + $0x308] sm:$0xff] }
  0xd6   :  { %v343_v19 = vpack.c.bf16 %v317_v1, %v315_v11  ;;  %v344_v20 = vpack.c.bf16 %v318_v2, %v316_v12  ;;  %v871_v12 = vld [vmem:[#allocation11 + $0x2c8] sm:$0xff] }
  0xd7   :  { %1147 = vperm.xlu2 %4655, %v829_v32   ;;  %v841_v32 = vld [vmem:[#allocation11 + $0x1d8] sm:$0xff] }
  0xd8   :  { %1142 = vperm.xlu1 %4654, %v828_v33   ;;  %1137 = vperm.xlu0 %4653, %v827_v34   ;;  %v840_v33 = vld [vmem:[#allocation11 + $0x1d0] sm:$0xff] }
  0xd9   :  { %v273_v38 = vpop.f32.mrf.mxu0  ;;  %v302_v39 = vpop.f32.mrf.mxu1  ;;  %v844_v34 = vld [vmem:[#allocation11 + $0x1f0] sm:$0xff] }
  0xda   :  { %v274_v46 = vadd.f32 %v273_v38, %v197_v43  ;;  %v303_v47 = vadd.f32 %v302_v39, %v197_v43  ;;  %v846_v38 = vld [vmem:[#allocation11 + $0x200] sm:$0xff]  ;;  %v845_v39 = vld [vmem:[#allocation11 + $0x1f8] sm:$0xff]  ;;  %v848_v43 = vld [vmem:[#allocation11 + $0x210] sm:$0xff] }
  0xdc   :  { %v319_v59 = vmax.f32 %v274_v46, 0.0  ;;  %v320_v60 = vmax.f32 %v303_v47, 0.0  ;;  %v851_v46 = vld [vmem:[#allocation11 + $0x228] sm:$0xff]  ;;  %v4553_v47 = vld [vmem:[#allocation7 + $0x10] sm:$0xff] }
  0xdf   :  { %1162 = vperm.xlu2 %4655, %v832_v40   ;;  %v4552_v40 = vld [vmem:[#allocation7 + $0x8] sm:$0xff] }
  0xe0   :  { %1157 = vperm.xlu1 %4654, %v831_v41   ;;  %1152 = vperm.xlu0 %4653, %v830_v42   ;;  %v850_v41 = vld [vmem:[#allocation11 + $0x220] sm:$0xff]  ;;  %v849_v42 = vld [vmem:[#allocation11 + $0x218] sm:$0xff] }
  0xe1   :  { %v275_v48 = vpop.f32.mrf.mxu0  ;;  %v304_v49 = vpop.f32.mrf.mxu1 }
  0xe2   :  { %v276_v52 = vadd.f32 %v275_v48, %v202_v45  ;;  %v305_v53 = vadd.f32 %v304_v49, %v202_v45  ;;  %v852_v45 = vld [vmem:[#allocation11 + $0x230] sm:$0xff]  ;;  %v855_v49 = vld [vmem:[#allocation11 + $0x248] sm:$0xff] }
  0xe3   :  { %v856_v48 = vld [vmem:[#allocation11 + $0x250] sm:$0xff] }
  0xe4   :  { %v321_v61 = vmax.f32 %v276_v52, 0.0  ;;  %v322_v62 = vmax.f32 %v305_v53, 0.0  ;;  %v858_v52 = vld [vmem:[#allocation11 + $0x260] sm:$0xff]  ;;  %v857_v53 = vld [vmem:[#allocation11 + $0x258] sm:$0xff] }
  0xe6   :  { %v345_v5 = vpack.c.bf16 %v321_v61, %v319_v59  ;;  %v346_v6 = vpack.c.bf16 %v322_v62, %v320_v60  ;;  %v4989_v59 = vpop.permute.xlu0 %370  ;;  %v865_v60 = vld [vmem:[#allocation11 + $0x298] sm:$0xff]  ;;  %v864_v61 = vld [vmem:[#allocation11 + $0x290] sm:$0xff]  ;;  %v4991_v62 = vpop.permute.xlu1 %375 }
  0xe7   :  { %1177 = vperm.xlu2 %4655, %v835_v54   ;;  %v4554_v54 = vld [vmem:[#allocation7 + $0x18] sm:$0xff] }
  0xe8   :  { %1172 = vperm.xlu1 %4654, %v834_v55   ;;  %1167 = vperm.xlu0 %4653, %v833_v58   ;;  %v862_v55 = vld [vmem:[#allocation11 + $0x280] sm:$0xff]  ;;  %v4987_v58 = vpop.permute.xlu2 %365 }
  0xe9   :  { %512 = vmatpush.bf16.msra.mxu2 %v345_v5  ;;  %561 = vmatpush.bf16.msra.mxu3 %v346_v6  ;;  %v868_v5 = vld [vmem:[#allocation11 + $0x2b0] sm:$0xff]  ;;  %v867_v6 = vld [vmem:[#allocation11 + $0x2a8] sm:$0xff] }
  0xed   :  { %513 = vmatpush.bf16.msra.mxu2 %v343_v19  ;;  %562 = vmatpush.bf16.msra.mxu3 %v344_v20  ;;  %v874_v20 = vld [vmem:[#allocation11 + $0x2e0] sm:$0xff] }
  0xee   :  { %v4997_v2 = vpop.permute.xlu0 %385  ;;  %v4999_v10 = vpop.permute.xlu1 %390 }
  0xef   :  { %1192 = vperm.xlu2 %4655, %v838_v21   ;;  %v873_v21 = vld [vmem:[#allocation11 + $0x2d8] sm:$0xff] }
  0xf0   :  { %1187 = vperm.xlu1 %4654, %v837_v22   ;;  %1182 = vperm.xlu0 %4653, %v836_v23   ;;  %v4993_v1 = vpop.permute.xlu2 %380  ;;  %v872_v23 = vld [vmem:[#allocation11 + $0x2d0] sm:$0xff] }
  0xf1   :  { %514 = vmatpush.bf16.msra.mxu2 %v341_v26  ;;  %563 = vmatpush.bf16.msra.mxu3 %v342_v28 }
  0xf5   :  { %515 = vmatpush.bf16.msra.mxu2 %v339_v31  ;;  %564 = vmatpush.bf16.msra.mxu3 %v340_v3  ;;  %v878_v3 = vld [vmem:[#allocation11 + $0x300] sm:$0xff] }
  0xf6   :  { %v5003_v16 = vpop.permute.xlu0 %400  ;;  %v5005_v19 = vpop.permute.xlu1 %405 }
  0xf7   :  { %1207 = vperm.xlu2 %4655, %v841_v32  }
  0xf8   :  { %1202 = vperm.xlu1 %4654, %v840_v33   ;;  %1197 = vperm.xlu0 %4653, %v839_v4   ;;  %v5001_v11 = vpop.permute.xlu2 %395  ;;  %v883_v4 = vld [vmem:[#allocation11 + $0x328] sm:$0xff] }
  0xf9   :  { %4275 = vmatmul.msk.bf16.vlgmr.msra.gmra.mxu2 %vm483_vm3, %v4551_v27  ;;  %4283 = vmatmul.msk.bf16.vlgmr.msra.gmra.mxu3 %vm483_vm3, %v4551_v27  ;;  %v882_v27 = vld [vmem:[#allocation11 + $0x320] sm:$0xff] }
  0xfe   :  { %v5011_v13 = vpop.permute.xlu0 %415  ;;  %v5013_v14 = vpop.permute.xlu1 %420 }
  0xff   :  { %1222 = vperm.xlu2 %4655, %v844_v34   ;;  %v881_v34 = vld [vmem:[#allocation11 + $0x318] sm:$0xff] }
 0x100   :  { %1217 = vperm.xlu1 %4654, %v843_v35   ;;  %1212 = vperm.xlu0 %4653, %v842_v36   ;;  %v5009_v22 = vpop.permute.xlu2 %410  ;;  %v4558_v35 = vld [vmem:[#allocation7 + $0x38] sm:$0xff] }
 0x106   :  { %v5017_v28 = vpop.permute.xlu0 %430  ;;  %v5021_v31 = vpop.permute.xlu1 %435 }
 0x107   :  { %1237 = vperm.xlu2 %4655, %v847_v37  }
 0x108   :  { %1232 = vperm.xlu1 %4654, %v846_v38   ;;  %1227 = vperm.xlu0 %4653, %v845_v39   ;;  %v5015_v26 = vpop.permute.xlu2 %425  ;;  %v886_v38 = vld [vmem:[#allocation11 + $0x340] sm:$0xff]  ;;  %v885_v39 = vld [vmem:[#allocation11 + $0x338] sm:$0xff] }
 0x109   :  { %4276 = vmatmul.msk.bf16.gmra.mxu2 %vm483_vm3, %v4552_v40  ;;  %4284 = vmatmul.msk.bf16.gmra.mxu3 %vm483_vm3, %v4552_v40 }
 0x10e   :  { %v5025_v33 = vpop.permute.xlu0 %912  ;;  %v5027_v36 = vpop.permute.xlu1 %917 }
 0x10f   :  { %1252 = vperm.xlu2 %4655, %v850_v41   ;;  %v884_v41 = vld [vmem:[#allocation11 + $0x330] sm:$0xff] }
 0x110   :  { %1247 = vperm.xlu1 %4654, %v849_v42   ;;  %1242 = vperm.xlu0 %4653, %v848_v43   ;;  %v5023_v32 = vpop.permute.xlu2 %440  ;;  %v889_v43 = vld [vmem:[#allocation11 + $0x358] sm:$0xff] }
 0x116   :  { %v5033_v40 = vpop.permute.xlu0 %927  ;;  %v5035_v42 = vpop.permute.xlu1 %932 }
 0x117   :  { %1267 = vperm.xlu2 %4655, %v853_v44   ;;  %v888_v44 = vld [vmem:[#allocation11 + $0x350] sm:$0xff] }
 0x118   :  { %1262 = vperm.xlu1 %4654, %v852_v45   ;;  %1257 = vperm.xlu0 %4653, %v851_v46   ;;  %v5031_v37 = vpop.permute.xlu2 %922  ;;  %v887_v46 = vld [vmem:[#allocation11 + $0x348] sm:$0xff] }
 0x119   :  { %4277 = vmatmul.msk.bf16.gmra.mxu2 %vm483_vm3, %v4553_v47  ;;  %4285 = vmatmul.msk.bf16.gmra.mxu3 %vm483_vm3, %v4553_v47 }
 0x11e   :  { %v5039_v47 = vpop.permute.xlu0 %942 }
 0x11f   :  { %1282 = vperm.xlu2 %4655, %v856_v48   ;;  %v5041_v48 = vpop.permute.xlu1 %947 }
 0x120   :  { %1277 = vperm.xlu1 %4654, %v855_v49   ;;  %1272 = vperm.xlu0 %4653, %v854_v50   ;;  %v5037_v45 = vpop.permute.xlu2 %937 }
 0x127   :  { %1297 = vperm.xlu2 %4655, %v859_v51   ;;  %v892_v51 = vld [vmem:[#allocation11 + $0x370] sm:$0xff] }
 0x128   :  { %1292 = vperm.xlu1 %4654, %v858_v52   ;;  %1287 = vperm.xlu0 %4653, %v857_v53   ;;  %v891_v52 = vld [vmem:[#allocation11 + $0x368] sm:$0xff] }
 0x129   :  { %4278 = vmatmul.msk.bf16.gmra.mxu2 %vm483_vm3, %v4554_v54  ;;  %4286 = vmatmul.msk.bf16.gmra.mxu3 %vm483_vm3, %v4554_v54 }
 0x12f   :  { %1312 = vperm.xlu2 %4655, %v862_v55   ;;  %v890_v55 = vld [vmem:[#allocation11 + $0x360] sm:$0xff] }
 0x130   :  { %1307 = vperm.xlu1 %4654, %v861_v56   ;;  %1302 = vperm.xlu0 %4653, %v860_v57   ;;  %v5045_v56 = vpop.permute.xlu2 %952 }
 0x137   :  { %1327 = vperm.xlu2 %4655, %v865_v60  }
 0x138   :  { %1322 = vperm.xlu1 %4654, %v864_v61   ;;  %1317 = vperm.xlu0 %4653, %v863_v63   ;;  %v5047_v61 = vpop.permute.xlu0 %957 }
 0x139   :  { %4279 = vmatmul.msk.bf16.gmra.mxu2 %vm483_vm3, %v4555_v0  ;;  %4287 = vmatmul.msk.bf16.gmra.mxu3 %vm483_vm3, %v4555_v0 }
 0x13f   :  { %1342 = vperm.xlu2 %4655, %v868_v5   ;;  %v895_v5 = vld [vmem:[#allocation11 + $0x388] sm:$0xff] }
 0x140   :  { %1337 = vperm.xlu1 %4654, %v867_v6   ;;  %1332 = vperm.xlu0 %4653, %v866_v7   ;;  %v894_v6 = vld [vmem:[#allocation11 + $0x380] sm:$0xff]  ;;  %v5049_v7 = vpop.permute.xlu1 %962 }
 0x147   :  { %1357 = vperm.xlu2 %4655, %v871_v12  }
 0x148   :  { %1352 = vperm.xlu1 %4654, %v870_v15   ;;  %1347 = vperm.xlu0 %4653, %v869_v17   ;;  %v893_v15 = vld [vmem:[#allocation11 + $0x378] sm:$0xff] }
 0x149   :  { %4280 = vmatmul.msk.bf16.gmra.mxu2 %vm483_vm3, %v4556_v18  ;;  %4288 = vmatmul.msk.bf16.gmra.mxu3 %vm483_vm3, %v4556_v18 }
 0x14f   :  { %1372 = vperm.xlu2 %4655, %v874_v20   ;;  %v5053_v20 = vpop.permute.xlu2 %967 }
 0x150   :  { %1367 = vperm.xlu1 %4654, %v873_v21   ;;  %1362 = vperm.xlu0 %4653, %v872_v23  }
 0x157   :  { %1387 = vperm.xlu2 %4655, %v877_v24   ;;  %v5059_v24 = vpop.permute.xlu0 %972 }
 0x158   :  { %1382 = vperm.xlu1 %4654, %v876_v25   ;;  %1377 = vperm.xlu0 %4653, %v875_v8  }
 0x159   :  { %4281 = vmatmul.msk.bf16.gmra.mxu2 %vm483_vm3, %v4557_v9  ;;  %4289 = vmatmul.msk.bf16.gmra.mxu3 %vm483_vm3, %v4557_v9  ;;  %v898_v9 = vld [vmem:[#allocation11 + $0x3a0] sm:$0xff] }
 0x15f   :  { %1402 = vperm.xlu2 %4655, %v880_v29  }
 0x160   :  { %1397 = vperm.xlu1 %4654, %v879_v30   ;;  %1392 = vperm.xlu0 %4653, %v878_v3   ;;  %v896_v3 = vld [vmem:[#allocation11 + $0x390] sm:$0xff] }
 0x167   :  { %1417 = vperm.xlu2 %4655, %v883_v4   ;;  %v5063_v4 = vpop.permute.xlu1 %977 }
 0x168   :  { %1412 = vperm.xlu1 %4654, %v882_v27   ;;  %1407 = vperm.xlu0 %4653, %v881_v34  }
 0x169   :  { %4282 = vmatmul.msk.bf16.gmra.mxu2 %vm483_vm3, %v4558_v35  ;;  %4290 = vmatmul.msk.bf16.gmra.mxu3 %vm483_vm3, %v4558_v35  ;;  %v5065_v35 = vpop.permute.xlu2 %982 }
 0x16f   :  { %1432 = vperm.xlu2 %4655, %v886_v38  }
 0x170   :  { %1427 = vperm.xlu1 %4654, %v885_v39   ;;  %1422 = vperm.xlu0 %4653, %v884_v41   ;;  %v901_v41 = vld [vmem:[#allocation11 + $0x3b8] sm:$0xff] }
 0x177   :  { %1447 = vperm.xlu2 %4655, %v889_v43   ;;  %v900_v43 = vld [vmem:[#allocation11 + $0x3b0] sm:$0xff] }
 0x178   :  { %1442 = vperm.xlu1 %4654, %v888_v44   ;;  %1437 = vperm.xlu0 %4653, %v887_v46   ;;  %v5067_v44 = vpop.permute.xlu0 %987 }
 0x17c   :  { %v517_v49 = vpop.f32.mrf.mxu2  ;;  %v566_v50 = vpop.f32.mrf.mxu3 }
 0x17d   :  { %v518_v53 = vadd.f32 %v517_v49, %v4987_v58  ;;  %v567_v54 = vadd.f32 %v566_v50, %v4987_v58  ;;  %v899_v49 = vld [vmem:[#allocation11 + $0x3a8] sm:$0xff] }
 0x17f   :  { %v606_v57 = vmax.f32 %v518_v53, 0.0  ;;  %v607_v60 = vmax.f32 %v567_v54, 0.0  ;;  %1462 = vperm.xlu2 %4655, %v892_v51  }
 0x180   :  { %1457 = vperm.xlu1 %4654, %v891_v52   ;;  %1452 = vperm.xlu0 %4653, %v890_v55   ;;  %v5071_v52 = vpop.permute.xlu1 %992 }
 0x181   :  { %2592 = vst [vmem:[#allocation14] sm:$0xff] %v606_v57 }
 0x182   :  { %2609 = vst [vmem:[#allocation14 + $0x80] sm:$0xff] %v607_v60 }
 0x184   :  { %v519_v63 = vpop.f32.mrf.mxu2  ;;  %v568_v0 = vpop.f32.mrf.mxu3 }
 0x185   :  { %v520_v58 = vadd.f32 %v519_v63, %v4989_v59  ;;  %v569_v12 = vadd.f32 %v568_v0, %v4989_v59  ;;  %v897_v59 = vld [vmem:[#allocation11 + $0x398] sm:$0xff]  ;;  %v903_v63 = vld [vmem:[#allocation11 + $0x3c8] sm:$0xff]  ;;  %v5077_v0 = vpop.permute.xlu2 %997 }
 0x187   :  { %v608_v17 = vmax.f32 %v520_v58, 0.0  ;;  %v609_v18 = vmax.f32 %v569_v12, 0.0  ;;  %1477 = vperm.xlu2 %4655, %v895_v5   ;;  %v5081_v58 = vpop.permute.xlu0 %1002 }
 0x188   :  { %1472 = vperm.xlu1 %4654, %v894_v6   ;;  %1467 = vperm.xlu0 %4653, %v893_v15   ;;  %v902_v6 = vld [vmem:[#allocation11 + $0x3c0] sm:$0xff] }
 0x189   :  { %2593 = vst [vmem:[#allocation14 + $0x8] sm:$0xff] %v608_v17  ;;  %v5055_v21 = vpack.c.bf16 %v608_v17, %v606_v57  ;;  %v5057_v23 = vpack.c.bf16 %v609_v18, %v607_v60  ;;  %v904_v60 = vld [vmem:[#allocation11 + $0x3d0] sm:$0xff]  ;;  %v5083_v17 = vpop.permute.xlu1 %1007 }
 0x18a   :  { %2610 = vst [vmem:[#allocation14 + $0x88] sm:$0xff] %v609_v18 }
 0x18c   :  { %v522_v25 = vpop.f32.mrf.mxu2  ;;  %v571_v8 = vpop.f32.mrf.mxu3 }
 0x18d   :  { %v523_v29 = vadd.f32 %v522_v25, %v4991_v62  ;;  %v572_v30 = vadd.f32 %v571_v8, %v4991_v62  ;;  %v907_v8 = vld [vmem:[#allocation11 + $0x3e8] sm:$0xff] }
 0x18f   :  { %v610_v27 = vmax.f32 %v523_v29, 0.0  ;;  %v611_v34 = vmax.f32 %v572_v30, 0.0  ;;  %1492 = vperm.xlu2 %4655, %v898_v9   ;;  %v906_v9 = vld [vmem:[#allocation11 + $0x3e0] sm:$0xff]  ;;  %v905_v29 = vld [vmem:[#allocation11 + $0x3d8] sm:$0xff]  ;;  %v5087_v30 = vpop.permute.xlu2 %1012 }
 0x190   :  { %1487 = vperm.xlu1 %4654, %v897_v59   ;;  %1482 = vperm.xlu0 %4653, %v896_v3  }
 0x191   :  { %2594 = vst [vmem:[#allocation14 + $0x10] sm:$0xff] %v610_v27 }
 0x192   :  { %2611 = vst [vmem:[#allocation14 + $0x90] sm:$0xff] %v611_v34 }
 0x194   :  { %v524_v38 = vpop.f32.mrf.mxu2  ;;  %v573_v39 = vpop.f32.mrf.mxu3 }
 0x195   :  { %v525_v62 = vadd.f32 %v524_v38, %v4993_v1  ;;  %v574_v46 = vadd.f32 %v573_v39, %v4993_v1 }
 0x197   :  { %v612_v50 = vmax.f32 %v525_v62, 0.0  ;;  %v613_v51 = vmax.f32 %v574_v46, 0.0  ;;  %1507 = vperm.xlu2 %4655, %v901_v41   ;;  %v909_v62 = vld [vmem:[#allocation11 + $0x3f8] sm:$0xff] }
 0x198   :  { %1502 = vperm.xlu1 %4654, %v900_v43   ;;  %1497 = vperm.xlu0 %4653, %v899_v49  }
 0x199   :  { %2595 = vst [vmem:[#allocation14 + $0x18] sm:$0xff] %v612_v50  ;;  %v5073_v53 = vpack.c.bf16 %v612_v50, %v610_v27  ;;  %v5075_v54 = vpack.c.bf16 %v613_v51, %v611_v34  ;;  %v5089_v34 = vpop.permute.xlu0 %1017  ;;  %v908_v50 = vld [vmem:[#allocation11 + $0x3f0] sm:$0xff] }
 0x19a   :  { %2612 = vst [vmem:[#allocation14 + $0x98] sm:$0xff] %v613_v51 }
 0x19c   :  { %v527_v55 = vpop.f32.mrf.mxu2  ;;  %v576_v57 = vpop.f32.mrf.mxu3 }
 0x19d   :  { %v528_v1 = vadd.f32 %v527_v55, %v4997_v2  ;;  %v577_v5 = vadd.f32 %v576_v57, %v4997_v2  ;;  %v5099_v57 = vpop.permute.xlu2 %1027 }
 0x19f   :  { %v614_v12 = vmax.f32 %v528_v1, 0.0  ;;  %v615_v15 = vmax.f32 %v577_v5, 0.0  ;;  %1522 = vperm.xlu2 %4655, %v904_v60  }
 0x1a0   :  { %1517 = vperm.xlu1 %4654, %v903_v63   ;;  %1512 = vperm.xlu0 %4653, %v902_v6  }
 0x1a1   :  { %2596 = vst [vmem:[#allocation14 + $0x20] sm:$0xff] %v614_v12  ;;  %v5101_v60 = vpop.permute.xlu0 %1032 }
 0x1a2   :  { %2613 = vst [vmem:[#allocation14 + $0xa0] sm:$0xff] %v615_v15 }
 0x1a4   :  { %v529_v18 = vpop.f32.mrf.mxu2  ;;  %v578_v25 = vpop.f32.mrf.mxu3 }
 0x1a5   :  { %v530_v59 = vadd.f32 %v529_v18, %v4999_v10  ;;  %v579_v2 = vadd.f32 %v578_v25, %v4999_v10  ;;  %v5095_v10 = vpop.permute.xlu1 %1022 }
 0x1a7   :  { %v616_v3 = vmax.f32 %v530_v59, 0.0  ;;  %v617_v27 = vmax.f32 %v579_v2, 0.0  ;;  %1537 = vperm.xlu2 %4655, %v907_v8   ;;  %v5111_v8 = vpop.permute.xlu2 %1042 }
 0x1a8   :  { %1532 = vperm.xlu1 %4654, %v906_v9   ;;  %1527 = vperm.xlu0 %4653, %v905_v29   ;;  %6408 = vst [vmem:[#allocation23_spill] sm:$0xff] %v5111_v8 }
 0x1a9   :  { %2597 = vst [vmem:[#allocation14 + $0x28] sm:$0xff] %v616_v3  ;;  %v5091_v38 = vpack.c.bf16 %v616_v3, %v614_v12  ;;  %v5093_v39 = vpack.c.bf16 %v617_v27, %v615_v15  ;;  %v5113_v2 = vpop.permute.xlu0 %1047 }
 0x1aa   :  { %2614 = vst [vmem:[#allocation14 + $0xa8] sm:$0xff] %v617_v27 }
 0x1ab   :  { %6409 = vst [vmem:[#allocation24_spill] sm:$0xff] %v5113_v2 }
 0x1ac   :  { %v532_v41 = vpop.f32.mrf.mxu2  ;;  %v581_v43 = vpop.f32.mrf.mxu3 }
 0x1ad   :  { %v533_v46 = vadd.f32 %v532_v41, %v5001_v11  ;;  %v582_v49 = vadd.f32 %v581_v43, %v5001_v11  ;;  %v5105_v12 = vpop.permute.xlu1 %1037 }
 0x1ae   :  { %6407 = vst [vmem:[#allocation22_spill] sm:$0xff] %v5105_v12 }
 0x1af   :  { %v618_v51 = vmax.f32 %v533_v46, 0.0  ;;  %v619_v55 = vmax.f32 %v582_v49, 0.0  ;;  %v5129_v46 = vpop.permute.xlu2 %1057 }
 0x1b0   :  { %1547 = vperm.xlu1 %4654, %v909_v62   ;;  %1542 = vperm.xlu0 %4653, %v908_v50   ;;  %6411 = vst [vmem:[#allocation26_spill] sm:$0xff] %v5129_v46 }
 0x1b1   :  { %2598 = vst [vmem:[#allocation14 + $0x30] sm:$0xff] %v618_v51  ;;  %v5137_v50 = vpop.permute.xlu0 %1062 }
 0x1b2   :  { %2615 = vst [vmem:[#allocation14 + $0xb0] sm:$0xff] %v619_v55 }
 0x1b3   :  { %6412 = vst [vmem:[#allocation27_spill] sm:$0xff] %v5137_v50 }
 0x1b4   :  { %v534_v63 = vpop.f32.mrf.mxu2  ;;  %v583_v1 = vpop.f32.mrf.mxu3 }
 0x1b5   :  { %v535_v5 = vadd.f32 %v534_v63, %v5003_v16  ;;  %v584_v6 = vadd.f32 %v583_v1, %v5003_v16  ;;  %v5123_v41 = vpop.permute.xlu1 %1052 }
 0x1b6   :  { %6410 = vst [vmem:[#allocation25_spill] sm:$0xff] %v5123_v41 }
 0x1b7   :  { %v620_v11 = vmax.f32 %v535_v5, 0.0  ;;  %v621_v15 = vmax.f32 %v584_v6, 0.0 }
 0x1b9   :  { %2599 = vst [vmem:[#allocation14 + $0x38] sm:$0xff] %v620_v11  ;;  %v5107_v18 = vpack.c.bf16 %v620_v11, %v618_v51  ;;  %v5109_v25 = vpack.c.bf16 %v621_v15, %v619_v55  ;;  %v5153_v11 = vpop.permute.xlu2 %1072 }
 0x1ba   :  { %2616 = vst [vmem:[#allocation14 + $0xb8] sm:$0xff] %v621_v15 }
 0x1bb   :  { %6414 = vst [vmem:[#allocation29_spill] sm:$0xff] %v5153_v11 }
 0x1bc   :  { %v537_v9 = vpop.f32.mrf.mxu2  ;;  %v586_v59 = vpop.f32.mrf.mxu3 }
 0x1bd   :  { %v5116_v29 = vadd.f32 %v537_v9, %v5005_v19  ;;  %v5119_v16 = vadd.f32 %v586_v59, %v5005_v19  ;;  %v5145_v63 = vpop.permute.xlu1 %1067  ;;  %v5157_v59 = vpop.permute.xlu0 %1077 }
 0x1be   :  { %6413 = vst [vmem:[#allocation28_spill] sm:$0xff] %v5145_v63 }
 0x1bf   :  { %v6336_v3 = vmax.f32 %v5116_v29, 0.0  ;;  %v6334_v27 = vmax.f32 %v5119_v16, 0.0  ;;  %6415 = vst [vmem:[#allocation30_spill] sm:$0xff] %v5157_v59 }
 0x1c1   :  { %2600 = vst [vmem:[#allocation14 + $0x40] sm:$0xff] %v6336_v3 }
 0x1c2   :  { %2617 = vst [vmem:[#allocation14 + $0xc0] sm:$0xff] %v6334_v27 }
 0x1c4   :  { %v539_v43 = vpop.f32.mrf.mxu2  ;;  %v588_v62 = vpop.f32.mrf.mxu3 }
 0x1c5   :  { %v5132_v49 = vadd.f32 %v539_v43, %v5009_v22  ;;  %v5135_v19 = vadd.f32 %v588_v62, %v5009_v22  ;;  %v5175_v3 = vpop.permute.xlu0 %1092 }
 0x1c6   :  { %6418 = vst [vmem:[#allocation33_spill] sm:$0xff] %v5175_v3 }
 0x1c7   :  { %v6335_v51 = vmax.f32 %v5132_v49, 0.0  ;;  %v6333_v55 = vmax.f32 %v5135_v19, 0.0 }
 0x1c9   :  { %2601 = vst [vmem:[#allocation14 + $0x48] sm:$0xff] %v6335_v51  ;;  %v5173_v51 = vpop.permute.xlu2 %1087 }
 0x1ca   :  { %2618 = vst [vmem:[#allocation14 + $0xc8] sm:$0xff] %v6333_v55 }
 0x1cb   :  { %6417 = vst [vmem:[#allocation32_spill] sm:$0xff] %v5173_v51 }
 0x1cc   :  { %v542_v1 = vpop.f32.mrf.mxu2  ;;  %v591_v5 = vpop.f32.mrf.mxu3 }
 0x1cd   :  { %v5148_v6 = vadd.f32 %v542_v1, %v5011_v13  ;;  %v5151_v22 = vadd.f32 %v591_v5, %v5011_v13  ;;  %v5163_v1 = vpop.permute.xlu1 %1082  ;;  %v5183_v11 = vpop.permute.xlu0 %1107 }
 0x1ce   :  { %6416 = vst [vmem:[#allocation31_spill] sm:$0xff] %v5163_v1 }
 0x1cf   :  { %v6338_v15 = vmax.f32 %v5148_v6, 0.0  ;;  %v6337_v9 = vmax.f32 %v5151_v22, 0.0  ;;  %6421 = vst [vmem:[#allocation36_spill] sm:$0xff] %v5183_v11 }
 0x1d1   :  { %2602 = vst [vmem:[#allocation14 + $0x50] sm:$0xff] %v6338_v15 }
 0x1d2   :  { %2619 = vst [vmem:[#allocation14 + $0xd0] sm:$0xff] %v6337_v9 }
 0x1d4   :  { %v544_v43 = vpop.f32.mrf.mxu2  ;;  %v593_v62 = vpop.f32.mrf.mxu3 }
 0x1d5   :  { %v5166_v13 = vadd.f32 %v544_v43, %v5013_v14  ;;  %v5169_v5 = vadd.f32 %v593_v62, %v5013_v14  ;;  %v5179_v59 = vpop.permute.xlu1 %1097 }
 0x1d6   :  { %6419 = vst [vmem:[#allocation34_spill] sm:$0xff] %v5179_v59  ;;  %v5193_v59 = vpop.permute.xlu0 %1122 }
 0x1d7   :  { %v628_v55 = vmax.f32 %v5166_v13, 0.0  ;;  %v629_v27 = vmax.f32 %v5169_v5, 0.0  ;;  %v5181_v13 = vpop.permute.xlu2 %1102  ;;  %6424 = vst [vmem:[#allocation39_spill] sm:$0xff] %v5193_v59 }
 0x1d8   :  { %6420 = vst [vmem:[#allocation35_spill] sm:$0xff] %v5181_v13 }
 0x1d9   :  { %2603 = vst [vmem:[#allocation14 + $0x58] sm:$0xff] %v628_v55 }
 0x1da   :  { %2620 = vst [vmem:[#allocation14 + $0xd8] sm:$0xff] %v629_v27 }
 0x1dc   :  { %v547_v9 = vpop.f32.mrf.mxu2  ;;  %v596_v15 = vpop.f32.mrf.mxu3 }
 0x1dd   :  { %v548_v1 = vadd.f32 %v547_v9, %v5015_v26  ;;  %v597_v43 = vadd.f32 %v596_v15, %v5015_v26  ;;  %v5187_v46 = vpop.permute.xlu1 %1112 }
 0x1de   :  { %6422 = vst [vmem:[#allocation37_spill] sm:$0xff] %v5187_v46 }
 0x1df   :  { %v630_v14 = vmax.f32 %v548_v1, 0.0  ;;  %v631_v62 = vmax.f32 %v597_v43, 0.0  ;;  %v5191_v13 = vpop.permute.xlu2 %1117 }
 0x1e0   :  { %6423 = vst [vmem:[#allocation38_spill] sm:$0xff] %v5191_v13 }
 0x1e1   :  { %2604 = vst [vmem:[#allocation14 + $0x60] sm:$0xff] %v630_v14 }
 0x1e2   :  { %2621 = vst [vmem:[#allocation14 + $0xe0] sm:$0xff] %v631_v62 }
 0x1e4   :  { %v549_v5 = vpop.f32.mrf.mxu2  ;;  %v598_v51 = vpop.f32.mrf.mxu3 }
 0x1e5   :  { %v550_v3 = vadd.f32 %v549_v5, %v5017_v28  ;;  %v599_v63 = vadd.f32 %v598_v51, %v5017_v28  ;;  %v5195_v28 = vpop.permute.xlu1 %1127 }
 0x1e6   :  { %6425 = vst [vmem:[#allocation40_spill] sm:$0xff] %v5195_v28 }
 0x1e7   :  { %v632_v50 = vmax.f32 %v550_v3, 0.0  ;;  %v633_v9 = vmax.f32 %v599_v63, 0.0  ;;  %v5199_v2 = vpop.permute.xlu2 %1132 }
 0x1e8   :  { %6426 = vst [vmem:[#allocation41_spill] sm:$0xff] %v5199_v2 }
 0x1e9   :  { %2605 = vst [vmem:[#allocation14 + $0x68] sm:$0xff] %v632_v50 }
 0x1ea   :  { %2622 = vst [vmem:[#allocation14 + $0xe8] sm:$0xff] %v633_v9 }
 0x1ec   :  { %v552_v26 = vpop.f32.mrf.mxu2  ;;  %v601_v15 = vpop.f32.mrf.mxu3 }
 0x1ed   :  { %v553_v1 = vadd.f32 %v552_v26, %v5021_v31  ;;  %v602_v43 = vadd.f32 %v601_v15, %v5021_v31  ;;  %v5201_v31 = vpop.permute.xlu0 %1137  ;;  %v5203_v28 = vpop.permute.xlu1 %1142 }
 0x1ee   :  { %6427 = vst [vmem:[#allocation42_spill] sm:$0xff] %v5201_v31 }
 0x1ef   :  { %v634_v11 = vmax.f32 %v553_v1, 0.0  ;;  %v635_v5 = vmax.f32 %v602_v43, 0.0  ;;  %v778_v43 = vpack.c.bf16 %v632_v50, %v630_v14  ;;  %6428 = vst [vmem:[#allocation43_spill] sm:$0xff] %v5203_v28  ;;  %v6433_v50 = vmax.f32 %v5116_v29, 0.0 }
 0x1f0   :  { %v6434_v14 = vmax.f32 %v5132_v49, 0.0  ;;  %v4594_v49 = vld [vmem:[#allocation10 + $0x118] sm:$0xff] }
 0x1f1   :  { %2606 = vst [vmem:[#allocation14 + $0x70] sm:$0xff] %v634_v11 }
 0x1f2   :  { %2623 = vst [vmem:[#allocation14 + $0xf0] sm:$0xff] %v635_v5 }
 0x1f4   :  { %v554_v3 = vpop.f32.mrf.mxu2  ;;  %v603_v51 = vpop.f32.mrf.mxu3 }
 0x1f5   :  { %v555_v63 = vadd.f32 %v554_v3, %v5023_v32  ;;  %v604_v46 = vadd.f32 %v603_v51, %v5023_v32  ;;  %v779_v3 = vpack.c.bf16 %v633_v9, %v631_v62  ;;  %v6429_v32 = vmax.f32 %v5148_v6, 0.0  ;;  %v5207_v51 = vpop.permute.xlu2 %1147 }
 0x1f6   :  { %6430 = vst [vmem:[#allocation44_spill] sm:$0xff] %v5207_v51  ;;  %v774_v62 = vpack.c.bf16 %v6434_v14, %v6433_v50  ;;  %v6435_v9 = vmax.f32 %v5119_v16, 0.0  ;;  %v4562_v14 = vld [vmem:[#allocation10 + $0x18] sm:$0xff] }
 0x1f7   :  { %v636_v41 = vmax.f32 %v555_v63, 0.0  ;;  %v637_v26 = vmax.f32 %v604_v46, 0.0  ;;  %v776_v46 = vpack.c.bf16 %v628_v55, %v6429_v32  ;;  %v6436_v55 = vmax.f32 %v5135_v19, 0.0  ;;  %v4560_v63 = vld [vmem:[#allocation10 + $0x8] sm:$0xff] }
 0x1f8   :  { %v4596_v32 = vld [vmem:[#allocation10 + $0x128] sm:$0xff] }
 0x1f9   :  { %2607 = vst [vmem:[#allocation14 + $0x78] sm:$0xff] %v636_v41  ;;  %v780_v15 = vpack.c.bf16 %v636_v41, %v634_v11  ;;  %v781_v1 = vpack.c.bf16 %v637_v26, %v635_v5  ;;  %v6431_v41 = vmax.f32 %v5151_v22, 0.0  ;;  %v5211_v5 = vpop.permute.xlu0 %1152  ;;  %v775_v6 = vpack.c.bf16 %v6436_v55, %v6435_v9  ;;  %v5221_v22 = vpop.permute.xlu1 %1157 }
 0x1fa   :  { %2624 = vst [vmem:[#allocation14 + $0xf8] sm:$0xff] %v637_v26  ;;  %v4595_v26 = vld [vmem:[#allocation10 + $0x120] sm:$0xff] }
 0x1fb   :  { %1934 = vmatpush.bf16.msrb.mxu0 %v780_v15  ;;  %4623 = vmatpush.bf16.msrb.mxu2 %v780_v15  ;;  %v777_v11 = vpack.c.bf16 %v629_v27, %v6431_v41  ;;  %6432 = vst [vmem:[#allocation45_spill] sm:$0xff] %v5211_v5  ;;  %4198 = dma.vmem_to_hbm [thread:$0]  %s4191_s15, 4096, %s4193_s2, [#allocation15], %s4861_s13, %s4861_s13, %s4862_s14  }
 0x1fc   :  { %2263 = vmatpush.bf16.msrb.mxu1 %v781_v1  ;;  %4631 = vmatpush.bf16.msrb.mxu3 %v781_v1  ;;  %6437 = vst [vmem:[#allocation46_spill] sm:$0xff] %v5221_v22 }
 0x1fd   :  { %v5225_v27 = vpop.permute.xlu2 %1162 }
 0x1fe   :  { %6438 = vst [vmem:[#allocation47_spill] sm:$0xff] %v5225_v27 }
 0x1ff   :  { %1935 = vmatpush.bf16.msrb.mxu0 %v778_v43  ;;  %4624 = vmatpush.bf16.msrb.mxu2 %v778_v43 }
 0x200   :  { %2264 = vmatpush.bf16.msrb.mxu1 %v779_v3  ;;  %4632 = vmatpush.bf16.msrb.mxu3 %v779_v3  ;;  %v4561_v3 = vld [vmem:[#allocation10 + $0x10] sm:$0xff] }
 0x201   :  { %v5229_v29 = vpop.permute.xlu0 %1167  ;;  %v5235_v16 = vpop.permute.xlu1 %1172 }
 0x202   :  { %6439 = vst [vmem:[#allocation48_spill] sm:$0xff] %v5229_v29 }
 0x203   :  { %1936 = vmatpush.bf16.msrb.mxu0 %v776_v46  ;;  %4625 = vmatpush.bf16.msrb.mxu2 %v776_v46  ;;  %6440 = vst [vmem:[#allocation49_spill] sm:$0xff] %v5235_v16 }
 0x204   :  { %2265 = vmatpush.bf16.msrb.mxu1 %v777_v11  ;;  %4633 = vmatpush.bf16.msrb.mxu3 %v777_v11 }
 0x207   :  { %1937 = vmatpush.bf16.msrb.mxu0 %v774_v62  ;;  %4626 = vmatpush.bf16.msrb.mxu2 %v774_v62  ;;  %v4597_v62 = vld [vmem:[#allocation10 + $0x130] sm:$0xff] }
 0x208   :  { %2266 = vmatpush.bf16.msrb.mxu1 %v775_v6  ;;  %4634 = vmatpush.bf16.msrb.mxu3 %v775_v6 }
 0x209   :  { %v5243_v19 = vpop.permute.xlu0 %1182 }
 0x20a   :  { %6442 = vst [vmem:[#allocation51_spill] sm:$0xff] %v5243_v19 }
 0x20b   :  { %1938 = vmatpush.bf16.msrb.mxu0 %v5107_v18  ;;  %4627 = vmatpush.bf16.msrb.mxu2 %v5107_v18  ;;  %v5241_v18 = vpop.permute.xlu2 %1177 }
 0x20c   :  { %2267 = vmatpush.bf16.msrb.mxu1 %v5109_v25  ;;  %4635 = vmatpush.bf16.msrb.mxu3 %v5109_v25  ;;  %6441 = vst [vmem:[#allocation50_spill] sm:$0xff] %v5241_v18  ;;  %v4559_v25 = vld [vmem:[#allocation10] sm:$0xff]  ;;  %v4602_v18 = vld [vmem:[#allocation10 + $0x158] sm:$0xff] }
 0x20f   :  { %1939 = vmatpush.bf16.msrb.mxu0 %v5091_v38  ;;  %4628 = vmatpush.bf16.msrb.mxu2 %v5091_v38 }
 0x210   :  { %2268 = vmatpush.bf16.msrb.mxu1 %v5093_v39  ;;  %4636 = vmatpush.bf16.msrb.mxu3 %v5093_v39 }
 0x211   :  { %v5253_v38 = vpop.permute.xlu0 %1197 }
 0x212   :  { %6445 = vst [vmem:[#allocation54_spill] sm:$0xff] %v5253_v38  ;;  %v4601_v38 = vld [vmem:[#allocation10 + $0x150] sm:$0xff] }
 0x213   :  { %1940 = vmatpush.bf16.msrb.mxu0 %v5073_v53  ;;  %4629 = vmatpush.bf16.msrb.mxu2 %v5073_v53  ;;  %v5249_v53 = vpop.permute.xlu1 %1187 }
 0x214   :  { %2269 = vmatpush.bf16.msrb.mxu1 %v5075_v54  ;;  %4637 = vmatpush.bf16.msrb.mxu3 %v5075_v54  ;;  %6443 = vst [vmem:[#allocation52_spill] sm:$0xff] %v5249_v53  ;;  %v5251_v54 = vpop.permute.xlu2 %1192 }
 0x215   :  { %6444 = vst [vmem:[#allocation53_spill] sm:$0xff] %v5251_v54 }
 0x217   :  { %1941 = vmatpush.bf16.msrb.mxu0 %v5055_v21  ;;  %4630 = vmatpush.bf16.msrb.mxu2 %v5055_v21 }
 0x218   :  { %2270 = vmatpush.bf16.msrb.mxu1 %v5057_v23  ;;  %4638 = vmatpush.bf16.msrb.mxu3 %v5057_v23 }
 0x219   :  { %v5259_v21 = vpop.permute.xlu0 %1212 }
 0x21a   :  { %1942 = vmatmul.bf16.vlgmr.msrb.gmra.mxu0 %v4559_v25  ;;  %2117 = vmatmul.bf16.vlgmr.msrb.gmra.mxu2 %v4594_v49  ;;  %6448 = vst [vmem:[#allocation57_spill] sm:$0xff] %v5259_v21 }
 0x21b   :  { %2271 = vmatmul.bf16.vlgmr.msrb.gmra.mxu1 %v4559_v25  ;;  %2446 = vmatmul.bf16.vlgmr.msrb.gmra.mxu3 %v4594_v49  ;;  %v5255_v39 = vpop.permute.xlu1 %1202 }
 0x21c   :  { %6446 = vst [vmem:[#allocation55_spill] sm:$0xff] %v5255_v39  ;;  %v5257_v15 = vpop.permute.xlu2 %1207 }
 0x21d   :  { %6447 = vst [vmem:[#allocation56_spill] sm:$0xff] %v5257_v15  ;;  %v4566_v15 = vld [vmem:[#allocation10 + $0x38] sm:$0xff] }
 0x221   :  { %v5265_v43 = vpop.permute.xlu0 %1227 }
 0x222   :  { %6451 = vst [vmem:[#allocation60_spill] sm:$0xff] %v5265_v43  ;;  %v4565_v43 = vld [vmem:[#allocation10 + $0x30] sm:$0xff] }
 0x223   :  { %v5261_v23 = vpop.permute.xlu1 %1217 }
 0x224   :  { %6449 = vst [vmem:[#allocation58_spill] sm:$0xff] %v5261_v23  ;;  %v5263_v1 = vpop.permute.xlu2 %1222  ;;  %v4600_v23 = vld [vmem:[#allocation10 + $0x148] sm:$0xff] }
 0x225   :  { %6450 = vst [vmem:[#allocation59_spill] sm:$0xff] %v5263_v1 }
 0x229   :  { %v5271_v11 = vpop.permute.xlu0 %1242 }
 0x22a   :  { %1947 = vmatmul.bf16.gmra.mxu0 %v4560_v63  ;;  %2122 = vmatmul.bf16.gmra.mxu2 %v4595_v26  ;;  %6454 = vst [vmem:[#allocation63_spill] sm:$0xff] %v5271_v11 }
 0x22b   :  { %2276 = vmatmul.bf16.gmra.mxu1 %v4560_v63  ;;  %2451 = vmatmul.bf16.gmra.mxu3 %v4595_v26  ;;  %v5267_v46 = vpop.permute.xlu1 %1232  ;;  %v4563_v63 = vld [vmem:[#allocation10 + $0x20] sm:$0xff]  ;;  %v4598_v26 = vld [vmem:[#allocation10 + $0x138] sm:$0xff] }
 0x22c   :  { %6452 = vst [vmem:[#allocation61_spill] sm:$0xff] %v5267_v46  ;;  %v5269_v41 = vpop.permute.xlu2 %1237 }
 0x22d   :  { %6453 = vst [vmem:[#allocation62_spill] sm:$0xff] %v5269_v41 }
 0x231   :  { %v5277_v55 = vpop.permute.xlu0 %1257 }
 0x232   :  { %6457 = vst [vmem:[#allocation66_spill] sm:$0xff] %v5277_v55 }
 0x233   :  { %v5273_v50 = vpop.permute.xlu1 %1247 }
 0x234   :  { %6455 = vst [vmem:[#allocation64_spill] sm:$0xff] %v5273_v50  ;;  %v5275_v9 = vpop.permute.xlu2 %1252  ;;  %v4564_v50 = vld [vmem:[#allocation10 + $0x28] sm:$0xff] }
 0x235   :  { %6456 = vst [vmem:[#allocation65_spill] sm:$0xff] %v5275_v9  ;;  %v4599_v9 = vld [vmem:[#allocation10 + $0x140] sm:$0xff] }
 0x239   :  { %v5283_v49 = vpop.permute.xlu0 %1272 }
 0x23a   :  { %1952 = vmatmul.bf16.gmra.mxu0 %v4561_v3  ;;  %2127 = vmatmul.bf16.gmra.mxu2 %v4596_v32 }
 0x23b   :  { %2281 = vmatmul.bf16.gmra.mxu1 %v4561_v3  ;;  %2456 = vmatmul.bf16.gmra.mxu3 %v4596_v32  ;;  %v5279_v6 = vpop.permute.xlu1 %1262 }
 0x23c   :  { %v5281_v25 = vpop.permute.xlu2 %1267 }
 0x241   :  { %v5289_v55 = vpop.permute.xlu0 %1287 }
 0x243   :  { %v5285_v3 = vpop.permute.xlu1 %1277 }
 0x244   :  { %v5287_v32 = vpop.permute.xlu2 %1282 }
 0x249   :  { %v5295_v11 = vpop.permute.xlu0 %1302 }
 0x24a   :  { %1957 = vmatmul.bf16.gmra.mxu0 %v4562_v14  ;;  %2132 = vmatmul.bf16.gmra.mxu2 %v4597_v62 }
 0x24b   :  { %2286 = vmatmul.bf16.gmra.mxu1 %v4562_v14  ;;  %2461 = vmatmul.bf16.gmra.mxu3 %v4597_v62  ;;  %v5291_v14 = vpop.permute.xlu1 %1292 }
 0x24c   :  { %v5293_v62 = vpop.permute.xlu2 %1297 }
 0x253   :  { %v5297_v46 = vpop.permute.xlu1 %1307 }
 0x25a   :  { %1962 = vmatmul.bf16.gmra.mxu0 %v4563_v63  ;;  %2137 = vmatmul.bf16.gmra.mxu2 %v4598_v26 }
 0x25b   :  { %2291 = vmatmul.bf16.gmra.mxu1 %v4563_v63  ;;  %2466 = vmatmul.bf16.gmra.mxu3 %v4598_v26  ;;  %v5299_v63 = vpop.permute.xlu2 %1312  ;;  %v5301_v26 = vpop.permute.xlu0 %1317 }
 0x25c   :  { %v5303_v41 = vpop.permute.xlu1 %1322 }
 0x263   :  { %v5305_v1 = vpop.permute.xlu2 %1327  ;;  %v5307_v21 = vpop.permute.xlu0 %1332 }
 0x26a   :  { %1967 = vmatmul.bf16.gmra.mxu0 %v4564_v50  ;;  %2142 = vmatmul.bf16.gmra.mxu2 %v4599_v9 }
 0x26b   :  { %2296 = vmatmul.bf16.gmra.mxu1 %v4564_v50  ;;  %2471 = vmatmul.bf16.gmra.mxu3 %v4599_v9  ;;  %v5309_v50 = vpop.permute.xlu1 %1337  ;;  %v5311_v9 = vpop.permute.xlu2 %1342 }
 0x26c   :  { %v5313_v39 = vpop.permute.xlu0 %1347 }
 0x273   :  { %v5315_v54 = vpop.permute.xlu1 %1352  ;;  %v5317_v53 = vpop.permute.xlu2 %1357 }
 0x274   :  { %v5319_v19 = vpop.permute.xlu0 %1362 }
 0x27a   :  { %1972 = vmatmul.bf16.gmra.mxu0 %v4565_v43  ;;  %2147 = vmatmul.bf16.gmra.mxu2 %v4600_v23 }
 0x27b   :  { %2301 = vmatmul.bf16.gmra.mxu1 %v4565_v43  ;;  %2476 = vmatmul.bf16.gmra.mxu3 %v4600_v23  ;;  %v5321_v43 = vpop.permute.xlu1 %1367  ;;  %v4567_v23 = vld [vmem:[#allocation10 + $0x40] sm:$0xff]  ;;  %v5323_v29 = vpop.permute.xlu2 %1372 }
 0x27c   :  { %v5326_v5 = vpop.permute.xlu0 %1377 }
 0x283   :  { %v5333_v13 = vpop.permute.xlu2 %1387 }
 0x284   :  { %6458 = vst [vmem:[#allocation67_spill] sm:$0xff] %v5333_v13 }
 0x28a   :  { %1977 = vmatmul.bf16.gmra.mxu0 %v4566_v15  ;;  %2152 = vmatmul.bf16.gmra.mxu2 %v4601_v38 }
 0x28b   :  { %2306 = vmatmul.bf16.gmra.mxu1 %v4566_v15  ;;  %2481 = vmatmul.bf16.gmra.mxu3 %v4601_v38  ;;  %v5329_v15 = vpop.permute.xlu1 %1382 }
 0x293   :  { %v5339_v12 = vpop.permute.xlu1 %1397 }
 0x294   :  { %6459 = vst [vmem:[#allocation68_spill] sm:$0xff] %v5339_v12 }
 0x297   :  { %v1943_v16 = vpop.f32.mrf.mxu0 }
 0x298   :  { %v1944_v27 = vadd.f32 %v1943_v16, %v5025_v33  ;;  %v2272_v22 = vpop.f32.mrf.mxu1 }
 0x299   :  { %v2273_v51 = vadd.f32 %v2272_v22, %v5025_v33  ;;  %v5336_v22 = vpop.permute.xlu0 %1392 }
 0x29a   :  { %1982 = vmatmul.bf16.gmra.mxu0 %v4567_v23  ;;  %2157 = vmatmul.bf16.gmra.mxu2 %v4602_v18 }
 0x29b   :  { %2311 = vmatmul.bf16.gmra.mxu1 %v4567_v23  ;;  %2486 = vmatmul.bf16.gmra.mxu3 %v4602_v18  ;;  %v4568_v18 = vld [vmem:[#allocation10 + $0x48] sm:$0xff]  ;;  %v4603_v23 = vld [vmem:[#allocation10 + $0x160] sm:$0xff] }
 0x29c   :  { %2881 = vmax.xlane.f32.xlu0 %v2273_v51  ;;  %2625 = vmax.xlane.f32.xlu2 %v1944_v27 }
 0x29d   :  { %v2118_v38 = vpop.f32.mrf.mxu2 }
 0x29e   :  { %v2447_v28 = vpop.f32.mrf.mxu3  ;;  %v2119_v33 = vadd.f32 %v2118_v38, %v5279_v6 }
 0x29f   :  { %v2448_v31 = vadd.f32 %v2447_v28, %v5279_v6  ;;  %v1945_v2 = vpop.f32.mrf.mxu0  ;;  %v5343_v6 = vpop.permute.xlu2 %1402 }
 0x2a0   :  { %v1946_v16 = vadd.f32 %v1945_v2, %v5027_v36  ;;  %v2274_v59 = vpop.f32.mrf.mxu1  ;;  %6460 = vst [vmem:[#allocation69_spill] sm:$0xff] %v5343_v6 }
 0x2a1   :  { %3021 = vmax.xlane.f32.xlu1 %v2448_v31  ;;  %v2275_v8 = vadd.f32 %v2274_v59, %v5027_v36  ;;  %v5345_v38 = vpop.permute.xlu0 %1407 }
 0x2a2   :  { %6461 = vst [vmem:[#allocation70_spill] sm:$0xff] %v5345_v38  ;;  %v4604_v38 = vld [vmem:[#allocation10 + $0x168] sm:$0xff] }
 0x2a4   :  { %2627 = vmax.xlane.f32.xlu0 %v1946_v16  ;;  %2765 = vmax.xlane.f32.xlu2 %v2119_v33 }
 0x2a5   :  { %v2120_v51 = vpop.f32.mrf.mxu2 }
 0x2a6   :  { %v2449_v27 = vpop.f32.mrf.mxu3  ;;  %v2121_v31 = vadd.f32 %v2120_v51, %v5281_v25  ;;  %v5348_v51 = vpop.permute.xlu1 %1412 }
 0x2a7   :  { %v1948_v28 = vpop.f32.mrf.mxu0  ;;  %v2450_v13 = vadd.f32 %v2449_v27, %v5281_v25  ;;  %6462 = vst [vmem:[#allocation71_spill] sm:$0xff] %v5348_v51 }
 0x2a8   :  { %v2277_v2 = vpop.f32.mrf.mxu1  ;;  %v1949_v16 = vadd.f32 %v1948_v28, %v5031_v37 }
 0x2a9   :  { %2883 = vmax.xlane.f32.xlu1 %v2275_v8  ;;  %v2278_v25 = vadd.f32 %v2277_v2, %v5031_v37  ;;  %v5354_v6 = vpop.permute.xlu0 %1422 }
 0x2aa   :  { %1987 = vmatmul.bf16.gmra.mxu0 %v4568_v18  ;;  %2162 = vmatmul.bf16.gmra.mxu2 %v4603_v23  ;;  %6464 = vst [vmem:[#allocation73_spill] sm:$0xff] %v5354_v6 }
 0x2ab   :  { %2316 = vmatmul.bf16.gmra.mxu1 %v4568_v18  ;;  %2491 = vmatmul.bf16.gmra.mxu3 %v4603_v23  ;;  %v5352_v23 = vpop.permute.xlu2 %1417 }
 0x2ac   :  { %2767 = vmax.xlane.f32.xlu0 %v2121_v31  ;;  %3023 = vmax.xlane.f32.xlu2 %v2450_v13  ;;  %6463 = vst [vmem:[#allocation72_spill] sm:$0xff] %v5352_v23  ;;  %v4569_v31 = vld [vmem:[#allocation10 + $0x50] sm:$0xff] }
 0x2ad   :  { %v2123_v36 = vpop.f32.mrf.mxu2 }
 0x2ae   :  { %v2452_v59 = vpop.f32.mrf.mxu3  ;;  %v2124_v28 = vadd.f32 %v2123_v36, %v5283_v49  ;;  %v5359_v2 = vpop.permute.xlu1 %1427 }
 0x2af   :  { %v1950_v33 = vpop.f32.mrf.mxu0  ;;  %v2453_v27 = vadd.f32 %v2452_v59, %v5283_v49  ;;  %6465 = vst [vmem:[#allocation74_spill] sm:$0xff] %v5359_v2 }
 0x2b0   :  { %v2279_v8 = vpop.f32.mrf.mxu1  ;;  %v1951_v51 = vadd.f32 %v1950_v33, %v5033_v40 }
 0x2b1   :  { %2629 = vmax.xlane.f32.xlu1 %v1949_v16  ;;  %v2280_v37 = vadd.f32 %v2279_v8, %v5033_v40  ;;  %v5364_v6 = vpop.permute.xlu0 %1437 }
 0x2b3   :  { %v5362_v36 = vpop.permute.xlu2 %1432 }
 0x2b4   :  { %3025 = vmax.xlane.f32.xlu0 %v2453_v27  ;;  %2885 = vmax.xlane.f32.xlu2 %v2278_v25  ;;  %6466 = vst [vmem:[#allocation75_spill] sm:$0xff] %v5362_v36 }
 0x2b5   :  { %v2125_v18 = vpop.f32.mrf.mxu2 }
 0x2b6   :  { %v2454_v13 = vpop.f32.mrf.mxu3  ;;  %v2126_v40 = vadd.f32 %v2125_v18, %v5285_v3  ;;  %v5368_v8 = vpop.permute.xlu1 %1442 }
 0x2b7   :  { %v1953_v12 = vpop.f32.mrf.mxu0  ;;  %v2455_v27 = vadd.f32 %v2454_v13, %v5285_v3  ;;  %6467 = vst [vmem:[#allocation76_spill] sm:$0xff] %v5368_v8 }
 0x2b8   :  { %v2282_v16 = vpop.f32.mrf.mxu1 }
 0x2b9   :  { %2769 = vmax.xlane.f32.xlu1 %v2124_v28  ;;  %v2283_v13 = vadd.f32 %v2282_v16, %v5035_v42  ;;  %v5375_v18 = vpop.permute.xlu0 %1452 }
 0x2ba   :  { %1992 = vmatmul.bf16.gmra.mxu0 %v4569_v31  ;;  %2167 = vmatmul.bf16.gmra.mxu2 %v4604_v38  ;;  %6469 = vst [vmem:[#allocation78_spill] sm:$0xff] %v5375_v18  ;;  %v4606_v18 = vld [vmem:[#allocation10 + $0x178] sm:$0xff] }
 0x2bb   :  { %2321 = vmatmul.bf16.gmra.mxu1 %v4569_v31  ;;  %2496 = vmatmul.bf16.gmra.mxu3 %v4604_v38  ;;  %v4570_v31 = vld [vmem:[#allocation10 + $0x58] sm:$0xff]  ;;  %v5371_v23 = vpop.permute.xlu2 %1447 }
 0x2bc   :  { %2887 = vmax.xlane.f32.xlu0 %v2280_v37  ;;  %2631 = vmax.xlane.f32.xlu2 %v1951_v51  ;;  %v4605_v37 = vld [vmem:[#allocation10 + $0x170] sm:$0xff]  ;;  %6468 = vst [vmem:[#allocation77_spill] sm:$0xff] %v5371_v23 }
 0x2bd   :  { %v2128_v59 = vpop.f32.mrf.mxu2 }
 0x2be   :  { %v2457_v25 = vpop.f32.mrf.mxu3  ;;  %v2129_v33 = vadd.f32 %v2128_v59, %v5287_v32 }
 0x2bf   :  { %v1955_v49 = vpop.f32.mrf.mxu0 }
 0x2c0   :  { %v2284_v28 = vpop.f32.mrf.mxu1  ;;  %v1956_v3 = vadd.f32 %v1955_v49, %v5037_v45 }
 0x2c1   :  { %3027 = vmax.xlane.f32.xlu1 %v2455_v27  ;;  %v1954_v27 = vadd.f32 %v1953_v12, %v5035_v42  ;;  %v2458_v42 = vadd.f32 %v2457_v25, %v5287_v32  ;;  %v2285_v32 = vadd.f32 %v2284_v28, %v5037_v45 }
 0x2c3   :  { %v5382_v49 = vpop.permute.xlu2 %1462 }
 0x2c4   :  { %2773 = vmax.xlane.f32.xlu0 %v2129_v33  ;;  %2771 = vmax.xlane.f32.xlu2 %v2126_v40 }
 0x2c5   :  { %v2130_v38 = vpop.f32.mrf.mxu2 }
 0x2c6   :  { %v2459_v51 = vpop.f32.mrf.mxu3  ;;  %v2131_v16 = vadd.f32 %v2130_v38, %v5289_v55 }
 0x2c7   :  { %v1958_v2 = vpop.f32.mrf.mxu0  ;;  %v2460_v12 = vadd.f32 %v2459_v51, %v5289_v55 }
 0x2c8   :  { %v2287_v36 = vpop.f32.mrf.mxu1  ;;  %v1959_v38 = vadd.f32 %v1958_v2, %v5039_v47 }
 0x2c9   :  { %2889 = vmax.xlane.f32.xlu1 %v2283_v13  ;;  %v5378_v13 = vpop.permute.xlu1 %1457  ;;  %v2288_v55 = vadd.f32 %v2287_v36, %v5039_v47 }
 0x2ca   :  { %1997 = vmatmul.bf16.gmra.mxu0 %v4570_v31  ;;  %2172 = vmatmul.bf16.gmra.mxu2 %v4605_v37  ;;  %6470 = vst [vmem:[#allocation79_spill] sm:$0xff] %v5378_v13 }
 0x2cb   :  { %2326 = vmatmul.bf16.gmra.mxu1 %v4570_v31  ;;  %2501 = vmatmul.bf16.gmra.mxu3 %v4605_v37  ;;  %v5384_v31 = vpop.permute.xlu0 %1467  ;;  %v5391_v51 = vpop.permute.xlu2 %1477 }
 0x2cc   :  { %2635 = vmax.xlane.f32.xlu0 %v1956_v3  ;;  %2633 = vmax.xlane.f32.xlu2 %v1954_v27  ;;  %v4571_v3 = vld [vmem:[#allocation10 + $0x60] sm:$0xff]  ;;  %6472 = vst [vmem:[#allocation81_spill] sm:$0xff] %v5391_v51 }
 0x2cd   :  { %v2133_v59 = vpop.f32.mrf.mxu2 }
 0x2ce   :  { %v2462_v40 = vpop.f32.mrf.mxu3  ;;  %v2134_v45 = vadd.f32 %v2133_v59, %v5291_v14 }
 0x2cf   :  { %v1960_v33 = vpop.f32.mrf.mxu0  ;;  %v2463_v2 = vadd.f32 %v2462_v40, %v5291_v14 }
 0x2d0   :  { %v2289_v23 = vpop.f32.mrf.mxu1  ;;  %v1961_v14 = vadd.f32 %v1960_v33, %v5041_v48 }
 0x2d1   :  { %2775 = vmax.xlane.f32.xlu1 %v2131_v16  ;;  %v5387_v16 = vpop.permute.xlu1 %1472 }
 0x2d2   :  { %6471 = vst [vmem:[#allocation80_spill] sm:$0xff] %v5387_v16 }
 0x2d3   :  { %v5403_v40 = vpop.permute.xlu2 %1492 }
 0x2d4   :  { %3031 = vmax.xlane.f32.xlu0 %v2460_v12  ;;  %3029 = vmax.xlane.f32.xlu2 %v2458_v42  ;;  %v5393_v42 = vpop.permute.xlu0 %1482  ;;  %6474 = vst [vmem:[#allocation83_spill] sm:$0xff] %v5403_v40 }
 0x2d5   :  { %v2135_v37 = vpop.f32.mrf.mxu2  ;;  %6473 = vst [vmem:[#allocation82_spill] sm:$0xff] %v5393_v42 }
 0x2d6   :  { %v2464_v27 = vpop.f32.mrf.mxu3  ;;  %v2136_v47 = vadd.f32 %v2135_v37, %v5293_v62 }
 0x2d7   :  { %v1963_v8 = vpop.f32.mrf.mxu0 }
 0x2d8   :  { %v2292_v13 = vpop.f32.mrf.mxu1  ;;  %v1964_v59 = vadd.f32 %v1963_v8, %v5045_v56 }
 0x2d9   :  { %2637 = vmax.xlane.f32.xlu1 %v1959_v38  ;;  %v5398_v36 = vpop.permute.xlu1 %1487 }
 0x2da   :  { %2002 = vmatmul.bf16.gmra.mxu0 %v4571_v3  ;;  %2177 = vmatmul.bf16.gmra.mxu2 %v4606_v18 }
 0x2db   :  { %2331 = vmatmul.bf16.gmra.mxu1 %v4571_v3  ;;  %2506 = vmatmul.bf16.gmra.mxu3 %v4606_v18  ;;  %v4572_v18 = vld [vmem:[#allocation10 + $0x68] sm:$0xff]  ;;  %v4607_v3 = vld [vmem:[#allocation10 + $0x180] sm:$0xff] }
 0x2dc   :  { %2893 = vmax.xlane.f32.xlu0 %v2288_v55  ;;  %2891 = vmax.xlane.f32.xlu2 %v2285_v32  ;;  %v2290_v32 = vadd.f32 %v2289_v23, %v5041_v48  ;;  %v5405_v51 = vpop.permute.xlu0 %1497  ;;  %v2465_v48 = vadd.f32 %v2464_v27, %v5293_v62  ;;  %v2293_v62 = vadd.f32 %v2292_v13, %v5045_v56 }
 0x2dd   :  { %v2138_v25 = vpop.f32.mrf.mxu2 }
 0x2de   :  { %v2467_v38 = vpop.f32.mrf.mxu3 }
 0x2df   :  { %v1965_v12 = vpop.f32.mrf.mxu0  ;;  %v2468_v8 = vadd.f32 %v2467_v38, %v5295_v11 }
 0x2e0   :  { %v2294_v16 = vpop.f32.mrf.mxu1 }
 0x2e1   :  { %3033 = vmax.xlane.f32.xlu1 %v2463_v2  ;;  %v5409_v23 = vpop.permute.xlu1 %1502  ;;  %v2139_v2 = vadd.f32 %v2138_v25, %v5295_v11  ;;  %v1966_v25 = vadd.f32 %v1965_v12, %v5047_v61  ;;  %v2295_v11 = vadd.f32 %v2294_v16, %v5047_v61 }
 0x2e2   :  { %6475 = vst [vmem:[#allocation84_spill] sm:$0xff] %v5409_v23 }
 0x2e4   :  { %2779 = vmax.xlane.f32.xlu0 %v2136_v47  ;;  %2777 = vmax.xlane.f32.xlu2 %v2134_v45  ;;  %v5418_v33 = vpop.permute.xlu0 %1512 }
 0x2e5   :  { %v2140_v28 = vpop.f32.mrf.mxu2 }
 0x2e6   :  { %v2469_v37 = vpop.f32.mrf.mxu3  ;;  %v2141_v61 = vadd.f32 %v2140_v28, %v5297_v46 }
 0x2e7   :  { %v5401_v55 = vpop.f32.mrf.mxu0 }
 0x2e8   :  { %v2297_v42 = vpop.f32.mrf.mxu1 }
 0x2e9   :  { %2895 = vmax.xlane.f32.xlu1 %v2290_v32  ;;  %v5414_v32 = vpop.permute.xlu2 %1507  ;;  %v5423_v23 = vpop.permute.xlu1 %1517 }
 0x2ea   :  { %2007 = vmatmul.bf16.gmra.mxu0 %v4572_v18  ;;  %2182 = vmatmul.bf16.gmra.mxu2 %v4607_v3  ;;  %6476 = vst [vmem:[#allocation85_spill] sm:$0xff] %v5423_v23 }
 0x2eb   :  { %2336 = vmatmul.bf16.gmra.mxu1 %v4572_v18  ;;  %2511 = vmatmul.bf16.gmra.mxu3 %v4607_v3  ;;  %v4573_v3 = vld [vmem:[#allocation10 + $0x70] sm:$0xff] }
 0x2ec   :  { %2641 = vmax.xlane.f32.xlu0 %v1964_v59  ;;  %2639 = vmax.xlane.f32.xlu2 %v1961_v14  ;;  %v4608_v14 = vld [vmem:[#allocation10 + $0x188] sm:$0xff]  ;;  %v5431_v12 = vpop.permute.xlu0 %1527 }
 0x2ed   :  { %v2143_v47 = vpop.f32.mrf.mxu2  ;;  %6477 = vst [vmem:[#allocation86_spill] sm:$0xff] %v5431_v12 }
 0x2ee   :  { %v2472_v18 = vpop.f32.mrf.mxu3  ;;  %v2144_v13 = vadd.f32 %v2143_v47, %v5299_v63 }
 0x2ef   :  { %v1970_v45 = vpop.f32.mrf.mxu0 }
 0x2f0   :  { %v5412_v40 = vpop.f32.mrf.mxu1  ;;  %v1971_v28 = vadd.f32 %v1970_v45, %v5053_v20 }
 0x2f1   :  { %2781 = vmax.xlane.f32.xlu1 %v2139_v2  ;;  %v5429_v38 = vpop.permute.xlu2 %1522  ;;  %v5438_v56 = vpop.permute.xlu1 %1532 }
 0x2f2   :  { %6478 = vst [vmem:[#allocation87_spill] sm:$0xff] %v5438_v56 }
 0x2f4   :  { %3037 = vmax.xlane.f32.xlu0 %v2468_v8  ;;  %3035 = vmax.xlane.f32.xlu2 %v2465_v48  ;;  %v2470_v8 = vadd.f32 %v2469_v37, %v5297_v46  ;;  %v5446_v37 = vpop.permute.xlu0 %1542  ;;  %v1969_v46 = vadd.f32 %v5401_v55, %v5049_v7  ;;  %v2473_v55 = vadd.f32 %v2472_v18, %v5299_v63 }
 0x2f5   :  { %v2145_v27 = vpop.f32.mrf.mxu2  ;;  %6479 = vst [vmem:[#allocation88_spill] sm:$0xff] %v5446_v37 }
 0x2f6   :  { %v2474_v48 = vpop.f32.mrf.mxu3 }
 0x2f7   :  { %v5421_v59 = vpop.f32.mrf.mxu0  ;;  %v2475_v45 = vadd.f32 %v2474_v48, %v5301_v26 }
 0x2f8   :  { %v5425_v2 = vpop.f32.mrf.mxu1 }
 0x2f9   :  { %2643 = vmax.xlane.f32.xlu1 %v1966_v25  ;;  %v5456_v47 = vpop.permute.xlu1 %1547  ;;  %v2303_v18 = vadd.f32 %v5425_v2, %v5059_v24 }
 0x2fa   :  { %2012 = vmatmul.bf16.gmra.mxu0 %v4573_v3  ;;  %2187 = vmatmul.bf16.gmra.mxu2 %v4608_v14  ;;  %6480 = vst [vmem:[#allocation89_spill] sm:$0xff] %v5456_v47 }
 0x2fb   :  { %2341 = vmatmul.bf16.gmra.mxu1 %v4573_v3  ;;  %2516 = vmatmul.bf16.gmra.mxu3 %v4608_v14  ;;  %v5444_v3 = vpop.permute.xlu2 %1537  ;;  %v4574_v14 = vld [vmem:[#allocation10 + $0x78] sm:$0xff] }
 0x2fc   :  { %2899 = vmax.xlane.f32.xlu0 %v2295_v11  ;;  %2897 = vmax.xlane.f32.xlu2 %v2293_v62  ;;  %v4609_v62 = vld [vmem:[#allocation10 + $0x190] sm:$0xff]  ;;  %v2298_v11 = vadd.f32 %v2297_v42, %v5049_v7 }
 0x2fd   :  { %v5442_v16 = vpop.f32.mrf.mxu2 }
 0x2ff   :  { %v5434_v23 = vpop.f32.mrf.mxu0 }
 0x300   :  { %v5436_v25 = vpop.f32.mrf.mxu1 }
 0x301   :  { %3039 = vmax.xlane.f32.xlu1 %v2470_v8  ;;  %v2477_v8 = vpop.f32.mrf.mxu3 }
 0x304   :  { %2785 = vmax.xlane.f32.xlu0 %v2144_v13  ;;  %2783 = vmax.xlane.f32.xlu2 %v2141_v61  ;;  %v2146_v61 = vadd.f32 %v2145_v27, %v5301_v26  ;;  %v2300_v26 = vadd.f32 %v5412_v40, %v5053_v20 }
 0x305   :  { %v2150_v42 = vpop.f32.mrf.mxu2 }
 0x306   :  { %v2151_v40 = vadd.f32 %v2150_v42, %v5305_v1 }
 0x307   :  { %v5449_v12 = vpop.f32.mrf.mxu0 }
 0x308   :  { %v5451_v56 = vpop.f32.mrf.mxu1 }
 0x309   :  { %2901 = vmax.xlane.f32.xlu1 %v2298_v11 }
 0x30a   :  { %2017 = vmatmul.bf16.gmra.mxu0 %v4574_v14  ;;  %2192 = vmatmul.bf16.gmra.mxu2 %v4609_v62 }
 0x30b   :  { %2346 = vmatmul.bf16.gmra.mxu1 %v4574_v14  ;;  %2521 = vmatmul.bf16.gmra.mxu3 %v4609_v62  ;;  %v5467_v14 = vpop.f32.mrf.mxu3  ;;  %v4575_v62 = vld [vmem:[#allocation10 + $0x80] sm:$0xff] }
 0x30c   :  { %2647 = vmax.xlane.f32.xlu0 %v1971_v28  ;;  %2645 = vmax.xlane.f32.xlu2 %v1969_v46  ;;  %v4610_v46 = vld [vmem:[#allocation10 + $0x198] sm:$0xff]  ;;  %v1974_v28 = vadd.f32 %v5421_v59, %v5059_v24  ;;  %v2149_v24 = vadd.f32 %v5442_v16, %v5303_v41  ;;  %v1979_v16 = vadd.f32 %v5449_v12, %v5065_v35 }
 0x30d   :  { %v2153_v48 = vpop.f32.mrf.mxu2  ;;  %v2480_v12 = vadd.f32 %v5467_v14, %v5305_v1 }
 0x30f   :  { %v2882_v13 = vpop.xlane.xlu0 %2881  ;;  %v2626_v37 = vpop.xlane.xlu2 %2625 }
 0x310   :  { %3271 = vst.msk [vmem:[#allocation13 + $0x400] sm:$0xff] %vm3141_vm4, %v2882_v13  ;;  %v5460_v11 = vpop.f32.mrf.mxu0  ;;  %v5462_v7 = vpop.f32.mrf.mxu1 }
 0x311   :  { %3142 = vst.msk [vmem:[#allocation13] sm:$0xff] %vm3141_vm4, %v2626_v37  ;;  %2787 = vmax.xlane.f32.xlu1 %v2146_v61  ;;  %v2310_v1 = vadd.f32 %v5462_v7, %v5067_v44 }
 0x313   :  { %v2482_v59 = vpop.f32.mrf.mxu3 }
 0x314   :  { %3043 = vmax.xlane.f32.xlu0 %v2475_v45  ;;  %3041 = vmax.xlane.f32.xlu2 %v2473_v55  ;;  %v3022_v27 = vpop.xlane.xlu1 %3021 }
 0x315   :  { %3341 = vst.msk [vmem:[#allocation13 + $0x630] sm:$0xff] %vm3141_vm4, %v3022_v27  ;;  %v5493_v27 = vpop.f32.mrf.mxu2 }
 0x317   :  { %v2628_v13 = vpop.xlane.xlu0 %2627  ;;  %v2766_v47 = vpop.xlane.xlu2 %2765 }
 0x318   :  { %3143 = vst.msk [vmem:[#allocation13 + $0x8] sm:$0xff] %vm3141_vm4, %v2628_v13  ;;  %v5473_v37 = vpop.f32.mrf.mxu0  ;;  %v5475_v63 = vpop.f32.mrf.mxu1  ;;  %v2305_v13 = vadd.f32 %v5436_v25, %v5063_v4 }
 0x319   :  { %3212 = vst.msk [vmem:[#allocation13 + $0x230] sm:$0xff] %vm3141_vm4, %v2766_v47  ;;  %2649 = vmax.xlane.f32.xlu1 %v1974_v28  ;;  %v2478_v47 = vadd.f32 %v2477_v8, %v5303_v41  ;;  %v4611_v28 = vld [vmem:[#allocation10 + $0x1a0] sm:$0xff]  ;;  %v1976_v41 = vadd.f32 %v5434_v23, %v5063_v4 }
 0x31a   :  { %2022 = vmatmul.bf16.gmra.mxu0 %v4575_v62  ;;  %2197 = vmatmul.bf16.gmra.mxu2 %v4610_v46 }
 0x31b   :  { %2351 = vmatmul.bf16.gmra.mxu1 %v4575_v62  ;;  %2526 = vmatmul.bf16.gmra.mxu3 %v4610_v46  ;;  %v2484_v62 = vpop.f32.mrf.mxu3  ;;  %v4576_v46 = vld [vmem:[#allocation10 + $0x88] sm:$0xff] }
 0x31c   :  { %2905 = vmax.xlane.f32.xlu0 %v2303_v18  ;;  %2903 = vmax.xlane.f32.xlu2 %v2300_v26  ;;  %v2884_v61 = vpop.xlane.xlu1 %2883 }
 0x31d   :  { %3272 = vst.msk [vmem:[#allocation13 + $0x408] sm:$0xff] %vm3141_vm4, %v2884_v61 }
 0x31f   :  { %v2768_v55 = vpop.xlane.xlu0 %2767  ;;  %v3024_v45 = vpop.xlane.xlu2 %3023 }
 0x320   :  { %3213 = vst.msk [vmem:[#allocation13 + $0x238] sm:$0xff] %vm3141_vm4, %v2768_v55  ;;  %v5485_v20 = vpop.f32.mrf.mxu0  ;;  %v5491_v2 = vpop.f32.mrf.mxu1  ;;  %v2154_v55 = vadd.f32 %v2153_v48, %v5307_v21 }
 0x321   :  { %3342 = vst.msk [vmem:[#allocation13 + $0x638] sm:$0xff] %vm3141_vm4, %v3024_v45  ;;  %3045 = vmax.xlane.f32.xlu1 %v2478_v47  ;;  %v2158_v47 = vpop.f32.mrf.mxu2 }
 0x323   :  { %v5510_v45 = vpop.f32.mrf.mxu3 }
 0x324   :  { %2791 = vmax.xlane.f32.xlu0 %v2151_v40  ;;  %2789 = vmax.xlane.f32.xlu2 %v2149_v24  ;;  %v2630_v8 = vpop.xlane.xlu1 %2629  ;;  %v2483_v24 = vadd.f32 %v2482_v59, %v5307_v21  ;;  %v2308_v21 = vadd.f32 %v5451_v56, %v5065_v35  ;;  %v2159_v56 = vadd.f32 %v2158_v47, %v5311_v9 }
 0x325   :  { %3144 = vst.msk [vmem:[#allocation13 + $0x10] sm:$0xff] %vm3141_vm4, %v2630_v8 }
 0x327   :  { %v3026_v26 = vpop.xlane.xlu0 %3025  ;;  %v2886_v18 = vpop.xlane.xlu2 %2885 }
 0x328   :  { %3343 = vst.msk [vmem:[#allocation13 + $0x640] sm:$0xff] %vm3141_vm4, %v3026_v26  ;;  %v5504_v42 = vpop.f32.mrf.mxu0  ;;  %v5506_v25 = vpop.f32.mrf.mxu1 }
 0x329   :  { %3273 = vst.msk [vmem:[#allocation13 + $0x410] sm:$0xff] %vm3141_vm4, %v2886_v18  ;;  %2907 = vmax.xlane.f32.xlu1 %v2305_v13  ;;  %v1981_v13 = vadd.f32 %v5460_v11, %v5067_v44  ;;  %v2156_v44 = vadd.f32 %v5493_v27, %v5309_v50  ;;  %v1986_v27 = vadd.f32 %v5485_v20, %v5077_v0 }
 0x32a   :  { %2027 = vmatmul.bf16.gmra.mxu0 %v4576_v46  ;;  %2202 = vmatmul.bf16.gmra.mxu2 %v4611_v28  ;;  %v2488_v20 = vadd.f32 %v5510_v45, %v5311_v9  ;;  %v2318_v45 = vadd.f32 %v5506_v25, %v5081_v58 }
 0x32b   :  { %2356 = vmatmul.bf16.gmra.mxu1 %v4576_v46  ;;  %2531 = vmatmul.bf16.gmra.mxu3 %v4611_v28  ;;  %v4577_v46 = vld [vmem:[#allocation10 + $0x90] sm:$0xff]  ;;  %v4612_v28 = vld [vmem:[#allocation10 + $0x1a8] sm:$0xff]  ;;  %v2489_v14 = vpop.f32.mrf.mxu3 }
 0x32c   :  { %2653 = vmax.xlane.f32.xlu0 %v1979_v16  ;;  %2651 = vmax.xlane.f32.xlu2 %v1976_v41  ;;  %v2770_v61 = vpop.xlane.xlu1 %2769  ;;  %v2160_v41 = vpop.f32.mrf.mxu2  ;;  %v2485_v16 = vadd.f32 %v2484_v62, %v5309_v50  ;;  %v1984_v50 = vadd.f32 %v5473_v37, %v5071_v52 }
 0x32d   :  { %3214 = vst.msk [vmem:[#allocation13 + $0x240] sm:$0xff] %vm3141_vm4, %v2770_v61 }
 0x32f   :  { %v2888_v4 = vpop.xlane.xlu0 %2887  ;;  %v2632_v23 = vpop.xlane.xlu2 %2631 }
 0x330   :  { %3274 = vst.msk [vmem:[#allocation13 + $0x418] sm:$0xff] %vm3141_vm4, %v2888_v4  ;;  %v5517_v40 = vpop.f32.mrf.mxu0  ;;  %v5520_v48 = vpop.f32.mrf.mxu1 }
 0x331   :  { %3145 = vst.msk [vmem:[#allocation13 + $0x18] sm:$0xff] %vm3141_vm4, %v2632_v23  ;;  %2793 = vmax.xlane.f32.xlu1 %v2154_v55  ;;  %v4578_v23 = vld [vmem:[#allocation10 + $0x98] sm:$0xff] }
 0x333   :  { %v5543_v4 = vpop.f32.mrf.mxu3 }
 0x334   :  { %3049 = vmax.xlane.f32.xlu0 %v2483_v24  ;;  %3047 = vmax.xlane.f32.xlu2 %v2480_v12  ;;  %v3028_v8 = vpop.xlane.xlu1 %3027  ;;  %v5541_v7 = vpop.f32.mrf.mxu2  ;;  %v4613_v12 = vld [vmem:[#allocation10 + $0x1b0] sm:$0xff]  ;;  %v2313_v24 = vadd.f32 %v5475_v63, %v5071_v52 }
 0x335   :  { %3344 = vst.msk [vmem:[#allocation13 + $0x648] sm:$0xff] %vm3141_vm4, %v3028_v8 }
 0x337   :  { %v2774_v26 = vpop.xlane.xlu0 %2773  ;;  %v2772_v18 = vpop.xlane.xlu2 %2771 }
 0x338   :  { %3216 = vst.msk [vmem:[#allocation13 + $0x250] sm:$0xff] %vm3141_vm4, %v2774_v26  ;;  %v5531_v59 = vpop.f32.mrf.mxu0  ;;  %v5534_v35 = vpop.f32.mrf.mxu1 }
 0x339   :  { %3215 = vst.msk [vmem:[#allocation13 + $0x248] sm:$0xff] %vm3141_vm4, %v2772_v18  ;;  %2655 = vmax.xlane.f32.xlu1 %v1981_v13  ;;  %v2161_v18 = vadd.f32 %v2160_v41, %v5313_v39 }
 0x33a   :  { %2032 = vmatmul.bf16.gmra.mxu0 %v4577_v46  ;;  %2207 = vmatmul.bf16.gmra.mxu2 %v4612_v28 }
 0x33b   :  { %2361 = vmatmul.bf16.gmra.mxu1 %v4577_v46  ;;  %2536 = vmatmul.bf16.gmra.mxu3 %v4612_v28  ;;  %v5559_v26 = vpop.f32.mrf.mxu3 }
 0x33c   :  { %2911 = vmax.xlane.f32.xlu0 %v2310_v1  ;;  %2909 = vmax.xlane.f32.xlu2 %v2308_v21  ;;  %v2890_v11 = vpop.xlane.xlu1 %2889  ;;  %v2165_v63 = vpop.f32.mrf.mxu2  ;;  %v2490_v21 = vadd.f32 %v2489_v14, %v5313_v39  ;;  %v2315_v39 = vadd.f32 %v5491_v2, %v5077_v0 }
 0x33d   :  { %3275 = vst.msk [vmem:[#allocation13 + $0x420] sm:$0xff] %vm3141_vm4, %v2890_v11  ;;  %v2166_v25 = vadd.f32 %v2165_v63, %v5317_v53 }
 0x33f   :  { %v2636_v61 = vpop.xlane.xlu0 %2635  ;;  %v2634_v55 = vpop.xlane.xlu2 %2633 }
 0x340   :  { %3147 = vst.msk [vmem:[#allocation13 + $0x28] sm:$0xff] %vm3141_vm4, %v2636_v61  ;;  %v5548_v28 = vpop.f32.mrf.mxu0  ;;  %v5556_v47 = vpop.f32.mrf.mxu1  ;;  %v4579_v61 = vld [vmem:[#allocation10 + $0xa0] sm:$0xff] }
 0x341   :  { %3146 = vst.msk [vmem:[#allocation13 + $0x20] sm:$0xff] %vm3141_vm4, %v2634_v55  ;;  %3051 = vmax.xlane.f32.xlu1 %v2485_v16  ;;  %v4614_v55 = vld [vmem:[#allocation10 + $0x1b8] sm:$0xff] }
 0x343   :  { %v2497_v9 = vpop.f32.mrf.mxu3 }
 0x344   :  { %2797 = vmax.xlane.f32.xlu0 %v2159_v56  ;;  %2795 = vmax.xlane.f32.xlu2 %v2156_v44  ;;  %v2776_v62 = vpop.xlane.xlu1 %2775  ;;  %v2168_v41 = vpop.f32.mrf.mxu2  ;;  %v1989_v44 = vadd.f32 %v5504_v42, %v5081_v58  ;;  %v2164_v58 = vadd.f32 %v5541_v7, %v5315_v54  ;;  %v1994_v7 = vadd.f32 %v5531_v59, %v5087_v30 }
 0x345   :  { %3217 = vst.msk [vmem:[#allocation13 + $0x258] sm:$0xff] %vm3141_vm4, %v2776_v62  ;;  %v2498_v59 = vadd.f32 %v2497_v9, %v5319_v19 }
 0x347   :  { %v3032_v8 = vpop.xlane.xlu0 %3031  ;;  %v3030_v46 = vpop.xlane.xlu2 %3029 }
 0x348   :  { %3346 = vst.msk [vmem:[#allocation13 + $0x658] sm:$0xff] %vm3141_vm4, %v3032_v8  ;;  %v5567_v1 = vpop.f32.mrf.mxu0  ;;  %v5569_v11 = vpop.f32.mrf.mxu1 }
 0x349   :  { %3345 = vst.msk [vmem:[#allocation13 + $0x650] sm:$0xff] %vm3141_vm4, %v3030_v46  ;;  %2913 = vmax.xlane.f32.xlu1 %v2313_v24 }
 0x34a   :  { %2037 = vmatmul.bf16.gmra.mxu0 %v4578_v23  ;;  %2212 = vmatmul.bf16.gmra.mxu2 %v4613_v12 }
 0x34b   :  { %2366 = vmatmul.bf16.gmra.mxu1 %v4578_v23  ;;  %2541 = vmatmul.bf16.gmra.mxu3 %v4613_v12  ;;  %v2493_v12 = vadd.f32 %v5543_v4, %v5315_v54  ;;  %v5594_v8 = vpop.f32.mrf.mxu3  ;;  %v1991_v54 = vadd.f32 %v5517_v40, %v5083_v17  ;;  %v2495_v40 = vadd.f32 %v5559_v26, %v5317_v53 }
 0x34c   :  { %2659 = vmax.xlane.f32.xlu0 %v1986_v27  ;;  %2657 = vmax.xlane.f32.xlu2 %v1984_v50  ;;  %v2638_v13 = vpop.xlane.xlu1 %2637  ;;  %v5587_v24 = vpop.f32.mrf.mxu2  ;;  %v4580_v50 = vld [vmem:[#allocation10 + $0xa8] sm:$0xff]  ;;  %v4615_v27 = vld [vmem:[#allocation10 + $0x1c0] sm:$0xff]  ;;  %v2325_v26 = vadd.f32 %v5556_v47, %v5089_v34 }
 0x34d   :  { %3148 = vst.msk [vmem:[#allocation13 + $0x30] sm:$0xff] %vm3141_vm4, %v2638_v13  ;;  %v2320_v13 = vadd.f32 %v5520_v48, %v5083_v17 }
 0x34f   :  { %v2894_v52 = vpop.xlane.xlu0 %2893  ;;  %v2892_v37 = vpop.xlane.xlu2 %2891 }
 0x350   :  { %3277 = vst.msk [vmem:[#allocation13 + $0x430] sm:$0xff] %vm3141_vm4, %v2894_v52  ;;  %v5580_v14 = vpop.f32.mrf.mxu0  ;;  %v5583_v23 = vpop.f32.mrf.mxu1 }
 0x351   :  { %3276 = vst.msk [vmem:[#allocation13 + $0x428] sm:$0xff] %vm3141_vm4, %v2892_v37  ;;  %2799 = vmax.xlane.f32.xlu1 %v2161_v18 }
 0x353   :  { %v5609_v48 = vpop.f32.mrf.mxu3 }
 0x354   :  { %3055 = vmax.xlane.f32.xlu0 %v2490_v21  ;;  %3053 = vmax.xlane.f32.xlu2 %v2488_v20  ;;  %v3034_v16 = vpop.xlane.xlu1 %3033  ;;  %v2173_v63 = vpop.f32.mrf.mxu2  ;;  %v2169_v21 = vadd.f32 %v2168_v41, %v5319_v19  ;;  %v2323_v19 = vadd.f32 %v5534_v35, %v5087_v30  ;;  %v2500_v30 = vadd.f32 %v5594_v8, %v5321_v43 }
 0x355   :  { %3347 = vst.msk [vmem:[#allocation13 + $0x660] sm:$0xff] %vm3141_vm4, %v3034_v16 }
 0x357   :  { %v2780_v56 = vpop.xlane.xlu0 %2779  ;;  %v2778_v62 = vpop.xlane.xlu2 %2777 }
 0x358   :  { %3219 = vst.msk [vmem:[#allocation13 + $0x268] sm:$0xff] %vm3141_vm4, %v2780_v56  ;;  %v5597_v4 = vpop.f32.mrf.mxu0  ;;  %v5601_v37 = vpop.f32.mrf.mxu1 }
 0x359   :  { %3218 = vst.msk [vmem:[#allocation13 + $0x260] sm:$0xff] %vm3141_vm4, %v2778_v62  ;;  %2661 = vmax.xlane.f32.xlu1 %v1989_v44  ;;  %v4581_v62 = vld [vmem:[#allocation10 + $0xb0] sm:$0xff] }
 0x35a   :  { %2042 = vmatmul.bf16.gmra.mxu0 %v4579_v61  ;;  %2217 = vmatmul.bf16.gmra.mxu2 %v4614_v55 }
 0x35b   :  { %2371 = vmatmul.bf16.gmra.mxu1 %v4579_v61  ;;  %2546 = vmatmul.bf16.gmra.mxu3 %v4614_v55  ;;  %v5625_v56 = vpop.f32.mrf.mxu3 }
 0x35c   :  { %2917 = vmax.xlane.f32.xlu0 %v2318_v45  ;;  %2915 = vmax.xlane.f32.xlu2 %v2315_v39  ;;  %v2896_v42 = vpop.xlane.xlu1 %2895  ;;  %v5622_v44 = vpop.f32.mrf.mxu2  ;;  %v4616_v39 = vld [vmem:[#allocation10 + $0x1c8] sm:$0xff]  ;;  %v1996_v45 = vadd.f32 %v5548_v28, %v5089_v34 }
 0x35d   :  { %3278 = vst.msk [vmem:[#allocation13 + $0x438] sm:$0xff] %vm3141_vm4, %v2896_v42 }
 0x35f   :  { %v2642_v0 = vpop.xlane.xlu0 %2641  ;;  %v2640_v2 = vpop.xlane.xlu2 %2639 }
 0x360   :  { %3150 = vst.msk [vmem:[#allocation13 + $0x40] sm:$0xff] %vm3141_vm4, %v2642_v0  ;;  %v5613_v17 = vpop.f32.mrf.mxu0  ;;  %v5620_v55 = vpop.f32.mrf.mxu1 }
 0x361   :  { %3149 = vst.msk [vmem:[#allocation13 + $0x38] sm:$0xff] %vm3141_vm4, %v2640_v2  ;;  %3057 = vmax.xlane.f32.xlu1 %v2493_v12  ;;  %v2171_v2 = vadd.f32 %v5587_v24, %v5321_v43  ;;  %v1999_v43 = vadd.f32 %v5567_v1, %v5095_v10  ;;  %v2001_v24 = vadd.f32 %v5580_v14, %v5099_v57 }
 0x362   :  { %v2503_v14 = vadd.f32 %v5609_v48, %v5323_v29  ;;  %v2333_v48 = vadd.f32 %v5601_v37, %v5101_v60 }
 0x363   :  { %v5644_v47 = vpop.f32.mrf.mxu3 }
 0x364   :  { %2803 = vmax.xlane.f32.xlu0 %v2166_v25  ;;  %2801 = vmax.xlane.f32.xlu2 %v2164_v58  ;;  %v2782_v46 = vpop.xlane.xlu1 %2781  ;;  %v5640_v0 = vpop.f32.mrf.mxu2  ;;  %v2174_v58 = vadd.f32 %v2173_v63, %v5323_v29 }
 0x365   :  { %3220 = vst.msk [vmem:[#allocation13 + $0x270] sm:$0xff] %vm3141_vm4, %v2782_v46  ;;  %v2179_v37 = vadd.f32 %v5640_v0, %v5329_v15 }
 0x367   :  { %v3038_v18 = vpop.xlane.xlu0 %3037  ;;  %v3036_v52 = vpop.xlane.xlu2 %3035 }
 0x368   :  { %3349 = vst.msk [vmem:[#allocation13 + $0x670] sm:$0xff] %vm3141_vm4, %v3038_v18  ;;  %v5635_v9 = vpop.f32.mrf.mxu0  ;;  %v5637_v28 = vpop.f32.mrf.mxu1 }
 0x369   :  { %3348 = vst.msk [vmem:[#allocation13 + $0x668] sm:$0xff] %vm3141_vm4, %v3036_v52  ;;  %2919 = vmax.xlane.f32.xlu1 %v2320_v13  ;;  %v2328_v13 = vadd.f32 %v5569_v11, %v5095_v10 }
 0x36a   :  { %2047 = vmatmul.bf16.gmra.mxu0 %v4580_v50  ;;  %2222 = vmatmul.bf16.gmra.mxu2 %v4615_v27 }
 0x36b   :  { %2376 = vmatmul.bf16.gmra.mxu1 %v4580_v50  ;;  %2551 = vmatmul.bf16.gmra.mxu3 %v4615_v27  ;;  %v4582_v50 = vld [vmem:[#allocation10 + $0xb8] sm:$0xff]  ;;  %v4617_v27 = vld [vmem:[#allocation10 + $0x1d0] sm:$0xff] }
 0x36c   :  { %2665 = vmax.xlane.f32.xlu0 %v1994_v7  ;;  %2663 = vmax.xlane.f32.xlu2 %v1991_v54  ;;  %v2644_v20 = vpop.xlane.xlu1 %2643  ;;  %v2180_v54 = vpop.f32.mrf.mxu2 }
 0x36d   :  { %3151 = vst.msk [vmem:[#allocation13 + $0x48] sm:$0xff] %vm3141_vm4, %v2644_v20  ;;  %v5664_v7 = vpop.f32.mrf.mxu3  ;;  %v2176_v20 = vadd.f32 %v5622_v44, %v5326_v5  ;;  %v4583_v44 = vld [vmem:[#allocation10 + $0xc0] sm:$0xff] }
 0x36f   :  { %v2900_v16 = vpop.xlane.xlu0 %2899  ;;  %v2898_v61 = vpop.xlane.xlu2 %2897 }
 0x370   :  { %3280 = vst.msk [vmem:[#allocation13 + $0x448] sm:$0xff] %vm3141_vm4, %v2900_v16  ;;  %v5651_v25 = vpop.f32.mrf.mxu0  ;;  %v5654_v8 = vpop.f32.mrf.mxu1  ;;  %v2505_v16 = vadd.f32 %v5625_v56, %v5326_v5  ;;  %v2330_v5 = vadd.f32 %v5583_v23, %v5099_v57  ;;  %v2508_v57 = vadd.f32 %v5644_v47, %v5329_v15  ;;  %v4584_v47 = vld [vmem:[#allocation10 + $0xc8] sm:$0xff] }
 0x371   :  { %3279 = vst.msk [vmem:[#allocation13 + $0x440] sm:$0xff] %vm3141_vm4, %v2898_v61  ;;  %2805 = vmax.xlane.f32.xlu1 %v2169_v21 }
 0x374   :  { %3061 = vmax.xlane.f32.xlu0 %v2498_v59  ;;  %3059 = vmax.xlane.f32.xlu2 %v2495_v40  ;;  %v3040_v41 = vpop.xlane.xlu1 %3039  ;;  %v5679_v61 = vpop.f32.mrf.mxu2 }
 0x375   :  { %3350 = vst.msk [vmem:[#allocation13 + $0x678] sm:$0xff] %vm3141_vm4, %v3040_v41  ;;  %v5681_v40 = vpop.f32.mrf.mxu3  ;;  %v4618_v41 = vld [vmem:[#allocation10 + $0x1d8] sm:$0xff] }
 0x377   :  { %v2786_v42 = vpop.xlane.xlu0 %2785  ;;  %v2784_v53 = vpop.xlane.xlu2 %2783 }
 0x378   :  { %3222 = vst.msk [vmem:[#allocation13 + $0x280] sm:$0xff] %vm3141_vm4, %v2786_v42  ;;  %v5667_v63 = vpop.f32.mrf.mxu0  ;;  %v5671_v21 = vpop.f32.mrf.mxu1 }
 0x379   :  { %3221 = vst.msk [vmem:[#allocation13 + $0x278] sm:$0xff] %vm3141_vm4, %v2784_v53  ;;  %2667 = vmax.xlane.f32.xlu1 %v1996_v45 }
 0x37a   :  { %2052 = vmatmul.bf16.gmra.mxu0 %v4581_v62  ;;  %2227 = vmatmul.bf16.gmra.mxu2 %v4616_v39 }
 0x37b   :  { %2381 = vmatmul.bf16.gmra.mxu1 %v4581_v62  ;;  %2556 = vmatmul.bf16.gmra.mxu3 %v4616_v39  ;;  %v2004_v62 = vadd.f32 %v5597_v4, %v5101_v60 }
 0x37c   :  { %2923 = vmax.xlane.f32.xlu0 %v2325_v26  ;;  %2921 = vmax.xlane.f32.xlu2 %v2323_v19  ;;  %v2902_v12 = vpop.xlane.xlu1 %2901  ;;  %v5696_v4 = vpop.f32.mrf.mxu2  ;;  %v6481_v19 = vld [vmem:[#allocation67_spill] sm:$0xff] }
 0x37d   :  { %3281 = vst.msk [vmem:[#allocation13 + $0x450] sm:$0xff] %vm3141_vm4, %v2902_v12  ;;  %v5699_v53 = vpop.f32.mrf.mxu3  ;;  %v2181_v26 = vadd.f32 %v2180_v54, %v6481_v19 }
 0x37f   :  { %v2648_v35 = vpop.xlane.xlu0 %2647  ;;  %v2646_v34 = vpop.xlane.xlu2 %2645 }
 0x380   :  { %3153 = vst.msk [vmem:[#allocation13 + $0x58] sm:$0xff] %vm3141_vm4, %v2648_v35  ;;  %v5686_v29 = vpop.f32.mrf.mxu0  ;;  %v5694_v56 = vpop.f32.mrf.mxu1 }
 0x381   :  { %3152 = vst.msk [vmem:[#allocation13 + $0x50] sm:$0xff] %vm3141_vm4, %v2646_v34  ;;  %3063 = vmax.xlane.f32.xlu1 %v2500_v30 }
 0x384   :  { %2809 = vmax.xlane.f32.xlu0 %v2174_v58  ;;  %2807 = vmax.xlane.f32.xlu2 %v2171_v2  ;;  %v2788_v46 = vpop.xlane.xlu1 %2787  ;;  %v5713_v34 = vpop.f32.mrf.mxu2  ;;  %v4619_v2 = vld [vmem:[#allocation10 + $0x1e0] sm:$0xff] }
 0x385   :  { %3223 = vst.msk [vmem:[#allocation13 + $0x288] sm:$0xff] %vm3141_vm4, %v2788_v46  ;;  %v6482_v58 = vld [vmem:[#allocation22_spill] sm:$0xff]  ;;  %v5717_v0 = vpop.f32.mrf.mxu3 }
 0x386   :  { %v2335_v46 = vadd.f32 %v5620_v55, %v6482_v58 }
 0x387   :  { %v3044_v18 = vpop.xlane.xlu0 %3043  ;;  %v3042_v52 = vpop.xlane.xlu2 %3041 }
 0x388   :  { %3352 = vst.msk [vmem:[#allocation13 + $0x688] sm:$0xff] %vm3141_vm4, %v3044_v18  ;;  %v5708_v12 = vpop.f32.mrf.mxu0  ;;  %v5710_v30 = vpop.f32.mrf.mxu1 }
 0x389   :  { %3351 = vst.msk [vmem:[#allocation13 + $0x680] sm:$0xff] %vm3141_vm4, %v3042_v52  ;;  %2925 = vmax.xlane.f32.xlu1 %v2328_v13  ;;  %v6483_v13 = vld [vmem:[#allocation23_spill] sm:$0xff] }
 0x38a   :  { %2057 = vmatmul.bf16.gmra.mxu0 %v4582_v50  ;;  %2232 = vmatmul.bf16.gmra.mxu2 %v4617_v27  ;;  %v2009_v18 = vadd.f32 %v5635_v9, %v6483_v13 }
 0x38b   :  { %2386 = vmatmul.bf16.gmra.mxu1 %v4582_v50  ;;  %2561 = vmatmul.bf16.gmra.mxu3 %v4617_v27  ;;  %v2006_v27 = vadd.f32 %v5613_v17, %v6482_v58 }
 0x38c   :  { %2671 = vmax.xlane.f32.xlu0 %v2001_v24  ;;  %2669 = vmax.xlane.f32.xlu2 %v1999_v43  ;;  %v2650_v11 = vpop.xlane.xlu1 %2649  ;;  %v2184_v43 = vadd.f32 %v5679_v61, %v5336_v22  ;;  %v5733_v9 = vpop.f32.mrf.mxu2  ;;  %v4620_v61 = vld [vmem:[#allocation10 + $0x1e8] sm:$0xff] }
 0x38d   :  { %3154 = vst.msk [vmem:[#allocation13 + $0x60] sm:$0xff] %vm3141_vm4, %v2650_v11  ;;  %v2510_v11 = vadd.f32 %v5664_v7, %v6481_v19 }
 0x38f   :  { %v2906_v10 = vpop.xlane.xlu0 %2905  ;;  %v2904_v1 = vpop.xlane.xlu2 %2903 }
 0x390   :  { %3283 = vst.msk [vmem:[#allocation13 + $0x460] sm:$0xff] %vm3141_vm4, %v2906_v10  ;;  %v5725_v55 = vpop.f32.mrf.mxu0  ;;  %v5728_v54 = vpop.f32.mrf.mxu1 }
 0x391   :  { %3282 = vst.msk [vmem:[#allocation13 + $0x458] sm:$0xff] %vm3141_vm4, %v2904_v1  ;;  %2811 = vmax.xlane.f32.xlu1 %v2176_v20  ;;  %v2513_v20 = vadd.f32 %v5681_v40, %v5336_v22  ;;  %v5740_v10 = vpop.f32.mrf.mxu3  ;;  %v2338_v22 = vadd.f32 %v5637_v28, %v6483_v13 }
 0x394   :  { %3067 = vmax.xlane.f32.xlu0 %v2505_v16  ;;  %3065 = vmax.xlane.f32.xlu2 %v2503_v14  ;;  %v3046_v59 = vpop.xlane.xlu1 %3045  ;;  %v4585_v16 = vld [vmem:[#allocation10 + $0xd0] sm:$0xff] }
 0x395   :  { %3353 = vst.msk [vmem:[#allocation13 + $0x690] sm:$0xff] %vm3141_vm4, %v3046_v59  ;;  %v6484_v59 = vld [vmem:[#allocation24_spill] sm:$0xff] }
 0x396   :  { %v2340_v40 = vadd.f32 %v5654_v8, %v6484_v59 }
 0x397   :  { %v2792_v39 = vpop.xlane.xlu0 %2791  ;;  %v2790_v45 = vpop.xlane.xlu2 %2789 }
 0x398   :  { %3225 = vst.msk [vmem:[#allocation13 + $0x298] sm:$0xff] %vm3141_vm4, %v2792_v39  ;;  %v5743_v14 = vpop.f32.mrf.mxu0  ;;  %v5747_v7 = vpop.f32.mrf.mxu1 }
 0x399   :  { %3224 = vst.msk [vmem:[#allocation13 + $0x290] sm:$0xff] %vm3141_vm4, %v2790_v45  ;;  %2673 = vmax.xlane.f32.xlu1 %v2004_v62  ;;  %v5755_v39 = vpop.f32.mrf.mxu2 }
 0x39a   :  { %2062 = vmatmul.bf16.gmra.mxu0 %v4583_v44  ;;  %2237 = vmatmul.bf16.gmra.mxu2 %v4618_v41 }
 0x39b   :  { %2391 = vmatmul.bf16.gmra.mxu1 %v4583_v44  ;;  %2566 = vmatmul.bf16.gmra.mxu3 %v4618_v41  ;;  %v2011_v44 = vadd.f32 %v5651_v25, %v6484_v59  ;;  %v5757_v25 = vpop.f32.mrf.mxu3  ;;  %v6490_v59 = vld [vmem:[#allocation27_spill] sm:$0xff] }
 0x39c   :  { %2929 = vmax.xlane.f32.xlu0 %v2333_v48  ;;  %2927 = vmax.xlane.f32.xlu2 %v2330_v5  ;;  %v2908_v42 = vpop.xlane.xlu1 %2907  ;;  %v6485_v5 = vld [vmem:[#allocation68_spill] sm:$0xff] }
 0x39d   :  { %3284 = vst.msk [vmem:[#allocation13 + $0x468] sm:$0xff] %vm3141_vm4, %v2908_v42  ;;  %v2515_v48 = vadd.f32 %v5699_v53, %v6485_v5  ;;  %v2186_v8 = vadd.f32 %v5696_v4, %v6485_v5  ;;  %v6491_v5 = vld [vmem:[#allocation71_spill] sm:$0xff] }
 0x39f   :  { %v2654_v23 = vpop.xlane.xlu0 %2653  ;;  %v2652_v60 = vpop.xlane.xlu2 %2651 }
 0x3a0   :  { %3156 = vst.msk [vmem:[#allocation13 + $0x70] sm:$0xff] %vm3141_vm4, %v2654_v23  ;;  %v6486_v23 = vld [vmem:[#allocation69_spill] sm:$0xff] }
 0x3a1   :  { %3155 = vst.msk [vmem:[#allocation13 + $0x68] sm:$0xff] %vm3141_vm4, %v2652_v60  ;;  %3069 = vmax.xlane.f32.xlu1 %v2508_v57  ;;  %v5762_v57 = vpop.f32.mrf.mxu0  ;;  %v2189_v60 = vadd.f32 %v5713_v34, %v6486_v23  ;;  %v5773_v19 = vpop.f32.mrf.mxu2 }
 0x3a4   :  { %2815 = vmax.xlane.f32.xlu0 %v2181_v26  ;;  %2813 = vmax.xlane.f32.xlu2 %v2179_v37  ;;  %v2794_v35 = vpop.xlane.xlu1 %2793  ;;  %v5770_v37 = vpop.f32.mrf.mxu1 }
 0x3a5   :  { %3226 = vst.msk [vmem:[#allocation13 + $0x2a0] sm:$0xff] %vm3141_vm4, %v2794_v35  ;;  %v5775_v26 = vpop.f32.mrf.mxu3  ;;  %v4586_v35 = vld [vmem:[#allocation10 + $0xd8] sm:$0xff] }
 0x3a7   :  { %v3050_v50 = vpop.xlane.xlu0 %3049  ;;  %v3048_v15 = vpop.xlane.xlu2 %3047 }
 0x3a8   :  { %3355 = vst.msk [vmem:[#allocation13 + $0x6a0] sm:$0xff] %vm3141_vm4, %v3050_v50  ;;  %v6488_v50 = vld [vmem:[#allocation26_spill] sm:$0xff] }
 0x3a9   :  { %3354 = vst.msk [vmem:[#allocation13 + $0x698] sm:$0xff] %vm3141_vm4, %v3048_v15  ;;  %2931 = vmax.xlane.f32.xlu1 %v2335_v46  ;;  %v2016_v15 = vadd.f32 %v5686_v29, %v6488_v50 }
 0x3aa   :  { %2067 = vmatmul.bf16.gmra.mxu0 %v4584_v47  ;;  %2242 = vmatmul.bf16.gmra.mxu2 %v4619_v2 }
 0x3ab   :  { %2396 = vmatmul.bf16.gmra.mxu1 %v4584_v47  ;;  %2571 = vmatmul.bf16.gmra.mxu3 %v4619_v2  ;;  %v4621_v47 = vld [vmem:[#allocation10 + $0x1f0] sm:$0xff]  ;;  %v6487_v2 = vld [vmem:[#allocation25_spill] sm:$0xff] }
 0x3ac   :  { %2677 = vmax.xlane.f32.xlu0 %v2009_v18  ;;  %2675 = vmax.xlane.f32.xlu2 %v2006_v27  ;;  %v2656_v52 = vpop.xlane.xlu1 %2655  ;;  %v2343_v58 = vadd.f32 %v5671_v21, %v6487_v2  ;;  %v2014_v34 = vadd.f32 %v5667_v63, %v6487_v2  ;;  %v5785_v27 = vpop.f32.mrf.mxu0  ;;  %v6489_v18 = vld [vmem:[#allocation70_spill] sm:$0xff] }
 0x3ad   :  { %3157 = vst.msk [vmem:[#allocation13 + $0x78] sm:$0xff] %vm3141_vm4, %v2656_v52  ;;  %v5787_v21 = vpop.f32.mrf.mxu1  ;;  %v2191_v52 = vadd.f32 %v5733_v9, %v6489_v18  ;;  %v5795_v29 = vpop.f32.mrf.mxu3 }
 0x3af   :  { %v2912_v17 = vpop.xlane.xlu0 %2911  ;;  %v2910_v24 = vpop.xlane.xlu2 %2909 }
 0x3b0   :  { %3286 = vst.msk [vmem:[#allocation13 + $0x478] sm:$0xff] %vm3141_vm4, %v2912_v17  ;;  %v5792_v17 = vpop.f32.mrf.mxu2 }
 0x3b1   :  { %3285 = vst.msk [vmem:[#allocation13 + $0x470] sm:$0xff] %vm3141_vm4, %v2910_v24  ;;  %2817 = vmax.xlane.f32.xlu1 %v2184_v43  ;;  %v2518_v24 = vadd.f32 %v5717_v0, %v6486_v23  ;;  %v2345_v0 = vadd.f32 %v5694_v56, %v6488_v50  ;;  %v2523_v56 = vadd.f32 %v5757_v25, %v6491_v5  ;;  %v4588_v25 = vld [vmem:[#allocation10 + $0xe8] sm:$0xff] }
 0x3b4   :  { %3073 = vmax.xlane.f32.xlu0 %v2513_v20  ;;  %3071 = vmax.xlane.f32.xlu2 %v2510_v11  ;;  %v3052_v1 = vpop.xlane.xlu1 %3051  ;;  %v2520_v11 = vadd.f32 %v5740_v10, %v6489_v18  ;;  %v5802_v20 = vpop.f32.mrf.mxu0  ;;  %v2348_v10 = vadd.f32 %v5710_v30, %v6490_v59 }
 0x3b5   :  { %3356 = vst.msk [vmem:[#allocation13 + $0x6a8] sm:$0xff] %vm3141_vm4, %v3052_v1  ;;  %v5805_v1 = vpop.f32.mrf.mxu1 }
 0x3b7   :  { %v2798_v41 = vpop.xlane.xlu0 %2797  ;;  %v2796_v62 = vpop.xlane.xlu2 %2795 }
 0x3b8   :  { %3228 = vst.msk [vmem:[#allocation13 + $0x2b0] sm:$0xff] %vm3141_vm4, %v2798_v41 }
 0x3b9   :  { %3227 = vst.msk [vmem:[#allocation13 + $0x2a8] sm:$0xff] %vm3141_vm4, %v2796_v62  ;;  %2679 = vmax.xlane.f32.xlu1 %v2011_v44  ;;  %v2019_v44 = vadd.f32 %v5708_v12, %v6490_v59 }
 0x3ba   :  { %2072 = vmatmul.bf16.gmra.mxu0 %v4585_v16  ;;  %2247 = vmatmul.bf16.gmra.mxu2 %v4620_v61 }
 0x3bb   :  { %2401 = vmatmul.bf16.gmra.mxu1 %v4585_v16  ;;  %2576 = vmatmul.bf16.gmra.mxu3 %v4620_v61  ;;  %v4587_v16 = vld [vmem:[#allocation10 + $0xe0] sm:$0xff]  ;;  %v4622_v61 = vld [vmem:[#allocation10 + $0x1f8] sm:$0xff] }
 0x3bc   :  { %2935 = vmax.xlane.f32.xlu0 %v2340_v40  ;;  %2933 = vmax.xlane.f32.xlu2 %v2338_v22  ;;  %v2914_v45 = vpop.xlane.xlu1 %2913  ;;  %v5815_v22 = vpop.f32.mrf.mxu2 }
 0x3bd   :  { %3287 = vst.msk [vmem:[#allocation13 + $0x480] sm:$0xff] %vm3141_vm4, %v2914_v45  ;;  %v5817_v40 = vpop.f32.mrf.mxu3  ;;  %v5820_v45 = vpop.f32.mrf.mxu0 }
 0x3bf   :  { %v2660_v28 = vpop.xlane.xlu0 %2659  ;;  %v2658_v42 = vpop.xlane.xlu2 %2657 }
 0x3c0   :  { %3159 = vst.msk [vmem:[#allocation13 + $0x88] sm:$0xff] %vm3141_vm4, %v2660_v28  ;;  %v5824_v28 = vpop.f32.mrf.mxu1 }
 0x3c1   :  { %3158 = vst.msk [vmem:[#allocation13 + $0x80] sm:$0xff] %vm3141_vm4, %v2658_v42  ;;  %3075 = vmax.xlane.f32.xlu1 %v2515_v48  ;;  %v2194_v42 = vadd.f32 %v5755_v39, %v6491_v5 }
 0x3c4   :  { %2821 = vmax.xlane.f32.xlu0 %v2189_v60  ;;  %2819 = vmax.xlane.f32.xlu2 %v2186_v8  ;;  %v2800_v53 = vpop.xlane.xlu1 %2799  ;;  %v6492_v8 = vld [vmem:[#allocation72_spill] sm:$0xff] }
 0x3c5   :  { %3229 = vst.msk [vmem:[#allocation13 + $0x2b8] sm:$0xff] %vm3141_vm4, %v2800_v53  ;;  %v2196_v23 = vadd.f32 %v5773_v19, %v6492_v8  ;;  %v6493_v53 = vld [vmem:[#allocation28_spill] sm:$0xff]  ;;  %v6494_v19 = vld [vmem:[#allocation29_spill] sm:$0xff] }
 0x3c6   :  { %v2021_v39 = vadd.f32 %v5725_v55, %v6493_v53  ;;  %v2525_v55 = vadd.f32 %v5775_v26, %v6492_v8  ;;  %v2353_v26 = vadd.f32 %v5747_v7, %v6494_v19 }
 0x3c7   :  { %v3056_v4 = vpop.xlane.xlu0 %3055  ;;  %v3054_v46 = vpop.xlane.xlu2 %3053 }
 0x3c8   :  { %3358 = vst.msk [vmem:[#allocation13 + $0x6b8] sm:$0xff] %vm3141_vm4, %v3056_v4  ;;  %v2024_v4 = vadd.f32 %v5743_v14, %v6494_v19 }
 0x3c9   :  { %3357 = vst.msk [vmem:[#allocation13 + $0x6b0] sm:$0xff] %vm3141_vm4, %v3054_v46  ;;  %2937 = vmax.xlane.f32.xlu1 %v2343_v58  ;;  %v5835_v58 = vpop.f32.mrf.mxu0  ;;  %v5843_v46 = vpop.f32.mrf.mxu1 }
 0x3ca   :  { %2077 = vmatmul.bf16.gmra.mxu0 %v4586_v35  ;;  %2252 = vmatmul.bf16.gmra.mxu2 %v4621_v47 }
 0x3cb   :  { %2406 = vmatmul.bf16.gmra.mxu1 %v4586_v35  ;;  %2581 = vmatmul.bf16.gmra.mxu3 %v4621_v47  ;;  %v2350_v35 = vadd.f32 %v5728_v54, %v6493_v53 }
 0x3cc   :  { %2683 = vmax.xlane.f32.xlu0 %v2016_v15  ;;  %2681 = vmax.xlane.f32.xlu2 %v2014_v34  ;;  %v2662_v13 = vpop.xlane.xlu1 %2661  ;;  %v6495_v34 = vld [vmem:[#allocation73_spill] sm:$0xff] }
 0x3cd   :  { %3160 = vst.msk [vmem:[#allocation13 + $0x90] sm:$0xff] %vm3141_vm4, %v2662_v13  ;;  %v2199_v50 = vadd.f32 %v5792_v17, %v6495_v34  ;;  %v2528_v14 = vadd.f32 %v5795_v29, %v6495_v34  ;;  %v6496_v17 = vld [vmem:[#allocation30_spill] sm:$0xff] }
 0x3ce   :  { %v2355_v29 = vadd.f32 %v5770_v37, %v6496_v17 }
 0x3cf   :  { %v2918_v63 = vpop.xlane.xlu0 %2917  ;;  %v2916_v43 = vpop.xlane.xlu2 %2915 }
 0x3d0   :  { %3289 = vst.msk [vmem:[#allocation13 + $0x490] sm:$0xff] %vm3141_vm4, %v2918_v63 }
 0x3d1   :  { %3288 = vst.msk [vmem:[#allocation13 + $0x488] sm:$0xff] %vm3141_vm4, %v2916_v43  ;;  %2823 = vmax.xlane.f32.xlu1 %v2191_v52  ;;  %v5854_v18 = vpop.f32.mrf.mxu0  ;;  %v5856_v52 = vpop.f32.mrf.mxu1  ;;  %v4589_v43 = vld [vmem:[#allocation10 + $0xf0] sm:$0xff] }
 0x3d4   :  { %3079 = vmax.xlane.f32.xlu0 %v2520_v11  ;;  %3077 = vmax.xlane.f32.xlu2 %v2518_v24  ;;  %v3058_v9 = vpop.xlane.xlu1 %3057  ;;  %v2026_v24 = vadd.f32 %v5762_v57, %v6496_v17 }
 0x3d5   :  { %3359 = vst.msk [vmem:[#allocation13 + $0x6c0] sm:$0xff] %vm3141_vm4, %v3058_v9 }
 0x3d7   :  { %v2804_v41 = vpop.xlane.xlu0 %2803  ;;  %v2802_v62 = vpop.xlane.xlu2 %2801 }
 0x3d8   :  { %3231 = vst.msk [vmem:[#allocation13 + $0x2c8] sm:$0xff] %vm3141_vm4, %v2804_v41 }
 0x3d9   :  { %3230 = vst.msk [vmem:[#allocation13 + $0x2c0] sm:$0xff] %vm3141_vm4, %v2802_v62  ;;  %2685 = vmax.xlane.f32.xlu1 %v2019_v44  ;;  %v5870_v59 = vpop.f32.mrf.mxu1  ;;  %v6497_v44 = vld [vmem:[#allocation74_spill] sm:$0xff] }
 0x3da   :  { %2082 = vmatmul.bf16.gmra.mxu0 %v4587_v16  ;;  %2257 = vmatmul.bf16.gmra.mxu2 %v4622_v61  ;;  %v2530_v41 = vadd.f32 %v5817_v40, %v6497_v44  ;;  %v2201_v37 = vadd.f32 %v5815_v22, %v6497_v44  ;;  %v4590_v40 = vld [vmem:[#allocation10 + $0xf8] sm:$0xff] }
 0x3db   :  { %2411 = vmatmul.bf16.gmra.mxu1 %v4587_v16  ;;  %2586 = vmatmul.bf16.gmra.mxu3 %v4622_v61  ;;  %v5867_v16 = vpop.f32.mrf.mxu0  ;;  %v2203_v61 = vpop.f32.mrf.mxu2 }
 0x3dc   :  { %2941 = vmax.xlane.f32.xlu0 %v2348_v10  ;;  %2939 = vmax.xlane.f32.xlu2 %v2345_v0  ;;  %v2920_v12 = vpop.xlane.xlu1 %2919  ;;  %v6498_v0 = vld [vmem:[#allocation75_spill] sm:$0xff] }
 0x3dd   :  { %3290 = vst.msk [vmem:[#allocation13 + $0x498] sm:$0xff] %vm3141_vm4, %v2920_v12  ;;  %v2204_v10 = vadd.f32 %v2203_v61, %v6498_v0  ;;  %v2532_v12 = vpop.f32.mrf.mxu3 }
 0x3df   :  { %v2666_v48 = vpop.xlane.xlu0 %2665  ;;  %v2664_v30 = vpop.xlane.xlu2 %2663 }
 0x3e0   :  { %3162 = vst.msk [vmem:[#allocation13 + $0xa0] sm:$0xff] %vm3141_vm4, %v2666_v48  ;;  %v6499_v48 = vld [vmem:[#allocation31_spill] sm:$0xff] }
 0x3e1   :  { %3161 = vst.msk [vmem:[#allocation13 + $0x98] sm:$0xff] %vm3141_vm4, %v2664_v30  ;;  %3081 = vmax.xlane.f32.xlu1 %v2523_v56  ;;  %v2358_v30 = vadd.f32 %v5787_v21, %v6499_v48  ;;  %v2029_v22 = vadd.f32 %v5785_v27, %v6499_v48  ;;  %v2533_v27 = vadd.f32 %v2532_v12, %v6498_v0  ;;  %v6504_v0 = vld [vmem:[#allocation34_spill] sm:$0xff]  ;;  %v6505_v48 = vld [vmem:[#allocation35_spill] sm:$0xff] }
 0x3e3   :  { %v5880_v56 = vpop.f32.mrf.mxu0  ;;  %v2205_v53 = vpop.f32.mrf.mxu2 }
 0x3e4   :  { %2827 = vmax.xlane.f32.xlu0 %v2196_v23  ;;  %2825 = vmax.xlane.f32.xlu2 %v2194_v42  ;;  %v2806_v60 = vpop.xlane.xlu1 %2805  ;;  %v5884_v23 = vpop.f32.mrf.mxu1 }
 0x3e5   :  { %3232 = vst.msk [vmem:[#allocation13 + $0x2d0] sm:$0xff] %vm3141_vm4, %v2806_v60  ;;  %v6500_v60 = vld [vmem:[#allocation32_spill] sm:$0xff] }
 0x3e7   :  { %v3062_v47 = vpop.xlane.xlu0 %3061  ;;  %v3060_v2 = vpop.xlane.xlu2 %3059 }
 0x3e8   :  { %3361 = vst.msk [vmem:[#allocation13 + $0x6d0] sm:$0xff] %vm3141_vm4, %v3062_v47  ;;  %v2206_v47 = vadd.f32 %v2205_v53, %v5364_v6 }
 0x3e9   :  { %3360 = vst.msk [vmem:[#allocation13 + $0x6c8] sm:$0xff] %vm3141_vm4, %v3060_v2  ;;  %2943 = vmax.xlane.f32.xlu1 %v2350_v35  ;;  %v2534_v35 = vpop.f32.mrf.mxu3 }
 0x3ea   :  { %2087 = vmatmul.bf16.gmra.mxu0 %v4588_v25 }
 0x3eb   :  { %2416 = vmatmul.bf16.gmra.mxu1 %v4588_v25  ;;  %v2031_v25 = vadd.f32 %v5802_v20, %v6500_v60  ;;  %v5895_v19 = vpop.f32.mrf.mxu0  ;;  %v2535_v20 = vadd.f32 %v2534_v35, %v5364_v6  ;;  %v2360_v6 = vadd.f32 %v5805_v1, %v6500_v60 }
 0x3ec   :  { %2689 = vmax.xlane.f32.xlu0 %v2024_v4  ;;  %2687 = vmax.xlane.f32.xlu2 %v2021_v39  ;;  %v2668_v54 = vpop.xlane.xlu1 %2667  ;;  %v5900_v4 = vpop.f32.mrf.mxu1 }
 0x3ed   :  { %3163 = vst.msk [vmem:[#allocation13 + $0xa8] sm:$0xff] %vm3141_vm4, %v2668_v54  ;;  %v2208_v54 = vpop.f32.mrf.mxu2 }
 0x3ef   :  { %v2924_v15 = vpop.xlane.xlu0 %2923  ;;  %v2922_v13 = vpop.xlane.xlu2 %2921 }
 0x3f0   :  { %3292 = vst.msk [vmem:[#allocation13 + $0x4a8] sm:$0xff] %vm3141_vm4, %v2924_v15  ;;  %v6501_v15 = vld [vmem:[#allocation33_spill] sm:$0xff] }
 0x3f1   :  { %3291 = vst.msk [vmem:[#allocation13 + $0x4a0] sm:$0xff] %vm3141_vm4, %v2922_v13  ;;  %2829 = vmax.xlane.f32.xlu1 %v2199_v50  ;;  %v4591_v50 = vld [vmem:[#allocation10 + $0x100] sm:$0xff]  ;;  %v2034_v13 = vadd.f32 %v5820_v45, %v6501_v15 }
 0x3f3   :  { %v5911_v17 = vpop.f32.mrf.mxu0 }
 0x3f4   :  { %3085 = vmax.xlane.f32.xlu0 %v2528_v14  ;;  %3083 = vmax.xlane.f32.xlu2 %v2525_v55  ;;  %v3064_v63 = vpop.xlane.xlu1 %3063 }
 0x3f5   :  { %3362 = vst.msk [vmem:[#allocation13 + $0x6d8] sm:$0xff] %vm3141_vm4, %v3064_v63  ;;  %v2363_v63 = vadd.f32 %v5824_v28, %v6501_v15 }
 0x3f7   :  { %v2810_v11 = vpop.xlane.xlu0 %2809  ;;  %v2808_v9 = vpop.xlane.xlu2 %2807 }
 0x3f8   :  { %3234 = vst.msk [vmem:[#allocation13 + $0x2e0] sm:$0xff] %vm3141_vm4, %v2810_v11  ;;  %v2210_v11 = vpop.f32.mrf.mxu2 }
 0x3f9   :  { %3233 = vst.msk [vmem:[#allocation13 + $0x2d8] sm:$0xff] %vm3141_vm4, %v2808_v9  ;;  %2691 = vmax.xlane.f32.xlu1 %v2026_v24  ;;  %v5913_v24 = vpop.f32.mrf.mxu1  ;;  %v6502_v9 = vld [vmem:[#allocation76_spill] sm:$0xff] }
 0x3fa   :  { %2092 = vmatmul.bf16.gmra.mxu0 %v4589_v43  ;;  %v2209_v28 = vadd.f32 %v2208_v54, %v6502_v9 }
 0x3fb   :  { %2421 = vmatmul.bf16.gmra.mxu1 %v4589_v43  ;;  %v2537_v43 = vpop.f32.mrf.mxu3 }
 0x3fc   :  { %2947 = vmax.xlane.f32.xlu0 %v2355_v29  ;;  %2945 = vmax.xlane.f32.xlu2 %v2353_v26  ;;  %v2926_v57 = vpop.xlane.xlu1 %2925  ;;  %v2538_v26 = vadd.f32 %v2537_v43, %v6502_v9 }
 0x3fd   :  { %3293 = vst.msk [vmem:[#allocation13 + $0x4b0] sm:$0xff] %vm3141_vm4, %v2926_v57  ;;  %v6503_v57 = vld [vmem:[#allocation77_spill] sm:$0xff] }
 0x3fe   :  { %v2211_v61 = vadd.f32 %v2210_v11, %v6503_v57 }
 0x3ff   :  { %v2672_v62 = vpop.xlane.xlu0 %2671  ;;  %v2670_v7 = vpop.xlane.xlu2 %2669 }
 0x400   :  { %3165 = vst.msk [vmem:[#allocation13 + $0xb8] sm:$0xff] %vm3141_vm4, %v2672_v62  ;;  %v5922_v62 = vpop.f32.mrf.mxu0 }
 0x401   :  { %3164 = vst.msk [vmem:[#allocation13 + $0xb0] sm:$0xff] %vm3141_vm4, %v2670_v7  ;;  %3087 = vmax.xlane.f32.xlu1 %v2530_v41  ;;  %v5924_v7 = vpop.f32.mrf.mxu1 }
 0x403   :  { %v2539_v44 = vpop.f32.mrf.mxu3 }
 0x404   :  { %2833 = vmax.xlane.f32.xlu0 %v2204_v10  ;;  %2831 = vmax.xlane.f32.xlu2 %v2201_v37  ;;  %v2812_v5 = vpop.xlane.xlu1 %2811  ;;  %v4592_v37 = vld [vmem:[#allocation10 + $0x108] sm:$0xff]  ;;  %v2365_v10 = vadd.f32 %v5843_v46, %v6504_v0 }
 0x405   :  { %3235 = vst.msk [vmem:[#allocation13 + $0x2e8] sm:$0xff] %vm3141_vm4, %v2812_v5 }
 0x407   :  { %v3068_v42 = vpop.xlane.xlu0 %3067  ;;  %v3066_v8 = vpop.xlane.xlu2 %3065 }
 0x408   :  { %3364 = vst.msk [vmem:[#allocation13 + $0x6e8] sm:$0xff] %vm3141_vm4, %v3068_v42  ;;  %v2213_v42 = vpop.f32.mrf.mxu2 }
 0x409   :  { %3363 = vst.msk [vmem:[#allocation13 + $0x6e0] sm:$0xff] %vm3141_vm4, %v3066_v8  ;;  %2949 = vmax.xlane.f32.xlu1 %v2358_v30  ;;  %v2039_v30 = vadd.f32 %v5854_v18, %v6505_v48  ;;  %v2540_v18 = vadd.f32 %v2539_v44, %v6503_v57 }
 0x40a   :  { %2097 = vmatmul.bf16.gmra.mxu0 %v4590_v40 }
 0x40b   :  { %2426 = vmatmul.bf16.gmra.mxu1 %v4590_v40  ;;  %v2036_v40 = vadd.f32 %v5835_v58, %v6504_v0  ;;  %v2542_v46 = vpop.f32.mrf.mxu3  ;;  %v5939_v58 = vpop.f32.mrf.mxu1 }
 0x40c   :  { %2695 = vmax.xlane.f32.xlu0 %v2031_v25  ;;  %2693 = vmax.xlane.f32.xlu2 %v2029_v22  ;;  %v2674_v21 = vpop.xlane.xlu1 %2673  ;;  %v6506_v22 = vld [vmem:[#allocation78_spill] sm:$0xff] }
 0x40d   :  { %3166 = vst.msk [vmem:[#allocation13 + $0xc0] sm:$0xff] %vm3141_vm4, %v2674_v21  ;;  %v2214_v60 = vadd.f32 %v2213_v42, %v6506_v22  ;;  %v5936_v21 = vpop.f32.mrf.mxu0  ;;  %v2543_v35 = vadd.f32 %v2542_v46, %v6506_v22  ;;  %v6511_v22 = vld [vmem:[#allocation39_spill] sm:$0xff] }
 0x40f   :  { %v2930_v2 = vpop.xlane.xlu0 %2929  ;;  %v2928_v39 = vpop.xlane.xlu2 %2927 }
 0x410   :  { %3295 = vst.msk [vmem:[#allocation13 + $0x4c0] sm:$0xff] %vm3141_vm4, %v2930_v2 }
 0x411   :  { %3294 = vst.msk [vmem:[#allocation13 + $0x4b8] sm:$0xff] %vm3141_vm4, %v2928_v39  ;;  %2835 = vmax.xlane.f32.xlu1 %v2206_v47  ;;  %v2215_v47 = vpop.f32.mrf.mxu2  ;;  %v4593_v39 = vld [vmem:[#allocation10 + $0x110] sm:$0xff] }
 0x414   :  { %3091 = vmax.xlane.f32.xlu0 %v2535_v20  ;;  %3089 = vmax.xlane.f32.xlu2 %v2533_v27  ;;  %v3070_v34 = vpop.xlane.xlu1 %3069  ;;  %v6507_v27 = vld [vmem:[#allocation36_spill] sm:$0xff] }
 0x415   :  { %3365 = vst.msk [vmem:[#allocation13 + $0x6f0] sm:$0xff] %vm3141_vm4, %v3070_v34  ;;  %v2041_v20 = vadd.f32 %v5867_v16, %v6507_v27  ;;  %v2370_v15 = vadd.f32 %v5870_v59, %v6507_v27 }
 0x417   :  { %v2816_v55 = vpop.xlane.xlu0 %2815  ;;  %v2814_v14 = vpop.xlane.xlu2 %2813 }
 0x418   :  { %3237 = vst.msk [vmem:[#allocation13 + $0x2f8] sm:$0xff] %vm3141_vm4, %v2816_v55  ;;  %v5953_v55 = vpop.f32.mrf.mxu0 }
 0x419   :  { %3236 = vst.msk [vmem:[#allocation13 + $0x2f0] sm:$0xff] %vm3141_vm4, %v2814_v14  ;;  %2697 = vmax.xlane.f32.xlu1 %v2034_v13  ;;  %v2544_v13 = vpop.f32.mrf.mxu3  ;;  %v5955_v14 = vpop.f32.mrf.mxu1 }
 0x41a   :  { %2102 = vmatmul.bf16.gmra.mxu0 %v4591_v50 }
 0x41b   :  { %2431 = vmatmul.bf16.gmra.mxu1 %v4591_v50  ;;  %v2368_v50 = vadd.f32 %v5856_v52, %v6505_v48 }
 0x41c   :  { %2953 = vmax.xlane.f32.xlu0 %v2363_v63  ;;  %2951 = vmax.xlane.f32.xlu2 %v2360_v6  ;;  %v2932_v45 = vpop.xlane.xlu1 %2931  ;;  %v2218_v6 = vpop.f32.mrf.mxu2  ;;  %v6508_v63 = vld [vmem:[#allocation79_spill] sm:$0xff] }
 0x41d   :  { %3296 = vst.msk [vmem:[#allocation13 + $0x4c8] sm:$0xff] %vm3141_vm4, %v2932_v45  ;;  %v2545_v43 = vadd.f32 %v2544_v13, %v6508_v63  ;;  %v2216_v59 = vadd.f32 %v2215_v47, %v6508_v63  ;;  %v2219_v11 = vadd.f32 %v2218_v6, %v5382_v49 }
 0x41f   :  { %v2678_v29 = vpop.xlane.xlu0 %2677  ;;  %v2676_v1 = vpop.xlane.xlu2 %2675 }
 0x420   :  { %3168 = vst.msk [vmem:[#allocation13 + $0xd0] sm:$0xff] %vm3141_vm4, %v2678_v29  ;;  %v6509_v29 = vld [vmem:[#allocation37_spill] sm:$0xff] }
 0x421   :  { %3167 = vst.msk [vmem:[#allocation13 + $0xc8] sm:$0xff] %vm3141_vm4, %v2676_v1  ;;  %3093 = vmax.xlane.f32.xlu1 %v2538_v26  ;;  %v2547_v9 = vpop.f32.mrf.mxu3  ;;  %v2373_v1 = vadd.f32 %v5884_v23, %v6509_v29 }
 0x424   :  { %2839 = vmax.xlane.f32.xlu0 %v2211_v61  ;;  %2837 = vmax.xlane.f32.xlu2 %v2209_v28  ;;  %v2818_v41 = vpop.xlane.xlu1 %2817  ;;  %v5966_v61 = vpop.f32.mrf.mxu1 }
 0x425   :  { %3238 = vst.msk [vmem:[#allocation13 + $0x300] sm:$0xff] %vm3141_vm4, %v2818_v41  ;;  %v2220_v44 = vpop.f32.mrf.mxu2  ;;  %v2044_v41 = vadd.f32 %v5880_v56, %v6509_v29  ;;  %v2548_v56 = vadd.f32 %v2547_v9, %v5382_v49  ;;  %v6516_v29 = vld [vmem:[#allocation82_spill] sm:$0xff] }
 0x427   :  { %v3074_v12 = vpop.xlane.xlu0 %3073  ;;  %v3072_v5 = vpop.xlane.xlu2 %3071 }
 0x428   :  { %3367 = vst.msk [vmem:[#allocation13 + $0x700] sm:$0xff] %vm3141_vm4, %v3074_v12 }
 0x429   :  { %3366 = vst.msk [vmem:[#allocation13 + $0x6f8] sm:$0xff] %vm3141_vm4, %v3072_v5  ;;  %2955 = vmax.xlane.f32.xlu1 %v2365_v10  ;;  %v5974_v10 = vpop.f32.mrf.mxu0  ;;  %v2549_v12 = vpop.f32.mrf.mxu3  ;;  %v2221_v5 = vadd.f32 %v2220_v44, %v5384_v31 }
 0x42a   :  { %2107 = vmatmul.bf16.gmra.mxu0 %v4592_v37 }
 0x42b   :  { %2436 = vmatmul.bf16.gmra.mxu1 %v4592_v37  ;;  %v6510_v37 = vld [vmem:[#allocation38_spill] sm:$0xff] }
 0x42c   :  { %2701 = vmax.xlane.f32.xlu0 %v2039_v30  ;;  %2699 = vmax.xlane.f32.xlu2 %v2036_v40  ;;  %v2680_v8 = vpop.xlane.xlu1 %2679  ;;  %v2046_v0 = vadd.f32 %v5895_v19, %v6510_v37  ;;  %v2550_v19 = vadd.f32 %v2549_v12, %v5384_v31  ;;  %v5982_v30 = vpop.f32.mrf.mxu1  ;;  %v2375_v49 = vadd.f32 %v5900_v4, %v6510_v37 }
 0x42d   :  { %3169 = vst.msk [vmem:[#allocation13 + $0xd8] sm:$0xff] %vm3141_vm4, %v2680_v8  ;;  %v2223_v42 = vpop.f32.mrf.mxu2  ;;  %v2378_v31 = vadd.f32 %v5913_v24, %v6511_v22  ;;  %v6513_v24 = vld [vmem:[#allocation81_spill] sm:$0xff] }
 0x42f   :  { %v2936_v25 = vpop.xlane.xlu0 %2935  ;;  %v2934_v53 = vpop.xlane.xlu2 %2933 }
 0x430   :  { %3298 = vst.msk [vmem:[#allocation13 + $0x4d8] sm:$0xff] %vm3141_vm4, %v2936_v25 }
 0x431   :  { %3297 = vst.msk [vmem:[#allocation13 + $0x4d0] sm:$0xff] %vm3141_vm4, %v2934_v53  ;;  %2841 = vmax.xlane.f32.xlu1 %v2214_v60  ;;  %v5984_v8 = vpop.f32.mrf.mxu0  ;;  %v2049_v60 = vadd.f32 %v5911_v17, %v6511_v22 }
 0x434   :  { %3097 = vmax.xlane.f32.xlu0 %v2543_v35  ;;  %3095 = vmax.xlane.f32.xlu2 %v2540_v18  ;;  %v3076_v2 = vpop.xlane.xlu1 %3075  ;;  %v2552_v18 = vpop.f32.mrf.mxu3 }
 0x435   :  { %3368 = vst.msk [vmem:[#allocation13 + $0x708] sm:$0xff] %vm3141_vm4, %v3076_v2  ;;  %v5995_v35 = vpop.f32.mrf.mxu1  ;;  %v2225_v17 = vpop.f32.mrf.mxu2 }
 0x437   :  { %v2822_v54 = vpop.xlane.xlu0 %2821  ;;  %v2820_v34 = vpop.xlane.xlu2 %2819 }
 0x438   :  { %3240 = vst.msk [vmem:[#allocation13 + $0x310] sm:$0xff] %vm3141_vm4, %v2822_v54 }
 0x439   :  { %3239 = vst.msk [vmem:[#allocation13 + $0x308] sm:$0xff] %vm3141_vm4, %v2820_v34  ;;  %2703 = vmax.xlane.f32.xlu1 %v2041_v20  ;;  %v5998_v2 = vpop.f32.mrf.mxu0  ;;  %v2226_v34 = vadd.f32 %v2225_v17, %v6513_v24 }
 0x43a   :  { %2112 = vmatmul.bf16.gmra.mxu0 %v4593_v39 }
 0x43b   :  { %2441 = vmatmul.bf16.gmra.mxu1 %v4593_v39  ;;  %v6512_v39 = vld [vmem:[#allocation80_spill] sm:$0xff] }
 0x43c   :  { %2959 = vmax.xlane.f32.xlu0 %v2370_v15  ;;  %2957 = vmax.xlane.f32.xlu2 %v2368_v50  ;;  %v2938_v16 = vpop.xlane.xlu1 %2937  ;;  %v2553_v27 = vadd.f32 %v2552_v18, %v6512_v39  ;;  %v2224_v4 = vadd.f32 %v2223_v42, %v6512_v39  ;;  %v2554_v50 = vpop.f32.mrf.mxu3  ;;  %v6519_v39 = vld [vmem:[#allocation43_spill] sm:$0xff] }
 0x43d   :  { %3299 = vst.msk [vmem:[#allocation13 + $0x4e0] sm:$0xff] %vm3141_vm4, %v2938_v16  ;;  %v6006_v13 = vpop.f32.mrf.mxu1  ;;  %v6514_v16 = vld [vmem:[#allocation40_spill] sm:$0xff]  ;;  %v2228_v9 = vpop.f32.mrf.mxu2 }
 0x43e   :  { %v2380_v6 = vadd.f32 %v5924_v7, %v6514_v16 }
 0x43f   :  { %v2684_v45 = vpop.xlane.xlu0 %2683  ;;  %v2682_v52 = vpop.xlane.xlu2 %2681 }
 0x440   :  { %3171 = vst.msk [vmem:[#allocation13 + $0xe8] sm:$0xff] %vm3141_vm4, %v2684_v45 }
 0x441   :  { %3170 = vst.msk [vmem:[#allocation13 + $0xe0] sm:$0xff] %vm3141_vm4, %v2682_v52  ;;  %3099 = vmax.xlane.f32.xlu1 %v2545_v43  ;;  %v6010_v45 = vpop.f32.mrf.mxu0  ;;  %v2051_v52 = vadd.f32 %v5922_v62, %v6514_v16  ;;  %v2555_v62 = vadd.f32 %v2554_v50, %v6513_v24 }
 0x444   :  { %2845 = vmax.xlane.f32.xlu0 %v2219_v11  ;;  %2843 = vmax.xlane.f32.xlu2 %v2216_v59  ;;  %v2824_v26 = vpop.xlane.xlu1 %2823  ;;  %v6515_v59 = vld [vmem:[#allocation41_spill] sm:$0xff]  ;;  %v2557_v7 = vpop.f32.mrf.mxu3 }
 0x445   :  { %3241 = vst.msk [vmem:[#allocation13 + $0x318] sm:$0xff] %vm3141_vm4, %v2824_v26  ;;  %v2054_v11 = vadd.f32 %v5936_v21, %v6515_v59  ;;  %v6020_v44 = vpop.f32.mrf.mxu1  ;;  %v2558_v21 = vadd.f32 %v2557_v7, %v6516_v29  ;;  %v2230_v37 = vpop.f32.mrf.mxu2 }
 0x447   :  { %v3080_v28 = vpop.xlane.xlu0 %3079  ;;  %v3078_v57 = vpop.xlane.xlu2 %3077 }
 0x448   :  { %3370 = vst.msk [vmem:[#allocation13 + $0x718] sm:$0xff] %vm3141_vm4, %v3080_v28 }
 0x449   :  { %3369 = vst.msk [vmem:[#allocation13 + $0x710] sm:$0xff] %vm3141_vm4, %v3078_v57  ;;  %2961 = vmax.xlane.f32.xlu1 %v2373_v1  ;;  %v2229_v1 = vadd.f32 %v2228_v9, %v6516_v29 }
 0x44c   :  { %2707 = vmax.xlane.f32.xlu0 %v2046_v0  ;;  %2705 = vmax.xlane.f32.xlu2 %v2044_v41  ;;  %v2686_v23 = vpop.xlane.xlu1 %2685  ;;  %v6026_v41 = vpop.f32.mrf.mxu0 }
 0x44d   :  { %3172 = vst.msk [vmem:[#allocation13 + $0xf0] sm:$0xff] %vm3141_vm4, %v2686_v23  ;;  %v6517_v23 = vld [vmem:[#allocation42_spill] sm:$0xff]  ;;  %v6037_v42 = vpop.f32.mrf.mxu1  ;;  %v2233_v22 = vpop.f32.mrf.mxu2 }
 0x44e   :  { %v2056_v12 = vadd.f32 %v5953_v55, %v6517_v23 }
 0x44f   :  { %v2942_v40 = vpop.xlane.xlu0 %2941  ;;  %v2940_v48 = vpop.xlane.xlu2 %2939 }
 0x450   :  { %3301 = vst.msk [vmem:[#allocation13 + $0x4f0] sm:$0xff] %vm3141_vm4, %v2942_v40 }
 0x451   :  { %3300 = vst.msk [vmem:[#allocation13 + $0x4e8] sm:$0xff] %vm3141_vm4, %v2940_v48  ;;  %2847 = vmax.xlane.f32.xlu1 %v2221_v5  ;;  %v2559_v48 = vpop.f32.mrf.mxu3 }
 0x454   :  { %3103 = vmax.xlane.f32.xlu0 %v2550_v19  ;;  %3101 = vmax.xlane.f32.xlu2 %v2548_v56  ;;  %v3082_v46 = vpop.xlane.xlu1 %3081  ;;  %v2383_v56 = vadd.f32 %v5939_v58, %v6515_v59  ;;  %v2385_v19 = vadd.f32 %v5955_v14, %v6517_v23  ;;  %v2231_v58 = vadd.f32 %v2230_v37, %v5398_v36  ;;  %v6518_v14 = vld [vmem:[#allocation83_spill] sm:$0xff] }
 0x455   :  { %3371 = vst.msk [vmem:[#allocation13 + $0x720] sm:$0xff] %vm3141_vm4, %v3082_v46  ;;  %v6039_v46 = vpop.f32.mrf.mxu0  ;;  %v6047_v18 = vpop.f32.mrf.mxu1 }
 0x457   :  { %v2828_v25 = vpop.xlane.xlu0 %2827  ;;  %v2826_v53 = vpop.xlane.xlu2 %2825 }
 0x458   :  { %3243 = vst.msk [vmem:[#allocation13 + $0x328] sm:$0xff] %vm3141_vm4, %v2828_v25 }
 0x459   :  { %3242 = vst.msk [vmem:[#allocation13 + $0x320] sm:$0xff] %vm3141_vm4, %v2826_v53  ;;  %2709 = vmax.xlane.f32.xlu1 %v2049_v60  ;;  %v2560_v60 = vadd.f32 %v2559_v48, %v5398_v36  ;;  %v2059_v36 = vadd.f32 %v5974_v10, %v6519_v39 }
 0x45c   :  { %2965 = vmax.xlane.f32.xlu0 %v2378_v31  ;;  %2963 = vmax.xlane.f32.xlu2 %v2375_v49  ;;  %v2944_v47 = vpop.xlane.xlu1 %2943  ;;  %v2234_v49 = vadd.f32 %v2233_v22, %v6518_v14  ;;  %v2562_v31 = vpop.f32.mrf.mxu3 }
 0x45d   :  { %3302 = vst.msk [vmem:[#allocation13 + $0x4f8] sm:$0xff] %vm3141_vm4, %v2944_v47  ;;  %v6050_v17 = vpop.f32.mrf.mxu0  ;;  %v2563_v10 = vadd.f32 %v2562_v31, %v6518_v14 }
 0x45f   :  { %v2690_v20 = vpop.xlane.xlu0 %2689  ;;  %v2688_v54 = vpop.xlane.xlu2 %2687 }
 0x460   :  { %3174 = vst.msk [vmem:[#allocation13 + $0x100] sm:$0xff] %vm3141_vm4, %v2690_v20 }
 0x461   :  { %3173 = vst.msk [vmem:[#allocation13 + $0xf8] sm:$0xff] %vm3141_vm4, %v2688_v54  ;;  %3105 = vmax.xlane.f32.xlu1 %v2553_v27  ;;  %v2388_v27 = vadd.f32 %v5966_v61, %v6519_v39 }
 0x464   :  { %2851 = vmax.xlane.f32.xlu0 %v2226_v34  ;;  %2849 = vmax.xlane.f32.xlu2 %v2224_v4  ;;  %v2830_v15 = vpop.xlane.xlu1 %2829  ;;  %v6520_v4 = vld [vmem:[#allocation44_spill] sm:$0xff]  ;;  %v2235_v34 = vpop.f32.mrf.mxu2 }
 0x465   :  { %3244 = vst.msk [vmem:[#allocation13 + $0x330] sm:$0xff] %vm3141_vm4, %v2830_v15  ;;  %v2061_v24 = vadd.f32 %v5984_v8, %v6520_v4  ;;  %v2564_v61 = vpop.f32.mrf.mxu3  ;;  %v6061_v15 = vpop.f32.mrf.mxu1  ;;  %v2236_v16 = vadd.f32 %v2235_v34, %v5405_v51 }
 0x466   :  { %v2565_v8 = vadd.f32 %v2564_v61, %v5405_v51  ;;  %v2390_v51 = vadd.f32 %v5982_v30, %v6520_v4  ;;  %v6525_v4 = vld [vmem:[#allocation48_spill] sm:$0xff] }
 0x467   :  { %v3086_v63 = vpop.xlane.xlu0 %3085  ;;  %v3084_v43 = vpop.xlane.xlu2 %3083 }
 0x468   :  { %3373 = vst.msk [vmem:[#allocation13 + $0x730] sm:$0xff] %vm3141_vm4, %v3086_v63 }
 0x469   :  { %3372 = vst.msk [vmem:[#allocation13 + $0x728] sm:$0xff] %vm3141_vm4, %v3084_v43  ;;  %2967 = vmax.xlane.f32.xlu1 %v2380_v6  ;;  %v6064_v43 = vpop.f32.mrf.mxu0 }
 0x46c   :  { %2713 = vmax.xlane.f32.xlu0 %v2054_v11  ;;  %2711 = vmax.xlane.f32.xlu2 %v2051_v52  ;;  %v2692_v26 = vpop.xlane.xlu1 %2691  ;;  %v2238_v52 = vpop.f32.mrf.mxu2  ;;  %v6521_v11 = vld [vmem:[#allocation45_spill] sm:$0xff] }
 0x46d   :  { %3175 = vst.msk [vmem:[#allocation13 + $0x108] sm:$0xff] %vm3141_vm4, %v2692_v26  ;;  %v2064_v9 = vadd.f32 %v5998_v2, %v6521_v11  ;;  %v6073_v29 = vpop.f32.mrf.mxu1 }
 0x46f   :  { %v2948_v28 = vpop.xlane.xlu0 %2947  ;;  %v2946_v57 = vpop.xlane.xlu2 %2945 }
 0x470   :  { %3304 = vst.msk [vmem:[#allocation13 + $0x508] sm:$0xff] %vm3141_vm4, %v2948_v28  ;;  %v2393_v28 = vadd.f32 %v5995_v35, %v6521_v11 }
 0x471   :  { %3303 = vst.msk [vmem:[#allocation13 + $0x500] sm:$0xff] %vm3141_vm4, %v2946_v57  ;;  %2853 = vmax.xlane.f32.xlu1 %v2229_v1  ;;  %v2567_v1 = vpop.f32.mrf.mxu3  ;;  %v6081_v57 = vpop.f32.mrf.mxu0 }
 0x474   :  { %3109 = vmax.xlane.f32.xlu0 %v2558_v21  ;;  %3107 = vmax.xlane.f32.xlu2 %v2555_v62  ;;  %v3088_v0 = vpop.xlane.xlu1 %3087  ;;  %v2240_v62 = vpop.f32.mrf.mxu2  ;;  %v6522_v21 = vld [vmem:[#allocation84_spill] sm:$0xff] }
 0x475   :  { %3374 = vst.msk [vmem:[#allocation13 + $0x738] sm:$0xff] %vm3141_vm4, %v3088_v0  ;;  %v2568_v37 = vadd.f32 %v2567_v1, %v6522_v21  ;;  %v2239_v30 = vadd.f32 %v2238_v52, %v6522_v21  ;;  %v2241_v35 = vadd.f32 %v2240_v62, %v5414_v32  ;;  %v6528_v21 = vld [vmem:[#allocation50_spill] sm:$0xff] }
 0x477   :  { %v2834_v5 = vpop.xlane.xlu0 %2833  ;;  %v2832_v40 = vpop.xlane.xlu2 %2831 }
 0x478   :  { %3246 = vst.msk [vmem:[#allocation13 + $0x340] sm:$0xff] %vm3141_vm4, %v2834_v5 }
 0x479   :  { %3245 = vst.msk [vmem:[#allocation13 + $0x338] sm:$0xff] %vm3141_vm4, %v2832_v40  ;;  %2715 = vmax.xlane.f32.xlu1 %v2056_v12  ;;  %v6089_v12 = vpop.f32.mrf.mxu1  ;;  %v2569_v5 = vpop.f32.mrf.mxu3 }
 0x47a   :  { %v6091_v40 = vpop.f32.mrf.mxu0 }
 0x47c   :  { %2971 = vmax.xlane.f32.xlu0 %v2385_v19  ;;  %2969 = vmax.xlane.f32.xlu2 %v2383_v56  ;;  %v2950_v55 = vpop.xlane.xlu1 %2949  ;;  %v6523_v56 = vld [vmem:[#allocation46_spill] sm:$0xff] }
 0x47d   :  { %3305 = vst.msk [vmem:[#allocation13 + $0x510] sm:$0xff] %vm3141_vm4, %v2950_v55  ;;  %v2395_v19 = vadd.f32 %v6006_v13, %v6523_v56 }
 0x47f   :  { %v2696_v25 = vpop.xlane.xlu0 %2695  ;;  %v2694_v53 = vpop.xlane.xlu2 %2693 }
 0x480   :  { %3177 = vst.msk [vmem:[#allocation13 + $0x118] sm:$0xff] %vm3141_vm4, %v2696_v25  ;;  %v6524_v25 = vld [vmem:[#allocation47_spill] sm:$0xff] }
 0x481   :  { %3176 = vst.msk [vmem:[#allocation13 + $0x110] sm:$0xff] %vm3141_vm4, %v2694_v53  ;;  %3111 = vmax.xlane.f32.xlu1 %v2560_v60  ;;  %v2066_v60 = vadd.f32 %v6010_v45, %v6523_v56  ;;  %v2069_v53 = vadd.f32 %v6026_v41, %v6524_v25  ;;  %v6102_v14 = vpop.f32.mrf.mxu1  ;;  %v2572_v13 = vpop.f32.mrf.mxu3  ;;  %v2570_v45 = vadd.f32 %v2569_v5, %v5414_v32 }
 0x482   :  { %v6105_v31 = vpop.f32.mrf.mxu0  ;;  %v2573_v41 = vadd.f32 %v2572_v13, %v5418_v33  ;;  %v2398_v32 = vadd.f32 %v6020_v44, %v6524_v25  ;;  %v6530_v25 = vld [vmem:[#allocation51_spill] sm:$0xff] }
 0x483   :  { %v2408_v13 = vadd.f32 %v6073_v29, %v6530_v25 }
 0x484   :  { %2857 = vmax.xlane.f32.xlu0 %v2234_v49  ;;  %2855 = vmax.xlane.f32.xlu2 %v2231_v58  ;;  %v2836_v47 = vpop.xlane.xlu1 %2835  ;;  %v2243_v58 = vpop.f32.mrf.mxu2 }
 0x485   :  { %3247 = vst.msk [vmem:[#allocation13 + $0x348] sm:$0xff] %vm3141_vm4, %v2836_v47  ;;  %v2244_v47 = vadd.f32 %v2243_v58, %v5418_v33  ;;  %v2400_v33 = vadd.f32 %v6037_v42, %v6525_v4 }
 0x487   :  { %v3092_v20 = vpop.xlane.xlu0 %3091  ;;  %v3090_v54 = vpop.xlane.xlu2 %3089 }
 0x488   :  { %3376 = vst.msk [vmem:[#allocation13 + $0x748] sm:$0xff] %vm3141_vm4, %v3092_v20 }
 0x489   :  { %3375 = vst.msk [vmem:[#allocation13 + $0x740] sm:$0xff] %vm3141_vm4, %v3090_v54  ;;  %2973 = vmax.xlane.f32.xlu1 %v2388_v27 }
 0x48a   :  { %v6117_v61 = vpop.f32.mrf.mxu0 }
 0x48c   :  { %2719 = vmax.xlane.f32.xlu0 %v2061_v24  ;;  %2717 = vmax.xlane.f32.xlu2 %v2059_v36  ;;  %v2698_v50 = vpop.xlane.xlu1 %2697  ;;  %v2245_v20 = vpop.f32.mrf.mxu2  ;;  %v2071_v24 = vadd.f32 %v6039_v46, %v6525_v4 }
 0x48d   :  { %3178 = vst.msk [vmem:[#allocation13 + $0x120] sm:$0xff] %vm3141_vm4, %v2698_v50  ;;  %v6113_v36 = vpop.f32.mrf.mxu1 }
 0x48f   :  { %v2954_v6 = vpop.xlane.xlu0 %2953  ;;  %v2952_v63 = vpop.xlane.xlu2 %2951 }
 0x490   :  { %3307 = vst.msk [vmem:[#allocation13 + $0x520] sm:$0xff] %vm3141_vm4, %v2954_v6 }
 0x491   :  { %3306 = vst.msk [vmem:[#allocation13 + $0x518] sm:$0xff] %vm3141_vm4, %v2952_v63  ;;  %2859 = vmax.xlane.f32.xlu1 %v2236_v16  ;;  %v2574_v16 = vpop.f32.mrf.mxu3  ;;  %v6526_v63 = vld [vmem:[#allocation85_spill] sm:$0xff] }
 0x492   :  { %v2246_v44 = vadd.f32 %v2245_v20, %v6526_v63  ;;  %v6133_v11 = vpop.f32.mrf.mxu0 }
 0x494   :  { %3115 = vmax.xlane.f32.xlu0 %v2565_v8  ;;  %3113 = vmax.xlane.f32.xlu2 %v2563_v10  ;;  %v3094_v59 = vpop.xlane.xlu1 %3093  ;;  %v2248_v46 = vpop.f32.mrf.mxu2  ;;  %v2575_v10 = vadd.f32 %v2574_v16, %v6526_v63 }
 0x495   :  { %3377 = vst.msk [vmem:[#allocation13 + $0x750] sm:$0xff] %vm3141_vm4, %v3094_v59  ;;  %v6127_v59 = vpop.f32.mrf.mxu1  ;;  %v2249_v42 = vadd.f32 %v2248_v46, %v5429_v38  ;;  %v6533_v46 = vld [vmem:[#allocation53_spill] sm:$0xff] }
 0x496   :  { %v2084_v63 = vadd.f32 %v6105_v31, %v6533_v46  ;;  %v6535_v31 = vld [vmem:[#allocation54_spill] sm:$0xff] }
 0x497   :  { %v2840_v26 = vpop.xlane.xlu0 %2839  ;;  %v2838_v7 = vpop.xlane.xlu2 %2837 }
 0x498   :  { %3249 = vst.msk [vmem:[#allocation13 + $0x358] sm:$0xff] %vm3141_vm4, %v2840_v26 }
 0x499   :  { %3248 = vst.msk [vmem:[#allocation13 + $0x350] sm:$0xff] %vm3141_vm4, %v2838_v7  ;;  %2721 = vmax.xlane.f32.xlu1 %v2064_v9  ;;  %v2577_v9 = vpop.f32.mrf.mxu3  ;;  %v6527_v7 = vld [vmem:[#allocation49_spill] sm:$0xff] }
 0x49a   :  { %v2403_v1 = vadd.f32 %v6047_v18, %v6527_v7  ;;  %v2074_v62 = vadd.f32 %v6050_v17, %v6527_v7  ;;  %v2578_v17 = vadd.f32 %v2577_v9, %v5429_v38  ;;  %v2405_v38 = vadd.f32 %v6061_v15, %v6528_v21 }
 0x49c   :  { %2977 = vmax.xlane.f32.xlu0 %v2393_v28  ;;  %2975 = vmax.xlane.f32.xlu2 %v2390_v51  ;;  %v2956_v2 = vpop.xlane.xlu1 %2955 }
 0x49d   :  { %3308 = vst.msk [vmem:[#allocation13 + $0x528] sm:$0xff] %vm3141_vm4, %v2956_v2  ;;  %v2250_v2 = vpop.f32.mrf.mxu2 }
 0x49f   :  { %v2702_v0 = vpop.xlane.xlu0 %2701  ;;  %v2700_v23 = vpop.xlane.xlu2 %2699 }
 0x4a0   :  { %3180 = vst.msk [vmem:[#allocation13 + $0x130] sm:$0xff] %vm3141_vm4, %v2702_v0  ;;  %v6144_v0 = vpop.f32.mrf.mxu1 }
 0x4a1   :  { %3179 = vst.msk [vmem:[#allocation13 + $0x128] sm:$0xff] %vm3141_vm4, %v2700_v23  ;;  %3117 = vmax.xlane.f32.xlu1 %v2568_v37  ;;  %v2076_v37 = vadd.f32 %v6064_v43, %v6528_v21  ;;  %v6146_v23 = vpop.f32.mrf.mxu0 }
 0x4a4   :  { %2863 = vmax.xlane.f32.xlu0 %v2241_v35  ;;  %2861 = vmax.xlane.f32.xlu2 %v2239_v30  ;;  %v2842_v48 = vpop.xlane.xlu1 %2841  ;;  %v2579_v30 = vpop.f32.mrf.mxu3  ;;  %v6529_v35 = vld [vmem:[#allocation86_spill] sm:$0xff] }
 0x4a5   :  { %3250 = vst.msk [vmem:[#allocation13 + $0x360] sm:$0xff] %vm3141_vm4, %v2842_v48  ;;  %v2251_v5 = vadd.f32 %v2250_v2, %v6529_v35  ;;  %v2580_v43 = vadd.f32 %v2579_v30, %v6529_v35  ;;  %v2086_v2 = vadd.f32 %v6117_v61, %v6535_v31  ;;  %v6538_v61 = vld [vmem:[#allocation55_spill] sm:$0xff] }
 0x4a7   :  { %v3098_v55 = vpop.xlane.xlu0 %3097  ;;  %v3096_v22 = vpop.xlane.xlu2 %3095 }
 0x4a8   :  { %3379 = vst.msk [vmem:[#allocation13 + $0x760] sm:$0xff] %vm3141_vm4, %v3098_v55  ;;  %v6154_v55 = vpop.f32.mrf.mxu1 }
 0x4a9   :  { %3378 = vst.msk [vmem:[#allocation13 + $0x758] sm:$0xff] %vm3141_vm4, %v3096_v22  ;;  %2979 = vmax.xlane.f32.xlu1 %v2395_v19  ;;  %v2253_v19 = vpop.f32.mrf.mxu2 }
 0x4ac   :  { %2725 = vmax.xlane.f32.xlu0 %v2069_v53  ;;  %2723 = vmax.xlane.f32.xlu2 %v2066_v60  ;;  %v2704_v49 = vpop.xlane.xlu1 %2703  ;;  %v6157_v60 = vpop.f32.mrf.mxu0  ;;  %v2079_v53 = vadd.f32 %v6081_v57, %v6530_v25 }
 0x4ad   :  { %3181 = vst.msk [vmem:[#allocation13 + $0x138] sm:$0xff] %vm3141_vm4, %v2704_v49 }
 0x4af   :  { %v2960_v39 = vpop.xlane.xlu0 %2959  ;;  %v2958_v27 = vpop.xlane.xlu2 %2957 }
 0x4b0   :  { %3310 = vst.msk [vmem:[#allocation13 + $0x538] sm:$0xff] %vm3141_vm4, %v2960_v39 }
 0x4b1   :  { %3309 = vst.msk [vmem:[#allocation13 + $0x530] sm:$0xff] %vm3141_vm4, %v2958_v27  ;;  %2865 = vmax.xlane.f32.xlu1 %v2244_v47  ;;  %v2582_v47 = vpop.f32.mrf.mxu3  ;;  %v2255_v57 = vpop.f32.mrf.mxu2 }
 0x4b2   :  { %v6168_v27 = vpop.f32.mrf.mxu1  ;;  %v2256_v29 = vadd.f32 %v2255_v57, %v5444_v3 }
 0x4b4   :  { %3121 = vmax.xlane.f32.xlu0 %v2573_v41  ;;  %3119 = vmax.xlane.f32.xlu2 %v2570_v45  ;;  %v3100_v54 = vpop.xlane.xlu1 %3099  ;;  %v6531_v45 = vld [vmem:[#allocation87_spill] sm:$0xff]  ;;  %v6171_v4 = vpop.f32.mrf.mxu0 }
 0x4b5   :  { %3380 = vst.msk [vmem:[#allocation13 + $0x768] sm:$0xff] %vm3141_vm4, %v3100_v54  ;;  %v2583_v41 = vadd.f32 %v2582_v47, %v6531_v45  ;;  %v2254_v15 = vadd.f32 %v2253_v19, %v6531_v45  ;;  %v6541_v47 = vld [vmem:[#allocation58_spill] sm:$0xff] }
 0x4b7   :  { %v2846_v34 = vpop.xlane.xlu0 %2845  ;;  %v2844_v50 = vpop.xlane.xlu2 %2843 }
 0x4b8   :  { %3252 = vst.msk [vmem:[#allocation13 + $0x370] sm:$0xff] %vm3141_vm4, %v2846_v34  ;;  %v6532_v34 = vld [vmem:[#allocation52_spill] sm:$0xff] }
 0x4b9   :  { %3251 = vst.msk [vmem:[#allocation13 + $0x368] sm:$0xff] %vm3141_vm4, %v2844_v50  ;;  %2727 = vmax.xlane.f32.xlu1 %v2071_v24  ;;  %v2410_v50 = vadd.f32 %v6089_v12, %v6532_v34 }
 0x4ba   :  { %v6180_v16 = vpop.f32.mrf.mxu1 }
 0x4bc   :  { %2983 = vmax.xlane.f32.xlu0 %v2400_v33  ;;  %2981 = vmax.xlane.f32.xlu2 %v2398_v32  ;;  %v2962_v6 = vpop.xlane.xlu1 %2961 }
 0x4bd   :  { %3311 = vst.msk [vmem:[#allocation13 + $0x540] sm:$0xff] %vm3141_vm4, %v2962_v6  ;;  %v2081_v6 = vadd.f32 %v6091_v40, %v6532_v34  ;;  %v2413_v40 = vadd.f32 %v6102_v14, %v6533_v46  ;;  %v6536_v14 = vld [vmem:[#allocation89_spill] sm:$0xff]  ;;  %v6543_v34 = vld [vmem:[#allocation62_spill] sm:$0xff] }
 0x4be   :  { %v6544_v46 = vld [vmem:[#allocation61_spill] sm:$0xff] }
 0x4bf   :  { %v2708_v8 = vpop.xlane.xlu0 %2707  ;;  %v2706_v52 = vpop.xlane.xlu2 %2705 }
 0x4c0   :  { %3183 = vst.msk [vmem:[#allocation13 + $0x148] sm:$0xff] %vm3141_vm4, %v2708_v8  ;;  %v2258_v8 = vpop.f32.mrf.mxu2 }
 0x4c1   :  { %3182 = vst.msk [vmem:[#allocation13 + $0x140] sm:$0xff] %vm3141_vm4, %v2706_v52  ;;  %3123 = vmax.xlane.f32.xlu1 %v2575_v10  ;;  %v2098_v10 = vpop.f32.mrf.mxu0  ;;  %v6534_v52 = vld [vmem:[#allocation88_spill] sm:$0xff] }
 0x4c2   :  { %v2429_v7 = vpop.f32.mrf.mxu1 }
 0x4c4   :  { %2869 = vmax.xlane.f32.xlu0 %v2249_v42  ;;  %2867 = vmax.xlane.f32.xlu2 %v2246_v44  ;;  %v2848_v26 = vpop.xlane.xlu1 %2847  ;;  %v2259_v44 = vadd.f32 %v2258_v8, %v6534_v52 }
 0x4c5   :  { %3253 = vst.msk [vmem:[#allocation13 + $0x378] sm:$0xff] %vm3141_vm4, %v2848_v26  ;;  %v2415_v26 = vadd.f32 %v6113_v36, %v6535_v31 }
 0x4c7   :  { %v3104_v51 = vpop.xlane.xlu0 %3103  ;;  %v3102_v28 = vpop.xlane.xlu2 %3101 }
 0x4c8   :  { %3382 = vst.msk [vmem:[#allocation13 + $0x778] sm:$0xff] %vm3141_vm4, %v3104_v51 }
 0x4c9   :  { %3381 = vst.msk [vmem:[#allocation13 + $0x770] sm:$0xff] %vm3141_vm4, %v3102_v28  ;;  %2985 = vmax.xlane.f32.xlu1 %v2403_v1  ;;  %v2100_v1 = vpop.f32.mrf.mxu0  ;;  %v2260_v28 = vpop.f32.mrf.mxu2 }
 0x4ca   :  { %v2261_v36 = vadd.f32 %v2260_v28, %v6536_v14  ;;  %v2432_v30 = vpop.f32.mrf.mxu1  ;;  %v6546_v28 = vld [vmem:[#allocation65_spill] sm:$0xff] }
 0x4cc   :  { %2731 = vmax.xlane.f32.xlu0 %v2076_v37  ;;  %2729 = vmax.xlane.f32.xlu2 %v2074_v62  ;;  %v2710_v18 = vpop.xlane.xlu1 %2709  ;;  %v6537_v37 = vld [vmem:[#allocation56_spill] sm:$0xff] }
 0x4cd   :  { %3184 = vst.msk [vmem:[#allocation13 + $0x150] sm:$0xff] %vm3141_vm4, %v2710_v18  ;;  %v2091_v18 = vadd.f32 %v6146_v23, %v6537_v37  ;;  %v2089_v23 = vadd.f32 %v6133_v11, %v6538_v61  ;;  %v2420_v11 = vadd.f32 %v6144_v0, %v6537_v37  ;;  %v2096_v0 = vadd.f32 %v6171_v4, %v6541_v47 }
 0x4cf   :  { %v2966_v48 = vpop.xlane.xlu0 %2965  ;;  %v2964_v56 = vpop.xlane.xlu2 %2963 }
 0x4d0   :  { %3313 = vst.msk [vmem:[#allocation13 + $0x550] sm:$0xff] %vm3141_vm4, %v2966_v48  ;;  %v2418_v48 = vadd.f32 %v6127_v59, %v6538_v61  ;;  %v6548_v61 = vld [vmem:[#allocation66_spill] sm:$0xff] }
 0x4d1   :  { %3312 = vst.msk [vmem:[#allocation13 + $0x548] sm:$0xff] %vm3141_vm4, %v2964_v56  ;;  %2871 = vmax.xlane.f32.xlu1 %v2251_v5  ;;  %v2103_v5 = vpop.f32.mrf.mxu0 }
 0x4d2   :  { %v6214_v25 = vpop.f32.mrf.mxu1 }
 0x4d4   :  { %3127 = vmax.xlane.f32.xlu0 %v2580_v43  ;;  %3125 = vmax.xlane.f32.xlu2 %v2578_v17  ;;  %v3106_v22 = vpop.xlane.xlu1 %3105  ;;  %v6539_v43 = vld [vmem:[#allocation57_spill] sm:$0xff] }
 0x4d5   :  { %3383 = vst.msk [vmem:[#allocation13 + $0x780] sm:$0xff] %vm3141_vm4, %v3106_v22  ;;  %v2423_v19 = vadd.f32 %v6154_v55, %v6539_v43  ;;  %v2094_v59 = vadd.f32 %v6157_v60, %v6539_v43  ;;  %v6540_v55 = vld [vmem:[#allocation59_spill] sm:$0xff]  ;;  %v2425_v60 = vadd.f32 %v6168_v27, %v6541_v47 }
 0x4d6   :  { %v2428_v4 = vadd.f32 %v6180_v16, %v6540_v55  ;;  %v2104_v16 = vadd.f32 %v2103_v5, %v6544_v46 }
 0x4d7   :  { %v2852_v58 = vpop.xlane.xlu0 %2851  ;;  %v2850_v49 = vpop.xlane.xlu2 %2849 }
 0x4d8   :  { %3255 = vst.msk [vmem:[#allocation13 + $0x388] sm:$0xff] %vm3141_vm4, %v2852_v58 }
 0x4d9   :  { %3254 = vst.msk [vmem:[#allocation13 + $0x380] sm:$0xff] %vm3141_vm4, %v2850_v49  ;;  %2733 = vmax.xlane.f32.xlu1 %v2079_v53  ;;  %v2105_v49 = vpop.f32.mrf.mxu0 }
 0x4da   :  { %v2437_v45 = vpop.f32.mrf.mxu1 }
 0x4dc   :  { %2989 = vmax.xlane.f32.xlu0 %v2408_v13  ;;  %2987 = vmax.xlane.f32.xlu2 %v2405_v38  ;;  %v2968_v39 = vpop.xlane.xlu1 %2967  ;;  %v2099_v38 = vadd.f32 %v2098_v10, %v6540_v55 }
 0x4dd   :  { %3314 = vst.msk [vmem:[#allocation13 + $0x558] sm:$0xff] %vm3141_vm4, %v2968_v39 }
 0x4df   :  { %v2714_v20 = vpop.xlane.xlu0 %2713  ;;  %v2712_v54 = vpop.xlane.xlu2 %2711 }
 0x4e0   :  { %3186 = vst.msk [vmem:[#allocation13 + $0x160] sm:$0xff] %vm3141_vm4, %v2714_v20 }
 0x4e1   :  { %3185 = vst.msk [vmem:[#allocation13 + $0x158] sm:$0xff] %vm3141_vm4, %v2712_v54  ;;  %3129 = vmax.xlane.f32.xlu1 %v2583_v41  ;;  %v6542_v41 = vld [vmem:[#allocation60_spill] sm:$0xff]  ;;  %v2108_v54 = vpop.f32.mrf.mxu0 }
 0x4e2   :  { %v2430_v20 = vadd.f32 %v2429_v7, %v6542_v41  ;;  %v2101_v27 = vadd.f32 %v2100_v1, %v6542_v41  ;;  %v2584_v1 = vpop.f32.mrf.mxu3 }
 0x4e4   :  { %2875 = vmax.xlane.f32.xlu0 %v2256_v29  ;;  %2873 = vmax.xlane.f32.xlu2 %v2254_v15  ;;  %v2854_v24 = vpop.xlane.xlu1 %2853 }
 0x4e5   :  { %3256 = vst.msk [vmem:[#allocation13 + $0x390] sm:$0xff] %vm3141_vm4, %v2854_v24 }
 0x4e7   :  { %v3110_v32 = vpop.xlane.xlu0 %3109  ;;  %v3108_v33 = vpop.xlane.xlu2 %3107 }
 0x4e8   :  { %3385 = vst.msk [vmem:[#allocation13 + $0x790] sm:$0xff] %vm3141_vm4, %v3110_v32  ;;  %v2439_v32 = vpop.f32.mrf.mxu1 }
 0x4e9   :  { %3384 = vst.msk [vmem:[#allocation13 + $0x788] sm:$0xff] %vm3141_vm4, %v3108_v33  ;;  %2991 = vmax.xlane.f32.xlu1 %v2410_v50  ;;  %v2106_v50 = vadd.f32 %v2105_v49, %v6543_v34  ;;  %v2110_v33 = vpop.f32.mrf.mxu0 }
 0x4ec   :  { %2737 = vmax.xlane.f32.xlu0 %v2084_v63  ;;  %2735 = vmax.xlane.f32.xlu2 %v2081_v6  ;;  %v2716_v12 = vpop.xlane.xlu1 %2715  ;;  %v2433_v63 = vadd.f32 %v2432_v30, %v6544_v46 }
 0x4ed   :  { %3187 = vst.msk [vmem:[#allocation13 + $0x168] sm:$0xff] %vm3141_vm4, %v2716_v12  ;;  %v6545_v12 = vld [vmem:[#allocation63_spill] sm:$0xff] }
 0x4ee   :  { %v2109_v31 = vadd.f32 %v2108_v54, %v6545_v12 }
 0x4ef   :  { %v2972_v42 = vpop.xlane.xlu0 %2971  ;;  %v2970_v9 = vpop.xlane.xlu2 %2969 }
 0x4f0   :  { %3316 = vst.msk [vmem:[#allocation13 + $0x568] sm:$0xff] %vm3141_vm4, %v2972_v42  ;;  %v2442_v42 = vpop.f32.mrf.mxu1 }
 0x4f1   :  { %3315 = vst.msk [vmem:[#allocation13 + $0x560] sm:$0xff] %vm3141_vm4, %v2970_v9  ;;  %2877 = vmax.xlane.f32.xlu1 %v2259_v44  ;;  %v2438_v44 = vadd.f32 %v2437_v45, %v6545_v12 }
 0x4f4   :  { %2995 = vmax.xlane.f32.xlu0 %v2415_v26  ;;  %2993 = vmax.xlane.f32.xlu2 %v2413_v40  ;;  %v3112_v51 = vpop.xlane.xlu1 %3111  ;;  %v2113_v40 = vpop.f32.mrf.mxu0 }
 0x4f5   :  { %3386 = vst.msk [vmem:[#allocation13 + $0x798] sm:$0xff] %vm3141_vm4, %v3112_v51  ;;  %v2435_v51 = vadd.f32 %v6214_v25, %v6543_v34  ;;  %v2443_v25 = vadd.f32 %v2442_v42, %v6546_v28 }
 0x4f7   :  { %v2858_v62 = vpop.xlane.xlu0 %2857  ;;  %v2856_v21 = vpop.xlane.xlu2 %2855 }
 0x4f8   :  { %3258 = vst.msk [vmem:[#allocation13 + $0x3a0] sm:$0xff] %vm3141_vm4, %v2858_v62 }
 0x4f9   :  { %3257 = vst.msk [vmem:[#allocation13 + $0x398] sm:$0xff] %vm3141_vm4, %v2856_v21  ;;  %2739 = vmax.xlane.f32.xlu1 %v2086_v2  ;;  %v2114_v2 = vadd.f32 %v2113_v40, %v6546_v28  ;;  %v2444_v21 = vpop.f32.mrf.mxu1 }
 0x4fc   :  { %2743 = vmax.xlane.f32.xlu0 %v2091_v18  ;;  %2879 = vmax.xlane.f32.xlu2 %v2261_v36  ;;  %v2974_v35 = vpop.xlane.xlu1 %2973  ;;  %v6547_v36 = vld [vmem:[#allocation64_spill] sm:$0xff] }
 0x4fd   :  { %3317 = vst.msk [vmem:[#allocation13 + $0x570] sm:$0xff] %vm3141_vm4, %v2974_v35  ;;  %v2440_v37 = vadd.f32 %v2439_v32, %v6547_v36  ;;  %v2587_v35 = vpop.f32.mrf.mxu3  ;;  %v2111_v5 = vadd.f32 %v2110_v33, %v6547_v36 }
 0x4ff   :  { %v2720_v56 = vpop.xlane.xlu0 %2719  ;;  %v2718_v17 = vpop.xlane.xlu2 %2717 }
 0x500   :  { %3189 = vst.msk [vmem:[#allocation13 + $0x178] sm:$0xff] %vm3141_vm4, %v2720_v56  ;;  %v2115_v56 = vpop.f32.mrf.mxu0 }
 0x501   :  { %3188 = vst.msk [vmem:[#allocation13 + $0x170] sm:$0xff] %vm3141_vm4, %v2718_v17  ;;  %2997 = vmax.xlane.f32.xlu1 %v2418_v48  ;;  %v2445_v48 = vadd.f32 %v2444_v21, %v6548_v61 }
 0x504   :  { %3001 = vmax.xlane.f32.xlu0 %v2423_v19  ;;  %2741 = vmax.xlane.f32.xlu2 %v2089_v23  ;;  %v2860_v22 = vpop.xlane.xlu1 %2859  ;;  %v2116_v23 = vadd.f32 %v2115_v56, %v6548_v61 }
 0x505   :  { %3259 = vst.msk [vmem:[#allocation13 + $0x3a8] sm:$0xff] %vm3141_vm4, %v2860_v22  ;;  %v2588_v22 = vadd.f32 %v2587_v35, %v6534_v52 }
 0x507   :  { %v3116_v53 = vpop.xlane.xlu0 %3115  ;;  %v3114_v58 = vpop.xlane.xlu2 %3113 }
 0x508   :  { %3388 = vst.msk [vmem:[#allocation13 + $0x7a8] sm:$0xff] %vm3141_vm4, %v3116_v53 }
 0x509   :  { %3387 = vst.msk [vmem:[#allocation13 + $0x7a0] sm:$0xff] %vm3141_vm4, %v3114_v58  ;;  %2745 = vmax.xlane.f32.xlu1 %v2094_v59  ;;  %v2589_v59 = vpop.f32.mrf.mxu3 }
 0x50a   :  { %v2590_v52 = vadd.f32 %v2589_v59, %v6536_v14 }
 0x50c   :  { %2749 = vmax.xlane.f32.xlu0 %v2099_v38  ;;  %2999 = vmax.xlane.f32.xlu2 %v2420_v11  ;;  %v2722_v13 = vpop.xlane.xlu1 %2721  ;;  %v2585_v11 = vadd.f32 %v2584_v1, %v5444_v3 }
 0x50d   :  { %3190 = vst.msk [vmem:[#allocation13 + $0x180] sm:$0xff] %vm3141_vm4, %v2722_v13 }
 0x50f   :  { %v2978_v39 = vpop.xlane.xlu0 %2977  ;;  %v2976_v57 = vpop.xlane.xlu2 %2975 }
 0x510   :  { %3319 = vst.msk [vmem:[#allocation13 + $0x580] sm:$0xff] %vm3141_vm4, %v2978_v39 }
 0x511   :  { %3318 = vst.msk [vmem:[#allocation13 + $0x578] sm:$0xff] %vm3141_vm4, %v2976_v57  ;;  %3003 = vmax.xlane.f32.xlu1 %v2425_v60 }
 0x514   :  { %3007 = vmax.xlane.f32.xlu0 %v2430_v20  ;;  %2747 = vmax.xlane.f32.xlu2 %v2096_v0  ;;  %v3118_v15 = vpop.xlane.xlu1 %3117 }
 0x515   :  { %3389 = vst.msk [vmem:[#allocation13 + $0x7b0] sm:$0xff] %vm3141_vm4, %v3118_v15 }
 0x517   :  { %v2864_v29 = vpop.xlane.xlu0 %2863  ;;  %v2862_v24 = vpop.xlane.xlu2 %2861 }
 0x518   :  { %3261 = vst.msk [vmem:[#allocation13 + $0x3b8] sm:$0xff] %vm3141_vm4, %v2864_v29 }
 0x519   :  { %3260 = vst.msk [vmem:[#allocation13 + $0x3b0] sm:$0xff] %vm3141_vm4, %v2862_v24  ;;  %2751 = vmax.xlane.f32.xlu1 %v2101_v27 }
 0x51c   :  { %2755 = vmax.xlane.f32.xlu0 %v2106_v50  ;;  %3005 = vmax.xlane.f32.xlu2 %v2428_v4  ;;  %v2980_v6 = vpop.xlane.xlu1 %2979 }
 0x51d   :  { %3320 = vst.msk [vmem:[#allocation13 + $0x588] sm:$0xff] %vm3141_vm4, %v2980_v6 }
 0x51f   :  { %v2726_v10 = vpop.xlane.xlu0 %2725  ;;  %v2724_v8 = vpop.xlane.xlu2 %2723 }
 0x520   :  { %3192 = vst.msk [vmem:[#allocation13 + $0x190] sm:$0xff] %vm3141_vm4, %v2726_v10 }
 0x521   :  { %3191 = vst.msk [vmem:[#allocation13 + $0x188] sm:$0xff] %vm3141_vm4, %v2724_v8  ;;  %3009 = vmax.xlane.f32.xlu1 %v2433_v63 }
 0x524   :  { %3013 = vmax.xlane.f32.xlu0 %v2438_v44  ;;  %2753 = vmax.xlane.f32.xlu2 %v2104_v16  ;;  %v2866_v9 = vpop.xlane.xlu1 %2865 }
 0x525   :  { %3262 = vst.msk [vmem:[#allocation13 + $0x3c0] sm:$0xff] %vm3141_vm4, %v2866_v9 }
 0x527   :  { %v3122_v26 = vpop.xlane.xlu0 %3121  ;;  %v3120_v7 = vpop.xlane.xlu2 %3119 }
 0x528   :  { %3391 = vst.msk [vmem:[#allocation13 + $0x7c0] sm:$0xff] %vm3141_vm4, %v3122_v26 }
 0x529   :  { %3390 = vst.msk [vmem:[#allocation13 + $0x7b8] sm:$0xff] %vm3141_vm4, %v3120_v7  ;;  %2757 = vmax.xlane.f32.xlu1 %v2109_v31 }
 0x52c   :  { %2761 = vmax.xlane.f32.xlu0 %v2114_v2  ;;  %3011 = vmax.xlane.f32.xlu2 %v2435_v51  ;;  %v2728_v62 = vpop.xlane.xlu1 %2727 }
 0x52d   :  { %3193 = vst.msk [vmem:[#allocation13 + $0x198] sm:$0xff] %vm3141_vm4, %v2728_v62 }
 0x52f   :  { %v2984_v18 = vpop.xlane.xlu0 %2983  ;;  %v2982_v30 = vpop.xlane.xlu2 %2981 }
 0x530   :  { %3322 = vst.msk [vmem:[#allocation13 + $0x598] sm:$0xff] %vm3141_vm4, %v2984_v18 }
 0x531   :  { %3321 = vst.msk [vmem:[#allocation13 + $0x590] sm:$0xff] %vm3141_vm4, %v2982_v30  ;;  %3015 = vmax.xlane.f32.xlu1 %v2440_v37 }
 0x534   :  { %3019 = vmax.xlane.f32.xlu0 %v2445_v48  ;;  %2759 = vmax.xlane.f32.xlu2 %v2111_v5  ;;  %v3124_v17 = vpop.xlane.xlu1 %3123 }
 0x535   :  { %3392 = vst.msk [vmem:[#allocation13 + $0x7c8] sm:$0xff] %vm3141_vm4, %v3124_v17 }
 0x537   :  { %v2870_v43 = vpop.xlane.xlu0 %2869  ;;  %v2868_v19 = vpop.xlane.xlu2 %2867 }
 0x538   :  { %3264 = vst.msk [vmem:[#allocation13 + $0x3d0] sm:$0xff] %vm3141_vm4, %v2870_v43 }
 0x539   :  { %3263 = vst.msk [vmem:[#allocation13 + $0x3c8] sm:$0xff] %vm3141_vm4, %v2868_v19  ;;  %2763 = vmax.xlane.f32.xlu1 %v2116_v23 }
 0x53c   :  { %3133 = vmax.xlane.f32.xlu0 %v2588_v22  ;;  %3017 = vmax.xlane.f32.xlu2 %v2443_v25  ;;  %v2986_v53 = vpop.xlane.xlu1 %2985 }
 0x53d   :  { %3323 = vst.msk [vmem:[#allocation13 + $0x5a0] sm:$0xff] %vm3141_vm4, %v2986_v53 }
 0x53f   :  { %v2732_v58 = vpop.xlane.xlu0 %2731  ;;  %v2730_v49 = vpop.xlane.xlu2 %2729 }
 0x540   :  { %3195 = vst.msk [vmem:[#allocation13 + $0x1a8] sm:$0xff] %vm3141_vm4, %v2732_v58 }
 0x541   :  { %3194 = vst.msk [vmem:[#allocation13 + $0x1a0] sm:$0xff] %vm3141_vm4, %v2730_v49  ;;  %3135 = vmax.xlane.f32.xlu1 %v2590_v52 }
 0x544   :  { %3131 = vmax.xlane.f32.xlu2 %v2585_v11  ;;  %v2872_v55 = vpop.xlane.xlu1 %2871 }
 0x545   :  { %3265 = vst.msk [vmem:[#allocation13 + $0x3d8] sm:$0xff] %vm3141_vm4, %v2872_v55 }
 0x547   :  { %v3128_v38 = vpop.xlane.xlu0 %3127  ;;  %v3126_v13 = vpop.xlane.xlu2 %3125 }
 0x548   :  { %3394 = vst.msk [vmem:[#allocation13 + $0x7d8] sm:$0xff] %vm3141_vm4, %v3128_v38 }
 0x549   :  { %3393 = vst.msk [vmem:[#allocation13 + $0x7d0] sm:$0xff] %vm3141_vm4, %v3126_v13 }
 0x54c   :  { %v2734_v14 = vpop.xlane.xlu1 %2733 }
 0x54d   :  { %3196 = vst.msk [vmem:[#allocation13 + $0x1b0] sm:$0xff] %vm3141_vm4, %v2734_v14 }
 0x54f   :  { %v2990_v47 = vpop.xlane.xlu0 %2989  ;;  %v2988_v60 = vpop.xlane.xlu2 %2987 }
 0x550   :  { %3325 = vst.msk [vmem:[#allocation13 + $0x5b0] sm:$0xff] %vm3141_vm4, %v2990_v47 }
 0x551   :  { %3324 = vst.msk [vmem:[#allocation13 + $0x5a8] sm:$0xff] %vm3141_vm4, %v2988_v60 }
 0x554   :  { %v3130_v3 = vpop.xlane.xlu1 %3129 }
 0x555   :  { %3395 = vst.msk [vmem:[#allocation13 + $0x7e0] sm:$0xff] %vm3141_vm4, %v3130_v3 }
 0x557   :  { %v2876_v39 = vpop.xlane.xlu0 %2875  ;;  %v2874_v57 = vpop.xlane.xlu2 %2873 }
 0x558   :  { %3267 = vst.msk [vmem:[#allocation13 + $0x3e8] sm:$0xff] %vm3141_vm4, %v2876_v39 }
 0x559   :  { %3266 = vst.msk [vmem:[#allocation13 + $0x3e0] sm:$0xff] %vm3141_vm4, %v2874_v57 }
 0x55c   :  { %v2992_v45 = vpop.xlane.xlu1 %2991 }
 0x55d   :  { %3326 = vst.msk [vmem:[#allocation13 + $0x5b8] sm:$0xff] %vm3141_vm4, %v2992_v45 }
 0x55f   :  { %v2738_v0 = vpop.xlane.xlu0 %2737  ;;  %v2736_v41 = vpop.xlane.xlu2 %2735 }
 0x560   :  { %3198 = vst.msk [vmem:[#allocation13 + $0x1c0] sm:$0xff] %vm3141_vm4, %v2738_v0 }
 0x561   :  { %3197 = vst.msk [vmem:[#allocation13 + $0x1b8] sm:$0xff] %vm3141_vm4, %v2736_v41 }
 0x564   :  { %v2878_v20 = vpop.xlane.xlu1 %2877 }
 0x565   :  { %3268 = vst.msk [vmem:[#allocation13 + $0x3f0] sm:$0xff] %vm3141_vm4, %v2878_v20 }
 0x567   :  { %v2996_v54 = vpop.xlane.xlu0 %2995  ;;  %v2994_v15 = vpop.xlane.xlu2 %2993 }
 0x568   :  { %3328 = vst.msk [vmem:[#allocation13 + $0x5c8] sm:$0xff] %vm3141_vm4, %v2996_v54 }
 0x569   :  { %3327 = vst.msk [vmem:[#allocation13 + $0x5c0] sm:$0xff] %vm3141_vm4, %v2994_v15 }
 0x56c   :  { %v2740_v27 = vpop.xlane.xlu1 %2739 }
 0x56d   :  { %3199 = vst.msk [vmem:[#allocation13 + $0x1c8] sm:$0xff] %vm3141_vm4, %v2740_v27 }
 0x56f   :  { %v2744_v29 = vpop.xlane.xlu0 %2743  ;;  %v2880_v24 = vpop.xlane.xlu2 %2879 }
 0x570   :  { %3201 = vst.msk [vmem:[#allocation13 + $0x1d8] sm:$0xff] %vm3141_vm4, %v2744_v29 }
 0x571   :  { %3269 = vst.msk [vmem:[#allocation13 + $0x3f8] sm:$0xff] %vm3141_vm4, %v2880_v24 }
 0x574   :  { %v2998_v4 = vpop.xlane.xlu1 %2997 }
 0x575   :  { %3329 = vst.msk [vmem:[#allocation13 + $0x5d0] sm:$0xff] %vm3141_vm4, %v2998_v4 }
 0x577   :  { %v3002_v34 = vpop.xlane.xlu0 %3001  ;;  %v2742_v50 = vpop.xlane.xlu2 %2741 }
 0x578   :  { %3331 = vst.msk [vmem:[#allocation13 + $0x5e0] sm:$0xff] %vm3141_vm4, %v3002_v34 }
 0x579   :  { %3200 = vst.msk [vmem:[#allocation13 + $0x1d0] sm:$0xff] %vm3141_vm4, %v2742_v50 }
 0x57c   :  { %v2746_v32 = vpop.xlane.xlu1 %2745 }
 0x57d   :  { %3202 = vst.msk [vmem:[#allocation13 + $0x1e0] sm:$0xff] %vm3141_vm4, %v2746_v32 }
 0x57f   :  { %v2750_v33 = vpop.xlane.xlu0 %2749  ;;  %v3000_v6 = vpop.xlane.xlu2 %2999 }
 0x580   :  { %3204 = vst.msk [vmem:[#allocation13 + $0x1f0] sm:$0xff] %vm3141_vm4, %v2750_v33 }
 0x581   :  { %3330 = vst.msk [vmem:[#allocation13 + $0x5d8] sm:$0xff] %vm3141_vm4, %v3000_v6 }
 0x584   :  { %v3004_v46 = vpop.xlane.xlu1 %3003 }
 0x585   :  { %3332 = vst.msk [vmem:[#allocation13 + $0x5e8] sm:$0xff] %vm3141_vm4, %v3004_v46 }
 0x587   :  { %v3008_v63 = vpop.xlane.xlu0 %3007  ;;  %v2748_v10 = vpop.xlane.xlu2 %2747 }
 0x588   :  { %3334 = vst.msk [vmem:[#allocation13 + $0x5f8] sm:$0xff] %vm3141_vm4, %v3008_v63 }
 0x589   :  { %3203 = vst.msk [vmem:[#allocation13 + $0x1e8] sm:$0xff] %vm3141_vm4, %v2748_v10 }
 0x58c   :  { %v2752_v8 = vpop.xlane.xlu1 %2751 }
 0x58d   :  { %3205 = vst.msk [vmem:[#allocation13 + $0x1f8] sm:$0xff] %vm3141_vm4, %v2752_v8 }
 0x58f   :  { %v2756_v16 = vpop.xlane.xlu0 %2755  ;;  %v3006_v12 = vpop.xlane.xlu2 %3005 }
 0x590   :  { %3207 = vst.msk [vmem:[#allocation13 + $0x208] sm:$0xff] %vm3141_vm4, %v2756_v16 }
 0x591   :  { %3333 = vst.msk [vmem:[#allocation13 + $0x5f0] sm:$0xff] %vm3141_vm4, %v3006_v12 }
 0x594   :  { %v3010_v44 = vpop.xlane.xlu1 %3009 }
 0x595   :  { %3335 = vst.msk [vmem:[#allocation13 + $0x600] sm:$0xff] %vm3141_vm4, %v3010_v44 }
 0x597   :  { %v3014_v42 = vpop.xlane.xlu0 %3013  ;;  %v2754_v9 = vpop.xlane.xlu2 %2753 }
 0x598   :  { %3337 = vst.msk [vmem:[#allocation13 + $0x610] sm:$0xff] %vm3141_vm4, %v3014_v42 }
 0x599   :  { %3206 = vst.msk [vmem:[#allocation13 + $0x200] sm:$0xff] %vm3141_vm4, %v2754_v9 }
 0x59c   :  { %v2758_v40 = vpop.xlane.xlu1 %2757 }
 0x59d   :  { %3208 = vst.msk [vmem:[#allocation13 + $0x210] sm:$0xff] %vm3141_vm4, %v2758_v40 }
 0x59f   :  { %v2762_v31 = vpop.xlane.xlu0 %2761  ;;  %v3012_v26 = vpop.xlane.xlu2 %3011 }
 0x5a0   :  { %3210 = vst.msk [vmem:[#allocation13 + $0x220] sm:$0xff] %vm3141_vm4, %v2762_v31 }
 0x5a1   :  { %3336 = vst.msk [vmem:[#allocation13 + $0x608] sm:$0xff] %vm3141_vm4, %v3012_v26 }
 0x5a4   :  { %v3016_v7 = vpop.xlane.xlu1 %3015 }
 0x5a5   :  { %3338 = vst.msk [vmem:[#allocation13 + $0x618] sm:$0xff] %vm3141_vm4, %v3016_v7 }
 0x5a7   :  { %v3020_v1 = vpop.xlane.xlu0 %3019  ;;  %v2760_v51 = vpop.xlane.xlu2 %2759 }
 0x5a8   :  { %3340 = vst.msk [vmem:[#allocation13 + $0x628] sm:$0xff] %vm3141_vm4, %v3020_v1 }
 0x5a9   :  { %3209 = vst.msk [vmem:[#allocation13 + $0x218] sm:$0xff] %vm3141_vm4, %v2760_v51 }
 0x5ac   :  { %v2764_v28 = vpop.xlane.xlu1 %2763 }
 0x5ad   :  { %3211 = vst.msk [vmem:[#allocation13 + $0x228] sm:$0xff] %vm3141_vm4, %v2764_v28 }
 0x5af   :  { %v3134_v2 = vpop.xlane.xlu0 %3133  ;;  %v3018_v62 = vpop.xlane.xlu2 %3017 }
 0x5b0   :  { %3397 = vst.msk [vmem:[#allocation13 + $0x7f0] sm:$0xff] %vm3141_vm4, %v3134_v2 }
 0x5b1   :  { %3339 = vst.msk [vmem:[#allocation13 + $0x620] sm:$0xff] %vm3141_vm4, %v3018_v62 }
 0x5b4   :  { %v3136_v21 = vpop.xlane.xlu1 %3135 }
 0x5b5   :  { %3398 = vst.msk [vmem:[#allocation13 + $0x7f8] sm:$0xff] %vm3141_vm4, %v3136_v21 }
 0x5b7   :  { %v3132_v36 = vpop.xlane.xlu2 %3131 }
 0x5b8   :  { %3396 = vst.msk [vmem:[#allocation13 + $0x7e8] sm:$0xff] %vm3141_vm4, %v3132_v36 }
 0x5b9   :  { %4185 = dma.vmem_to_hbm [thread:$0]  %s4178_s18, 32768, %s4180_s20, [#allocation4], %s4861_s13, %s4861_s13, %s4862_s14  }
 0x5ba   :  { %4856 = dma.done.wait [#allocation4], 32768  }
 0x5bb   :  { %4857 = vsyncadd [#allocation4], 4294934528 }
 0x5bc   :  { %4858 = dma.done.wait [#allocation15], 4096  }
 0x5bd   :  { %4859 = vsyncadd [#allocation15], 4294963200 }
 0x5be   :  { %4207 = vsyncpa [#allocation3], 1 }
 0x5bf   :  { %4208 = vsyncpa [#allocation6], 1 }
 0x5c0   :  { %4209 = vsyncpa [#allocation9], 1 }
 0x5c1   :  { %4210 = vsyncpa [#allocation12], 1 }
 0x5c2   :  { %4211 = vsyncpa [#allocation4], 1 }
 0x5c3   :  { %4212 = vsyncpa [#allocation15], 1 }

</bundles_post_ra>
